<compile_context>
chip_gen: v7x
topology: tpu7x:2x2x1
jax: 0.10.0
libtpu: 0.0.40
codegen_flags: <defaults>
</compile_context>

<pallas_src>
import functools

import jax
import jax.numpy as jnp
from jax.experimental import pallas as pl
from jax.experimental.pallas import tpu as pltpu

HIDDEN_DIM = 768
NUM_CONCEPTS = 10


# --------------------------------------------------------------------------- kernel ---
def _aan_kernel(h_ref, bias_ref, wct_ref, bc_ref, w1_ref, b1_ref, w2_ref, b2_ref,
                out_ref, *, n_concepts, eltwise_dtype):
    """One batch tile of the AAN forward.

    h_ref   : (TB, S, H)  hidden_states in producer dtype (cast to MXU dtype in VMEM)
    bias_ref: (TB, 1, S)  additive mask bias, f32  ((1 - mask) * -1e9)
    wct_ref : (NCP, H)    W_c transposed (concept rows), MXU dtype
    bc_ref  : (NCP, 1)    b_c as a column, f32
    w1_ref  : (H, H) MXU dtype     b1_ref: (1, H) f32
    w2_ref  : (1, H) f32           b2_ref: (1, 1) f32 in SMEM
    out_ref : (TB, H) f32          ctx_agg
    """
    tb = h_ref.shape[0]
    hidden = h_ref.shape[2]
    ncp = wct_ref.shape[0]
    mm_dtype = wct_ref.dtype

    # In-kernel cast: hidden under the HBM DMA; replaces a wrapper-side cast+pad pass.
    h = h_ref[...].astype(mm_dtype)                                    # (TB, S, H)

    # ---- AttentionConcepts: per-concept attention over the sequence ------------------
    # scores[b, c, s] = W_c[:, c] . h[b, s, :]  — produced directly in the lane-dense
    # (TB, NCP, S) layout (no XLU transpose; the sequence softmax uses lane reductions).
    wct_b = jnp.broadcast_to(wct_ref[...][None], (tb, ncp, hidden))
    scores = jax.lax.dot_general(                                      # 'bch,bsh->bcs'
        wct_b, h, dimension_numbers=(((2,), (2,)), ((0,), (0,))),
        preferred_element_type=jnp.float32)                            # (TB, NCP, S)
    scores = scores + bc_ref[...][None]                                # + b_c[c]
    scores = scores + bias_ref[...]                                    # mask padded pos.

    scores = scores - jnp.max(scores, axis=-1, keepdims=True)
    e = jnp.exp(scores)
    denom = jnp.sum(e, axis=-1, keepdims=True)                         # (TB, NCP, 1)
    # Approx reciprocal (EUP slot, ~1e-3 rel); switch to `e / denom` for strict parity.
    attn_abs = e * pl.reciprocal(denom, approx=True)                   # (TB, NCP, S)

    # ctx_abs[b, c, :] = sum_s attn_abs[b, c, s] * h[b, s, :]   ('bcs,bsh->bch')
    ctx_abs = jax.lax.dot_general(
        attn_abs.astype(mm_dtype), h,
        dimension_numbers=(((2,), (1,)), ((0,), (0,))),
        preferred_element_type=jnp.float32)                            # (TB, NCP, H) f32

    # ---- AttentionSelf: aggregate the concept vectors --------------------------------
    # NCP is a multiple of 16 -> merging (TB, NCP) sublanes is a tile-aligned reshape,
    # so the W1 matmul runs as one (TB*NCP, H) @ (H, H).
    ctx2d = ctx_abs.reshape(tb * ncp, hidden)
    u_pre = jnp.dot(ctx2d.astype(mm_dtype), w1_ref[...],
                    preferred_element_type=jnp.float32) + b1_ref[...]  # (TB*NCP, H) f32
    # bf16 tanh where the EUP has bf16 (v6e/v7x); f32 on v5e.  u only feeds the scalar
    # score below, so ctx_abs precision is untouched.
    u = jnp.tanh(u_pre.astype(eltwise_dtype))

    # u @ w2 has a single useful output lane -> VPU multiply + lane reduction (f32 acc),
    # not the MXU.
    # TODO(synk): if a v5e bundle dump shows the single vector-store slot saturating
    # here, tile this stage over NCP chunks with lax.fori_loop(unroll=True).
    s = jnp.sum(u * w2_ref[...], axis=-1, keepdims=True) + b2_ref[0, 0]   # (TB*NCP, 1)
    s = s.reshape(tb, ncp, 1)

    if ncp > n_concepts:
        # Exclude padded concept slots from the aggregation softmax.
        cidx = jax.lax.broadcasted_iota(jnp.int32, (tb, ncp, 1), 1)
        s = jnp.where(cidx < n_concepts, s, jnp.float32(-1e9))

    s = s - jnp.max(s, axis=1, keepdims=True)
    es = jnp.exp(s)
    attn_agg = es * pl.reciprocal(jnp.sum(es, axis=1, keepdims=True), approx=True)

    ctx_agg = jnp.sum(attn_agg * ctx_abs, axis=1)                      # (TB, H)
    out_ref[...] = ctx_agg.astype(out_ref.dtype)


# --------------------------------------------------------------------- build helpers ---
def _default_eltwise_dtype():
    """bf16 transcendentals only where the VPU/EUP supports bf16 (v6e/Trillium and
    later); on v5e and earlier a bf16 tanh would only add converts, so keep f32."""
    try:
        kind = jax.devices()[0].device_kind.lower()
    except Exception:
        return jnp.float32
    if "v6" in kind or "v7" in kind or "trillium" in kind:
        return jnp.bfloat16
    return jnp.float32


def _select_batch_tile(batch, tb_request):
    """Pick (TB, padded batch).  Prefer configurations with no batch padding: a
    multiple-of-8 divisor of B when B % 8 == 0, or a single full-batch block (block
    dim == array dim is exempt from the 8-row rule) for small odd batches.  Only
    large batches that are not a multiple of 8 pay the pad copy."""
    tb_request = max(1, int(tb_request))
    if batch % 8 == 0:
        tb = max(8, min((tb_request // 8) * 8 or 8, batch))
        while batch % tb:
            tb -= 8
        return tb, batch
    if batch <= max(64, tb_request):
        return batch, batch
    tb = max(8, (tb_request // 8) * 8)
    return tb, ((batch + tb - 1) // tb) * tb


def _vmem_limit_bytes(tb, seq, hidden, ncp, in_bytes, mm_bytes, single_buffer_weights):
    """Explicit scoped-VMEM request: pipeline buffers plus a generous allowance for
    in-kernel temporaries (lane/sublane padding of narrow dims included).  Size TB so
    this stays comfortably inside v7x's 64 MiB physical VMEM."""
    lane, sub = 128, 8
    wbuf = 1 if single_buffer_weights else 2
    seq_l = max(seq, lane)
    pipeline = (2 * tb * seq * hidden * in_bytes               # hidden_states double buffer
                + 2 * tb * sub * seq_l * 4                     # mask bias (TB,1,S)
                + 2 * tb * hidden * 4                          # output double buffer
                + wbuf * (ncp * hidden + hidden * hidden) * mm_bytes   # W_c^T, W1
                + wbuf * (ncp * lane + 2 * sub * hidden) * 4)          # b_c, b1, w2
    temps = (tb * seq * hidden * mm_bytes                      # matmul-dtype copy of h
             + tb * ncp * hidden * mm_bytes                    # broadcast W_c^T
             + 3 * tb * max(ncp, sub) * seq_l * 4              # scores / exp / attn_abs
             + 2 * tb * ncp * hidden * 4                       # ctx_abs + u
             + 2 * tb * hidden * 4)
    est = pipeline + temps
    return int(min(96 << 20, max(32 << 20, est + est // 2 + (4 << 20))))


def _build_call(batch_pad, seq, hidden, ncp, nc, tb, in_dtype, matmul_dtype,
                eltwise_dtype, single_buffer_weights):
    # Grid-invariant weights: the constant index_map already suppresses re-DMA after
    # step 0; Buffered(1) additionally drops the unused second VMEM buffer (~1.2 MiB,
    # mostly relevant under v7x's tighter VMEM).
    wkw = {"pipeline_mode": pl.Buffered(1)} if single_buffer_weights else {}

    in_specs = [
        pl.BlockSpec((tb, seq, hidden), lambda b: (b, 0, 0)),     # hidden_states (full S, H)
        pl.BlockSpec((tb, 1, seq), lambda b: (b, 0, 0)),          # additive mask bias
        pl.BlockSpec((ncp, hidden), lambda b: (0, 0), **wkw),     # W_c^T
        pl.BlockSpec((ncp, 1), lambda b: (0, 0), **wkw),          # b_c (column)
        pl.BlockSpec((hidden, hidden), lambda b: (0, 0), **wkw),  # W1
        pl.BlockSpec((1, hidden), lambda b: (0, 0), **wkw),       # b1
        pl.BlockSpec((1, hidden), lambda b: (0, 0), **wkw),       # w2 (row layout)
        pl.BlockSpec(memory_space=pltpu.MemorySpace.SMEM),        # b2 scalar
    ]
    out_specs = pl.BlockSpec((tb, hidden), lambda b: (b, 0))      # lane-dense output block

    mm_bytes = jnp.dtype(matmul_dtype).itemsize
    in_bytes = jnp.dtype(in_dtype).itemsize
    flops = int(batch_pad * (4 * seq * hidden * ncp               # scores + ctx_abs matmuls
                             + 2 * ncp * hidden * hidden          # W1 matmul
                             + 4 * ncp * hidden))                 # w2 dot + weighted sum
    transcendentals = int(batch_pad * (seq * ncp + ncp * hidden + ncp))
    bytes_accessed = int(batch_pad * seq * hidden * in_bytes
                         + batch_pad * seq * 4
                         + batch_pad * hidden * 4
                         + (ncp * hidden + hidden * hidden) * mm_bytes
                         + (ncp + 2 * hidden + 1) * 4)

    return jax.jit(pl.pallas_call(
        functools.partial(_aan_kernel, n_concepts=nc, eltwise_dtype=eltwise_dtype),
        out_shape=jax.ShapeDtypeStruct((batch_pad, hidden), jnp.float32),
        grid_spec=pltpu.PrefetchScalarGridSpec(
            num_scalar_prefetch=0,
            grid=(batch_pad // tb,),
            in_specs=in_specs,
            out_specs=out_specs,
        ),
        compiler_params=pltpu.CompilerParams(
            dimension_semantics=("parallel",),
            vmem_limit_bytes=_vmem_limit_bytes(tb, seq, hidden, ncp, in_bytes,
                                               mm_bytes, single_buffer_weights),
        ),
        cost_estimate=pl.CostEstimate(flops=flops,
                                      transcendentals=transcendentals,
                                      bytes_accessed=bytes_accessed),
    ))


_CALL_CACHE = {}


# -------------------------------------------------------------------------- wrapper ---
def pooling_module_aan(hidden_states, attn_mask, params, *, tb=8,
                       matmul_dtype=jnp.bfloat16, eltwise_dtype=None):
    """AAN pooling forward.  hidden_states: (B, S, H); attn_mask: (B, S) {0,1}.
    Returns ctx_agg: (B, H) f32.

    hidden_states is consumed in its producer dtype (f32 or bf16) and cast to the
    matmul dtype inside the kernel — no wrapper-side cast/pad pass over it, and no
    sequence padding (the S block dimension equals the full sequence).  For big
    batches raise `tb` to 16-32 on v5e/v6e; on v7x size it so the hidden-state
    double buffer (2*tb*S*H*itemsize) stays under ~40 MiB and keep >= 2 grid steps
    per TensorCore."""
    B, S, H = hidden_states.shape
    NC = params["wc"].shape[1]
    NCP = ((NC + 15) // 16) * 16            # concepts padded -> tile-aligned reshapes
    if eltwise_dtype is None:
        eltwise_dtype = _default_eltwise_dtype()

    TB, B_pad = _select_batch_tile(B, tb)

    h = hidden_states                        # producer dtype; cast happens in-kernel
    # Precomputed additive mask bias (tiny (B, S) work; lane-dense in the kernel).
    bias = ((attn_mask.astype(jnp.float32) - 1.0) * 1e9)[:, None, :]   # (B, 1, S)
    if B_pad != B:
        # Only large batches that are not a multiple of 8 pay this copy.
        h = jnp.pad(h, ((0, B_pad - B), (0, 0), (0, 0)))
        bias = jnp.pad(bias, ((0, B_pad - B), (0, 0), (0, 0)))

    wc_t = params["wc"].T                    # (NC, H): concept rows
    bc_col = params["bc"].reshape(NC, 1)
    if NCP != NC:
        wc_t = jnp.pad(wc_t, ((0, NCP - NC), (0, 0)))
        bc_col = jnp.pad(bc_col, ((0, NCP - NC), (0, 0)))
    wc_t = wc_t.astype(matmul_dtype)
    bc_col = bc_col.astype(jnp.float32)
    w1 = params["w1"].astype(matmul_dtype)
    b1 = params["b1"].reshape(1, H).astype(jnp.float32)
    w2_row = params["w2"].reshape(1, H).astype(jnp.float32)
    b2 = params["b2"].reshape(1, 1).astype(jnp.float32)

    args = (h, bias, wc_t, bc_col, w1, b1, w2_row, b2)
    key = (B_pad, S, H, NCP, NC, TB, jnp.dtype(h.dtype).name,
           jnp.dtype(matmul_dtype).name, jnp.dtype(eltwise_dtype).name)
    call = _CALL_CACHE.get(key)
    if call is None:
        build = functools.partial(_build_call, B_pad, S, H, NCP, NC, TB,
                                  h.dtype, matmul_dtype, eltwise_dtype)
        if hasattr(pl, "Buffered"):          # version gate for pipeline_mode support
            try:
                call = build(True)
                # Lowering-only capability probe (no execution): if this Pallas build
                # rejects pipeline_mode=Buffered(1), fall back to default double
                # buffering.  Genuine failures re-surface on the real call below.
                call.lower(*[jax.ShapeDtypeStruct(a.shape, a.dtype) for a in args])
            except Exception:
                call = build(False)
        else:
            call = build(False)
        _CALL_CACHE[key] = call
    out = call(*args)
    return out[:B]


# ----------------------------------------------------------------- reference / init ---
def _reference(hidden_states, attn_mask, params, matmul_dtype=jnp.float32,
               eltwise_dtype=jnp.float32):
    """Pure-JAX reference of the same AAN forward (matmul operands cast to
    matmul_dtype, tanh input cast to eltwise_dtype, f32 accumulation)."""
    cast = lambda x: x.astype(matmul_dtype)
    mask = attn_mask.astype(jnp.float32)[:, :, None]
    scores = jnp.einsum("bsh,hc->bsc", cast(hidden_states), cast(params["wc"]),
                        preferred_element_type=jnp.float32) + params["bc"]
    scores = scores + (1.0 - mask) * (-1e9)
    attn_abs = jax.nn.softmax(scores, axis=1)
    ctx_abs = jnp.einsum("bsc,bsh->bch", cast(attn_abs), cast(hidden_states),
                         preferred_element_type=jnp.float32)
    u_pre = jnp.einsum("bch,hk->bck", cast(ctx_abs), cast(params["w1"]),
                       preferred_element_type=jnp.float32) + params["b1"]
    u = jnp.tanh(u_pre.astype(eltwise_dtype)).astype(jnp.float32)
    s = jnp.einsum("bck,ko->bco", u, params["w2"]) + params["b2"][0, 0]
    attn_agg = jax.nn.softmax(s, axis=1)
    return jnp.sum(attn_agg * ctx_abs, axis=1)


def init_params(key, hidden=HIDDEN_DIM, n_concepts=NUM_CONCEPTS):
    """Deterministic nn.Linear-style init (uniform +/- 1/sqrt(fan_in))."""
    k = jax.random.split(key, 6)
    bound = 1.0 / jnp.sqrt(hidden)
    return {
        "wc": jax.random.uniform(k[0], (hidden, n_concepts), jnp.float32, -bound, bound),
        "bc": jax.random.uniform(k[1], (1, n_concepts), jnp.float32, -bound, bound),
        "w1": jax.random.uniform(k[2], (hidden, hidden), jnp.float32, -bound, bound),
        "b1": jax.random.uniform(k[3], (1, hidden), jnp.float32, -bound, bound),
        "w2": jax.random.uniform(k[4], (hidden, 1), jnp.float32, -bound, bound),
        "b2": jax.random.uniform(k[5], (1, 1), jnp.float32, -bound, bound),
    }


if __name__ == "__main__":
    key = jax.random.PRNGKey(0)
    k_h, k_p, k_h2 = jax.random.split(key, 3)
    params = init_params(k_p, HIDDEN_DIM, NUM_CONCEPTS)

    # Small shapes.  B=12 (not a multiple of 8) exercises the pad-free TB == B path;
    # S=48 exercises a full-S block that is not a multiple of 128.  H is fixed at 768
    # by the module.
    B, S, H = 12, 48, HIDDEN_DIM
    hidden_states = jax.random.normal(k_h, (B, S, H), dtype=jnp.float32)
    attn_mask = jnp.ones((B, S), dtype=jnp.int32)
    attn_mask = attn_mask.at[1, S - 7:].set(0).at[5, S // 2:].set(0)   # padded tails

    elt = _default_eltwise_dtype()

    # Default optimized path: bf16 MXU operands, f32 accumulation, in-kernel cast.
    out = jax.block_until_ready(pooling_module_aan(hidden_states, attn_mask, params))
    assert out.shape == (B, H)
    assert bool(jnp.all(jnp.isfinite(out)))

    ref_matched = _reference(hidden_states, attn_mask, params,
                             matmul_dtype=jnp.bfloat16, eltwise_dtype=elt)
    assert jnp.allclose(out, ref_matched, atol=1e-2, rtol=1e-2), \
        "mismatch vs matched-precision (bf16) reference"

    # Strict semantics check: full-f32 kernel vs full-f32 reference.
    out_f32 = jax.block_until_ready(
        pooling_module_aan(hidden_states, attn_mask, params,
                           matmul_dtype=jnp.float32, eltwise_dtype=jnp.float32))
    ref_f32 = _reference(hidden_states, attn_mask, params)
    assert jnp.allclose(out_f32, ref_f32, atol=1e-2, rtol=1e-2), "mismatch vs f32 reference"
    assert jnp.allclose(out, ref_f32, atol=5e-2, rtol=5e-2), \
        "bf16 path drifted too far from the f32 reference"

    # Batch-tiled path (B multiple of 8 -> TB=8, 2 grid steps, no padding anywhere).
    B2 = 16
    hidden2 = jax.random.normal(k_h2, (B2, S, H), dtype=jnp.float32)
    mask2 = jnp.ones((B2, S), dtype=jnp.int32).at[3, S - 9:].set(0)
    out2 = jax.block_until_ready(pooling_module_aan(hidden2, mask2, params))
    ref2 = _reference(hidden2, mask2, params, matmul_dtype=jnp.bfloat16, eltwise_dtype=elt)
    assert jnp.allclose(out2, ref2, atol=1e-2, rtol=1e-2), "mismatch on the tiled-grid path"

    print("KERNEL_OK")
</pallas_src>

<mosaic_0001>
module attributes {stable_mosaic.version = 11 : i64} {
  func.func @_aan_kernel(%arg0: i32, %arg1: memref<12x48x768xf32, #tpu.memory_space<vmem>>, %arg2: memref<12x1x48xf32, #tpu.memory_space<vmem>>, %arg3: memref<16x768xbf16, #tpu.memory_space<vmem>>, %arg4: memref<16x1xf32, #tpu.memory_space<vmem>>, %arg5: memref<768x768xbf16, #tpu.memory_space<vmem>>, %arg6: memref<1x768xf32, #tpu.memory_space<vmem>>, %arg7: memref<1x768xf32, #tpu.memory_space<vmem>>, %arg8: memref<1x1xf32, #tpu.memory_space<smem>>, %arg9: memref<12x768xf32, #tpu.memory_space<vmem>>) attributes {dimension_semantics = [#tpu.dimension_semantics<parallel>], iteration_bounds = array<i64: 1>, scalar_prefetch = 0 : i64, scratch_operands = 0 : i64, tpu.core_type = #tpu.core_type<tc>, window_params = [{transform_indices = @transform_0, window_bounds = array<i64: 12, 48, 768>}, {transform_indices = @transform_1, window_bounds = array<i64: 12, 1, 48>}, {pipeline_mode = #tpu.pipeline_mode<synchronous>, transform_indices = @transform_2, window_bounds = array<i64: 16, 768>}, {pipeline_mode = #tpu.pipeline_mode<synchronous>, transform_indices = @transform_3, window_bounds = array<i64: 16, 1>}, {pipeline_mode = #tpu.pipeline_mode<synchronous>, transform_indices = @transform_4, window_bounds = array<i64: 768, 768>}, {pipeline_mode = #tpu.pipeline_mode<synchronous>, transform_indices = @transform_5, window_bounds = array<i64: 1, 768>}, {pipeline_mode = #tpu.pipeline_mode<synchronous>, transform_indices = @transform_6, window_bounds = array<i64: 1, 768>}, {transform_indices = @transform_7, window_bounds = array<i64: 1, 1>}, {transform_indices = @transform_8, window_bounds = array<i64: 12, 768>}]} {
    %c0 = arith.constant 0 : index
    %c0_0 = arith.constant 0 : index
    %c0_1 = arith.constant 0 : index
    %0 = vector.load %arg1[%c0, %c0_0, %c0_1] : memref<12x48x768xf32, #tpu.memory_space<vmem>>, vector<12x48x768xf32>
    %1 = arith.truncf %0 : vector<12x48x768xf32> to vector<12x48x768xbf16>
    %c0_2 = arith.constant 0 : index
    %c0_3 = arith.constant 0 : index
    %2 = vector.load %arg3[%c0_2, %c0_3] : memref<16x768xbf16, #tpu.memory_space<vmem>>, vector<16x768xbf16>
    %3 = vector.shape_cast %2 : vector<16x768xbf16> to vector<1x16x768xbf16>
    %4 = vector.shape_cast %3 : vector<1x16x768xbf16> to vector<1x16x768xbf16>
    %5 = vector.broadcast %4 : vector<1x16x768xbf16> to vector<12x16x768xbf16>
    %cst = arith.constant dense<0.000000e+00> : vector<12x16x48xf32>
    %6 = tpu.matmul %5, %1, %cst {dimension_numbers = #tpu.dot_dimension_numbers<[2], [2], [1], [1], [0, 0, 0, 1, 1, 1], [0], [0]>} : vector<12x16x768xbf16>, vector<12x48x768xbf16>, vector<12x16x48xf32> -> vector<12x16x48xf32>
    %c0_4 = arith.constant 0 : index
    %c0_5 = arith.constant 0 : index
    %7 = vector.load %arg4[%c0_4, %c0_5] : memref<16x1xf32, #tpu.memory_space<vmem>>, vector<16x1xf32>
    %8 = vector.shape_cast %7 : vector<16x1xf32> to vector<1x16x1xf32>
    %9 = vector.broadcast %8 : vector<1x16x1xf32> to vector<12x16x48xf32>
    %10 = arith.addf %6, %9 : vector<12x16x48xf32>
    %c0_6 = arith.constant 0 : index
    %c0_7 = arith.constant 0 : index
    %c0_8 = arith.constant 0 : index
    %11 = vector.load %arg2[%c0_6, %c0_7, %c0_8] : memref<12x1x48xf32, #tpu.memory_space<vmem>>, vector<12x1x48xf32>
    %12 = vector.broadcast %11 : vector<12x1x48xf32> to vector<12x16x48xf32>
    %13 = arith.addf %10, %12 : vector<12x16x48xf32>
    %cst_9 = arith.constant dense<0xFF800000> : vector<12x16xf32>
    %14 = vector.multi_reduction <maximumf>, %13, %cst_9 [2] : vector<12x16x48xf32> to vector<12x16xf32>
    %15 = vector.shape_cast %14 : vector<12x16xf32> to vector<12x16x1xf32>
    %16 = vector.broadcast %15 : vector<12x16x1xf32> to vector<12x16x48xf32>
    %17 = arith.subf %13, %16 : vector<12x16x48xf32>
    %18 = math.exp %17 : vector<12x16x48xf32>
    %cst_10 = arith.constant dense<0.000000e+00> : vector<12x16xf32>
    %19 = vector.multi_reduction <add>, %18, %cst_10 [2] : vector<12x16x48xf32> to vector<12x16xf32>
    %20 = vector.shape_cast %19 : vector<12x16xf32> to vector<12x16x1xf32>
    %21 = tpu.reciprocal %20 {approx = true} : vector<12x16x1xf32> -> vector<12x16x1xf32>
    %22 = vector.broadcast %21 : vector<12x16x1xf32> to vector<12x16x48xf32>
    %23 = arith.mulf %18, %22 : vector<12x16x48xf32>
    %24 = arith.truncf %23 : vector<12x16x48xf32> to vector<12x16x48xbf16>
    %cst_11 = arith.constant dense<0.000000e+00> : vector<12x16x768xf32>
    %25 = tpu.matmul %24, %1, %cst_11 {dimension_numbers = #tpu.dot_dimension_numbers<[2], [1], [1], [2], [0, 0, 0, 1, 1, 2], [0], [0]>} : vector<12x16x48xbf16>, vector<12x48x768xbf16>, vector<12x16x768xf32> -> vector<12x16x768xf32>
    %26 = vector.shape_cast %25 : vector<12x16x768xf32> to vector<192x768xf32>
    %27 = arith.truncf %26 : vector<192x768xf32> to vector<192x768xbf16>
    %c0_12 = arith.constant 0 : index
    %c0_13 = arith.constant 0 : index
    %28 = vector.load %arg5[%c0_12, %c0_13] : memref<768x768xbf16, #tpu.memory_space<vmem>>, vector<768x768xbf16>
    %cst_14 = arith.constant dense<0.000000e+00> : vector<192x768xf32>
    %29 = tpu.matmul %27, %28, %cst_14 {dimension_numbers = #tpu.dot_dimension_numbers<[1], [0], [0], [1], [0, 0, 1, 1], [], []>} : vector<192x768xbf16>, vector<768x768xbf16>, vector<192x768xf32> -> vector<192x768xf32>
    %c0_15 = arith.constant 0 : index
    %c0_16 = arith.constant 0 : index
    %30 = vector.load %arg6[%c0_15, %c0_16] : memref<1x768xf32, #tpu.memory_space<vmem>>, vector<1x768xf32>
    %31 = vector.broadcast %30 : vector<1x768xf32> to vector<192x768xf32>
    %32 = arith.addf %29, %31 : vector<192x768xf32>
    %33 = math.tanh %32 : vector<192x768xf32>
    %c0_17 = arith.constant 0 : index
    %c0_18 = arith.constant 0 : index
    %34 = vector.load %arg7[%c0_17, %c0_18] : memref<1x768xf32, #tpu.memory_space<vmem>>, vector<1x768xf32>
    %35 = vector.broadcast %34 : vector<1x768xf32> to vector<192x768xf32>
    %36 = arith.mulf %33, %35 : vector<192x768xf32>
    %cst_19 = arith.constant dense<0.000000e+00> : vector<192xf32>
    %37 = vector.multi_reduction <add>, %36, %cst_19 [1] : vector<192x768xf32> to vector<192xf32>
    %38 = vector.shape_cast %37 : vector<192xf32> to vector<192x1xf32>
    %c0_20 = arith.constant 0 : index
    %c0_21 = arith.constant 0 : index
    %39 = memref.load %arg8[%c0_20, %c0_21] : memref<1x1xf32, #tpu.memory_space<smem>>
    %40 = vector.broadcast %39 : f32 to vector<192x1xf32>
    %41 = arith.addf %38, %40 : vector<192x1xf32>
    %42 = vector.shape_cast %41 : vector<192x1xf32> to vector<12x16x1xf32>
    %43 = tpu.iota {dimensions = array<i32: 1>} : vector<12x16x1xi32>
    %c10_i32 = arith.constant 10 : i32
    %44 = vector.broadcast %c10_i32 : i32 to vector<12x16x1xi32>
    %45 = arith.cmpi slt, %43, %44 : vector<12x16x1xi32>
    %cst_22 = arith.constant -1.000000e+09 : f32
    %46 = vector.broadcast %cst_22 : f32 to vector<12x16x1xf32>
    %47 = arith.select %45, %42, %46 : vector<12x16x1xi1>, vector<12x16x1xf32>
    %cst_23 = arith.constant dense<0xFF800000> : vector<12x1xf32>
    %48 = vector.multi_reduction <maximumf>, %47, %cst_23 [1] : vector<12x16x1xf32> to vector<12x1xf32>
    %49 = vector.shape_cast %48 : vector<12x1xf32> to vector<12x1x1xf32>
    %50 = vector.broadcast %49 : vector<12x1x1xf32> to vector<12x16x1xf32>
    %51 = arith.subf %47, %50 : vector<12x16x1xf32>
    %52 = math.exp %51 : vector<12x16x1xf32>
    %cst_24 = arith.constant dense<0.000000e+00> : vector<12x1xf32>
    %53 = vector.multi_reduction <add>, %52, %cst_24 [1] : vector<12x16x1xf32> to vector<12x1xf32>
    %54 = vector.shape_cast %53 : vector<12x1xf32> to vector<12x1x1xf32>
    %55 = tpu.reciprocal %54 {approx = true} : vector<12x1x1xf32> -> vector<12x1x1xf32>
    %56 = vector.broadcast %55 : vector<12x1x1xf32> to vector<12x16x1xf32>
    %57 = arith.mulf %52, %56 : vector<12x16x1xf32>
    %58 = vector.broadcast %57 : vector<12x16x1xf32> to vector<12x16x768xf32>
    %59 = arith.mulf %58, %25 : vector<12x16x768xf32>
    %cst_25 = arith.constant dense<0.000000e+00> : vector<12x768xf32>
    %60 = vector.multi_reduction <add>, %59, %cst_25 [1] : vector<12x16x768xf32> to vector<12x768xf32>
    %c0_26 = arith.constant 0 : index
    %c0_27 = arith.constant 0 : index
    %61 = vector.load %arg9[%c0_26, %c0_27] : memref<12x768xf32, #tpu.memory_space<vmem>>, vector<12x768xf32>
    tpu.vector_store %arg9[%c0_26, %c0_27], %60 {strides = array<i32>} : memref<12x768xf32, #tpu.memory_space<vmem>>, vector<12x768xf32>,
    return
  }
  func.func @transform_0(%arg0: i32) -> (i32, i32, i32) {
    %c0_i32 = arith.constant 0 : i32
    %c0_i32_0 = arith.constant 0 : i32
    %c0_i32_1 = arith.constant 0 : i32
    return %arg0, %c0_i32, %c0_i32_0 : i32, i32, i32
  }
  func.func @transform_1(%arg0: i32) -> (i32, i32, i32) {
    %c0_i32 = arith.constant 0 : i32
    %c0_i32_0 = arith.constant 0 : i32
    %c0_i32_1 = arith.constant 0 : i32
    return %arg0, %c0_i32, %c0_i32_0 : i32, i32, i32
  }
  func.func @transform_2(%arg0: i32) -> (i32, i32) {
    %c0_i32 = arith.constant 0 : i32
    %c0_i32_0 = arith.constant 0 : i32
    %c0_i32_1 = arith.constant 0 : i32
    return %c0_i32, %c0_i32_0 : i32, i32
  }
  func.func @transform_3(%arg0: i32) -> (i32, i32) {
    %c0_i32 = arith.constant 0 : i32
    %c0_i32_0 = arith.constant 0 : i32
    %c0_i32_1 = arith.constant 0 : i32
    return %c0_i32, %c0_i32_0 : i32, i32
  }
  func.func @transform_4(%arg0: i32) -> (i32, i32) {
    %c0_i32 = arith.constant 0 : i32
    %c0_i32_0 = arith.constant 0 : i32
    %c0_i32_1 = arith.constant 0 : i32
    return %c0_i32, %c0_i32_0 : i32, i32
  }
  func.func @transform_5(%arg0: i32) -> (i32, i32) {
    %c0_i32 = arith.constant 0 : i32
    %c0_i32_0 = arith.constant 0 : i32
    %c0_i32_1 = arith.constant 0 : i32
    return %c0_i32, %c0_i32_0 : i32, i32
  }
  func.func @transform_6(%arg0: i32) -> (i32, i32) {
    %c0_i32 = arith.constant 0 : i32
    %c0_i32_0 = arith.constant 0 : i32
    %c0_i32_1 = arith.constant 0 : i32
    return %c0_i32, %c0_i32_0 : i32, i32
  }
  func.func @transform_7(%arg0: i32) -> (i32, i32) {
    %c0_i32 = arith.constant 0 : i32
    %c0_i32_0 = arith.constant 0 : i32
    %c0_i32_1 = arith.constant 0 : i32
    return %c0_i32, %c0_i32_0 : i32, i32
  }
  func.func @transform_8(%arg0: i32) -> (i32, i32) {
    %c0_i32 = arith.constant 0 : i32
    %c0_i32_0 = arith.constant 0 : i32
    return %arg0, %c0_i32 : i32, i32
  }
}

</mosaic_0001>

<bundles_post_ra>
// kernel: tpu_custom_call.1
= control target key start
LH: loop header
LB: loop body
LE: loop exit
PB: predicated region body
PF: predicated region fallthrough
CT: control target
= control target key end

     0   :  { %14 = vsyncpa [#allocation4], 0  ;;  %s14767_s0 = inlined_call_operand.hbm [shape: f32[12,48,768], index: 0, kind: input, shape index: {}]   ;;  %s14768_s1 = inlined_call_operand.hbm [shape: f32[12,1,48], index: 1, kind: input, shape index: {}]   ;;  %s14769_s2 = inlined_call_operand.hbm [shape: bf16[16,768], index: 2, kind: input, shape index: {}]   ;;  %s14770_s3 = inlined_call_operand.vmem [shape: f32[16,1], index: 3, kind: input, shape index: {}]   ;;  %s14771_s4 = inlined_call_operand.hbm [shape: bf16[768,768], index: 4, kind: input, shape index: {}]   ;;  %s14772_s5 = inlined_call_operand.hbm [shape: f32[1,768], index: 5, kind: input, shape index: {}]   ;;  %s14773_s6 = inlined_call_operand.hbm [shape: f32[1,768], index: 6, kind: input, shape index: {}]   ;;  %s14774_s7 = inlined_call_operand.<no memory space> [shape: f32[1,1], index: 7, kind: input, shape index: {}]   ;;  %s14775_s8 = inlined_call_operand.hbm [shape: f32[12,768], index: 8, kind: output, shape index: {}]  }
   0x1   :  { %15 = vsyncpa [#allocation7], 0 }
   0x2   :  { %16 = vsyncpa [#allocation10], 0 }
   0x3   :  { %17 = vsyncpa [#allocation13], 0 }
   0x4   :  { %18 = vsyncpa [#allocation5], 0  ;;  %s11006_s27 = smov [#allocation6]   ;;  %s10842_s9 = scalar_lea.hbm %s14768_s1, 192 }
   0x5   :  { %s36_s28 = sshll.u32 %s11006_s27, 4  ;;  %p10843_p0 = scmp.ne.s32.totalorder %s14768_s1, %s10842_s9  ;;  %s37_s28 = int_to_ptr.vmem [resolvable:$true] %s36_s28 }
   0x6   :  { %p10846_p1 = scmp.lt.u32.totalorder %s10842_s9, %s14768_s1 }
   0x8   :  { %p10848_p2 = pnand %p10846_p1, %p10843_p0 }
   0xa   :  { %10851 = shalt.err (!%p10848_p2)
}
   0xb   :  { %s10852_s14 = scalar_lea.vmem %s37_s28, 192  ;;  %p10857_p4 = scmp.lt.s32.totalorder %s37_s28, %s37_s28 }
   0xc   :  { %p10853_p3 = scmp.ne.s32.totalorder %s37_s28, %s10852_s14  ;;  %p10858_p5 = scmp.lt.s32.totalorder %s10852_s14, %s10852_s14 }
   0xe   :  { %p10859_p6 = por %p10858_p5, %p10857_p4 }
  0x10   :  { %p10860_p7 = pnand %p10859_p6, %p10853_p3 }
  0x12   :  { %10863 = shalt.err (!%p10860_p7)
}
  0x13   :  { %s11007_s15 = smov 16   ;;  %s11008_s16 = smov 1  }
  0x14   :  { %42 = dma.hbm_to_vmem [thread:$0]  %s14768_s1, 192, %s37_s28, [#allocation7], %s11007_s15, %s11007_s15, %s11008_s16  }
  0x15   :  { %s11009_s19 = smov [#allocation9]   ;;  %s11010_s21 = smov [#allocation3]  }
  0x16   :  { %s62_s20 = sshll.u32 %s11009_s19, 4  ;;  %s24_s22 = sshll.u32 %s11010_s21, 4  ;;  %s63_s20 = int_to_ptr.vmem [resolvable:$true] %s62_s20  ;;  %s25_s22 = int_to_ptr.vmem [resolvable:$true] %s24_s22 }
  0x17   :  { %s10864_s25 = scalar_lea.hbm %s14771_s4, 36864 }
  0x18   :  { %p10865_p8 = scmp.ne.s32.totalorder %s14771_s4, %s10864_s25  ;;  %p10868_p9 = scmp.lt.u32.totalorder %s10864_s25, %s14771_s4 }
  0x1a   :  { %p10870_p10 = pnand %p10868_p9, %p10865_p8 }
  0x1c   :  { %10873 = shalt.err (!%p10870_p10)
}
  0x1d   :  { %s10874_s1 = scalar_lea.vmem %s63_s20, 36864  ;;  %p10879_p12 = scmp.lt.s32.totalorder %s63_s20, %s63_s20 }
  0x1e   :  { %p10875_p11 = scmp.ne.s32.totalorder %s63_s20, %s10874_s1  ;;  %p10880_p13 = scmp.lt.s32.totalorder %s10874_s1, %s10874_s1 }
  0x20   :  { %p10881_p0 = por %p10880_p13, %p10879_p12 }
  0x22   :  { %p10882_p1 = pnand %p10881_p0, %p10875_p11 }
  0x24   :  { %10885 = shalt.err (!%p10882_p1)
}
  0x25   :  { %s11011_s28 = smov 384   ;;  %s11012_s9 = smov 24  }
  0x26   :  { %68 = dma.hbm_to_vmem [thread:$0]  %s14771_s4, 36864, %s63_s20, [#allocation10], %s11011_s28, %s11011_s28, %s11012_s9  }
  0x27   :  { %s10886_s14 = scalar_lea.hbm %s14767_s0, 55296 }
  0x28   :  { %p10887_p2 = scmp.ne.s32.totalorder %s14767_s0, %s10886_s14  ;;  %p10890_p3 = scmp.lt.u32.totalorder %s10886_s14, %s14767_s0 }
  0x2a   :  { %p10892_p4 = pnand %p10890_p3, %p10887_p2 }
  0x2c   :  { %10895 = shalt.err (!%p10892_p4)
}
  0x2d   :  { %s10896_s19 = scalar_lea.vmem %s25_s22, 55296  ;;  %p10901_p6 = scmp.lt.s32.totalorder %s25_s22, %s25_s22 }
  0x2e   :  { %p10897_p5 = scmp.ne.s32.totalorder %s25_s22, %s10896_s19  ;;  %p10902_p7 = scmp.lt.s32.totalorder %s10896_s19, %s10896_s19 }
  0x30   :  { %p10903_p8 = por %p10902_p7, %p10901_p6 }
  0x32   :  { %p10904_p9 = pnand %p10903_p8, %p10897_p5 }
  0x34   :  { %10907 = shalt.err (!%p10904_p9)
}
  0x35   :  { %s11013_s4 = smov 768   ;;  %s11014_s20 = smov 48  }
  0x36   :  { %30 = dma.hbm_to_vmem [thread:$0]  %s14767_s0, 55296, %s25_s22, [#allocation4], %s11013_s4, %s11013_s4, %s11014_s20  }
  0x37   :  { %s11015_s24 = smov [#allocation8]   ;;  %s11016_s26 = smov [#allocation11]  }
  0x38   :  { %s48_s25 = sshll.u32 %s11015_s24, 4  ;;  %s75_s27 = sshll.u32 %s11016_s26, 4  ;;  %s49_s25 = int_to_ptr.vmem [resolvable:$true] %s48_s25  ;;  %s76_s27 = int_to_ptr.vmem [resolvable:$true] %s75_s27 }
  0x39   :  { %s10908_s1 = scalar_lea.hbm %s14769_s2, 768 }
  0x3a   :  { %p10909_p10 = scmp.ne.s32.totalorder %s14769_s2, %s10908_s1  ;;  %p10912_p11 = scmp.lt.u32.totalorder %s10908_s1, %s14769_s2 }
  0x3c   :  { %p10914_p12 = pnand %p10912_p11, %p10909_p10 }
  0x3e   :  { %10917 = shalt.err (!%p10914_p12)
}
  0x3f   :  { %s10918_s0 = scalar_lea.vmem %s49_s25, 768  ;;  %p10923_p0 = scmp.lt.s32.totalorder %s49_s25, %s49_s25 }
  0x40   :  { %p10919_p13 = scmp.ne.s32.totalorder %s49_s25, %s10918_s0  ;;  %p10924_p1 = scmp.lt.s32.totalorder %s10918_s0, %s10918_s0 }
  0x42   :  { %p10925_p2 = por %p10924_p1, %p10923_p0 }
  0x44   :  { %p10926_p3 = pnand %p10925_p2, %p10919_p13 }
  0x46   :  { %10929 = shalt.err (!%p10926_p3)
}
  0x47   :  { %54 = dma.hbm_to_vmem [thread:$0]  %s14769_s2, 768, %s49_s25, [#allocation7], %s11011_s28, %s11011_s28, %s11012_s9  }
  0x48   :  { %s10930_s17 = scalar_lea.hbm %s14772_s5, 96 }
  0x49   :  { %p10931_p4 = scmp.ne.s32.totalorder %s14772_s5, %s10930_s17  ;;  %p10934_p5 = scmp.lt.u32.totalorder %s10930_s17, %s14772_s5 }
  0x4b   :  { %p10936_p6 = pnand %p10934_p5, %p10931_p4 }
  0x4d   :  { %10939 = shalt.err (!%p10936_p6)
}
  0x4e   :  { %s10940_s24 = scalar_lea.vmem %s76_s27, 96  ;;  %p10945_p8 = scmp.lt.s32.totalorder %s76_s27, %s76_s27 }
  0x4f   :  { %p10941_p7 = scmp.ne.s32.totalorder %s76_s27, %s10940_s24  ;;  %p10946_p9 = scmp.lt.s32.totalorder %s10940_s24, %s10940_s24 }
  0x51   :  { %p10947_p10 = por %p10946_p9, %p10945_p8 }
  0x53   :  { %p10948_p11 = pnand %p10947_p10, %p10941_p7 }
  0x55   :  { %10951 = shalt.err (!%p10948_p11)
}
  0x56   :  { %78 = dma.hbm_to_vmem [thread:$0]  %s14772_s5, 96, %s76_s27, [#allocation10]  }
  0x57   :  { %s11017_s9 = smov [#allocation12]   ;;  %s10952_s30 = scalar_lea.hbm %s14773_s6, 96 }
  0x58   :  { %s85_s25 = sshll.u32 %s11017_s9, 4  ;;  %p10953_p12 = scmp.ne.s32.totalorder %s14773_s6, %s10952_s30  ;;  %s86_s25 = int_to_ptr.vmem [resolvable:$true] %s85_s25 }
  0x59   :  { %p10956_p13 = scmp.lt.u32.totalorder %s10952_s30, %s14773_s6 }
  0x5b   :  { %p10958_p0 = pnand %p10956_p13, %p10953_p12 }
  0x5d   :  { %10961 = shalt.err (!%p10958_p0)
}
  0x5e   :  { %s10962_s13 = scalar_lea.vmem %s86_s25, 96  ;;  %p10967_p2 = scmp.lt.s32.totalorder %s86_s25, %s86_s25 }
  0x5f   :  { %p10963_p1 = scmp.ne.s32.totalorder %s86_s25, %s10962_s13  ;;  %p10968_p3 = scmp.lt.s32.totalorder %s10962_s13, %s10962_s13 }
  0x61   :  { %p10969_p4 = por %p10968_p3, %p10967_p2 }
  0x63   :  { %p10970_p5 = pnand %p10969_p4, %p10963_p1 }
  0x65   :  { %10973 = shalt.err (!%p10970_p5)
}
  0x66   :  { %88 = dma.hbm_to_vmem [thread:$0]  %s14773_s6, 96, %s86_s25, [#allocation13]  }
  0x67   :  { %10996 = dma.done.wait [#allocation4], 55296  }
  0x68   :  { %10997 = vsyncadd [#allocation4], 4294912000 }
  0x69   :  { %10998 = dma.done.wait [#allocation7], 960  }
  0x6a   :  { %10999 = vsyncadd [#allocation7], 4294966336 }
  0x6b   :  { %11000 = dma.done.wait [#allocation10], 36960  }
  0x6c   :  { %11001 = vsyncadd [#allocation10], 4294930336 }
  0x6d   :  { %11002 = dma.done.wait [#allocation13], 96  }
  0x6e   :  { %11003 = vsyncadd [#allocation13], 4294967200  ;;  %v14776_v0 = vmov 0   ;;  %v111_v1 = vld [vmem:[#allocation3 + $0x8] sm:$0xff]  ;;  %v117_v2 = vld [vmem:[#allocation3 + $0x38] sm:$0xff]  ;;  %vm2390_vm0 = vcmask 392192  }
  0x6f   :  { %9930 = vset.pattern.permute.xlu0 %v14776_v0  ;;  %v113_v3 = vld [vmem:[#allocation3 + $0x18] sm:$0xff]  ;;  %v11147_v4 = vpack.c.bf16 %v117_v2, %v111_v1  ;;  %v119_v5 = vld [vmem:[#allocation3 + $0x48] sm:$0xff]  ;;  %v110_v6 = vld [vmem:[#allocation3] sm:$0xff]  ;;  %vm8999_vm2 = vcmask 1041409   ;;  %vm9001_vm3 = vcmask 1042434   ;;  %vm9003_vm4 = vcmask 1043459  }
  0x70   :  { %v116_v7 = vld [vmem:[#allocation3 + $0x30] sm:$0xff]  ;;  %v11149_v8 = vpack.c.bf16 %v119_v5, %v113_v3  ;;  %v118_v11 = vld [vmem:[#allocation3 + $0x40] sm:$0xff]  ;;  %v123_v12 = vld [vmem:[#allocation3 + $0x68] sm:$0xff]  ;;  %vm9005_vm5 = vcmask 1044484   ;;  %vm9007_vm6 = vcmask 1045509   ;;  %vm9009_vm7 = vcmask 1046534  }
  0x71   :  { %v11151_v9 = vpack.c.bf16 %v116_v7, %v110_v6  ;;  %v112_v10 = vld [vmem:[#allocation3 + $0x10] sm:$0xff]  ;;  %806 = vmatprep.subr.bf16.mxu0 %v11147_v4  ;;  %v129_v14 = vld [vmem:[#allocation3 + $0x98] sm:$0xff]  ;;  %v131_v16 = vld [vmem:[#allocation3 + $0xa8] sm:$0xff]  ;;  %vm9011_vm8 = vcmask 1047559  }
  0x72   :  { %v11154_v13 = vpack.c.bf16 %v118_v11, %v112_v10  ;;  %v125_v15 = vld [vmem:[#allocation3 + $0x78] sm:$0xff]  ;;  %847 = vmatprep.subr.bf16.mxu1 %v11149_v8  ;;  %v11158_v17 = vpack.c.bf16 %v129_v14, %v123_v12  ;;  %v122_v19 = vld [vmem:[#allocation3 + $0x60] sm:$0xff]  ;;  %v128_v20 = vld [vmem:[#allocation3 + $0x90] sm:$0xff] }
  0x73   :  { %807 = vmatpush1.bf16.xpose.msra.mxu0 %v11151_v9  ;;  %v11160_v18 = vpack.c.bf16 %v131_v16, %v125_v15  ;;  %v124_v21 = vld [vmem:[#allocation3 + $0x70] sm:$0xff]  ;;  %v130_v22 = vld [vmem:[#allocation3 + $0xa0] sm:$0xff]  ;;  %v135_v23 = vld [vmem:[#allocation3 + $0xc8] sm:$0xff]  ;;  %v11165_v27 = vpack.c.bf16 %v128_v20, %v122_v19 }
  0x74   :  { %848 = vmatpush1.bf16.xpose.msra.mxu1 %v11154_v13  ;;  %808 = vmatprep.subr.bf16.mxu0 %v11158_v17  ;;  %v141_v24 = vld [vmem:[#allocation3 + $0xf8] sm:$0xff]  ;;  %v143_v26 = vld [vmem:[#allocation3 + $0x108] sm:$0xff]  ;;  %v11169_v29 = vpack.c.bf16 %v130_v22, %v124_v21  ;;  %v134_v33 = vld [vmem:[#allocation3 + $0xc0] sm:$0xff] }
  0x75   :  { %849 = vmatprep.subr.bf16.mxu1 %v11160_v18  ;;  %v137_v25 = vld [vmem:[#allocation3 + $0xd8] sm:$0xff]  ;;  %v11167_v28 = vld [vmem:[#allocation8 + $0x4] ss:$24 sps:$4 sm:$0xff]   ;;  %v11171_v30 = vpack.c.bf16 %v141_v24, %v135_v23  ;;  %v142_v36 = vld [vmem:[#allocation3 + $0x100] sm:$0xff] }
  0x76   :  { %v11173_v31 = vld [vmem:[#allocation8 + $0xc] ss:$24 sps:$4 sm:$0xff]   ;;  %v11175_v32 = vpack.c.bf16 %v143_v26, %v137_v25  ;;  %838 = vmatprep.mubr.bf16.mxu0 %v11167_v28  ;;  %v115_v37 = vld [vmem:[#allocation3 + $0x28] sm:$0xff]  ;;  %v114_v45 = vld [vmem:[#allocation3 + $0x20] sm:$0xff] }
  0x77   :  { %879 = vmatprep.mubr.bf16.mxu1 %v11173_v31  ;;  %v140_v34 = vld [vmem:[#allocation3 + $0xf0] sm:$0xff]  ;;  %v121_v38 = vld [vmem:[#allocation3 + $0x58] sm:$0xff]  ;;  %v147_v39 = vld [vmem:[#allocation3 + $0x128] sm:$0xff] }
  0x78   :  { %v136_v35 = vld [vmem:[#allocation3 + $0xd0] sm:$0xff]  ;;  %v153_v40 = vld [vmem:[#allocation3 + $0x158] sm:$0xff]  ;;  %v11183_v41 = vpack.c.bf16 %v140_v34, %v134_v33  ;;  %v11187_v43 = vpack.c.bf16 %v121_v38, %v115_v37  ;;  %v146_v47 = vld [vmem:[#allocation3 + $0x120] sm:$0xff] }
  0x79   :  { %v11185_v42 = vpack.c.bf16 %v142_v36, %v136_v35  ;;  %v11189_v44 = vpack.c.bf16 %v153_v40, %v147_v39  ;;  %v120_v46 = vld [vmem:[#allocation3 + $0x50] sm:$0xff]  ;;  %v127_v49 = vld [vmem:[#allocation3 + $0x88] sm:$0xff]  ;;  %v133_v50 = vld [vmem:[#allocation3 + $0xb8] sm:$0xff] }
  0x7a   :  { %v152_v48 = vld [vmem:[#allocation3 + $0x150] sm:$0xff]  ;;  %v11195_v51 = vld [vmem:[#allocation8] ss:$24 sps:$4 sm:$0xff]   ;;  %v165_v53 = vld [vmem:[#allocation3 + $0x1b8] sm:$0xff]  ;;  %v11199_v55 = vpack.c.bf16 %v120_v46, %v114_v45  ;;  %v11203_v57 = vpack.c.bf16 %v133_v50, %v127_v49 }
  0x7b   :  { %809 = vmatpush1.bf16.xpose.msra.mxu0 %v11165_v27  ;;  %v159_v52 = vld [vmem:[#allocation3 + $0x188] sm:$0xff]  ;;  %v11201_v56 = vpack.c.bf16 %v152_v48, %v146_v47  ;;  %v11207_v59 = vld [vmem:[#allocation8 + $0x14] ss:$24 sps:$4 sm:$0xff]   ;;  %v132_v61 = vld [vmem:[#allocation3 + $0xb0] sm:$0xff] }
  0x7c   :  { %850 = vmatpush1.bf16.xpose.msra.mxu1 %v11169_v29  ;;  %810 = vmatprep.subr.bf16.mxu0 %v11171_v30  ;;  %v11197_v54 = vld [vmem:[#allocation8 + $0x8] ss:$24 sps:$4 sm:$0xff]   ;;  %v11205_v58 = vpack.c.bf16 %v165_v53, %v159_v52  ;;  %v126_v60 = vld [vmem:[#allocation3 + $0x80] sm:$0xff]  ;;  %v145_v2 = vld [vmem:[#allocation3 + $0x118] sm:$0xff] }
  0x7d   :  { %851 = vmatprep.subr.bf16.mxu1 %v11175_v32  ;;  %v158_v62 = vld [vmem:[#allocation3 + $0x180] sm:$0xff]  ;;  %v164_v63 = vld [vmem:[#allocation3 + $0x1b0] sm:$0xff]  ;;  %v139_v1 = vld [vmem:[#allocation3 + $0xe8] sm:$0xff]  ;;  %v11217_v6 = vpack.c.bf16 %v132_v61, %v126_v60 }
  0x7e   :  { %v171_v3 = vld [vmem:[#allocation3 + $0x1e8] sm:$0xff]  ;;  %v177_v5 = vld [vmem:[#allocation3 + $0x218] sm:$0xff]  ;;  %v11219_v7 = vpack.c.bf16 %v164_v63, %v158_v62  ;;  %v11221_v10 = vpack.c.bf16 %v145_v2, %v139_v1  ;;  %v138_v12 = vld [vmem:[#allocation3 + $0xe0] sm:$0xff] }
  0x7f   :  { %v11223_v11 = vpack.c.bf16 %v177_v5, %v171_v3  ;;  %v144_v14 = vld [vmem:[#allocation3 + $0x110] sm:$0xff]  ;;  %v170_v15 = vld [vmem:[#allocation3 + $0x1e0] sm:$0xff]  ;;  %v149_v19 = vld [vmem:[#allocation3 + $0x138] sm:$0xff] }
  0x80   :  { %v176_v16 = vld [vmem:[#allocation3 + $0x210] sm:$0xff]  ;;  %v155_v20 = vld [vmem:[#allocation3 + $0x168] sm:$0xff]  ;;  %v157_v22 = vld [vmem:[#allocation3 + $0x178] sm:$0xff]  ;;  %v11229_v23 = vpack.c.bf16 %v144_v14, %v138_v12 }
  0x81   :  { %v151_v21 = vld [vmem:[#allocation3 + $0x148] sm:$0xff]  ;;  %v11231_v24 = vpack.c.bf16 %v176_v16, %v170_v15  ;;  %v11233_v25 = vpack.c.bf16 %v155_v20, %v149_v19  ;;  %v764_v26 = vld [vmem:[%s14770_s3] sm:$0xff]  ;;  %v148_v35 = vld [vmem:[#allocation3 + $0x130] sm:$0xff] }
  0x82   :  { %v11238_v33 = vpack.c.bf16 %v157_v22, %v151_v21  ;;  %768 = vperm.xlu0 %9930, %v764_v26   ;;  %v765_v34 = vld [vmem:[%s14770_s3 + $0x8] sm:$0xff]  ;;  %v154_v36 = vld [vmem:[#allocation3 + $0x160] sm:$0xff]  ;;  %v156_v38 = vld [vmem:[#allocation3 + $0x170] sm:$0xff] }
  0x83   :  { %811 = vmatpush1.bf16.xpose.msra.mxu0 %v11183_v41  ;;  %v150_v37 = vld [vmem:[#allocation3 + $0x140] sm:$0xff]  ;;  %v161_v39 = vld [vmem:[#allocation3 + $0x198] sm:$0xff]  ;;  %v167_v40 = vld [vmem:[#allocation3 + $0x1c8] sm:$0xff]  ;;  %v11249_v48 = vpack.c.bf16 %v154_v36, %v148_v35 }
  0x84   :  { %852 = vmatpush1.bf16.xpose.msra.mxu1 %v11185_v42  ;;  %888 = vmatprep.subr.bf16.mxu0 %v11187_v43  ;;  %v11247_v45 = vld [vmem:[#allocation8 + $0x10] ss:$24 sps:$4 sm:$0xff]   ;;  %v163_v46 = vld [vmem:[#allocation3 + $0x1a8] sm:$0xff]  ;;  %v11251_v49 = vpack.c.bf16 %v156_v38, %v150_v37  ;;  %v11253_v50 = vpack.c.bf16 %v167_v40, %v161_v39  ;;  %v166_v60 = vld [vmem:[#allocation3 + $0x1c0] sm:$0xff] }
  0x85   :  { %929 = vmatprep.subr.bf16.mxu1 %v11189_v44  ;;  %v169_v47 = vld [vmem:[#allocation3 + $0x1d8] sm:$0xff]  ;;  %15178 = vst [vmem:[#allocation20_spill] sm:$0xff] %v11249_v48  ;;  %v160_v53 = vld [vmem:[#allocation3 + $0x190] sm:$0xff]  ;;  %v162_v61 = vld [vmem:[#allocation3 + $0x1a0] sm:$0xff] }
  0x86   :  { %773 = vperm.xlu0 %9930, %v765_v34   ;;  %15179 = vst [vmem:[#allocation21_spill] sm:$0xff] %v11251_v49  ;;  %15180 = vst [vmem:[#allocation22_spill] sm:$0xff] %v11253_v50  ;;  %v11255_v52 = vpack.c.bf16 %v169_v47, %v163_v46  ;;  %v168_v62 = vld [vmem:[#allocation3 + $0x1d0] sm:$0xff]  ;;  %v173_v63 = vld [vmem:[#allocation3 + $0x1f8] sm:$0xff]  ;;  %v11265_v5 = vpack.c.bf16 %v166_v60, %v160_v53 }
  0x87   :  { %v179_v1 = vld [vmem:[#allocation3 + $0x228] sm:$0xff]  ;;  %v181_v3 = vld [vmem:[#allocation3 + $0x238] sm:$0xff]  ;;  %v11267_v12 = vpack.c.bf16 %v168_v62, %v162_v61  ;;  %v172_v16 = vld [vmem:[#allocation3 + $0x1f0] sm:$0xff] }
  0x88   :  { %15181 = vst [vmem:[#allocation23_spill] sm:$0xff] %v11255_v52  ;;  %v175_v2 = vld [vmem:[#allocation3 + $0x208] sm:$0xff]  ;;  %15182 = vst [vmem:[#allocation24_spill] sm:$0xff] %v11265_v5  ;;  %v11269_v14 = vpack.c.bf16 %v179_v1, %v173_v63  ;;  %v178_v19 = vld [vmem:[#allocation3 + $0x220] sm:$0xff] }
  0x89   :  { %15183 = vst [vmem:[#allocation25_spill] sm:$0xff] %v11267_v12  ;;  %v11271_v15 = vpack.c.bf16 %v181_v3, %v175_v2  ;;  %v174_v20 = vld [vmem:[#allocation3 + $0x200] sm:$0xff]  ;;  %v180_v21 = vld [vmem:[#allocation3 + $0x230] sm:$0xff]  ;;  %v183_v22 = vld [vmem:[#allocation3 + $0x248] sm:$0xff]  ;;  %v11277_v36 = vpack.c.bf16 %v178_v19, %v172_v16 }
  0x8a   :  { %839 = vmatmul.mubr.bf16.vlgmr.msra.gmra.mrb[0].mxu0 %v11195_v51  ;;  %15184 = vst [vmem:[#allocation26_spill] sm:$0xff] %v11269_v14  ;;  %v189_v26 = vld [vmem:[#allocation3 + $0x278] sm:$0xff]  ;;  %v191_v35 = vld [vmem:[#allocation3 + $0x288] sm:$0xff]  ;;  %v11279_v37 = vpack.c.bf16 %v180_v21, %v174_v20  ;;  %v182_v40 = vld [vmem:[#allocation3 + $0x240] sm:$0xff] }
  0x8b   :  { %880 = vmatmul.mubr.bf16.vlgmr.msra.gmra.mrb[0].mxu1 %v11197_v54  ;;  %889 = vmatpush1.bf16.xpose.msra.mxu0 %v11199_v55  ;;  %15185 = vst [vmem:[#allocation27_spill] sm:$0xff] %v11271_v15  ;;  %v185_v34 = vld [vmem:[#allocation3 + $0x258] sm:$0xff]  ;;  %15186 = vst [vmem:[#allocation28_spill] sm:$0xff] %v11277_v36  ;;  %v11281_v38 = vpack.c.bf16 %v189_v26, %v183_v22  ;;  %v188_v46 = vld [vmem:[#allocation3 + $0x270] sm:$0xff] }
  0x8c   :  { %930 = vmatpush1.bf16.xpose.msra.mxu1 %v11201_v56  ;;  %890 = vmatprep.subr.bf16.mxu0 %v11203_v57  ;;  %15187 = vst [vmem:[#allocation29_spill] sm:$0xff] %v11279_v37  ;;  %v11283_v39 = vpack.c.bf16 %v191_v35, %v185_v34  ;;  %v184_v47 = vld [vmem:[#allocation3 + $0x250] sm:$0xff]  ;;  %v190_v53 = vld [vmem:[#allocation3 + $0x280] sm:$0xff]  ;;  %v195_v60 = vld [vmem:[#allocation3 + $0x2a8] sm:$0xff]  ;;  %v11289_v1 = vpack.c.bf16 %v188_v46, %v182_v40 }
  0x8d   :  { %931 = vmatprep.subr.bf16.mxu1 %v11205_v58  ;;  %920 = vmatprep.mubr.bf16.mxu0 %v11207_v59  ;;  %15188 = vst [vmem:[#allocation30_spill] sm:$0xff] %v11281_v38  ;;  %v201_v61 = vld [vmem:[#allocation3 + $0x2d8] sm:$0xff]  ;;  %v203_v63 = vld [vmem:[#allocation3 + $0x2e8] sm:$0xff]  ;;  %v11291_v2 = vpack.c.bf16 %v190_v53, %v184_v47  ;;  %v194_v19 = vld [vmem:[#allocation3 + $0x2a0] sm:$0xff] }
  0x8e   :  { %961 = vmatprep.mubr.bf16.mxu1 %v11167_v28  ;;  %15189 = vst [vmem:[#allocation31_spill] sm:$0xff] %v11283_v39  ;;  %v197_v62 = vld [vmem:[#allocation3 + $0x2b8] sm:$0xff]  ;;  %15190 = vst [vmem:[#allocation32_spill] sm:$0xff] %v11289_v1  ;;  %v11293_v3 = vpack.c.bf16 %v201_v61, %v195_v60  ;;  %v200_v20 = vld [vmem:[#allocation3 + $0x2d0] sm:$0xff] }
  0x8f   :  { %15191 = vst [vmem:[#allocation33_spill] sm:$0xff] %v11291_v2  ;;  %v11295_v16 = vpack.c.bf16 %v203_v63, %v197_v62  ;;  %v196_v21 = vld [vmem:[#allocation3 + $0x2b0] sm:$0xff]  ;;  %v202_v22 = vld [vmem:[#allocation3 + $0x2e0] sm:$0xff]  ;;  %v207_v26 = vld [vmem:[#allocation3 + $0x308] sm:$0xff]  ;;  %v11305_v46 = vpack.c.bf16 %v200_v20, %v194_v19 }
  0x90   :  { %15192 = vst [vmem:[#allocation34_spill] sm:$0xff] %v11293_v3  ;;  %v213_v34 = vld [vmem:[#allocation3 + $0x338] sm:$0xff]  ;;  %v215_v40 = vld [vmem:[#allocation3 + $0x348] sm:$0xff]  ;;  %v11307_v47 = vpack.c.bf16 %v202_v22, %v196_v21  ;;  %v206_v61 = vld [vmem:[#allocation3 + $0x300] sm:$0xff] }
  0x91   :  { %15193 = vst [vmem:[#allocation35_spill] sm:$0xff] %v11295_v16  ;;  %v209_v35 = vld [vmem:[#allocation3 + $0x318] sm:$0xff]  ;;  %15194 = vst [vmem:[#allocation36_spill] sm:$0xff] %v11305_v46  ;;  %v11309_v53 = vpack.c.bf16 %v213_v34, %v207_v26  ;;  %v212_v62 = vld [vmem:[#allocation3 + $0x330] sm:$0xff] }
  0x92   :  { %15195 = vst [vmem:[#allocation37_spill] sm:$0xff] %v11307_v47  ;;  %v11311_v60 = vpack.c.bf16 %v215_v40, %v209_v35  ;;  %v208_v63 = vld [vmem:[#allocation3 + $0x310] sm:$0xff]  ;;  %v214_v0 = vld [vmem:[#allocation3 + $0x340] sm:$0xff]  ;;  %v219_v19 = vld [vmem:[#allocation3 + $0x368] sm:$0xff]  ;;  %v11317_v21 = vpack.c.bf16 %v212_v62, %v206_v61 }
  0x93   :  { %891 = vmatpush1.bf16.xpose.msra.mxu0 %v11217_v6  ;;  %15196 = vst [vmem:[#allocation38_spill] sm:$0xff] %v11309_v53  ;;  %v225_v20 = vld [vmem:[#allocation3 + $0x398] sm:$0xff]  ;;  %v11319_v22 = vpack.c.bf16 %v214_v0, %v208_v63  ;;  %v186_v35 = vld [vmem:[#allocation3 + $0x260] sm:$0xff]  ;;  %v192_v40 = vld [vmem:[#allocation3 + $0x290] sm:$0xff] }
  0x94   :  { %932 = vmatpush1.bf16.xpose.msra.mxu1 %v11219_v7  ;;  %892 = vmatprep.subr.bf16.mxu0 %v11221_v10  ;;  %15197 = vst [vmem:[#allocation39_spill] sm:$0xff] %v11311_v60  ;;  %15198 = vst [vmem:[#allocation40_spill] sm:$0xff] %v11317_v21  ;;  %v11323_v34 = vpack.c.bf16 %v225_v20, %v219_v19  ;;  %v205_v61 = vld [vmem:[#allocation3 + $0x2f8] sm:$0xff]  ;;  %v231_v0 = vld [vmem:[#allocation3 + $0x3c8] sm:$0xff] }
  0x95   :  { %933 = vmatprep.subr.bf16.mxu1 %v11223_v11  ;;  %15199 = vst [vmem:[#allocation41_spill] sm:$0xff] %v11319_v22  ;;  %v237_v62 = vld [vmem:[#allocation3 + $0x3f8] sm:$0xff]  ;;  %v198_v20 = vld [vmem:[#allocation3 + $0x2c0] sm:$0xff] }
  0x96   :  { %15201 = vst [vmem:[#allocation43_spill] sm:$0xff] %v11323_v34  ;;  %v11335_v19 = vpack.c.bf16 %v237_v62, %v231_v0 }
  0x98   :  { %15205 = vst [vmem:[#allocation47_spill] sm:$0xff] %v11335_v19 }
  0x9b   :  { %893 = vmatpush1.bf16.xpose.msra.mxu0 %v11229_v23 }
  0x9c   :  { %934 = vmatpush1.bf16.xpose.msra.mxu1 %v11231_v24  ;;  %970 = vmatprep.subr.bf16.mxu0 %v11233_v25 }
  0x9d   :  { %1011 = vmatprep.subr.bf16.mxu1 %v11238_v33 }
  0xa2   :  { %921 = vmatmul.mubr.bf16.vlgmr.msra.gmra.mrb[4].mxu0 %v11247_v45 }
  0xa3   :  { %962 = vmatmul.mubr.bf16.vlgmr.msra.gmra.mrb[4].mxu1 %v11195_v51  ;;  %971 = vmatpush1.bf16.xpose.msra.mxu0 %v11249_v48 }
  0xa4   :  { %1012 = vmatpush1.bf16.xpose.msra.mxu1 %v11251_v49  ;;  %972 = vmatprep.subr.bf16.mxu0 %v11253_v50 }
  0xa5   :  { %1013 = vmatprep.subr.bf16.mxu1 %v11255_v52  ;;  %1002 = vmatprep.mubr.bf16.mxu0 %v11173_v31 }
  0xa6   :  { %1043 = vmatprep.mubr.bf16.mxu1 %v11207_v59 }
  0xab   :  { %973 = vmatpush1.bf16.xpose.msra.mxu0 %v11265_v5 }
  0xac   :  { %1014 = vmatpush1.bf16.xpose.msra.mxu1 %v11267_v12  ;;  %974 = vmatprep.subr.bf16.mxu0 %v11269_v14 }
  0xad   :  { %1015 = vmatprep.subr.bf16.mxu1 %v11271_v15 }
  0xb3   :  { %975 = vmatpush1.bf16.xpose.msra.mxu0 %v11277_v36 }
  0xb4   :  { %1016 = vmatpush1.bf16.xpose.msra.mxu1 %v11279_v37  ;;  %1052 = vmatprep.subr.bf16.mxu0 %v11281_v38  ;;  %v199_v37 = vld [vmem:[#allocation3 + $0x2c8] sm:$0xff] }
  0xb5   :  { %1093 = vmatprep.subr.bf16.mxu1 %v11283_v39  ;;  %v224_v39 = vld [vmem:[#allocation3 + $0x390] sm:$0xff]  ;;  %v11333_v63 = vpack.c.bf16 %v205_v61, %v199_v37  ;;  %v217_v37 = vld [vmem:[#allocation3 + $0x358] sm:$0xff] }
  0xb6   :  { %v249_v61 = vld [vmem:[#allocation3 + $0x458] sm:$0xff] }
  0xb7   :  { %15204 = vst [vmem:[#allocation46_spill] sm:$0xff] %v11333_v63 }
  0xba   :  { %1003 = vmatmul.mubr.bf16.vlgmr.msra.gmra.mrb[8].mxu0 %v11197_v54 }
  0xbb   :  { %1044 = vmatmul.mubr.bf16.vlgmr.msra.gmra.mrb[8].mxu1 %v11247_v45  ;;  %1053 = vmatpush1.bf16.xpose.msra.mxu0 %v11289_v1 }
  0xbc   :  { %1094 = vmatpush1.bf16.xpose.msra.mxu1 %v11291_v2  ;;  %1054 = vmatprep.subr.bf16.mxu0 %v11293_v3  ;;  %v193_v2 = vld [vmem:[#allocation3 + $0x298] sm:$0xff] }
  0xbd   :  { %1095 = vmatprep.subr.bf16.mxu1 %v11295_v16  ;;  %1084 = vmatprep.mubr.bf16.mxu0 %v11167_v28  ;;  %v187_v16 = vld [vmem:[#allocation3 + $0x268] sm:$0xff] }
  0xbe   :  { %1125 = vmatprep.mubr.bf16.mxu1 %v11173_v31  ;;  %v11321_v26 = vpack.c.bf16 %v193_v2, %v187_v16  ;;  %v11329_v2 = vpack.c.bf16 %v192_v40, %v186_v35  ;;  %v230_v35 = vld [vmem:[#allocation3 + $0x3c0] sm:$0xff]  ;;  %v236_v40 = vld [vmem:[#allocation3 + $0x3f0] sm:$0xff] }
  0xbf   :  { %v11347_v62 = vpack.c.bf16 %v236_v40, %v230_v35 }
  0xc0   :  { %15200 = vst [vmem:[#allocation42_spill] sm:$0xff] %v11321_v26  ;;  %15202 = vst [vmem:[#allocation44_spill] sm:$0xff] %v11329_v2 }
  0xc1   :  { %15207 = vst [vmem:[#allocation49_spill] sm:$0xff] %v11347_v62 }
  0xc3   :  { %1055 = vmatpush1.bf16.xpose.msra.mxu0 %v11305_v46 }
  0xc4   :  { %1096 = vmatpush1.bf16.xpose.msra.mxu1 %v11307_v47  ;;  %1056 = vmatprep.subr.bf16.mxu0 %v11309_v53  ;;  %v218_v47 = vld [vmem:[#allocation3 + $0x360] sm:$0xff]  ;;  %v339_v53 = vld [vmem:[#allocation3 + $0x728] sm:$0xff] }
  0xc5   :  { %1097 = vmatprep.subr.bf16.mxu1 %v11311_v60  ;;  %v11331_v16 = vpack.c.bf16 %v224_v39, %v218_v47  ;;  %v211_v39 = vld [vmem:[#allocation3 + $0x328] sm:$0xff]  ;;  %v210_v60 = vld [vmem:[#allocation3 + $0x320] sm:$0xff] }
  0xc6   :  { %v243_v47 = vld [vmem:[#allocation3 + $0x428] sm:$0xff] }
  0xc7   :  { %15203 = vst [vmem:[#allocation45_spill] sm:$0xff] %v11331_v16 }
  0xcb   :  { %1057 = vmatpush1.bf16.xpose.msra.mxu0 %v11317_v21  ;;  %v227_v21 = vld [vmem:[#allocation3 + $0x3a8] sm:$0xff] }
  0xcc   :  { %1098 = vmatpush1.bf16.xpose.msra.mxu1 %v11319_v22  ;;  %1134 = vmatprep.subr.bf16.mxu0 %v11321_v26  ;;  %v204_v22 = vld [vmem:[#allocation3 + $0x2f0] sm:$0xff]  ;;  %v221_v26 = vld [vmem:[#allocation3 + $0x378] sm:$0xff] }
  0xcd   :  { %1175 = vmatprep.subr.bf16.mxu1 %v11323_v34  ;;  %v11345_v0 = vpack.c.bf16 %v204_v22, %v198_v20  ;;  %v11349_v34 = vpack.c.bf16 %v217_v37, %v211_v39  ;;  %v223_v22 = vld [vmem:[#allocation3 + $0x388] sm:$0xff]  ;;  %v229_v20 = vld [vmem:[#allocation3 + $0x3b8] sm:$0xff]  ;;  %v11361_v39 = vpack.c.bf16 %v227_v21, %v221_v26 }
  0xce   :  { %v11363_v37 = vpack.c.bf16 %v229_v20, %v223_v22  ;;  %v232_v20 = vld [vmem:[#allocation3 + $0x3d0] sm:$0xff] }
  0xcf   :  { %15206 = vst [vmem:[#allocation48_spill] sm:$0xff] %v11345_v0  ;;  %15208 = vst [vmem:[#allocation50_spill] sm:$0xff] %v11349_v34 }
  0xd0   :  { %15212 = vst [vmem:[#allocation54_spill] sm:$0xff] %v11361_v39  ;;  %15213 = vst [vmem:[#allocation55_spill] sm:$0xff] %v11363_v37 }
  0xd2   :  { %1085 = vmatmul.mubr.bf16.vlgmr.msra.gmra.mrb[12].mxu0 %v11195_v51 }
  0xd3   :  { %1126 = vmatmul.mubr.bf16.vlgmr.msra.gmra.mrb[12].mxu1 %v11197_v54  ;;  %1135 = vmatpush1.bf16.xpose.msra.mxu0 %v11329_v2  ;;  %v248_v2 = vld [vmem:[#allocation3 + $0x450] sm:$0xff] }
  0xd4   :  { %1176 = vmatpush1.bf16.xpose.msra.mxu1 %v11331_v16  ;;  %1136 = vmatprep.subr.bf16.mxu0 %v11333_v63  ;;  %v11351_v16 = vpack.c.bf16 %v249_v61, %v243_v47  ;;  %v216_v63 = vld [vmem:[#allocation3 + $0x350] sm:$0xff]  ;;  %v226_v61 = vld [vmem:[#allocation3 + $0x3a0] sm:$0xff] }
  0xd5   :  { %1177 = vmatprep.subr.bf16.mxu1 %v11335_v19  ;;  %1166 = vmatprep.mubr.bf16.mxu0 %v11207_v59  ;;  %v242_v19 = vld [vmem:[#allocation3 + $0x420] sm:$0xff]  ;;  %v11357_v35 = vpack.c.bf16 %v216_v63, %v210_v60  ;;  %v220_v47 = vld [vmem:[#allocation3 + $0x370] sm:$0xff]  ;;  %v239_v60 = vld [vmem:[#allocation3 + $0x408] sm:$0xff] }
  0xd6   :  { %1207 = vmatprep.mubr.bf16.mxu1 %v11167_v28  ;;  %15209 = vst [vmem:[#allocation51_spill] sm:$0xff] %v11351_v16  ;;  %v11359_v40 = vpack.c.bf16 %v248_v2, %v242_v19  ;;  %v235_v2 = vld [vmem:[#allocation3 + $0x3e8] sm:$0xff]  ;;  %v241_v63 = vld [vmem:[#allocation3 + $0x418] sm:$0xff]  ;;  %v11369_v21 = vpack.c.bf16 %v226_v61, %v220_v47  ;;  %v234_v47 = vld [vmem:[#allocation3 + $0x3e0] sm:$0xff] }
  0xd7   :  { %15210 = vst [vmem:[#allocation52_spill] sm:$0xff] %v11357_v35  ;;  %v11375_v22 = vpack.c.bf16 %v241_v63, %v235_v2  ;;  %v240_v61 = vld [vmem:[#allocation3 + $0x410] sm:$0xff] }
  0xd8   :  { %15211 = vst [vmem:[#allocation53_spill] sm:$0xff] %v11359_v40  ;;  %15214 = vst [vmem:[#allocation56_spill] sm:$0xff] %v11369_v21 }
  0xd9   :  { %15217 = vst [vmem:[#allocation59_spill] sm:$0xff] %v11375_v22 }
  0xdb   :  { %1137 = vmatpush1.bf16.xpose.msra.mxu0 %v11345_v0  ;;  %v233_v0 = vld [vmem:[#allocation3 + $0x3d8] sm:$0xff] }
  0xdc   :  { %1178 = vmatpush1.bf16.xpose.msra.mxu1 %v11347_v62  ;;  %1138 = vmatprep.subr.bf16.mxu0 %v11349_v34  ;;  %v222_v62 = vld [vmem:[#allocation3 + $0x380] sm:$0xff]  ;;  %v228_v34 = vld [vmem:[#allocation3 + $0x3b0] sm:$0xff]  ;;  %v11373_v19 = vpack.c.bf16 %v239_v60, %v233_v0  ;;  %v251_v0 = vld [vmem:[#allocation3 + $0x468] sm:$0xff] }
  0xdd   :  { %1179 = vmatprep.subr.bf16.mxu1 %v11351_v16  ;;  %v11371_v26 = vpack.c.bf16 %v228_v34, %v222_v62  ;;  %v245_v34 = vld [vmem:[#allocation3 + $0x438] sm:$0xff]  ;;  %v247_v62 = vld [vmem:[#allocation3 + $0x448] sm:$0xff]  ;;  %v250_v16 = vld [vmem:[#allocation3 + $0x460] sm:$0xff] }
  0xde   :  { %15216 = vst [vmem:[#allocation58_spill] sm:$0xff] %v11373_v19  ;;  %v253_v60 = vld [vmem:[#allocation3 + $0x478] sm:$0xff]  ;;  %v11389_v63 = vpack.c.bf16 %v251_v0, %v245_v34  ;;  %v254_v0 = vld [vmem:[#allocation3 + $0x480] sm:$0xff] }
  0xdf   :  { %15215 = vst [vmem:[#allocation57_spill] sm:$0xff] %v11371_v26 }
  0xe0   :  { %15220 = vst [vmem:[#allocation62_spill] sm:$0xff] %v11389_v63 }
  0xe3   :  { %1139 = vmatpush1.bf16.xpose.msra.mxu0 %v11357_v35  ;;  %v333_v35 = vld [vmem:[#allocation3 + $0x6f8] sm:$0xff] }
  0xe4   :  { %1180 = vmatpush1.bf16.xpose.msra.mxu1 %v11359_v40  ;;  %1216 = vmatprep.subr.bf16.mxu0 %v11361_v39  ;;  %v238_v40 = vld [vmem:[#allocation3 + $0x400] sm:$0xff]  ;;  %v261_v39 = vld [vmem:[#allocation3 + $0x4b8] sm:$0xff] }
  0xe5   :  { %1257 = vmatprep.subr.bf16.mxu1 %v11363_v37  ;;  %v11385_v2 = vpack.c.bf16 %v238_v40, %v232_v20  ;;  %v244_v37 = vld [vmem:[#allocation3 + $0x430] sm:$0xff]  ;;  %v263_v40 = vld [vmem:[#allocation3 + $0x4c8] sm:$0xff] }
  0xe6   :  { %v11397_v20 = vpack.c.bf16 %v250_v16, %v244_v37  ;;  %v269_v16 = vld [vmem:[#allocation3 + $0x4f8] sm:$0xff]  ;;  %v275_v37 = vld [vmem:[#allocation3 + $0x528] sm:$0xff] }
  0xe7   :  { %15218 = vst [vmem:[#allocation60_spill] sm:$0xff] %v11385_v2 }
  0xe8   :  { %15222 = vst [vmem:[#allocation64_spill] sm:$0xff] %v11397_v20 }
  0xea   :  { %1167 = vmatmul.mubr.bf16.vlgmr.msra.gmra.mrb[16].mxu0 %v11247_v45 }
  0xeb   :  { %1208 = vmatmul.mubr.bf16.vlgmr.msra.gmra.mrb[16].mxu1 %v11195_v51  ;;  %1217 = vmatpush1.bf16.xpose.msra.mxu0 %v11369_v21  ;;  %v11387_v51 = vpack.c.bf16 %v240_v61, %v234_v47  ;;  %v255_v21 = vld [vmem:[#allocation3 + $0x488] sm:$0xff] }
  0xec   :  { %1258 = vmatpush1.bf16.xpose.msra.mxu1 %v11371_v26  ;;  %1218 = vmatprep.subr.bf16.mxu0 %v11373_v19  ;;  %v11391_v26 = vpack.c.bf16 %v253_v60, %v247_v62  ;;  %v252_v19 = vld [vmem:[#allocation3 + $0x470] sm:$0xff]  ;;  %v11401_v61 = vpack.c.bf16 %v261_v39, %v255_v21 }
  0xed   :  { %1259 = vmatprep.subr.bf16.mxu1 %v11375_v22  ;;  %1248 = vmatprep.mubr.bf16.mxu0 %v11173_v31  ;;  %15219 = vst [vmem:[#allocation61_spill] sm:$0xff] %v11387_v51  ;;  %v246_v22 = vld [vmem:[#allocation3 + $0x440] sm:$0xff]  ;;  %v260_v62 = vld [vmem:[#allocation3 + $0x4b0] sm:$0xff] }
  0xee   :  { %1289 = vmatprep.mubr.bf16.mxu1 %v11207_v59  ;;  %15221 = vst [vmem:[#allocation63_spill] sm:$0xff] %v11391_v26  ;;  %v257_v59 = vld [vmem:[#allocation3 + $0x498] sm:$0xff]  ;;  %v11399_v47 = vpack.c.bf16 %v252_v19, %v246_v22  ;;  %15224 = vst [vmem:[#allocation66_spill] sm:$0xff] %v11401_v61  ;;  %v256_v60 = vld [vmem:[#allocation3 + $0x490] sm:$0xff]  ;;  %v11409_v39 = vpack.c.bf16 %v260_v62, %v254_v0  ;;  %v11415_v22 = vpack.c.bf16 %v275_v37, %v269_v16 }
  0xef   :  { %v11403_v34 = vpack.c.bf16 %v263_v40, %v257_v59  ;;  %v266_v59 = vld [vmem:[#allocation3 + $0x4e0] sm:$0xff]  ;;  %v272_v40 = vld [vmem:[#allocation3 + $0x510] sm:$0xff] }
  0xf0   :  { %15223 = vst [vmem:[#allocation65_spill] sm:$0xff] %v11399_v47  ;;  %15226 = vst [vmem:[#allocation68_spill] sm:$0xff] %v11409_v39  ;;  %v268_v0 = vld [vmem:[#allocation3 + $0x4f0] sm:$0xff]  ;;  %v274_v62 = vld [vmem:[#allocation3 + $0x520] sm:$0xff] }
  0xf1   :  { %15225 = vst [vmem:[#allocation67_spill] sm:$0xff] %v11403_v34  ;;  %15229 = vst [vmem:[#allocation71_spill] sm:$0xff] %v11415_v22 }
  0xf3   :  { %1219 = vmatpush1.bf16.xpose.msra.mxu0 %v11385_v2  ;;  %v267_v2 = vld [vmem:[#allocation3 + $0x4e8] sm:$0xff] }
  0xf4   :  { %1260 = vmatpush1.bf16.xpose.msra.mxu1 %v11387_v51  ;;  %1220 = vmatprep.subr.bf16.mxu0 %v11389_v63  ;;  %v262_v51 = vld [vmem:[#allocation3 + $0x4c0] sm:$0xff]  ;;  %v273_v63 = vld [vmem:[#allocation3 + $0x518] sm:$0xff] }
  0xf5   :  { %1261 = vmatprep.subr.bf16.mxu1 %v11391_v26  ;;  %v11411_v21 = vpack.c.bf16 %v262_v51, %v256_v60  ;;  %v11413_v19 = vpack.c.bf16 %v273_v63, %v267_v2  ;;  %v279_v51 = vld [vmem:[#allocation3 + $0x548] sm:$0xff]  ;;  %v285_v2 = vld [vmem:[#allocation3 + $0x578] sm:$0xff] }
  0xf6   :  { %v281_v63 = vld [vmem:[#allocation3 + $0x558] sm:$0xff]  ;;  %v287_v60 = vld [vmem:[#allocation3 + $0x588] sm:$0xff]  ;;  %v11429_v16 = vpack.c.bf16 %v285_v2, %v279_v51  ;;  %v258_v51 = vld [vmem:[#allocation3 + $0x4a0] sm:$0xff] }
  0xf7   :  { %15227 = vst [vmem:[#allocation69_spill] sm:$0xff] %v11411_v21  ;;  %15228 = vst [vmem:[#allocation70_spill] sm:$0xff] %v11413_v19  ;;  %v11431_v37 = vpack.c.bf16 %v287_v60, %v281_v63  ;;  %v259_v26 = vld [vmem:[#allocation3 + $0x4a8] sm:$0xff]  ;;  %v264_v2 = vld [vmem:[#allocation3 + $0x4d0] sm:$0xff] }
  0xf8   :  { %15232 = vst [vmem:[#allocation74_spill] sm:$0xff] %v11429_v16  ;;  %v290_v63 = vld [vmem:[#allocation3 + $0x5a0] sm:$0xff]  ;;  %v296_v60 = vld [vmem:[#allocation3 + $0x5d0] sm:$0xff] }
  0xf9   :  { %15233 = vst [vmem:[#allocation75_spill] sm:$0xff] %v11431_v37 }
  0xfb   :  { %1221 = vmatpush1.bf16.xpose.msra.mxu0 %v11397_v20  ;;  %v327_v20 = vld [vmem:[#allocation3 + $0x6c8] sm:$0xff] }
  0xfc   :  { %1262 = vmatpush1.bf16.xpose.msra.mxu1 %v11399_v47  ;;  %1298 = vmatprep.subr.bf16.mxu0 %v11401_v61  ;;  %v286_v47 = vld [vmem:[#allocation3 + $0x580] sm:$0xff]  ;;  %v299_v61 = vld [vmem:[#allocation3 + $0x5e8] sm:$0xff] }
  0xfd   :  { %1339 = vmatprep.subr.bf16.mxu1 %v11403_v34  ;;  %v284_v34 = vld [vmem:[#allocation3 + $0x570] sm:$0xff] }
 0x102   :  { %1249 = vmatmul.mubr.bf16.vlgmr.msra.gmra.mrb[20].mxu0 %v11197_v54  ;;  %v11425_v54 = vpack.c.bf16 %v272_v40, %v266_v59 }
 0x103   :  { %1290 = vmatmul.mubr.bf16.vlgmr.msra.gmra.mrb[20].mxu1 %v11247_v45  ;;  %1299 = vmatpush1.bf16.xpose.msra.mxu0 %v11409_v39  ;;  %v11427_v45 = vpack.c.bf16 %v274_v62, %v268_v0  ;;  %v293_v39 = vld [vmem:[#allocation3 + $0x5b8] sm:$0xff] }
 0x104   :  { %1340 = vmatpush1.bf16.xpose.msra.mxu1 %v11411_v21  ;;  %1300 = vmatprep.subr.bf16.mxu0 %v11413_v19  ;;  %15230 = vst [vmem:[#allocation72_spill] sm:$0xff] %v11425_v54  ;;  %v278_v21 = vld [vmem:[#allocation3 + $0x540] sm:$0xff]  ;;  %v265_v19 = vld [vmem:[#allocation3 + $0x4d8] sm:$0xff] }
 0x105   :  { %1341 = vmatprep.subr.bf16.mxu1 %v11415_v22  ;;  %1330 = vmatprep.mubr.bf16.mxu0 %v11167_v28  ;;  %15231 = vst [vmem:[#allocation73_spill] sm:$0xff] %v11427_v45  ;;  %v280_v22 = vld [vmem:[#allocation3 + $0x550] sm:$0xff]  ;;  %v291_v28 = vld [vmem:[#allocation3 + $0x5a8] sm:$0xff]  ;;  %v11437_v59 = vpack.c.bf16 %v284_v34, %v278_v21  ;;  %v11441_v0 = vpack.c.bf16 %v265_v19, %v259_v26  ;;  %v309_v21 = vld [vmem:[#allocation3 + $0x638] sm:$0xff] }
 0x106   :  { %1371 = vmatprep.mubr.bf16.mxu1 %v11173_v31  ;;  %v297_v31 = vld [vmem:[#allocation3 + $0x5d8] sm:$0xff]  ;;  %v11439_v40 = vpack.c.bf16 %v286_v47, %v280_v22  ;;  %v303_v34 = vld [vmem:[#allocation3 + $0x608] sm:$0xff]  ;;  %v11449_v26 = vpack.c.bf16 %v264_v2, %v258_v51  ;;  %v11451_v47 = vpack.c.bf16 %v296_v60, %v290_v63 }
 0x107   :  { %15234 = vst [vmem:[#allocation76_spill] sm:$0xff] %v11437_v59  ;;  %15236 = vst [vmem:[#allocation78_spill] sm:$0xff] %v11441_v0  ;;  %v11443_v62 = vpack.c.bf16 %v297_v31, %v291_v28  ;;  %v11455_v22 = vpack.c.bf16 %v309_v21, %v303_v34  ;;  %v11457_v28 = vld [vmem:[#allocation8] ss:$24 sps:$4 sm:$0xff]   ;;  %v289_v2 = vld [vmem:[#allocation3 + $0x598] sm:$0xff] }
 0x108   :  { %15235 = vst [vmem:[#allocation77_spill] sm:$0xff] %v11439_v40  ;;  %15238 = vst [vmem:[#allocation80_spill] sm:$0xff] %v11449_v26  ;;  %v270_v31 = vld [vmem:[#allocation3 + $0x500] sm:$0xff]  ;;  %v283_v51 = vld [vmem:[#allocation3 + $0x568] sm:$0xff] }
 0x109   :  { %15237 = vst [vmem:[#allocation79_spill] sm:$0xff] %v11443_v62  ;;  %15239 = vst [vmem:[#allocation81_spill] sm:$0xff] %v11451_v47  ;;  %v315_v63 = vld [vmem:[#allocation3 + $0x668] sm:$0xff]  ;;  %v321_v60 = vld [vmem:[#allocation3 + $0x698] sm:$0xff] }
 0x10a   :  { %15241 = vst [vmem:[#allocation83_spill] sm:$0xff] %v11455_v22  ;;  %v11467_v34 = vld [vmem:[#allocation8 + $0x14] ss:$24 sps:$4 sm:$0xff]   ;;  %v11470_v21 = vld [vmem:[#allocation8 + $0x4] ss:$24 sps:$4 sm:$0xff]  }
 0x10b   :  { %1301 = vmatpush1.bf16.xpose.msra.mxu0 %v11425_v54  ;;  %v320_v54 = vld [vmem:[#allocation3 + $0x690] sm:$0xff] }
 0x10c   :  { %1342 = vmatpush1.bf16.xpose.msra.mxu1 %v11427_v45  ;;  %1302 = vmatprep.subr.bf16.mxu0 %v11429_v16  ;;  %v271_v45 = vld [vmem:[#allocation3 + $0x508] sm:$0xff]  ;;  %v277_v16 = vld [vmem:[#allocation3 + $0x538] sm:$0xff] }
 0x10d   :  { %1343 = vmatprep.subr.bf16.mxu1 %v11431_v37  ;;  %v11453_v19 = vpack.c.bf16 %v277_v16, %v271_v45  ;;  %v11460_v37 = vld [vmem:[#allocation8 + $0x8] ss:$24 sps:$4 sm:$0xff]   ;;  %v302_v45 = vld [vmem:[#allocation3 + $0x600] sm:$0xff] }
 0x10e   :  { %v308_v16 = vld [vmem:[#allocation3 + $0x630] sm:$0xff] }
 0x10f   :  { %15240 = vst [vmem:[#allocation82_spill] sm:$0xff] %v11453_v19 }
 0x113   :  { %1303 = vmatpush1.bf16.xpose.msra.mxu0 %v11437_v59  ;;  %v314_v59 = vld [vmem:[#allocation3 + $0x660] sm:$0xff] }
 0x114   :  { %1344 = vmatpush1.bf16.xpose.msra.mxu1 %v11439_v40  ;;  %1380 = vmatprep.subr.bf16.mxu0 %v11441_v0  ;;  %v276_v40 = vld [vmem:[#allocation3 + $0x530] sm:$0xff] }
 0x115   :  { %1421 = vmatprep.subr.bf16.mxu1 %v11443_v62  ;;  %v11473_v62 = vpack.c.bf16 %v276_v40, %v270_v31  ;;  %v288_v0 = vld [vmem:[#allocation3 + $0x590] sm:$0xff]  ;;  %v295_v40 = vld [vmem:[#allocation3 + $0x5c8] sm:$0xff]  ;;  %v301_v31 = vld [vmem:[#allocation3 + $0x5f8] sm:$0xff] }
 0x117   :  { %15242 = vst [vmem:[#allocation84_spill] sm:$0xff] %v11473_v62 }
 0x11a   :  { %1331 = vmatmul.mubr.bf16.vlgmr.msra.gmra.mrb[24].mxu0 %v11457_v28 }
 0x11b   :  { %1372 = vmatmul.mubr.bf16.vlgmr.msra.gmra.mrb[24].mxu1 %v11460_v37  ;;  %1381 = vmatpush1.bf16.xpose.msra.mxu0 %v11449_v26  ;;  %v11479_v26 = vpack.c.bf16 %v321_v60, %v315_v63  ;;  %v292_v63 = vld [vmem:[#allocation3 + $0x5b0] sm:$0xff]  ;;  %v298_v60 = vld [vmem:[#allocation3 + $0x5e0] sm:$0xff] }
 0x11c   :  { %1422 = vmatpush1.bf16.xpose.msra.mxu1 %v11451_v47  ;;  %1382 = vmatprep.subr.bf16.mxu0 %v11453_v19  ;;  %v11475_v47 = vpack.c.bf16 %v308_v16, %v302_v45  ;;  %v11477_v19 = vpack.c.bf16 %v289_v2, %v283_v51  ;;  %v11487_v16 = vpack.c.bf16 %v320_v54, %v314_v59  ;;  %v307_v54 = vld [vmem:[#allocation3 + $0x628] sm:$0xff]  ;;  %v313_v59 = vld [vmem:[#allocation3 + $0x658] sm:$0xff] }
 0x11d   :  { %1423 = vmatprep.subr.bf16.mxu1 %v11455_v22  ;;  %1412 = vmatprep.mubr.bf16.mxu0 %v11467_v34  ;;  %15245 = vst [vmem:[#allocation87_spill] sm:$0xff] %v11479_v26  ;;  %v282_v22 = vld [vmem:[#allocation3 + $0x560] sm:$0xff]  ;;  %v11489_v51 = vpack.c.bf16 %v299_v61, %v293_v39  ;;  %v11491_v2 = vpack.c.bf16 %v301_v31, %v295_v40  ;;  %v11505_v31 = vld [vmem:[#allocation8 + $0x10] ss:$24 sps:$4 sm:$0xff]  }
 0x11e   :  { %1453 = vmatprep.mubr.bf16.mxu1 %v11470_v21  ;;  %15243 = vst [vmem:[#allocation85_spill] sm:$0xff] %v11475_v47  ;;  %15244 = vst [vmem:[#allocation86_spill] sm:$0xff] %v11477_v19  ;;  %v11485_v45 = vpack.c.bf16 %v288_v0, %v282_v22  ;;  %v311_v0 = vld [vmem:[#allocation3 + $0x648] sm:$0xff]  ;;  %v11497_v61 = vpack.c.bf16 %v298_v60, %v292_v63  ;;  %v11503_v40 = vpack.c.bf16 %v313_v59, %v307_v54  ;;  %v11513_v54 = vld [vmem:[#allocation8 + $0xc] ss:$24 sps:$4 sm:$0xff]  }
 0x11f   :  { %15247 = vst [vmem:[#allocation89_spill] sm:$0xff] %v11487_v16  ;;  %15248 = vst [vmem:[#allocation90_spill] sm:$0xff] %v11489_v51  ;;  %v323_v63 = vld [vmem:[#allocation3 + $0x6a8] sm:$0xff] }
 0x120   :  { %15246 = vst [vmem:[#allocation88_spill] sm:$0xff] %v11485_v45  ;;  %15249 = vst [vmem:[#allocation91_spill] sm:$0xff] %v11491_v2  ;;  %v319_v60 = vld [vmem:[#allocation3 + $0x688] sm:$0xff] }
 0x121   :  { %15250 = vst [vmem:[#allocation92_spill] sm:$0xff] %v11497_v61  ;;  %15253 = vst [vmem:[#allocation95_spill] sm:$0xff] %v11503_v40 }
 0x123   :  { %1383 = vmatpush1.bf16.xpose.msra.mxu0 %v11473_v62  ;;  %v305_v62 = vld [vmem:[#allocation3 + $0x618] sm:$0xff] }
 0x124   :  { %1424 = vmatpush1.bf16.xpose.msra.mxu1 %v11475_v47  ;;  %1384 = vmatprep.subr.bf16.mxu0 %v11477_v19  ;;  %v294_v47 = vld [vmem:[#allocation3 + $0x5c0] sm:$0xff]  ;;  %v300_v19 = vld [vmem:[#allocation3 + $0x5f0] sm:$0xff]  ;;  %v11501_v22 = vpack.c.bf16 %v311_v0, %v305_v62  ;;  %v317_v62 = vld [vmem:[#allocation3 + $0x678] sm:$0xff] }
 0x125   :  { %1425 = vmatprep.subr.bf16.mxu1 %v11479_v26  ;;  %v11499_v39 = vpack.c.bf16 %v300_v19, %v294_v47  ;;  %v310_v26 = vld [vmem:[#allocation3 + $0x640] sm:$0xff]  ;;  %v312_v19 = vld [vmem:[#allocation3 + $0x650] sm:$0xff]  ;;  %v325_v0 = vld [vmem:[#allocation3 + $0x6b8] sm:$0xff] }
 0x126   :  { %15252 = vst [vmem:[#allocation94_spill] sm:$0xff] %v11501_v22  ;;  %v306_v47 = vld [vmem:[#allocation3 + $0x620] sm:$0xff] }
 0x127   :  { %15251 = vst [vmem:[#allocation93_spill] sm:$0xff] %v11499_v39 }
 0x12b   :  { %1385 = vmatpush1.bf16.xpose.msra.mxu0 %v11485_v45  ;;  %v324_v45 = vld [vmem:[#allocation3 + $0x6b0] sm:$0xff] }
 0x12c   :  { %1426 = vmatpush1.bf16.xpose.msra.mxu1 %v11487_v16  ;;  %1462 = vmatprep.subr.bf16.mxu0 %v11489_v51  ;;  %v304_v16 = vld [vmem:[#allocation3 + $0x610] sm:$0xff]  ;;  %v322_v51 = vld [vmem:[#allocation3 + $0x6a0] sm:$0xff] }
 0x12d   :  { %1503 = vmatprep.subr.bf16.mxu1 %v11491_v2  ;;  %v11517_v59 = vpack.c.bf16 %v310_v26, %v304_v16  ;;  %v11519_v2 = vpack.c.bf16 %v312_v19, %v306_v47  ;;  %v329_v26 = vld [vmem:[#allocation3 + $0x6d8] sm:$0xff]  ;;  %v335_v16 = vld [vmem:[#allocation3 + $0x708] sm:$0xff] }
 0x12f   :  { %15254 = vst [vmem:[#allocation96_spill] sm:$0xff] %v11517_v59  ;;  %15255 = vst [vmem:[#allocation97_spill] sm:$0xff] %v11519_v2 }
 0x132   :  { %1413 = vmatmul.mubr.bf16.vlgmr.msra.gmra.mrb[28].mxu0 %v11505_v31 }
 0x133   :  { %1454 = vmatmul.mubr.bf16.vlgmr.msra.gmra.mrb[28].mxu1 %v11457_v28  ;;  %1463 = vmatpush1.bf16.xpose.msra.mxu0 %v11497_v61  ;;  %v316_v61 = vld [vmem:[#allocation3 + $0x670] sm:$0xff] }
 0x134   :  { %1504 = vmatpush1.bf16.xpose.msra.mxu1 %v11499_v39  ;;  %1464 = vmatprep.subr.bf16.mxu0 %v11501_v22  ;;  %v11521_v39 = vpack.c.bf16 %v323_v63, %v317_v62  ;;  %v11523_v22 = vpack.c.bf16 %v325_v0, %v319_v60  ;;  %v11529_v47 = vpack.c.bf16 %v322_v51, %v316_v61  ;;  %v326_v60 = vld [vmem:[#allocation3 + $0x6c0] sm:$0xff]  ;;  %v332_v0 = vld [vmem:[#allocation3 + $0x6f0] sm:$0xff]  ;;  %v341_v51 = vld [vmem:[#allocation3 + $0x738] sm:$0xff] }
 0x135   :  { %1505 = vmatprep.subr.bf16.mxu1 %v11503_v40  ;;  %1494 = vmatprep.mubr.bf16.mxu0 %v11513_v54  ;;  %v318_v40 = vld [vmem:[#allocation3 + $0x680] sm:$0xff]  ;;  %v11533_v62 = vpack.c.bf16 %v333_v35, %v327_v20  ;;  %v11535_v63 = vpack.c.bf16 %v335_v16, %v329_v26  ;;  %v347_v61 = vld [vmem:[#allocation3 + $0x768] sm:$0xff]  ;;  %v11541_v35 = vpack.c.bf16 %v332_v0, %v326_v60  ;;  %v344_v16 = vld [vmem:[#allocation3 + $0x750] sm:$0xff] }
 0x136   :  { %1535 = vmatprep.mubr.bf16.mxu1 %v11467_v34  ;;  %15256 = vst [vmem:[#allocation98_spill] sm:$0xff] %v11521_v39  ;;  %15257 = vst [vmem:[#allocation99_spill] sm:$0xff] %v11523_v22  ;;  %v11531_v19 = vpack.c.bf16 %v324_v45, %v318_v40  ;;  %v11547_v40 = vpack.c.bf16 %v347_v61, %v341_v51  ;;  %v338_v26 = vld [vmem:[#allocation3 + $0x720] sm:$0xff]  ;;  %v340_v60 = vld [vmem:[#allocation3 + $0x730] sm:$0xff] }
 0x137   :  { %15258 = vst [vmem:[#allocation100_spill] sm:$0xff] %v11529_v47  ;;  %15260 = vst [vmem:[#allocation102_spill] sm:$0xff] %v11533_v62  ;;  %v359_v0 = vld [vmem:[#allocation3 + $0x7c8] sm:$0xff]  ;;  %v11557_v51 = vpack.c.bf16 %v344_v16, %v338_v26  ;;  %v337_v16 = vld [vmem:[#allocation3 + $0x718] sm:$0xff] }
 0x138   :  { %15259 = vst [vmem:[#allocation101_spill] sm:$0xff] %v11531_v19  ;;  %15261 = vst [vmem:[#allocation103_spill] sm:$0xff] %v11535_v63  ;;  %v331_v26 = vld [vmem:[#allocation3 + $0x6e8] sm:$0xff] }
 0x139   :  { %15262 = vst [vmem:[#allocation104_spill] sm:$0xff] %v11541_v35  ;;  %15265 = vst [vmem:[#allocation107_spill] sm:$0xff] %v11547_v40 }
 0x13a   :  { %15266 = vst [vmem:[#allocation108_spill] sm:$0xff] %v11557_v51 }
 0x13b   :  { %1465 = vmatpush1.bf16.xpose.msra.mxu0 %v11517_v59  ;;  %v328_v59 = vld [vmem:[#allocation3 + $0x6d0] sm:$0xff] }
 0x13c   :  { %1506 = vmatpush1.bf16.xpose.msra.mxu1 %v11519_v2  ;;  %1466 = vmatprep.subr.bf16.mxu0 %v11521_v39  ;;  %v334_v2 = vld [vmem:[#allocation3 + $0x700] sm:$0xff]  ;;  %v345_v39 = vld [vmem:[#allocation3 + $0x758] sm:$0xff] }
 0x13d   :  { %1507 = vmatprep.subr.bf16.mxu1 %v11523_v22  ;;  %v11543_v20 = vpack.c.bf16 %v334_v2, %v328_v59  ;;  %v11545_v45 = vpack.c.bf16 %v345_v39, %v339_v53  ;;  %v346_v2 = vld [vmem:[#allocation3 + $0x760] sm:$0xff]  ;;  %v351_v53 = vld [vmem:[#allocation3 + $0x788] sm:$0xff]  ;;  %v357_v39 = vld [vmem:[#allocation3 + $0x7b8] sm:$0xff] }
 0x13e   :  { %v353_v59 = vld [vmem:[#allocation3 + $0x798] sm:$0xff]  ;;  %v11559_v61 = vpack.c.bf16 %v346_v2, %v340_v60  ;;  %v352_v22 = vld [vmem:[#allocation3 + $0x790] sm:$0xff]  ;;  %v363_v60 = vld [vmem:[#allocation3 + $0x7e8] sm:$0xff] }
 0x13f   :  { %15263 = vst [vmem:[#allocation105_spill] sm:$0xff] %v11543_v20  ;;  %15264 = vst [vmem:[#allocation106_spill] sm:$0xff] %v11545_v45  ;;  %v369_v2 = vld [vmem:[#allocation3 + $0x818] sm:$0xff] }
 0x140   :  { %15267 = vst [vmem:[#allocation109_spill] sm:$0xff] %v11559_v61 }
 0x143   :  { %1467 = vmatpush1.bf16.xpose.msra.mxu0 %v11529_v47 }
 0x144   :  { %1508 = vmatpush1.bf16.xpose.msra.mxu1 %v11531_v19  ;;  %1544 = vmatprep.subr.bf16.mxu0 %v11533_v62  ;;  %v356_v19 = vld [vmem:[#allocation3 + $0x7b0] sm:$0xff] }
 0x145   :  { %1585 = vmatprep.subr.bf16.mxu1 %v11535_v63  ;;  %v11563_v63 = vpack.c.bf16 %v359_v0, %v353_v59  ;;  %v11575_v0 = vpack.c.bf16 %v337_v16, %v331_v26 }
 0x147   :  { %15269 = vst [vmem:[#allocation111_spill] sm:$0xff] %v11563_v63  ;;  %15272 = vst [vmem:[#allocation114_spill] sm:$0xff] %v11575_v0 }
 0x14a   :  { %1495 = vmatmul.mubr.bf16.vlgmr.msra.gmra.mrb[32].mxu0 %v11460_v37 }
 0x14b   :  { %1536 = vmatmul.mubr.bf16.vlgmr.msra.gmra.mrb[32].mxu1 %v11505_v31  ;;  %1545 = vmatpush1.bf16.xpose.msra.mxu0 %v11541_v35 }
 0x14c   :  { %1586 = vmatpush1.bf16.xpose.msra.mxu1 %v11543_v20  ;;  %1546 = vmatprep.subr.bf16.mxu0 %v11545_v45  ;;  %v11561_v20 = vpack.c.bf16 %v357_v39, %v351_v53  ;;  %v358_v45 = vld [vmem:[#allocation3 + $0x7c0] sm:$0xff]  ;;  %v11569_v53 = vpop.permute.xlu0 %768 }
 0x14d   :  { %1587 = vmatprep.subr.bf16.mxu1 %v11547_v40  ;;  %1576 = vmatprep.mubr.bf16.mxu0 %v11470_v21  ;;  %v350_v40 = vld [vmem:[#allocation3 + $0x780] sm:$0xff]  ;;  %v11573_v59 = vpack.c.bf16 %v358_v45, %v352_v22  ;;  %v368_v22 = vld [vmem:[#allocation3 + $0x810] sm:$0xff]  ;;  %v349_v45 = vld [vmem:[#allocation3 + $0x778] sm:$0xff] }
 0x14e   :  { %1617 = vmatprep.mubr.bf16.mxu1 %v11513_v54  ;;  %15268 = vst [vmem:[#allocation110_spill] sm:$0xff] %v11561_v20  ;;  %v11571_v39 = vpack.c.bf16 %v356_v19, %v350_v40  ;;  %v343_v19 = vld [vmem:[#allocation3 + $0x748] sm:$0xff] }
 0x14f   :  { %15271 = vst [vmem:[#allocation113_spill] sm:$0xff] %v11573_v59 }
 0x150   :  { %15270 = vst [vmem:[#allocation112_spill] sm:$0xff] %v11571_v39  ;;  %v11582_v62 = vpop.permute.xlu0 %773 }
 0x153   :  { %1547 = vmatpush1.bf16.xpose.msra.mxu0 %v11557_v51  ;;  %v362_v51 = vld [vmem:[#allocation3 + $0x7e0] sm:$0xff] }
 0x154   :  { %1588 = vmatpush1.bf16.xpose.msra.mxu1 %v11559_v61  ;;  %1548 = vmatprep.subr.bf16.mxu0 %v11561_v20  ;;  %v11577_v61 = vpack.c.bf16 %v369_v2, %v363_v60  ;;  %v336_v20 = vld [vmem:[#allocation3 + $0x710] sm:$0xff]  ;;  %v375_v60 = vld [vmem:[#allocation3 + $0x848] sm:$0xff]  ;;  %v381_v2 = vld [vmem:[#allocation3 + $0x878] sm:$0xff]  ;;  %v11589_v12 = vpack.c.bf16 %v368_v22, %v362_v51 }
 0x155   :  { %1589 = vmatprep.subr.bf16.mxu1 %v11563_v63  ;;  %v330_v63 = vld [vmem:[#allocation3 + $0x6e0] sm:$0xff]  ;;  %v11593_v1 = vpack.c.bf16 %v381_v2, %v375_v60  ;;  %v380_v51 = vld [vmem:[#allocation3 + $0x870] sm:$0xff]  ;;  %v365_v2 = vld [vmem:[#allocation3 + $0x7f8] sm:$0xff] }
 0x156   :  { %15273 = vst [vmem:[#allocation115_spill] sm:$0xff] %v11577_v61  ;;  %15275 = vst [vmem:[#allocation117_spill] sm:$0xff] %v11589_v12  ;;  %v392_v60 = vld [vmem:[#allocation3 + $0x8d0] sm:$0xff] }
 0x157   :  { %15277 = vst [vmem:[#allocation119_spill] sm:$0xff] %v11593_v1 }
 0x15b   :  { %1549 = vmatpush1.bf16.xpose.msra.mxu0 %v11571_v39 }
 0x15c   :  { %1590 = vmatpush1.bf16.xpose.msra.mxu1 %v11573_v59  ;;  %1626 = vmatprep.subr.bf16.mxu0 %v11575_v0  ;;  %v11586_v0 = vpack.c.bf16 %v336_v20, %v330_v63  ;;  %v348_v63 = vld [vmem:[#allocation3 + $0x770] sm:$0xff]  ;;  %v374_v20 = vld [vmem:[#allocation3 + $0x840] sm:$0xff] }
 0x15d   :  { %v840_v35 = vpop.f32.mrb[0].mxu0  ;;  %1667 = vmatprep.subr.bf16.mxu1 %v11577_v61  ;;  %v11591_v61 = vpack.c.bf16 %v349_v45, %v343_v19  ;;  %v11605_v22 = vpack.c.bf16 %v380_v51, %v374_v20  ;;  %v373_v20 = vld [vmem:[#allocation3 + $0x838] sm:$0xff] }
 0x15e   :  { %v841_v40 = vadd.f32 %v840_v35, %v11569_v53  ;;  %v881_v26 = vpop.f32.mrb[0].mxu1  ;;  %v842_v16 = vpop.f32.mrb[1].mxu0  ;;  %15274 = vst [vmem:[#allocation116_spill] sm:$0xff] %v11586_v0 }
 0x15f   :  { %v883_v59 = vpop.f32.mrb[1].mxu1  ;;  %v843_v39 = vpop.f32.mrb[2].mxu0  ;;  %15276 = vst [vmem:[#allocation118_spill] sm:$0xff] %v11591_v61  ;;  %15279 = vst [vmem:[#allocation121_spill] sm:$0xff] %v11605_v22  ;;  %v386_v16 = vld [vmem:[#allocation3 + $0x8a0] sm:$0xff] }
 0x160   :  { %v844_v47 = vadd.f32 %v843_v39, %v11582_v62  ;;  %v884_v15 = vpop.f32.mrb[2].mxu1  ;;  %v845_v46 = vpop.f32.mrb[3].mxu0  ;;  %v882_v3 = vadd.f32 %v881_v26, %v841_v40  ;;  %v361_v39 = vld [vmem:[#allocation3 + $0x7d8] sm:$0xff]  ;;  %v387_v59 = vld [vmem:[#allocation3 + $0x8a8] sm:$0xff]  ;;  %v354_v40 = vld [vmem:[#allocation3 + $0x7a0] sm:$0xff] }
 0x161   :  { %v886_v52 = vpop.f32.mrb[3].mxu1  ;;  %v342_v46 = vld [vmem:[#allocation3 + $0x740] sm:$0xff]  ;;  %v360_v26 = vld [vmem:[#allocation3 + $0x7d0] sm:$0xff] }
 0x162   :  { %1577 = vmatmul.mubr.bf16.vlgmr.msra.gmra.mrb[36].mxu0 %v11457_v28  ;;  %v885_v35 = vadd.f32 %v884_v15, %v844_v47  ;;  %v355_v52 = vld [vmem:[#allocation3 + $0x7a8] sm:$0xff]  ;;  %v393_v15 = vld [vmem:[#allocation3 + $0x8d8] sm:$0xff]  ;;  %v11603_v47 = vpack.c.bf16 %v348_v63, %v342_v46  ;;  %v11615_v51 = vpack.c.bf16 %v360_v26, %v354_v40  ;;  %v372_v40 = vld [vmem:[#allocation3 + $0x830] sm:$0xff] }
 0x163   :  { %1618 = vmatmul.mubr.bf16.vlgmr.msra.gmra.mrb[36].mxu1 %v11460_v37  ;;  %1627 = vmatpush1.bf16.xpose.msra.mxu0 %v11586_v0  ;;  %v11607_v19 = vpack.c.bf16 %v361_v39, %v355_v52  ;;  %v11609_v45 = vpack.c.bf16 %v393_v15, %v387_v59  ;;  %v371_v46 = vld [vmem:[#allocation3 + $0x828] sm:$0xff]  ;;  %v11617_v52 = vpack.c.bf16 %v392_v60, %v386_v16  ;;  %v364_v15 = vld [vmem:[#allocation3 + $0x7f0] sm:$0xff]  ;;  %v9116_v26 = vld [vmem:[#allocation6] ss:$0 sm:$0xff] }
 0x164   :  { %1668 = vmatpush1.bf16.xpose.msra.mxu1 %v11589_v12  ;;  %1628 = vmatprep.subr.bf16.mxu0 %v11591_v61  ;;  %15278 = vst [vmem:[#allocation120_spill] sm:$0xff] %v11603_v47  ;;  %v367_v63 = vld [vmem:[#allocation3 + $0x808] sm:$0xff]  ;;  %15282 = vst [vmem:[#allocation124_spill] sm:$0xff] %v11615_v51  ;;  %v11619_v39 = vpack.c.bf16 %v371_v46, %v365_v2  ;;  %v377_v16 = vld [vmem:[#allocation3 + $0x858] sm:$0xff] }
 0x165   :  { %1669 = vmatprep.subr.bf16.mxu1 %v11593_v1  ;;  %1658 = vmatprep.mubr.bf16.mxu0 %v11467_v34  ;;  %15280 = vst [vmem:[#allocation122_spill] sm:$0xff] %v11607_v19  ;;  %15281 = vst [vmem:[#allocation123_spill] sm:$0xff] %v11609_v45  ;;  %v11621_v59 = vpack.c.bf16 %v373_v20, %v367_v63  ;;  %v383_v63 = vld [vmem:[#allocation3 + $0x888] sm:$0xff]  ;;  %v385_v12 = vld [vmem:[#allocation3 + $0x898] sm:$0xff] }
 0x166   :  { %1699 = vmatprep.mubr.bf16.mxu1 %v11470_v21  ;;  %15283 = vst [vmem:[#allocation125_spill] sm:$0xff] %v11617_v52  ;;  %15284 = vst [vmem:[#allocation126_spill] sm:$0xff] %v11619_v39  ;;  %v379_v20 = vld [vmem:[#allocation3 + $0x868] sm:$0xff] }
 0x167   :  { %15285 = vst [vmem:[#allocation127_spill] sm:$0xff] %v11621_v59 }
 0x16b   :  { %1629 = vmatpush1.bf16.xpose.msra.mxu0 %v11603_v47 }
 0x16c   :  { %1670 = vmatpush1.bf16.xpose.msra.mxu1 %v11605_v22  ;;  %1630 = vmatprep.subr.bf16.mxu0 %v11607_v19  ;;  %v366_v22 = vld [vmem:[#allocation3 + $0x800] sm:$0xff] }
 0x16d   :  { %1671 = vmatprep.subr.bf16.mxu1 %v11609_v45  ;;  %v370_v45 = vld [vmem:[#allocation3 + $0x820] sm:$0xff]  ;;  %v11631_v0 = vpack.c.bf16 %v372_v40, %v366_v22  ;;  %v397_v40 = vld [vmem:[#allocation3 + $0x8f8] sm:$0xff] }
 0x16e   :  { %v378_v22 = vld [vmem:[#allocation3 + $0x860] sm:$0xff] }
 0x16f   :  { %15287 = vst [vmem:[#allocation129_spill] sm:$0xff] %v11631_v0 }
 0x173   :  { %1631 = vmatpush1.bf16.xpose.msra.mxu0 %v11615_v51 }
 0x174   :  { %1672 = vmatpush1.bf16.xpose.msra.mxu1 %v11617_v52  ;;  %1708 = vmatprep.subr.bf16.mxu0 %v11619_v39  ;;  %v11627_v52 = vpack.c.bf16 %v370_v45, %v364_v15  ;;  %v391_v15 = vld [vmem:[#allocation3 + $0x8c8] sm:$0xff] }
 0x175   :  { %v922_v1 = vpop.f32.mrb[4].mxu0  ;;  %1749 = vmatprep.subr.bf16.mxu1 %v11621_v59 }
 0x176   :  { %v923_v60 = vadd.f32 %v922_v1, %v882_v3  ;;  %v963_v2 = vpop.f32.mrb[4].mxu1  ;;  %v924_v46 = vpop.f32.mrb[5].mxu0  ;;  %15286 = vst [vmem:[#allocation128_spill] sm:$0xff] %v11627_v52  ;;  %v11635_v1 = vpack.c.bf16 %v383_v63, %v377_v16  ;;  %v11637_v3 = vpack.c.bf16 %v385_v12, %v379_v20  ;;  %v384_v12 = vld [vmem:[#allocation3 + $0x890] sm:$0xff]  ;;  %v394_v20 = vld [vmem:[#allocation3 + $0x8e0] sm:$0xff] }
 0x177   :  { %v965_v51 = vpop.f32.mrb[5].mxu1  ;;  %v925_v19 = vpop.f32.mrb[6].mxu0  ;;  %v11655_v16 = vpack.c.bf16 %v384_v12, %v378_v22  ;;  %v11659_v46 = vpack.c.bf16 %v397_v40, %v391_v15  ;;  %v388_v63 = vld [vmem:[#allocation3 + $0x8b0] sm:$0xff]  ;;  %v401_v22 = vld [vmem:[#allocation3 + $0x918] sm:$0xff]  ;;  %v407_v12 = vld [vmem:[#allocation3 + $0x948] sm:$0xff] }
 0x178   :  { %v926_v39 = vadd.f32 %v925_v19, %v885_v35  ;;  %v11629_v47 = vpop.f32.mrb[6].mxu1  ;;  %v927_v61 = vpop.f32.mrb[7].mxu0  ;;  %v11633_v59 = vadd.f32 %v9116_v26, %v923_v60  ;;  %15288 = vst [vmem:[#allocation130_spill] sm:$0xff] %v11635_v1  ;;  %15289 = vst [vmem:[#allocation131_spill] sm:$0xff] %v11637_v3  ;;  %v389_v19 = vld [vmem:[#allocation3 + $0x8b8] sm:$0xff]  ;;  %v395_v51 = vld [vmem:[#allocation3 + $0x8e8] sm:$0xff]  ;;  %v11671_v40 = vpack.c.bf16 %v407_v12, %v401_v22 }
 0x179   :  { %v968_v49 = vpop.f32.mrb[7].mxu1  ;;  %v376_v61 = vld [vmem:[#allocation3 + $0x850] sm:$0xff]  ;;  %15291 = vst [vmem:[#allocation133_spill] sm:$0xff] %v11655_v16  ;;  %v11657_v60 = vpack.c.bf16 %v395_v51, %v389_v19  ;;  %15293 = vst [vmem:[#allocation135_spill] sm:$0xff] %v11659_v46  ;;  %v11665_v19 = vpack.c.bf16 %v394_v20, %v388_v63  ;;  %v406_v63 = vld [vmem:[#allocation3 + $0x940] sm:$0xff]  ;;  %v967_v22 = vadd.f32 %v11629_v47, %v11582_v62 }
 0x17a   :  { %1659 = vmatmul.mubr.bf16.vlgmr.msra.gmra.mrb[40].mxu0 %v11505_v31  ;;  %v2391_v45 = vsel %vm2390_vm0, %v11633_v59, -inf  ;;  %v11644_v35 = vadd.f32 %v9116_v26, %v926_v39  ;;  %v382_v49 = vld [vmem:[#allocation3 + $0x880] sm:$0xff]  ;;  %15297 = vst [vmem:[#allocation139_spill] sm:$0xff] %v11671_v40  ;;  %v411_v20 = vld [vmem:[#allocation3 + $0x968] sm:$0xff]  ;;  %v413_v12 = vld [vmem:[#allocation3 + $0x978] sm:$0xff] }
 0x17b   :  { %1700 = vmatmul.mubr.bf16.vlgmr.msra.gmra.mrb[40].mxu1 %v11457_v28  ;;  %1709 = vmatpush1.bf16.xpose.msra.mxu0 %v11627_v52  ;;  %v11653_v26 = vpack.c.bf16 %v382_v49, %v376_v61  ;;  %15292 = vst [vmem:[#allocation134_spill] sm:$0xff] %v11657_v60  ;;  %v396_v61 = vld [vmem:[#allocation3 + $0x8f0] sm:$0xff]  ;;  %v399_v49 = vld [vmem:[#allocation3 + $0x908] sm:$0xff]  ;;  %15294 = vst [vmem:[#allocation136_spill] sm:$0xff] %v11665_v19 }
 0x17c   :  { %1750 = vmatpush1.bf16.xpose.msra.mxu1 %v11631_v0  ;;  %2392 = vmax.xlane.f32.xlu1 %v2391_v45  ;;  %v2394_v39 = vsel %vm2390_vm0, %v11644_v35, -inf  ;;  %v390_v45 = vld [vmem:[#allocation3 + $0x8c0] sm:$0xff]  ;;  %v400_v0 = vld [vmem:[#allocation3 + $0x910] sm:$0xff] }
 0x17d   :  { %1710 = vmatprep.subr.bf16.mxu0 %v11635_v1  ;;  %1751 = vmatprep.subr.bf16.mxu1 %v11637_v3  ;;  %15290 = vst [vmem:[#allocation132_spill] sm:$0xff] %v11653_v26  ;;  %v11667_v51 = vpack.c.bf16 %v396_v61, %v390_v45  ;;  %v404_v3 = vld [vmem:[#allocation3 + $0x930] sm:$0xff]  ;;  %v417_v45 = vld [vmem:[#allocation3 + $0x998] sm:$0xff]  ;;  %v11682_v36 = vpack.c.bf16 %v406_v63, %v400_v0 }
 0x17e   :  { %1740 = vmatprep.mubr.bf16.mxu0 %v11513_v54  ;;  %1781 = vmatprep.mubr.bf16.mxu1 %v11467_v34  ;;  %v11684_v14 = vpack.c.bf16 %v417_v45, %v411_v20  ;;  %v425_v63 = vld [vmem:[#allocation3 + $0x9d8] sm:$0xff]  ;;  %v431_v20 = vld [vmem:[#allocation3 + $0xa08] sm:$0xff] }
 0x17f   :  { %15295 = vst [vmem:[#allocation137_spill] sm:$0xff] %v11667_v51  ;;  %15299 = vst [vmem:[#allocation141_spill] sm:$0xff] %v11682_v36 }
 0x180   :  { %2395 = vmax.xlane.f32.xlu1 %v2394_v39  ;;  %v405_v39 = vld [vmem:[#allocation3 + $0x938] sm:$0xff]  ;;  %15300 = vst [vmem:[#allocation142_spill] sm:$0xff] %v11684_v14 }
 0x181   :  { %v11669_v15 = vpack.c.bf16 %v405_v39, %v399_v49 }
 0x183   :  { %1711 = vmatpush1.bf16.xpose.msra.mxu0 %v11653_v26  ;;  %15296 = vst [vmem:[#allocation138_spill] sm:$0xff] %v11669_v15  ;;  %v9117_v26 = vld [vmem:[#allocation6 + $0x1] ss:$0 sm:$0xff] }
 0x184   :  { %1752 = vmatpush1.bf16.xpose.msra.mxu1 %v11655_v16  ;;  %1712 = vmatprep.subr.bf16.mxu0 %v11657_v60  ;;  %v964_v16 = vadd.f32 %v963_v2, %v11569_v53 }
 0x185   :  { %1753 = vmatprep.subr.bf16.mxu1 %v11659_v46  ;;  %v398_v46 = vld [vmem:[#allocation3 + $0x900] sm:$0xff] }
 0x18b   :  { %1713 = vmatpush1.bf16.xpose.msra.mxu0 %v11665_v19 }
 0x18c   :  { %1754 = vmatpush1.bf16.xpose.msra.mxu1 %v11667_v51  ;;  %1790 = vmatprep.subr.bf16.mxu0 %v11669_v15  ;;  %v419_v51 = vld [vmem:[#allocation3 + $0x9a8] sm:$0xff]  ;;  %v11680_v15 = vpack.c.bf16 %v404_v3, %v398_v46  ;;  %v410_v46 = vld [vmem:[#allocation3 + $0x960] sm:$0xff] }
 0x18d   :  { %v1004_v60 = vpop.f32.mrb[8].mxu0  ;;  %1831 = vmatprep.subr.bf16.mxu1 %v11671_v40 }
 0x18e   :  { %v1005_v61 = vadd.f32 %v1004_v60, %v964_v16  ;;  %v1045_v49 = vpop.f32.mrb[8].mxu1  ;;  %v1006_v39 = vpop.f32.mrb[9].mxu0  ;;  %15298 = vst [vmem:[#allocation140_spill] sm:$0xff] %v11680_v15  ;;  %v11686_v60 = vpack.c.bf16 %v419_v51, %v413_v12  ;;  %v429_v51 = vld [vmem:[#allocation3 + $0x9f8] sm:$0xff]  ;;  %v428_v12 = vld [vmem:[#allocation3 + $0x9f0] sm:$0xff] }
 0x18f   :  { %v1047_v2 = vpop.f32.mrb[9].mxu1  ;;  %v1007_v19 = vpop.f32.mrb[10].mxu0 }
 0x190   :  { %v1046_v1 = vadd.f32 %v1045_v49, %v1005_v61  ;;  %v1008_v52 = vadd.f32 %v1007_v19, %v967_v22  ;;  %v1048_v38 = vpop.f32.mrb[10].mxu1  ;;  %v1009_v40 = vpop.f32.mrb[11].mxu0  ;;  %15301 = vst [vmem:[#allocation143_spill] sm:$0xff] %v11686_v60  ;;  %v416_v19 = vld [vmem:[#allocation3 + $0x990] sm:$0xff]  ;;  %v11710_v49 = vpack.c.bf16 %v431_v20, %v425_v63  ;;  %v422_v22 = vld [vmem:[#allocation3 + $0x9c0] sm:$0xff] }
 0x191   :  { %v1050_v16 = vpop.f32.mrb[11].mxu1  ;;  %v424_v2 = vld [vmem:[#allocation3 + $0x9d0] sm:$0xff]  ;;  %v434_v20 = vld [vmem:[#allocation3 + $0xa20] sm:$0xff] }
 0x192   :  { %v1049_v39 = vadd.f32 %v1048_v38, %v1008_v52  ;;  %1741 = vmatmul.mubr.bf16.vlgmr.msra.gmra.mrb[44].mxu0 %v11460_v37  ;;  %v11689_v47 = vadd.f32 %v9117_v26, %v1046_v1  ;;  %v412_v38 = vld [vmem:[#allocation3 + $0x970] sm:$0xff]  ;;  %v418_v52 = vld [vmem:[#allocation3 + $0x9a0] sm:$0xff]  ;;  %v423_v1 = vld [vmem:[#allocation3 + $0x9c8] sm:$0xff]  ;;  %15305 = vst [vmem:[#allocation147_spill] sm:$0xff] %v11710_v49 }
 0x193   :  { %1782 = vmatmul.mubr.bf16.vlgmr.msra.gmra.mrb[44].mxu1 %v11505_v31  ;;  %1791 = vmatpush1.bf16.xpose.msra.mxu0 %v11680_v15  ;;  %v11706_v45 = vpack.c.bf16 %v418_v52, %v412_v38  ;;  %v11708_v61 = vpack.c.bf16 %v429_v51, %v423_v1  ;;  %v430_v16 = vld [vmem:[#allocation3 + $0xa00] sm:$0xff]  ;;  %v11716_v38 = vpack.c.bf16 %v428_v12, %v422_v22  ;;  %v408_v63 = vld [vmem:[#allocation3 + $0x950] sm:$0xff]  ;;  %v415_v12 = vld [vmem:[#allocation3 + $0x988] sm:$0xff] }
 0x194   :  { %1832 = vmatpush1.bf16.xpose.msra.mxu1 %v11682_v36  ;;  %v2397_v0 = vsel %vm2390_vm0, %v11689_v47, -inf  ;;  %v11696_v3 = vadd.f32 %v9117_v26, %v1049_v39  ;;  %1792 = vmatprep.subr.bf16.mxu0 %v11684_v14  ;;  %v11704_v26 = vpack.c.bf16 %v416_v19, %v410_v46  ;;  %v403_v39 = vld [vmem:[#allocation3 + $0x928] sm:$0xff]  ;;  %v441_v19 = vld [vmem:[#allocation3 + $0xa58] sm:$0xff]  ;;  %v11718_v52 = vpack.c.bf16 %v430_v16, %v424_v2  ;;  %v440_v22 = vld [vmem:[#allocation3 + $0xa50] sm:$0xff] }
 0x195   :  { %2398 = vmax.xlane.f32.xlu0 %v2397_v0  ;;  %1833 = vmatprep.subr.bf16.mxu1 %v11686_v60  ;;  %15303 = vst [vmem:[#allocation145_spill] sm:$0xff] %v11706_v45  ;;  %15304 = vst [vmem:[#allocation146_spill] sm:$0xff] %v11708_v61  ;;  %v409_v0 = vld [vmem:[#allocation3 + $0x958] sm:$0xff]  ;;  %v435_v46 = vld [vmem:[#allocation3 + $0xa28] sm:$0xff] }
 0x196   :  { %v2400_v40 = vsel %vm2390_vm0, %v11696_v3, -inf  ;;  %1822 = vmatprep.mubr.bf16.mxu0 %v11470_v21  ;;  %1863 = vmatprep.mubr.bf16.mxu1 %v11513_v54  ;;  %15302 = vst [vmem:[#allocation144_spill] sm:$0xff] %v11704_v26  ;;  %15306 = vst [vmem:[#allocation148_spill] sm:$0xff] %v11716_v38  ;;  %v11720_v1 = vpack.c.bf16 %v409_v0, %v403_v39  ;;  %v11722_v51 = vpack.c.bf16 %v441_v19, %v435_v46  ;;  %v421_v2 = vld [vmem:[#allocation3 + $0x9b8] sm:$0xff]  ;;  %v447_v46 = vld [vmem:[#allocation3 + $0xa88] sm:$0xff] }
 0x197   :  { %2401 = vmax.xlane.f32.xlu1 %v2400_v40  ;;  %15307 = vst [vmem:[#allocation149_spill] sm:$0xff] %v11718_v52  ;;  %v402_v40 = vld [vmem:[#allocation3 + $0x920] sm:$0xff]  ;;  %v453_v19 = vld [vmem:[#allocation3 + $0xab8] sm:$0xff] }
 0x198   :  { %15308 = vst [vmem:[#allocation150_spill] sm:$0xff] %v11720_v1  ;;  %15309 = vst [vmem:[#allocation151_spill] sm:$0xff] %v11722_v51  ;;  %v11736_v15 = vpack.c.bf16 %v453_v19, %v447_v46  ;;  %v445_v46 = vld [vmem:[#allocation3 + $0xa78] sm:$0xff] }
 0x19a   :  { %15313 = vst [vmem:[#allocation155_spill] sm:$0xff] %v11736_v15 }
 0x19b   :  { %1793 = vmatpush1.bf16.xpose.msra.mxu0 %v11704_v26  ;;  %v11732_v26 = vpack.c.bf16 %v440_v22, %v434_v20 }
 0x19c   :  { %1834 = vmatpush1.bf16.xpose.msra.mxu1 %v11706_v45  ;;  %1794 = vmatprep.subr.bf16.mxu0 %v11708_v61 }
 0x19d   :  { %1835 = vmatprep.subr.bf16.mxu1 %v11710_v49  ;;  %15311 = vst [vmem:[#allocation153_spill] sm:$0xff] %v11732_v26 }
 0x1a3   :  { %1795 = vmatpush1.bf16.xpose.msra.mxu0 %v11716_v38 }
 0x1a4   :  { %1836 = vmatpush1.bf16.xpose.msra.mxu1 %v11718_v52  ;;  %1872 = vmatprep.subr.bf16.mxu0 %v11720_v1  ;;  %v11729_v52 = vpack.c.bf16 %v408_v63, %v402_v40  ;;  %v452_v40 = vld [vmem:[#allocation3 + $0xab0] sm:$0xff]  ;;  %v433_v63 = vld [vmem:[#allocation3 + $0xa18] sm:$0xff] }
 0x1a5   :  { %v1086_v49 = vpop.f32.mrb[12].mxu0  ;;  %1913 = vmatprep.subr.bf16.mxu1 %v11722_v51  ;;  %v11734_v51 = vpack.c.bf16 %v421_v2, %v415_v12  ;;  %v426_v12 = vld [vmem:[#allocation3 + $0x9e0] sm:$0xff] }
 0x1a6   :  { %v1087_v16 = vadd.f32 %v1086_v49, %v11569_v53  ;;  %v1127_v39 = vpop.f32.mrb[12].mxu1  ;;  %v1088_v0 = vpop.f32.mrb[13].mxu0  ;;  %15310 = vst [vmem:[#allocation152_spill] sm:$0xff] %v11729_v52  ;;  %v458_v2 = vld [vmem:[#allocation3 + $0xae0] sm:$0xff] }
 0x1a7   :  { %v1129_v45 = vpop.f32.mrb[13].mxu1  ;;  %v1089_v60 = vpop.f32.mrb[14].mxu0  ;;  %15312 = vst [vmem:[#allocation154_spill] sm:$0xff] %v11734_v51  ;;  %v439_v0 = vld [vmem:[#allocation3 + $0xa48] sm:$0xff] }
 0x1a8   :  { %v1128_v36 = vadd.f32 %v1127_v39, %v1087_v16  ;;  %v1090_v1 = vadd.f32 %v1089_v60, %v11582_v62  ;;  %v1130_v38 = vpop.f32.mrb[14].mxu1  ;;  %v1091_v61 = vpop.f32.mrb[15].mxu0  ;;  %v414_v60 = vld [vmem:[#allocation3 + $0x980] sm:$0xff]  ;;  %v420_v45 = vld [vmem:[#allocation3 + $0x9b0] sm:$0xff]  ;;  %v437_v16 = vld [vmem:[#allocation3 + $0xa38] sm:$0xff] }
 0x1a9   :  { %v1132_v14 = vpop.f32.mrb[15].mxu1  ;;  %v446_v61 = vld [vmem:[#allocation3 + $0xa80] sm:$0xff]  ;;  %v443_v39 = vld [vmem:[#allocation3 + $0xa68] sm:$0xff] }
 0x1aa   :  { %v1131_v49 = vadd.f32 %v1130_v38, %v1090_v1  ;;  %1823 = vmatmul.mubr.bf16.vlgmr.msra.gmra.mrb[48].mxu0 %v11457_v28  ;;  %v427_v14 = vld [vmem:[#allocation3 + $0x9e8] sm:$0xff]  ;;  %v465_v28 = vld [vmem:[#allocation3 + $0xb18] sm:$0xff]  ;;  %v11748_v1 = vpack.c.bf16 %v452_v40, %v446_v61  ;;  %v11764_v61 = vpack.c.bf16 %v445_v46, %v439_v0  ;;  %v436_v40 = vld [vmem:[#allocation3 + $0xa30] sm:$0xff] }
 0x1ab   :  { %1864 = vmatmul.mubr.bf16.vlgmr.msra.gmra.mrb[48].mxu1 %v11460_v37  ;;  %1873 = vmatpush1.bf16.xpose.msra.mxu0 %v11729_v52  ;;  %v459_v38 = vld [vmem:[#allocation3 + $0xae8] sm:$0xff]  ;;  %v11746_v37 = vpack.c.bf16 %v420_v45, %v414_v60  ;;  %v11750_v20 = vpack.c.bf16 %v433_v63, %v427_v14  ;;  %v11762_v45 = vpack.c.bf16 %v443_v39, %v437_v16  ;;  %v442_v14 = vld [vmem:[#allocation3 + $0xa60] sm:$0xff]  ;;  %v457_v46 = vld [vmem:[#allocation3 + $0xad8] sm:$0xff] }
 0x1ac   :  { %1914 = vmatpush1.bf16.xpose.msra.mxu1 %v11732_v26  ;;  %1874 = vmatprep.subr.bf16.mxu0 %v11734_v51  ;;  %15315 = vst [vmem:[#allocation157_spill] sm:$0xff] %v11748_v1  ;;  %v11752_v22 = vpack.c.bf16 %v465_v28, %v459_v38  ;;  %15321 = vst [vmem:[#allocation163_spill] sm:$0xff] %v11764_v61  ;;  %v438_v63 = vld [vmem:[#allocation3 + $0xa40] sm:$0xff]  ;;  %v444_v28 = vld [vmem:[#allocation3 + $0xa70] sm:$0xff] }
 0x1ad   :  { %1915 = vmatprep.subr.bf16.mxu1 %v11736_v15  ;;  %1904 = vmatprep.mubr.bf16.mxu0 %v11467_v34  ;;  %15314 = vst [vmem:[#allocation156_spill] sm:$0xff] %v11746_v37  ;;  %15316 = vst [vmem:[#allocation158_spill] sm:$0xff] %v11750_v20  ;;  %v432_v34 = vld [vmem:[#allocation3 + $0xa10] sm:$0xff]  ;;  %v455_v39 = vld [vmem:[#allocation3 + $0xac8] sm:$0xff] }
 0x1ae   :  { %1945 = vmatprep.mubr.bf16.mxu1 %v11470_v21  ;;  %15317 = vst [vmem:[#allocation159_spill] sm:$0xff] %v11752_v22  ;;  %v464_v21 = vld [vmem:[#allocation3 + $0xb10] sm:$0xff]  ;;  %v11758_v19 = vpack.c.bf16 %v432_v34, %v426_v12  ;;  %15320 = vst [vmem:[#allocation162_spill] sm:$0xff] %v11762_v45  ;;  %v9118_v12 = vld [vmem:[#allocation6 + $0x2] ss:$0 sm:$0xff] }
 0x1af   :  { %v11760_v60 = vpack.c.bf16 %v464_v21, %v458_v2  ;;  %v449_v34 = vld [vmem:[#allocation3 + $0xa98] sm:$0xff]  ;;  %v451_v0 = vld [vmem:[#allocation3 + $0xaa8] sm:$0xff] }
 0x1b0   :  { %15318 = vst [vmem:[#allocation160_spill] sm:$0xff] %v11758_v19  ;;  %v11776_v26 = vpack.c.bf16 %v455_v39, %v449_v34  ;;  %v469_v34 = vld [vmem:[#allocation3 + $0xb38] sm:$0xff] }
 0x1b1   :  { %15319 = vst [vmem:[#allocation161_spill] sm:$0xff] %v11760_v60 }
 0x1b2   :  { %15324 = vst [vmem:[#allocation166_spill] sm:$0xff] %v11776_v26 }
 0x1b3   :  { %1875 = vmatpush1.bf16.xpose.msra.mxu0 %v11746_v37  ;;  %v11772_v37 = vpack.c.bf16 %v444_v28, %v438_v63  ;;  %v467_v63 = vld [vmem:[#allocation3 + $0xb28] sm:$0xff] }
 0x1b4   :  { %1916 = vmatpush1.bf16.xpose.msra.mxu1 %v11748_v1  ;;  %1876 = vmatprep.subr.bf16.mxu0 %v11750_v20  ;;  %v463_v28 = vld [vmem:[#allocation3 + $0xb08] sm:$0xff] }
 0x1b5   :  { %1917 = vmatprep.subr.bf16.mxu1 %v11752_v22  ;;  %15323 = vst [vmem:[#allocation165_spill] sm:$0xff] %v11772_v37 }
 0x1bb   :  { %1877 = vmatpush1.bf16.xpose.msra.mxu0 %v11758_v19 }
 0x1bc   :  { %1918 = vmatpush1.bf16.xpose.msra.mxu1 %v11760_v60  ;;  %1954 = vmatprep.subr.bf16.mxu0 %v11762_v45  ;;  %v11770_v60 = vpack.c.bf16 %v442_v14, %v436_v40  ;;  %v456_v40 = vld [vmem:[#allocation3 + $0xad0] sm:$0xff]  ;;  %v461_v14 = vld [vmem:[#allocation3 + $0xaf8] sm:$0xff] }
 0x1bd   :  { %v1168_v38 = vpop.f32.mrb[16].mxu0  ;;  %1995 = vmatprep.subr.bf16.mxu1 %v11764_v61  ;;  %v11802_v39 = vpack.c.bf16 %v467_v63, %v461_v14 }
 0x1be   :  { %v1169_v2 = vadd.f32 %v1168_v38, %v1128_v36  ;;  %v1209_v21 = vpop.f32.mrb[16].mxu1  ;;  %v1170_v16 = vpop.f32.mrb[17].mxu0  ;;  %15322 = vst [vmem:[#allocation164_spill] sm:$0xff] %v11770_v60  ;;  %v11778_v36 = vpack.c.bf16 %v457_v46, %v451_v0  ;;  %v11783_v38 = vld [vmem:[#allocation8] ss:$24 sps:$4 sm:$0xff]   ;;  %v11804_v0 = vpack.c.bf16 %v469_v34, %v463_v28  ;;  %v460_v46 = vld [vmem:[#allocation3 + $0xaf0] sm:$0xff] }
 0x1bf   :  { %v1211_v19 = vpop.f32.mrb[17].mxu1  ;;  %v1171_v22 = vpop.f32.mrb[18].mxu0  ;;  %15328 = vst [vmem:[#allocation170_spill] sm:$0xff] %v11802_v39 }
 0x1c0   :  { %v1172_v45 = vadd.f32 %v1171_v22, %v1131_v49  ;;  %v1212_v1 = vpop.f32.mrb[18].mxu1  ;;  %v1173_v20 = vpop.f32.mrb[19].mxu0  ;;  %v11774_v15 = vadd.f32 %v9118_v12, %v1169_v2  ;;  %15325 = vst [vmem:[#allocation167_spill] sm:$0xff] %v11778_v36  ;;  %v454_v22 = vld [vmem:[#allocation3 + $0xac0] sm:$0xff]  ;;  %15329 = vst [vmem:[#allocation171_spill] sm:$0xff] %v11804_v0 }
 0x1c1   :  { %v1214_v61 = vpop.f32.mrb[19].mxu1  ;;  %v448_v20 = vld [vmem:[#allocation3 + $0xa90] sm:$0xff]  ;;  %v11793_v2 = vld [vmem:[#allocation8 + $0x14] ss:$24 sps:$4 sm:$0xff]  }
 0x1c2   :  { %1905 = vmatmul.mubr.bf16.vlgmr.msra.gmra.mrb[52].mxu0 %v11505_v31  ;;  %v2403_v19 = vsel %vm2390_vm0, %v11774_v15, -inf  ;;  %v11787_v49 = vadd.f32 %v9118_v12, %v1172_v45  ;;  %v450_v61 = vld [vmem:[#allocation3 + $0xaa0] sm:$0xff]  ;;  %v11798_v12 = vpack.c.bf16 %v454_v22, %v448_v20  ;;  %v468_v20 = vld [vmem:[#allocation3 + $0xb30] sm:$0xff]  ;;  %v471_v22 = vld [vmem:[#allocation3 + $0xb48] sm:$0xff] }
 0x1c3   :  { %1946 = vmatmul.mubr.bf16.vlgmr.msra.gmra.mrb[52].mxu1 %v11783_v38  ;;  %1955 = vmatpush1.bf16.xpose.msra.mxu0 %v11770_v60  ;;  %v11800_v16 = vpack.c.bf16 %v456_v40, %v450_v61  ;;  %v473_v61 = vld [vmem:[#allocation3 + $0xb58] sm:$0xff]  ;;  %v479_v40 = vld [vmem:[#allocation3 + $0xb88] sm:$0xff] }
 0x1c4   :  { %1996 = vmatpush1.bf16.xpose.msra.mxu1 %v11772_v37  ;;  %2404 = vmax.xlane.f32.xlu1 %v2403_v19  ;;  %v2406_v45 = vsel %vm2390_vm0, %v11787_v49, -inf  ;;  %15326 = vst [vmem:[#allocation168_spill] sm:$0xff] %v11798_v12  ;;  %v466_v19 = vld [vmem:[#allocation3 + $0xb20] sm:$0xff]  ;;  %v11816_v34 = vpack.c.bf16 %v479_v40, %v473_v61  ;;  %v476_v37 = vld [vmem:[#allocation3 + $0xb70] sm:$0xff]  ;;  %v485_v40 = vld [vmem:[#allocation3 + $0xbb8] sm:$0xff] }
 0x1c5   :  { %1956 = vmatprep.subr.bf16.mxu0 %v11776_v26  ;;  %1997 = vmatprep.subr.bf16.mxu1 %v11778_v36  ;;  %15327 = vst [vmem:[#allocation169_spill] sm:$0xff] %v11800_v16  ;;  %v462_v36 = vld [vmem:[#allocation3 + $0xb00] sm:$0xff]  ;;  %v11810_v14 = vpack.c.bf16 %v466_v19, %v460_v46  ;;  %v483_v46 = vld [vmem:[#allocation3 + $0xba8] sm:$0xff]  ;;  %v489_v19 = vld [vmem:[#allocation3 + $0xbd8] sm:$0xff] }
 0x1c6   :  { %1986 = vmatprep.mubr.bf16.mxu0 %v11513_v54  ;;  %2027 = vmatprep.mubr.bf16.mxu1 %v11793_v2  ;;  %v11812_v63 = vpack.c.bf16 %v468_v20, %v462_v36  ;;  %15333 = vst [vmem:[#allocation175_spill] sm:$0xff] %v11816_v34  ;;  %v478_v36 = vld [vmem:[#allocation3 + $0xb80] sm:$0xff]  ;;  %v1213_v20 = vadd.f32 %v1212_v1, %v11582_v62 }
 0x1c7   :  { %15330 = vst [vmem:[#allocation172_spill] sm:$0xff] %v11810_v14  ;;  %v11828_v50 = vpack.c.bf16 %v489_v19, %v483_v46 }
 0x1c8   :  { %2407 = vmax.xlane.f32.xlu1 %v2406_v45  ;;  %v477_v45 = vld [vmem:[#allocation3 + $0xb78] sm:$0xff]  ;;  %15331 = vst [vmem:[#allocation173_spill] sm:$0xff] %v11812_v63 }
 0x1c9   :  { %v11814_v28 = vpack.c.bf16 %v477_v45, %v471_v22  ;;  %15336 = vst [vmem:[#allocation178_spill] sm:$0xff] %v11828_v50 }
 0x1cb   :  { %1957 = vmatpush1.bf16.xpose.msra.mxu0 %v11798_v12  ;;  %15332 = vst [vmem:[#allocation174_spill] sm:$0xff] %v11814_v28 }
 0x1cc   :  { %1998 = vmatpush1.bf16.xpose.msra.mxu1 %v11800_v16  ;;  %1958 = vmatprep.subr.bf16.mxu0 %v11802_v39  ;;  %v1210_v16 = vadd.f32 %v1209_v21, %v11569_v53  ;;  %v472_v39 = vld [vmem:[#allocation3 + $0xb50] sm:$0xff]  ;;  %v491_v21 = vld [vmem:[#allocation3 + $0xbe8] sm:$0xff] }
 0x1cd   :  { %1999 = vmatprep.subr.bf16.mxu1 %v11804_v0  ;;  %v470_v0 = vld [vmem:[#allocation3 + $0xb40] sm:$0xff]  ;;  %v11830_v1 = vpack.c.bf16 %v491_v21, %v485_v40  ;;  %v475_v21 = vld [vmem:[#allocation3 + $0xb68] sm:$0xff] }
 0x1ce   :  { %v11824_v26 = vpack.c.bf16 %v476_v37, %v470_v0  ;;  %v497_v0 = vld [vmem:[#allocation3 + $0xc18] sm:$0xff]  ;;  %v502_v40 = vld [vmem:[#allocation3 + $0xc40] sm:$0xff] }
 0x1cf   :  { %15337 = vst [vmem:[#allocation179_spill] sm:$0xff] %v11830_v1 }
 0x1d0   :  { %15334 = vst [vmem:[#allocation176_spill] sm:$0xff] %v11824_v26 }
 0x1d3   :  { %1959 = vmatpush1.bf16.xpose.msra.mxu0 %v11810_v14 }
 0x1d4   :  { %2000 = vmatpush1.bf16.xpose.msra.mxu1 %v11812_v63  ;;  %2036 = vmatprep.subr.bf16.mxu0 %v11814_v28  ;;  %v9119_v28 = vld [vmem:[#allocation6 + $0x3] ss:$0 sm:$0xff] }
 0x1d5   :  { %v1250_v12 = vpop.f32.mrb[20].mxu0  ;;  %2077 = vmatprep.subr.bf16.mxu1 %v11816_v34  ;;  %v11826_v34 = vpack.c.bf16 %v478_v36, %v472_v39  ;;  %v495_v39 = vld [vmem:[#allocation3 + $0xc08] sm:$0xff] }
 0x1d6   :  { %v1251_v22 = vadd.f32 %v1250_v12, %v1210_v16  ;;  %v1291_v45 = vpop.f32.mrb[20].mxu1  ;;  %v1252_v61 = vpop.f32.mrb[21].mxu0  ;;  %v11832_v16 = vld [vmem:[#allocation8 + $0x8] ss:$24 sps:$4 sm:$0xff]   ;;  %v11846_v36 = vld [vmem:[#allocation8 + $0x4] ss:$24 sps:$4 sm:$0xff]  }
 0x1d7   :  { %v1293_v14 = vpop.f32.mrb[21].mxu1  ;;  %v1253_v63 = vpop.f32.mrb[22].mxu0  ;;  %15335 = vst [vmem:[#allocation177_spill] sm:$0xff] %v11826_v34  ;;  %v496_v61 = vld [vmem:[#allocation3 + $0xc10] sm:$0xff] }
 0x1d8   :  { %v1292_v60 = vadd.f32 %v1291_v45, %v1251_v22  ;;  %v1254_v51 = vadd.f32 %v1253_v63, %v1213_v20  ;;  %v1294_v52 = vpop.f32.mrb[22].mxu1  ;;  %v1255_v5 = vpop.f32.mrb[23].mxu0  ;;  %v503_v63 = vld [vmem:[#allocation3 + $0xc48] sm:$0xff]  ;;  %v494_v45 = vld [vmem:[#allocation3 + $0xc00] sm:$0xff] }
 0x1d9   :  { %v1296_v48 = vpop.f32.mrb[23].mxu1  ;;  %v11858_v22 = vpack.c.bf16 %v503_v63, %v497_v0  ;;  %v480_v0 = vld [vmem:[#allocation3 + $0xb90] sm:$0xff]  ;;  %v506_v63 = vld [vmem:[#allocation3 + $0xc60] sm:$0xff] }
 0x1da   :  { %v1295_v12 = vadd.f32 %v1294_v52, %v1254_v51  ;;  %1987 = vmatmul.mubr.bf16.vlgmr.msra.gmra.mrb[56].mxu0 %v11832_v16  ;;  %v11835_v14 = vadd.f32 %v9119_v28, %v1292_v60  ;;  %v482_v48 = vld [vmem:[#allocation3 + $0xba0] sm:$0xff]  ;;  %v488_v52 = vld [vmem:[#allocation3 + $0xbd0] sm:$0xff] }
 0x1db   :  { %2028 = vmatmul.mubr.bf16.vlgmr.msra.gmra.mrb[56].mxu1 %v11505_v31  ;;  %2037 = vmatpush1.bf16.xpose.msra.mxu0 %v11824_v26  ;;  %v484_v51 = vld [vmem:[#allocation3 + $0xbb0] sm:$0xff]  ;;  %v490_v60 = vld [vmem:[#allocation3 + $0xbe0] sm:$0xff]  ;;  %v501_v31 = vld [vmem:[#allocation3 + $0xc38] sm:$0xff]  ;;  %15341 = vst [vmem:[#allocation183_spill] sm:$0xff] %v11858_v22 }
 0x1dc   :  { %2078 = vmatpush1.bf16.xpose.msra.mxu1 %v11826_v34  ;;  %v2409_v5 = vsel %vm2390_vm0, %v11835_v14, -inf  ;;  %v11842_v37 = vadd.f32 %v9119_v28, %v1295_v12  ;;  %2038 = vmatprep.subr.bf16.mxu0 %v11828_v50  ;;  %v11850_v28 = vpack.c.bf16 %v488_v52, %v482_v48  ;;  %v11854_v19 = vpack.c.bf16 %v490_v60, %v484_v51  ;;  %v481_v12 = vld [vmem:[#allocation3 + $0xb98] sm:$0xff] }
 0x1dd   :  { %2410 = vmax.xlane.f32.xlu1 %v2409_v5  ;;  %2079 = vmatprep.subr.bf16.mxu1 %v11830_v1  ;;  %v11856_v20 = vpack.c.bf16 %v501_v31, %v495_v39  ;;  %v507_v5 = vld [vmem:[#allocation3 + $0xc68] sm:$0xff]  ;;  %v513_v48 = vld [vmem:[#allocation3 + $0xc98] sm:$0xff]  ;;  %v11866_v51 = vpack.c.bf16 %v502_v40, %v496_v61  ;;  %v11868_v60 = vpack.c.bf16 %v481_v12, %v475_v21  ;;  %v474_v31 = vld [vmem:[#allocation3 + $0xb60] sm:$0xff] }
 0x1de   :  { %2068 = vmatprep.mubr.bf16.mxu0 %v11846_v36  ;;  %2109 = vmatprep.mubr.bf16.mxu1 %v11513_v54  ;;  %15338 = vst [vmem:[#allocation180_spill] sm:$0xff] %v11850_v28  ;;  %v2412_v46 = vsel %vm2390_vm0, %v11842_v37, -inf  ;;  %15339 = vst [vmem:[#allocation181_spill] sm:$0xff] %v11854_v19  ;;  %v500_v54 = vld [vmem:[#allocation3 + $0xc30] sm:$0xff]  ;;  %v11870_v39 = vpack.c.bf16 %v513_v48, %v507_v5  ;;  %v493_v61 = vld [vmem:[#allocation3 + $0xbf8] sm:$0xff] }
 0x1df   :  { %15340 = vst [vmem:[#allocation182_spill] sm:$0xff] %v11856_v20  ;;  %v11864_v52 = vpack.c.bf16 %v500_v54, %v494_v45  ;;  %15343 = vst [vmem:[#allocation185_spill] sm:$0xff] %v11866_v51  ;;  %v512_v45 = vld [vmem:[#allocation3 + $0xc90] sm:$0xff]  ;;  %v487_v54 = vld [vmem:[#allocation3 + $0xbc8] sm:$0xff] }
 0x1e0   :  { %15344 = vst [vmem:[#allocation186_spill] sm:$0xff] %v11868_v60  ;;  %15345 = vst [vmem:[#allocation187_spill] sm:$0xff] %v11870_v39  ;;  %v519_v5 = vld [vmem:[#allocation3 + $0xcc8] sm:$0xff]  ;;  %v525_v48 = vld [vmem:[#allocation3 + $0xcf8] sm:$0xff] }
 0x1e1   :  { %2413 = vmax.xlane.f32.xlu1 %v2412_v46  ;;  %15342 = vst [vmem:[#allocation184_spill] sm:$0xff] %v11864_v52  ;;  %v11884_v50 = vpack.c.bf16 %v525_v48, %v519_v5  ;;  %v509_v5 = vld [vmem:[#allocation3 + $0xc78] sm:$0xff]  ;;  %v515_v48 = vld [vmem:[#allocation3 + $0xca8] sm:$0xff] }
 0x1e3   :  { %2039 = vmatpush1.bf16.xpose.msra.mxu0 %v11850_v28  ;;  %15349 = vst [vmem:[#allocation191_spill] sm:$0xff] %v11884_v50 }
 0x1e4   :  { %2080 = vmatpush1.bf16.xpose.msra.mxu1 %v11854_v19  ;;  %2040 = vmatprep.subr.bf16.mxu0 %v11856_v20  ;;  %v11880_v20 = vpack.c.bf16 %v512_v45, %v506_v63 }
 0x1e5   :  { %2081 = vmatprep.subr.bf16.mxu1 %v11858_v22 }
 0x1e6   :  { %15347 = vst [vmem:[#allocation189_spill] sm:$0xff] %v11880_v20 }
 0x1eb   :  { %2041 = vmatpush1.bf16.xpose.msra.mxu0 %v11864_v52 }
 0x1ec   :  { %2082 = vmatpush1.bf16.xpose.msra.mxu1 %v11866_v51  ;;  %2118 = vmatprep.subr.bf16.mxu0 %v11868_v60  ;;  %v11877_v51 = vpack.c.bf16 %v480_v0, %v474_v31  ;;  %v524_v31 = vld [vmem:[#allocation3 + $0xcf0] sm:$0xff]  ;;  %v505_v0 = vld [vmem:[#allocation3 + $0xc58] sm:$0xff] }
 0x1ed   :  { %v1332_v46 = vpop.f32.mrb[24].mxu0  ;;  %2159 = vmatprep.subr.bf16.mxu1 %v11870_v39  ;;  %v11882_v39 = vpack.c.bf16 %v493_v61, %v487_v54 }
 0x1ee   :  { %v1333_v40 = vadd.f32 %v1332_v46, %v11569_v53  ;;  %v1373_v21 = vpop.f32.mrb[24].mxu1  ;;  %v1334_v12 = vpop.f32.mrb[25].mxu0  ;;  %15346 = vst [vmem:[#allocation188_spill] sm:$0xff] %v11877_v51 }
 0x1ef   :  { %v1375_v22 = vpop.f32.mrb[25].mxu1  ;;  %v1335_v19 = vpop.f32.mrb[26].mxu0  ;;  %15348 = vst [vmem:[#allocation190_spill] sm:$0xff] %v11882_v39  ;;  %v530_v12 = vld [vmem:[#allocation3 + $0xd20] sm:$0xff] }
 0x1f0   :  { %v1374_v1 = vadd.f32 %v1373_v21, %v1333_v40  ;;  %v1336_v34 = vadd.f32 %v1335_v19, %v11582_v62  ;;  %v1376_v60 = vpop.f32.mrb[26].mxu1  ;;  %v1337_v52 = vpop.f32.mrb[27].mxu0  ;;  %v486_v19 = vld [vmem:[#allocation3 + $0xbc0] sm:$0xff]  ;;  %v492_v22 = vld [vmem:[#allocation3 + $0xbf0] sm:$0xff] }
 0x1f1   :  { %v1378_v28 = vpop.f32.mrb[27].mxu1  ;;  %v518_v52 = vld [vmem:[#allocation3 + $0xcc0] sm:$0xff]  ;;  %v11894_v63 = vpack.c.bf16 %v492_v22, %v486_v19  ;;  %v504_v21 = vld [vmem:[#allocation3 + $0xc50] sm:$0xff]  ;;  %v511_v19 = vld [vmem:[#allocation3 + $0xc88] sm:$0xff] }
 0x1f2   :  { %v1377_v46 = vadd.f32 %v1376_v60, %v1336_v34  ;;  %2069 = vmatmul.mubr.bf16.vlgmr.msra.gmra.mrb[60].mxu0 %v11783_v38  ;;  %v499_v28 = vld [vmem:[#allocation3 + $0xc28] sm:$0xff]  ;;  %v537_v60 = vld [vmem:[#allocation3 + $0xd58] sm:$0xff]  ;;  %v11896_v45 = vpack.c.bf16 %v524_v31, %v518_v52  ;;  %v498_v40 = vld [vmem:[#allocation3 + $0xc20] sm:$0xff] }
 0x1f3   :  { %2110 = vmatmul.mubr.bf16.vlgmr.msra.gmra.mrb[60].mxu1 %v11832_v16  ;;  %2119 = vmatpush1.bf16.xpose.msra.mxu0 %v11877_v51  ;;  %v531_v34 = vld [vmem:[#allocation3 + $0xd28] sm:$0xff]  ;;  %15350 = vst [vmem:[#allocation192_spill] sm:$0xff] %v11894_v63  ;;  %v11898_v54 = vpack.c.bf16 %v505_v0, %v499_v28  ;;  %v517_v22 = vld [vmem:[#allocation3 + $0xcb8] sm:$0xff]  ;;  %v11906_v52 = vpack.c.bf16 %v504_v21, %v498_v40  ;;  %v516_v40 = vld [vmem:[#allocation3 + $0xcb0] sm:$0xff] }
 0x1f4   :  { %2160 = vmatpush1.bf16.xpose.msra.mxu1 %v11880_v20  ;;  %2120 = vmatprep.subr.bf16.mxu0 %v11882_v39  ;;  %15351 = vst [vmem:[#allocation193_spill] sm:$0xff] %v11896_v45  ;;  %v11900_v61 = vpack.c.bf16 %v537_v60, %v531_v34  ;;  %v11910_v28 = vpack.c.bf16 %v515_v48, %v509_v5  ;;  %v508_v34 = vld [vmem:[#allocation3 + $0xc70] sm:$0xff]  ;;  %v514_v60 = vld [vmem:[#allocation3 + $0xca0] sm:$0xff] }
 0x1f5   :  { %2161 = vmatprep.subr.bf16.mxu1 %v11884_v50  ;;  %2150 = vmatprep.mubr.bf16.mxu0 %v11793_v2  ;;  %15352 = vst [vmem:[#allocation194_spill] sm:$0xff] %v11898_v54  ;;  %15354 = vst [vmem:[#allocation196_spill] sm:$0xff] %v11906_v52  ;;  %v11912_v0 = vpack.c.bf16 %v517_v22, %v511_v19  ;;  %v9120_v21 = vld [vmem:[#allocation6 + $0x4] ss:$0 sm:$0xff]  ;;  %v527_v19 = vld [vmem:[#allocation3 + $0xd08] sm:$0xff] }
 0x1f6   :  { %2191 = vmatprep.mubr.bf16.mxu1 %v11846_v36  ;;  %15353 = vst [vmem:[#allocation195_spill] sm:$0xff] %v11900_v61  ;;  %v536_v36 = vld [vmem:[#allocation3 + $0xd50] sm:$0xff]  ;;  %15356 = vst [vmem:[#allocation198_spill] sm:$0xff] %v11910_v28  ;;  %v523_v22 = vld [vmem:[#allocation3 + $0xce8] sm:$0xff] }
 0x1f7   :  { %v11908_v31 = vpack.c.bf16 %v536_v36, %v530_v12  ;;  %15357 = vst [vmem:[#allocation199_spill] sm:$0xff] %v11912_v0  ;;  %v521_v12 = vld [vmem:[#allocation3 + $0xcd8] sm:$0xff] }
 0x1f9   :  { %15355 = vst [vmem:[#allocation197_spill] sm:$0xff] %v11908_v31 }
 0x1fb   :  { %2121 = vmatpush1.bf16.xpose.msra.mxu0 %v11894_v63  ;;  %v11920_v63 = vpack.c.bf16 %v514_v60, %v508_v34  ;;  %v528_v34 = vld [vmem:[#allocation3 + $0xd10] sm:$0xff]  ;;  %v533_v60 = vld [vmem:[#allocation3 + $0xd38] sm:$0xff] }
 0x1fc   :  { %2162 = vmatpush1.bf16.xpose.msra.mxu1 %v11896_v45  ;;  %2122 = vmatprep.subr.bf16.mxu0 %v11898_v54 }
 0x1fd   :  { %2163 = vmatprep.subr.bf16.mxu1 %v11900_v61  ;;  %v510_v61 = vld [vmem:[#allocation3 + $0xc80] sm:$0xff] }
 0x1fe   :  { %v11924_v39 = vpack.c.bf16 %v516_v40, %v510_v61  ;;  %v520_v61 = vld [vmem:[#allocation3 + $0xcd0] sm:$0xff]  ;;  %v539_v40 = vld [vmem:[#allocation3 + $0xd68] sm:$0xff] }
 0x203   :  { %2123 = vmatpush1.bf16.xpose.msra.mxu0 %v11906_v52  ;;  %v529_v52 = vld [vmem:[#allocation3 + $0xd18] sm:$0xff] }
 0x204   :  { %2164 = vmatpush1.bf16.xpose.msra.mxu1 %v11908_v31  ;;  %2200 = vmatprep.subr.bf16.mxu0 %v11910_v28 }
 0x205   :  { %v1414_v45 = vpop.f32.mrb[28].mxu0  ;;  %2241 = vmatprep.subr.bf16.mxu1 %v11912_v0 }
 0x206   :  { %v1415_v36 = vadd.f32 %v1414_v45, %v1374_v1  ;;  %v11918_v5 = vpop.f32.mrb[28].mxu1  ;;  %v1416_v48 = vpop.f32.mrb[29].mxu0  ;;  %v11928_v45 = vpack.c.bf16 %v527_v19, %v521_v12 }
 0x207   :  { %v1457_v54 = vpop.f32.mrb[29].mxu1  ;;  %v1417_v31 = vpop.f32.mrb[30].mxu0  ;;  %v11930_v48 = vpack.c.bf16 %v529_v52, %v523_v22  ;;  %v526_v52 = vld [vmem:[#allocation3 + $0xd00] sm:$0xff] }
 0x208   :  { %v1418_v28 = vadd.f32 %v1417_v31, %v1377_v46  ;;  %v11922_v50 = vpop.f32.mrb[30].mxu1  ;;  %v1419_v20 = vpop.f32.mrb[31].mxu0  ;;  %v11926_v0 = vadd.f32 %v9120_v21, %v1415_v36  ;;  %v11933_v54 = vld [vmem:[#allocation8 + $0x10] ss:$24 sps:$4 sm:$0xff]   ;;  %v11949_v36 = vpack.c.bf16 %v526_v52, %v520_v61 }
 0x209   :  { %v1460_v51 = vpop.f32.mrb[31].mxu1  ;;  %v2393_v1 = vpop.xlane.xlu1 %2392  ;;  %v540_v61 = vld [vmem:[#allocation3 + $0xd70] sm:$0xff] }
 0x20a   :  { %v2463_v26 = vsub.f32 %v11633_v59, %v2393_v1  ;;  %2151 = vmatmul.mubr.bf16.vlgmr.msra.gmra.mrb[64].mxu0 %v11933_v54  ;;  %v2415_v46 = vsel %vm2390_vm0, %v11926_v0, -inf  ;;  %v11940_v20 = vadd.f32 %v9120_v21, %v1418_v28  ;;  %v522_v59 = vld [vmem:[#allocation3 + $0xce0] sm:$0xff]  ;;  %v535_v28 = vld [vmem:[#allocation3 + $0xd48] sm:$0xff]  ;;  %v541_v21 = vld [vmem:[#allocation3 + $0xd78] sm:$0xff]  ;;  %v11953_v1 = vpack.c.bf16 %v539_v40, %v533_v60 }
 0x20b   :  { %2192 = vmatmul.mubr.bf16.vlgmr.msra.gmra.mrb[64].mxu1 %v11783_v38  ;;  %2201 = vmatpush1.bf16.xpose.msra.mxu0 %v11920_v63  ;;  %v11951_v22 = vpack.c.bf16 %v528_v34, %v522_v59  ;;  %v1456_v40 = vadd.f32 %v11918_v5, %v11569_v53  ;;  %v9121_v5 = vld [vmem:[#allocation6 + $0x5] ss:$0 sm:$0xff] }
 0x20c   :  { %v2487_v51 = vmul.f32 1.442695, %v2463_v26  ;;  %2242 = vmatpush1.bf16.xpose.msra.mxu1 %v11924_v39  ;;  %2416 = vmax.xlane.f32.xlu1 %v2415_v46  ;;  %v10839_v26 = vld [vmem:[#allocation8 + $0xc] ss:$24 sps:$4 sm:$0xff]   ;;  %v2418_v12 = vsel %vm2390_vm0, %v11940_v20, -inf  ;;  %v11955_v46 = vpack.c.bf16 %v541_v21, %v535_v28  ;;  %v1459_v21 = vadd.f32 %v11922_v50, %v11582_v62 }
 0x20d   :  { %v2396_v31 = vpop.xlane.xlu1 %2395  ;;  %2202 = vmatprep.subr.bf16.mxu0 %v11928_v45  ;;  %2243 = vmatprep.subr.bf16.mxu1 %v11930_v48  ;;  %15358 = vst [vmem:[#allocation200_spill] sm:$0xff] %v11951_v22 }
 0x20e   :  { %10372 = vpow2.f32 %v2487_v51  ;;  %v2464_v38 = vsub.f32 %v11644_v35, %v2396_v31  ;;  %2232 = vmatprep.mubr.bf16.mxu0 %v10839_v26  ;;  %2273 = vmatprep.mubr.bf16.mxu1 %v11793_v2  ;;  %15359 = vst [vmem:[#allocation201_spill] sm:$0xff] %v11955_v46  ;;  %v532_v35 = vld [vmem:[#allocation3 + $0xd30] sm:$0xff]  ;;  %v538_v2 = vld [vmem:[#allocation3 + $0xd60] sm:$0xff] }
 0x20f   :  { %v534_v51 = vld [vmem:[#allocation3 + $0xd40] sm:$0xff]  ;;  %v11961_v52 = vpack.c.bf16 %v538_v2, %v532_v35 }
 0x210   :  { %v2489_v19 = vmul.f32 1.442695, %v2464_v38  ;;  %2419 = vmax.xlane.f32.xlu1 %v2418_v12  ;;  %v11965_v31 = vpack.c.bf16 %v540_v61, %v534_v51 }
 0x212   :  { %10374 = vpow2.f32 %v2489_v19  ;;  %15360 = vst [vmem:[#allocation202_spill] sm:$0xff] %v11965_v31 }
 0x213   :  { %2203 = vmatpush1.bf16.xpose.msra.mxu0 %v11949_v36 }
 0x214   :  { %2244 = vmatpush1.bf16.xpose.msra.mxu1 %v11951_v22  ;;  %2204 = vmatprep.subr.bf16.mxu0 %v11953_v1 }
 0x215   :  { %2245 = vmatprep.subr.bf16.mxu1 %v11955_v46 }
 0x218   :  { %v11963_v59 = vpop.eup %10372 }
 0x219   :  { %v2535_v34 = vsel %vm2390_vm0, %v11963_v59, 0.0 }
 0x21a   :  { %2536 = vadd.xlane.f32.xlu1 %v2535_v34 }
 0x21b   :  { %2205 = vmatpush1.bf16.xpose.msra.mxu0 %v11961_v52 }
 0x21c   :  { %v11970_v60 = vpop.eup %10374  ;;  %2246 = vmatpush1.bf16.xpose.msra.mxu1 %v11965_v31  ;;  %2670 = vmatprep.subr.bf16.mxu0 %v11147_v4 }
 0x21d   :  { %v1496_v38 = vpop.f32.mrb[32].mxu0  ;;  %v2538_v28 = vsel %vm2390_vm0, %v11970_v60, 0.0  ;;  %2713 = vmatprep.subr.bf16.mxu1 %v11149_v8 }
 0x21e   :  { %v1497_v26 = vadd.f32 %v1496_v38, %v1456_v40  ;;  %v1537_v12 = vpop.f32.mrb[32].mxu1  ;;  %2539 = vadd.xlane.f32.xlu0 %v2538_v28  ;;  %v1498_v19 = vpop.f32.mrb[33].mxu0 }
 0x21f   :  { %v1539_v35 = vpop.f32.mrb[33].mxu1  ;;  %v1499_v2 = vpop.f32.mrb[34].mxu0 }
 0x220   :  { %v1538_v51 = vadd.f32 %v1537_v12, %v1497_v26  ;;  %v1500_v61 = vadd.f32 %v1499_v2, %v1459_v21  ;;  %v1540_v34 = vpop.f32.mrb[34].mxu1  ;;  %v1501_v4 = vpop.f32.mrb[35].mxu0  ;;  %v9122_v12 = vld [vmem:[#allocation6 + $0x6] ss:$0 sm:$0xff] }
 0x221   :  { %v1542_v31 = vpop.f32.mrb[35].mxu1 }
 0x222   :  { %v1541_v46 = vadd.f32 %v1540_v34, %v1500_v61  ;;  %2233 = vmatmul.mubr.bf16.vlgmr.msra.gmra.mrb[68].mxu0 %v11832_v16  ;;  %v11982_v22 = vadd.f32 %v9121_v5, %v1538_v51  ;;  %v15361_v31 = vmov 0   ;;  %v2399_v38 = vpop.xlane.xlu0 %2398 }
 0x223   :  { %2274 = vmatmul.mubr.bf16.vlgmr.msra.gmra.mrb[68].mxu1 %v11933_v54  ;;  %2671 = vmatpush1.bf16.msra.mxu0 %v11151_v9 }
 0x224   :  { %v2421_v8 = vsel %vm2390_vm0, %v11982_v22, -inf  ;;  %v11988_v50 = vadd.f32 %v9121_v5, %v1541_v46  ;;  %2714 = vmatpush1.bf16.msra.mxu1 %v11154_v13  ;;  %2672 = vmatprep.subr.bf16.mxu0 %v11158_v17 }
 0x225   :  { %2422 = vmax.xlane.f32.xlu1 %v2421_v8  ;;  %2715 = vmatprep.subr.bf16.mxu1 %v11160_v18 }
 0x226   :  { %v2424_v16 = vsel %vm2390_vm0, %v11988_v50, -inf  ;;  %2702 = vmatprep.mubr.bf16.mxu0 %v15361_v31  ;;  %2745 = vmatprep.mubr.bf16.mxu1 %v15361_v31 }
 0x227   :  { %2425 = vmax.xlane.f32.xlu0 %v2424_v16  ;;  %2673 = vmatpush1.bf16.msra.mxu0 %v11165_v27 }
 0x228   :  { %2716 = vmatpush1.bf16.msra.mxu1 %v11169_v29  ;;  %2674 = vmatprep.subr.bf16.mxu0 %v11171_v30 }
 0x229   :  { %2717 = vmatprep.subr.bf16.mxu1 %v11175_v32 }
 0x22b   :  { %2675 = vmatpush1.bf16.msra.mxu0 %v11183_v41 }
 0x22c   :  { %2718 = vmatpush1.bf16.msra.mxu1 %v11185_v42  ;;  %2756 = vmatprep.subr.bf16.mxu0 %v11187_v43  ;;  %v2402_v42 = vpop.xlane.xlu1 %2401  ;;  %v2465_v43 = vsub.f32 %v11689_v47, %v2399_v38 }
 0x22d   :  { %2802 = vmatprep.subr.bf16.mxu1 %v11189_v44  ;;  %v2466_v44 = vsub.f32 %v11696_v3, %v2402_v42 }
 0x22e   :  { %v2491_v28 = vmul.f32 1.442695, %v2465_v43 }
 0x22f   :  { %v2493_v21 = vmul.f32 1.442695, %v2466_v44 }
 0x230   :  { %10376 = vpow2.f32 %v2491_v28 }
 0x231   :  { %10378 = vpow2.f32 %v2493_v21 }
 0x235   :  { %v1578_v9 = vpop.f32.mrb[36].mxu0 }
 0x236   :  { %v1579_v13 = vadd.f32 %v1578_v9, %v11569_v53  ;;  %v1619_v17 = vpop.f32.mrb[36].mxu1  ;;  %v1580_v18 = vpop.f32.mrb[37].mxu0 }
 0x237   :  { %v1621_v27 = vpop.f32.mrb[37].mxu1  ;;  %v1581_v54 = vpop.f32.mrb[38].mxu0 }
 0x238   :  { %v1620_v29 = vadd.f32 %v1619_v17, %v1579_v13  ;;  %v1582_v30 = vadd.f32 %v1581_v54, %v11582_v62  ;;  %v1622_v46 = vpop.f32.mrb[38].mxu1  ;;  %v1583_v32 = vpop.f32.mrb[39].mxu0 }
 0x239   :  { %v1624_v40 = vpop.f32.mrb[39].mxu1 }
 0x23a   :  { %v1623_v41 = vadd.f32 %v1622_v46, %v1582_v30  ;;  %v12016_v17 = vpop.eup %10376 }
 0x23b   :  { %v12020_v54 = vpop.eup %10378 }
 0x23c   :  { %v2544_v32 = vsel %vm2390_vm0, %v12020_v54, 0.0 }
 0x24d   :  { %v1660_v26 = vpop.f32.mrb[40].mxu0 }
 0x24e   :  { %v1661_v19 = vadd.f32 %v1660_v26, %v1620_v29  ;;  %v1701_v35 = vpop.f32.mrb[40].mxu1  ;;  %v1662_v2 = vpop.f32.mrb[41].mxu0 }
 0x24f   :  { %v1703_v5 = vpop.f32.mrb[41].mxu1  ;;  %v1663_v51 = vpop.f32.mrb[42].mxu0  ;;  %v9123_v2 = vld [vmem:[#allocation6 + $0x7] ss:$0 sm:$0xff] }
 0x250   :  { %v1664_v61 = vadd.f32 %v1663_v51, %v1623_v41  ;;  %v1704_v34 = vpop.f32.mrb[42].mxu1  ;;  %v1665_v4 = vpop.f32.mrb[43].mxu0  ;;  %v12009_v8 = vadd.f32 %v9122_v12, %v1661_v19 }
 0x251   :  { %v1706_v16 = vpop.f32.mrb[43].mxu1  ;;  %v2405_v47 = vpop.xlane.xlu1 %2404  ;;  %v1705_v44 = vadd.f32 %v1704_v34, %v11582_v62 }
 0x252   :  { %v2467_v3 = vsub.f32 %v11774_v15, %v2405_v47  ;;  %v2427_v9 = vsel %vm2390_vm0, %v12009_v8, -inf  ;;  %v12014_v13 = vadd.f32 %v9122_v12, %v1664_v61  ;;  %v2541_v15 = vsel %vm2390_vm0, %v12016_v17, 0.0 }
 0x253   :  { %2428 = vmax.xlane.f32.xlu1 %v2427_v9 }
 0x254   :  { %v2495_v18 = vmul.f32 1.442695, %v2467_v3  ;;  %v2430_v27 = vsel %vm2390_vm0, %v12014_v13, -inf }
 0x255   :  { %v2408_v29 = vpop.xlane.xlu1 %2407  ;;  %2431 = vmax.xlane.f32.xlu0 %v2430_v27 }
 0x256   :  { %10380 = vpow2.f32 %v2495_v18  ;;  %v2468_v30 = vsub.f32 %v11787_v49, %v2408_v29  ;;  %v1702_v49 = vadd.f32 %v1701_v35, %v11569_v53 }
 0x257   :  { %2542 = vadd.xlane.f32.xlu1 %v2541_v15 }
 0x258   :  { %v2497_v46 = vmul.f32 1.442695, %v2468_v30 }
 0x259   :  { %2545 = vadd.xlane.f32.xlu0 %v2544_v32 }
 0x25a   :  { %10382 = vpow2.f32 %v2497_v46 }
 0x260   :  { %v12027_v40 = vpop.eup %10380 }
 0x261   :  { %v2547_v41 = vsel %vm2390_vm0, %v12027_v40, 0.0 }
 0x262   :  { %2548 = vadd.xlane.f32.xlu1 %v2547_v41 }
 0x264   :  { %v12031_v38 = vpop.eup %10382 }
 0x265   :  { %v1742_v42 = vpop.f32.mrb[44].mxu0  ;;  %v2550_v43 = vsel %vm2390_vm0, %v12031_v38, 0.0 }
 0x266   :  { %v1743_v28 = vadd.f32 %v1742_v42, %v1702_v49  ;;  %v1783_v21 = vpop.f32.mrb[44].mxu1  ;;  %2551 = vadd.xlane.f32.xlu0 %v2550_v43  ;;  %v1744_v26 = vpop.f32.mrb[45].mxu0 }
 0x267   :  { %v1785_v12 = vpop.f32.mrb[45].mxu1  ;;  %v1745_v19 = vpop.f32.mrb[46].mxu0 }
 0x268   :  { %v1784_v5 = vadd.f32 %v1783_v21, %v1743_v28  ;;  %v1746_v51 = vadd.f32 %v1745_v19, %v1705_v44  ;;  %v1786_v61 = vpop.f32.mrb[46].mxu1  ;;  %v1747_v4 = vpop.f32.mrb[47].mxu0 }
 0x269   :  { %v1788_v16 = vpop.f32.mrb[47].mxu1 }
 0x26a   :  { %v1787_v47 = vadd.f32 %v1786_v61, %v1746_v51  ;;  %v12037_v35 = vadd.f32 %v9123_v2, %v1784_v5  ;;  %v2411_v44 = vpop.xlane.xlu1 %2410  ;;  %v9124_v51 = vld [vmem:[#allocation6 + $0x8] ss:$0 sm:$0xff] }
 0x26b   :  { %v2469_v26 = vsub.f32 %v11835_v14, %v2411_v44 }
 0x26c   :  { %v2433_v3 = vsel %vm2390_vm0, %v12037_v35, -inf  ;;  %v12041_v9 = vadd.f32 %v9123_v2, %v1787_v47 }
 0x26d   :  { %2434 = vmax.xlane.f32.xlu1 %v2433_v3  ;;  %v2499_v19 = vmul.f32 1.442695, %v2469_v26 }
 0x26e   :  { %v2436_v34 = vsel %vm2390_vm0, %v12041_v9, -inf  ;;  %v2414_v21 = vpop.xlane.xlu1 %2413 }
 0x26f   :  { %2437 = vmax.xlane.f32.xlu0 %v2436_v34  ;;  %v2470_v12 = vsub.f32 %v11842_v37, %v2414_v21  ;;  %10384 = vpow2.f32 %v2499_v19 }
 0x271   :  { %v2501_v2 = vmul.f32 1.442695, %v2470_v12 }
 0x273   :  { %10386 = vpow2.f32 %v2501_v2 }
 0x27d   :  { %v1824_v18 = vpop.f32.mrb[48].mxu0 }
 0x27e   :  { %v1825_v27 = vadd.f32 %v1824_v18, %v11569_v53  ;;  %v1865_v29 = vpop.f32.mrb[48].mxu1  ;;  %v1826_v30 = vpop.f32.mrb[49].mxu0 }
 0x27f   :  { %v1867_v15 = vpop.f32.mrb[49].mxu1  ;;  %v1827_v46 = vpop.f32.mrb[50].mxu0 }
 0x280   :  { %v1866_v32 = vadd.f32 %v1865_v29, %v1825_v27  ;;  %v1828_v41 = vadd.f32 %v1827_v46, %v11582_v62  ;;  %v1868_v49 = vpop.f32.mrb[50].mxu1  ;;  %v1829_v42 = vpop.f32.mrb[51].mxu0 }
 0x281   :  { %v1870_v43 = vpop.f32.mrb[51].mxu1 }
 0x282   :  { %v1869_v28 = vadd.f32 %v1868_v49, %v1828_v41  ;;  %v12056_v41 = vpop.eup %10384 }
 0x283   :  { %v12060_v42 = vpop.eup %10386 }
 0x284   :  { %v2556_v21 = vsel %vm2390_vm0, %v12060_v42, 0.0 }
 0x295   :  { %v1906_v5 = vpop.f32.mrb[52].mxu0 }
 0x296   :  { %v1907_v61 = vadd.f32 %v1906_v5, %v1866_v32  ;;  %v1947_v4 = vpop.f32.mrb[52].mxu1  ;;  %v1908_v16 = vpop.f32.mrb[53].mxu0 }
 0x297   :  { %v1949_v47 = vpop.f32.mrb[53].mxu1  ;;  %v1909_v3 = vpop.f32.mrb[54].mxu0  ;;  %v1948_v5 = vadd.f32 %v1947_v4, %v11569_v53 }
 0x298   :  { %v1910_v34 = vadd.f32 %v1909_v3, %v1869_v28  ;;  %v1950_v18 = vpop.f32.mrb[54].mxu1  ;;  %v1911_v27 = vpop.f32.mrb[55].mxu0  ;;  %v12049_v29 = vadd.f32 %v9124_v51, %v1907_v61 }
 0x299   :  { %v1952_v30 = vpop.f32.mrb[55].mxu1  ;;  %v2417_v14 = vpop.xlane.xlu1 %2416  ;;  %v1951_v16 = vadd.f32 %v1950_v18, %v11582_v62 }
 0x29a   :  { %v2471_v37 = vsub.f32 %v11926_v0, %v2417_v14  ;;  %v2439_v15 = vsel %vm2390_vm0, %v12049_v29, -inf  ;;  %v12054_v46 = vadd.f32 %v9124_v51, %v1910_v34  ;;  %v2553_v0 = vsel %vm2390_vm0, %v12056_v41, 0.0  ;;  %v9125_v14 = vld [vmem:[#allocation6 + $0x9] ss:$0 sm:$0xff] }
 0x29b   :  { %2440 = vmax.xlane.f32.xlu1 %v2439_v15 }
 0x29c   :  { %v2503_v32 = vmul.f32 1.442695, %v2471_v37  ;;  %v2442_v49 = vsel %vm2390_vm0, %v12054_v46, -inf }
 0x29d   :  { %v2420_v43 = vpop.xlane.xlu1 %2419  ;;  %2443 = vmax.xlane.f32.xlu0 %v2442_v49 }
 0x29e   :  { %10388 = vpow2.f32 %v2503_v32  ;;  %v2472_v44 = vsub.f32 %v11940_v20, %v2420_v43 }
 0x29f   :  { %2554 = vadd.xlane.f32.xlu1 %v2553_v0 }
 0x2a0   :  { %v2505_v28 = vmul.f32 1.442695, %v2472_v44 }
 0x2a1   :  { %2557 = vadd.xlane.f32.xlu0 %v2556_v21 }
 0x2a2   :  { %10390 = vpow2.f32 %v2505_v28 }
 0x2a7   :  { %v2537_v26 = vpop.xlane.xlu1 %2536 }
 0x2a8   :  { %v12067_v12 = vpop.eup %10388  ;;  %10392 = vrcp.f32 %v2537_v26 }
 0x2a9   :  { %v2559_v19 = vsel %vm2390_vm0, %v12067_v12, 0.0 }
 0x2aa   :  { %2560 = vadd.xlane.f32.xlu1 %v2559_v19 }
 0x2ab   :  { %v2540_v2 = vpop.xlane.xlu0 %2539 }
 0x2ac   :  { %v12071_v20 = vpop.eup %10390  ;;  %10394 = vrcp.f32 %v2540_v2 }
 0x2ad   :  { %v1988_v51 = vpop.f32.mrb[56].mxu0  ;;  %v2562_v61 = vsel %vm2390_vm0, %v12071_v20, 0.0 }
 0x2ae   :  { %v1989_v47 = vadd.f32 %v1988_v51, %v1948_v5  ;;  %v2029_v3 = vpop.f32.mrb[56].mxu1  ;;  %2563 = vadd.xlane.f32.xlu0 %v2562_v61  ;;  %v1990_v34 = vpop.f32.mrb[57].mxu0  ;;  %v15364_v61 = vld [vmem:[#allocation24_spill] sm:$0xff] }
 0x2af   :  { %v2031_v27 = vpop.f32.mrb[57].mxu1  ;;  %v1991_v30 = vpop.f32.mrb[58].mxu0 }
 0x2b0   :  { %v2030_v37 = vadd.f32 %v2029_v3, %v1989_v47  ;;  %v1992_v15 = vadd.f32 %v1991_v30, %v1951_v16  ;;  %v2032_v32 = vpop.f32.mrb[58].mxu1  ;;  %v1993_v49 = vpop.f32.mrb[59].mxu0  ;;  %v15366_v3 = vld [vmem:[#allocation28_spill] sm:$0xff]  ;;  %v15367_v27 = vld [vmem:[#allocation30_spill] sm:$0xff] }
 0x2b1   :  { %v2034_v43 = vpop.f32.mrb[59].mxu1 }
 0x2b2   :  { %v2033_v4 = vadd.f32 %v2032_v32, %v1992_v15  ;;  %v12077_v44 = vadd.f32 %v9125_v14, %v2030_v37  ;;  %v10393_v0 = vpop.eup %10392  ;;  %v2423_v16 = vpop.xlane.xlu1 %2422  ;;  %v9126_v32 = vld [vmem:[#allocation6 + $0xa] ss:$0 sm:$0xff] }
 0x2b3   :  { %v2631_v19 = vmul.f32 %v10393_v0, %v11963_v59  ;;  %v2473_v34 = vsub.f32 %v11982_v22, %v2423_v16 }
 0x2b4   :  { %v2445_v28 = vsel %vm2390_vm0, %v12077_v44, -inf  ;;  %v12081_v18 = vadd.f32 %v9125_v14, %v2033_v4  ;;  %v2426_v47 = vpop.xlane.xlu0 %2425 }
 0x2b5   :  { %2446 = vmax.xlane.f32.xlu1 %v2445_v28  ;;  %v2474_v30 = vsub.f32 %v11988_v50, %v2426_v47  ;;  %v2507_v14 = vmul.f32 1.442695, %v2473_v34 }
 0x2b6   :  { %v10395_v21 = vpop.eup %10394  ;;  %v2448_v26 = vsel %vm2390_vm0, %v12081_v18, -inf }
 0x2b7   :  { %v2632_v2 = vmul.f32 %v10395_v21, %v11970_v60  ;;  %2449 = vmax.xlane.f32.xlu0 %v2448_v26  ;;  %v15362_v60 = vld [vmem:[#allocation20_spill] sm:$0xff]  ;;  %v2509_v37 = vmul.f32 1.442695, %v2474_v30  ;;  %10396 = vpow2.f32 %v2507_v14 }
 0x2b9   :  { %v2655_v5 = vpack.c.bf16 %v2632_v2, %v2631_v19  ;;  %10398 = vpow2.f32 %v2509_v37 }
 0x2bb   :  { %9128 = vmatmul.mubr.msk.bf16.vlgmr.msra.gmra.mrb[72].mxu0 %vm2390_vm0, %v2655_v5  ;;  %9129 = vmatmul.mubr.msk.bf16.vlgmr.msra.gmra.mrb[72].mxu1 %vm2390_vm0, %v2655_v5 }
 0x2bc   :  { %2757 = vmatpush1.bf16.msra.mxu0 %v11199_v55  ;;  %2788 = vmatprep.mubr.bf16.mxu0 %v15361_v31 }
 0x2bd   :  { %2758 = vmatprep.subr.bf16.mxu0 %v11203_v57  ;;  %2803 = vmatpush1.bf16.msra.mxu1 %v11201_v56 }
 0x2be   :  { %2804 = vmatprep.subr.bf16.mxu1 %v11205_v58  ;;  %2834 = vmatprep.mubr.bf16.mxu1 %v15361_v31 }
 0x2c0   :  { %2759 = vmatpush1.bf16.msra.mxu0 %v11217_v6 }
 0x2c1   :  { %2760 = vmatprep.subr.bf16.mxu0 %v11221_v10  ;;  %2805 = vmatpush1.bf16.msra.mxu1 %v11219_v7 }
 0x2c2   :  { %2806 = vmatprep.subr.bf16.mxu1 %v11223_v11 }
 0x2c4   :  { %2761 = vmatpush1.bf16.msra.mxu0 %v11229_v23 }
 0x2c5   :  { %v2070_v55 = vpop.f32.mrb[60].mxu0  ;;  %2845 = vmatprep.subr.bf16.mxu0 %v11233_v25  ;;  %2807 = vmatpush1.bf16.msra.mxu1 %v11231_v24  ;;  %v15363_v25 = vld [vmem:[#allocation22_spill] sm:$0xff] }
 0x2c6   :  { %v2071_v56 = vadd.f32 %v2070_v55, %v11569_v53  ;;  %v2111_v57 = vpop.f32.mrb[60].mxu1  ;;  %v2072_v58 = vpop.f32.mrb[61].mxu0  ;;  %2888 = vmatprep.subr.bf16.mxu1 %v11238_v33  ;;  %v15365_v33 = vld [vmem:[#allocation26_spill] sm:$0xff] }
 0x2c7   :  { %9130 = vmatmul.mubr.msk.bf16.vlgmr.msra.gmra.mrb[76].mxu0 %vm2390_vm0, %v2655_v5  ;;  %v2113_v6 = vpop.f32.mrb[61].mxu1  ;;  %v2073_v10 = vpop.f32.mrb[62].mxu0 }
 0x2c8   :  { %v2112_v7 = vadd.f32 %v2111_v57, %v2071_v56  ;;  %v2074_v11 = vadd.f32 %v2073_v10, %v11582_v62  ;;  %v2114_v59 = vpop.f32.mrb[62].mxu1  ;;  %v2075_v23 = vpop.f32.mrb[63].mxu0  ;;  %2846 = vmatpush1.bf16.msra.mxu0 %v15362_v60  ;;  %2877 = vmatprep.mubr.bf16.mxu0 %v15361_v31 }
 0x2c9   :  { %v2116_v24 = vpop.f32.mrb[63].mxu1  ;;  %2847 = vmatprep.subr.bf16.mxu0 %v15363_v25  ;;  %v12122_v58 = vpop.eup %10396 }
 0x2ca   :  { %v2115_v51 = vadd.f32 %v2114_v59, %v2074_v11  ;;  %v12127_v11 = vpop.eup %10398  ;;  %v2565_v60 = vsel %vm2390_vm0, %v12122_v58, 0.0 }
 0x2cc   :  { %2848 = vmatpush1.bf16.msra.mxu0 %v15364_v61 }
 0x2cd   :  { %2849 = vmatprep.subr.bf16.mxu0 %v15365_v33 }
 0x2d0   :  { %2850 = vmatpush1.bf16.msra.mxu0 %v15366_v3 }
 0x2d1   :  { %2934 = vmatprep.subr.bf16.mxu0 %v15367_v27 }
 0x2dd   :  { %v2152_v15 = vpop.f32.mrb[64].mxu0 }
 0x2de   :  { %v2153_v49 = vadd.f32 %v2152_v15, %v2112_v7  ;;  %v2193_v43 = vpop.f32.mrb[64].mxu1  ;;  %v2154_v4 = vpop.f32.mrb[65].mxu0 }
 0x2df   :  { %v2195_v0 = vpop.f32.mrb[65].mxu1  ;;  %v2155_v28 = vpop.f32.mrb[66].mxu0  ;;  %v2194_v34 = vadd.f32 %v2193_v43, %v11569_v53 }
 0x2e0   :  { %v2156_v21 = vadd.f32 %v2155_v28, %v2115_v51  ;;  %v2196_v26 = vpop.f32.mrb[66].mxu1  ;;  %v2157_v19 = vpop.f32.mrb[67].mxu0  ;;  %v12115_v2 = vadd.f32 %v9126_v32, %v2153_v49 }
 0x2e1   :  { %v2198_v22 = vpop.f32.mrb[67].mxu1  ;;  %v2429_v5 = vpop.xlane.xlu1 %2428  ;;  %v2197_v37 = vadd.f32 %v2196_v26, %v11582_v62 }
 0x2e2   :  { %v2475_v50 = vsub.f32 %v12009_v8, %v2429_v5  ;;  %v2432_v55 = vpop.xlane.xlu0 %2431  ;;  %v2451_v56 = vsel %vm2390_vm0, %v12115_v2, -inf  ;;  %v12120_v57 = vadd.f32 %v9126_v32, %v2156_v21  ;;  %v9127_v21 = vld [vmem:[#allocation6 + $0xb] ss:$0 sm:$0xff]  ;;  %v15370_v5 = vld [vmem:[#allocation23_spill] sm:$0xff] }
 0x2e3   :  { %v2476_v6 = vsub.f32 %v12014_v13, %v2432_v55  ;;  %2452 = vmax.xlane.f32.xlu1 %v2451_v56  ;;  %v2568_v13 = vsel %vm2390_vm0, %v12127_v11, 0.0  ;;  %v15369_v22 = vld [vmem:[#allocation32_spill] sm:$0xff] }
 0x2e4   :  { %v2511_v10 = vmul.f32 1.442695, %v2475_v50  ;;  %v2454_v7 = vsel %vm2390_vm0, %v12120_v57, -inf  ;;  %v15371_v50 = vld [vmem:[#allocation34_spill] sm:$0xff] }
 0x2e5   :  { %v2513_v59 = vmul.f32 1.442695, %v2476_v6  ;;  %v2543_v23 = vpop.xlane.xlu1 %2542  ;;  %2455 = vmax.xlane.f32.xlu0 %v2454_v7 }
 0x2e6   :  { %10400 = vpow2.f32 %v2511_v10  ;;  %v2546_v8 = vpop.xlane.xlu0 %2545 }
 0x2e7   :  { %10402 = vpow2.f32 %v2513_v59  ;;  %2566 = vadd.xlane.f32.xlu1 %v2565_v60  ;;  %v15373_v60 = vld [vmem:[#allocation36_spill] sm:$0xff] }
 0x2e8   :  { %10404 = vrcp.f32 %v2543_v23 }
 0x2e9   :  { %10406 = vrcp.f32 %v2546_v8  ;;  %2569 = vadd.xlane.f32.xlu0 %v2568_v13  ;;  %v15372_v8 = vld [vmem:[#allocation25_spill] sm:$0xff] }
 0x2ef   :  { %v2549_v24 = vpop.xlane.xlu1 %2548 }
 0x2f0   :  { %v12133_v25 = vpop.eup %10400  ;;  %10408 = vrcp.f32 %v2549_v24 }
 0x2f1   :  { %v12135_v51 = vpop.eup %10402  ;;  %v2571_v61 = vsel %vm2390_vm0, %v12133_v25, 0.0 }
 0x2f2   :  { %v10405_v33 = vpop.eup %10404  ;;  %2572 = vadd.xlane.f32.xlu1 %v2571_v61  ;;  %v2574_v16 = vsel %vm2390_vm0, %v12135_v51, 0.0 }
 0x2f3   :  { %v10407_v47 = vpop.eup %10406  ;;  %v2552_v3 = vpop.xlane.xlu0 %2551  ;;  %2575 = vadd.xlane.f32.xlu0 %v2574_v16  ;;  %v2633_v27 = vmul.f32 %v10405_v33, %v12016_v17 }
 0x2f4   :  { %v2634_v30 = vmul.f32 %v10407_v47, %v12020_v54  ;;  %10410 = vrcp.f32 %v2552_v3  ;;  %v15368_v54 = vld [vmem:[#allocation21_spill] sm:$0xff] }
 0x2f5   :  { %v2234_v14 = vpop.f32.mrb[68].mxu0 }
 0x2f6   :  { %v2235_v15 = vadd.f32 %v2234_v14, %v2194_v34  ;;  %v2275_v32 = vpop.f32.mrb[68].mxu1  ;;  %v2236_v49 = vpop.f32.mrb[69].mxu0  ;;  %v2656_v4 = vpack.c.bf16 %v2634_v30, %v2633_v27  ;;  %v15375_v34 = vld [vmem:[#allocation38_spill] sm:$0xff]  ;;  %v15376_v27 = vld [vmem:[#allocation29_spill] sm:$0xff]  ;;  %v15378_v14 = vld [vmem:[#allocation31_spill] sm:$0xff] }
 0x2f7   :  { %v2277_v0 = vpop.f32.mrb[69].mxu1  ;;  %v2237_v28 = vpop.f32.mrb[70].mxu0 }
 0x2f8   :  { %v2276_v19 = vadd.f32 %v2275_v32, %v2235_v15  ;;  %9131 = vmatmul.mubr.msk.bf16.vlgmr.msra.gmra.mrb[76].mxu1 %vm2390_vm0, %v2656_v4  ;;  %9132 = vmatmul.mubr.msk.bf16.vlgmr.msra.gmra.mrb[80].mxu0 %vm2390_vm0, %v2656_v4  ;;  %v2238_v53 = vadd.f32 %v2237_v28, %v2197_v37  ;;  %v2278_v17 = vpop.f32.mrb[70].mxu1  ;;  %v2239_v43 = vpop.f32.mrb[71].mxu0  ;;  %v15379_v37 = vld [vmem:[#allocation42_spill] sm:$0xff]  ;;  %v15382_v15 = vld [vmem:[#allocation35_spill] sm:$0xff]  ;;  %v15384_v0 = vld [vmem:[#allocation37_spill] sm:$0xff] }
 0x2f9   :  { %2889 = vmatpush1.bf16.msra.mxu1 %v15368_v54  ;;  %2935 = vmatpush1.bf16.msra.mxu0 %v15369_v22  ;;  %v2280_v62 = vpop.f32.mrb[71].mxu1  ;;  %v15383_v32 = vld [vmem:[#allocation46_spill] sm:$0xff]  ;;  %v15385_v28 = vld [vmem:[#allocation48_spill] sm:$0xff]  ;;  %v15388_v43 = vld [vmem:[#allocation41_spill] sm:$0xff] }
 0x2fa   :  { %v2279_v26 = vadd.f32 %v2278_v17, %v2238_v53  ;;  %2890 = vmatprep.subr.bf16.mxu1 %v15370_v5  ;;  %2936 = vmatprep.subr.bf16.mxu0 %v15371_v50  ;;  %v2435_v55 = vpop.xlane.xlu1 %2434  ;;  %v12151_v56 = vadd.f32 %v9127_v21, %v2276_v19  ;;  %v10409_v10 = vpop.eup %10408  ;;  %v15389_v54 = vld [vmem:[#allocation52_spill] sm:$0xff]  ;;  %v15390_v22 = vld [vmem:[#allocation43_spill] sm:$0xff]  ;;  %v15391_v62 = vld [vmem:[#allocation54_spill] sm:$0xff] }
 0x2fb   :  { %v2477_v6 = vsub.f32 %v12037_v35, %v2435_v55  ;;  %2920 = vmatprep.mubr.bf16.mxu1 %v15361_v31  ;;  %2966 = vmatprep.mubr.bf16.mxu0 %v15361_v31  ;;  %v15374_v35 = vld [vmem:[#allocation27_spill] sm:$0xff]  ;;  %v2635_v16 = vmul.f32 %v10409_v10, %v12027_v40  ;;  %v15380_v40 = vld [vmem:[#allocation33_spill] sm:$0xff]  ;;  %v15393_v5 = vld [vmem:[#allocation56_spill] sm:$0xff] }
 0x2fc   :  { %v2438_v7 = vpop.xlane.xlu0 %2437  ;;  %v2457_v59 = vsel %vm2390_vm0, %v12151_v56, -inf  ;;  %v12158_v23 = vadd.f32 %v9127_v21, %v2279_v26  ;;  %v15387_v21 = vld [vmem:[#allocation50_spill] sm:$0xff]  ;;  %v15392_v26 = vld [vmem:[#allocation45_spill] sm:$0xff]  ;;  %v15394_v50 = vld [vmem:[#allocation47_spill] sm:$0xff] }
 0x2fd   :  { %2891 = vmatpush1.bf16.msra.mxu1 %v15372_v8  ;;  %2937 = vmatpush1.bf16.msra.mxu0 %v15373_v60  ;;  %v2515_v13 = vmul.f32 1.442695, %v2477_v6  ;;  %v2478_v24 = vsub.f32 %v12041_v9, %v2438_v7  ;;  %v15377_v9 = vld [vmem:[#allocation40_spill] sm:$0xff]  ;;  %v15395_v55 = vld [vmem:[#allocation58_spill] sm:$0xff]  ;;  %v15396_v6 = vld [vmem:[#allocation49_spill] sm:$0xff] }
 0x2fe   :  { %v10411_v61 = vpop.eup %10410  ;;  %2458 = vmax.xlane.f32.xlu1 %v2457_v59  ;;  %2892 = vmatprep.subr.bf16.mxu1 %v15374_v35  ;;  %v2460_v33 = vsel %vm2390_vm0, %v12158_v23, -inf  ;;  %v15397_v10 = vld [vmem:[#allocation60_spill] sm:$0xff]  ;;  %v15398_v7 = vld [vmem:[#allocation51_spill] sm:$0xff]  ;;  %v15399_v59 = vld [vmem:[#allocation62_spill] sm:$0xff] }
 0x2ff   :  { %v2636_v47 = vmul.f32 %v10411_v61, %v12031_v38  ;;  %10412 = vpow2.f32 %v2515_v13  ;;  %v2517_v3 = vmul.f32 1.442695, %v2478_v24  ;;  %2938 = vmatprep.subr.bf16.mxu0 %v15375_v34  ;;  %2461 = vmax.xlane.f32.xlu0 %v2460_v33  ;;  %v15381_v38 = vld [vmem:[#allocation44_spill] sm:$0xff]  ;;  %v15400_v8 = vld [vmem:[#allocation53_spill] sm:$0xff]  ;;  %v15402_v13 = vld [vmem:[#allocation55_spill] sm:$0xff] }
 0x300   :  { %v15401_v60 = vld [vmem:[#allocation64_spill] sm:$0xff]  ;;  %v15403_v24 = vld [vmem:[#allocation66_spill] sm:$0xff] }
 0x301   :  { %10414 = vpow2.f32 %v2517_v3  ;;  %2893 = vmatpush1.bf16.msra.mxu1 %v15376_v27  ;;  %2939 = vmatpush1.bf16.msra.mxu0 %v15377_v9  ;;  %v2657_v30 = vpack.c.bf16 %v2636_v47, %v2635_v16 }
 0x302   :  { %2977 = vmatprep.subr.bf16.mxu1 %v15378_v14  ;;  %3020 = vmatprep.subr.bf16.mxu0 %v15379_v37 }
 0x304   :  { %9133 = vmatmul.mubr.msk.bf16.vlgmr.msra.gmra.mrb[80].mxu1 %vm2390_vm0, %v2656_v4  ;;  %9134 = vmatmul.mubr.msk.bf16.vlgmr.msra.gmra.mrb[84].mxu0 %vm2390_vm0, %v2657_v30  ;;  %v15386_v4 = vld [vmem:[#allocation39_spill] sm:$0xff] }
 0x305   :  { %2978 = vmatpush1.bf16.msra.mxu1 %v15380_v40  ;;  %3021 = vmatpush1.bf16.msra.mxu0 %v15381_v38 }
 0x306   :  { %2979 = vmatprep.subr.bf16.mxu1 %v15382_v15  ;;  %3022 = vmatprep.subr.bf16.mxu0 %v15383_v32 }
 0x307   :  { %3009 = vmatprep.mubr.bf16.mxu1 %v15361_v31  ;;  %3052 = vmatprep.mubr.bf16.mxu0 %v15361_v31 }
 0x309   :  { %v12181_v49 = vpop.eup %10412  ;;  %2980 = vmatpush1.bf16.msra.mxu1 %v15384_v0  ;;  %3023 = vmatpush1.bf16.msra.mxu0 %v15385_v28  ;;  %v15404_v28 = vld [vmem:[#allocation57_spill] sm:$0xff] }
 0x30a   :  { %2981 = vmatprep.subr.bf16.mxu1 %v15386_v4  ;;  %3024 = vmatprep.subr.bf16.mxu0 %v15387_v21  ;;  %v2577_v19 = vsel %vm2390_vm0, %v12181_v49, 0.0  ;;  %v15405_v4 = vld [vmem:[#allocation68_spill] sm:$0xff]  ;;  %v15406_v21 = vld [vmem:[#allocation59_spill] sm:$0xff] }
 0x30b   :  { %v12189_v53 = vpop.eup %10414  ;;  %2578 = vadd.xlane.f32.xlu1 %v2577_v19  ;;  %v15407_v19 = vld [vmem:[#allocation70_spill] sm:$0xff] }
 0x30c   :  { %v2580_v17 = vsel %vm2390_vm0, %v12189_v53, 0.0 }
 0x30d   :  { %2982 = vmatpush1.bf16.msra.mxu1 %v15388_v43  ;;  %3025 = vmatpush1.bf16.msra.mxu0 %v15389_v54  ;;  %v15408_v43 = vld [vmem:[#allocation61_spill] sm:$0xff]  ;;  %v15409_v54 = vld [vmem:[#allocation72_spill] sm:$0xff] }
 0x30e   :  { %2581 = vadd.xlane.f32.xlu0 %v2580_v17  ;;  %3066 = vmatprep.subr.bf16.mxu1 %v15390_v22 }
 0x30f   :  { %3109 = vmatprep.subr.bf16.mxu0 %v15391_v62 }
 0x310   :  { %9135 = vmatmul.mubr.msk.bf16.vlgmr.msra.gmra.mrb[84].mxu1 %vm2390_vm0, %v2657_v30  ;;  %9136 = vmatmul.mubr.msk.bf16.vlgmr.msra.gmra.mrb[88].mxu0 %vm2390_vm0, %v2657_v30 }
 0x311   :  { %3067 = vmatpush1.bf16.msra.mxu1 %v15392_v26  ;;  %3110 = vmatpush1.bf16.msra.mxu0 %v15393_v5  ;;  %v15410_v5 = vld [vmem:[#allocation63_spill] sm:$0xff] }
 0x312   :  { %3068 = vmatprep.subr.bf16.mxu1 %v15394_v50  ;;  %3111 = vmatprep.subr.bf16.mxu0 %v15395_v55  ;;  %v15411_v50 = vld [vmem:[#allocation74_spill] sm:$0xff] }
 0x313   :  { %3098 = vmatprep.mubr.bf16.mxu1 %v15361_v31  ;;  %3141 = vmatprep.mubr.bf16.mxu0 %v15361_v31 }
 0x315   :  { %3069 = vmatpush1.bf16.msra.mxu1 %v15396_v6  ;;  %3112 = vmatpush1.bf16.msra.mxu0 %v15397_v10 }
 0x316   :  { %3070 = vmatprep.subr.bf16.mxu1 %v15398_v7  ;;  %3113 = vmatprep.subr.bf16.mxu0 %v15399_v59  ;;  %v15412_v7 = vld [vmem:[#allocation65_spill] sm:$0xff]  ;;  %v15413_v59 = vld [vmem:[#allocation76_spill] sm:$0xff] }
 0x319   :  { %3071 = vmatpush1.bf16.msra.mxu1 %v15400_v8  ;;  %3114 = vmatpush1.bf16.msra.mxu0 %v15401_v60  ;;  %v15414_v8 = vld [vmem:[#allocation67_spill] sm:$0xff]  ;;  %v15415_v60 = vld [vmem:[#allocation78_spill] sm:$0xff] }
 0x31a   :  { %3152 = vmatprep.subr.bf16.mxu1 %v15402_v13  ;;  %3198 = vmatprep.subr.bf16.mxu0 %v15403_v24  ;;  %v15416_v13 = vld [vmem:[#allocation69_spill] sm:$0xff]  ;;  %v15419_v24 = vld [vmem:[#allocation82_spill] sm:$0xff] }
 0x328   :  { %v2441_v61 = vpop.xlane.xlu1 %2440 }
 0x329   :  { %v2479_v35 = vsub.f32 %v12049_v29, %v2441_v61  ;;  %v15420_v61 = vld [vmem:[#allocation73_spill] sm:$0xff] }
 0x32a   :  { %v2444_v33 = vpop.xlane.xlu0 %2443 }
 0x32b   :  { %v2519_v16 = vmul.f32 1.442695, %v2479_v35  ;;  %v2480_v47 = vsub.f32 %v12054_v46, %v2444_v33  ;;  %v15421_v35 = vld [vmem:[#allocation84_spill] sm:$0xff] }
 0x32c   :  { %v2555_v3 = vpop.xlane.xlu1 %2554 }
 0x32d   :  { %10416 = vpow2.f32 %v2519_v16  ;;  %v2521_v34 = vmul.f32 1.442695, %v2480_v47  ;;  %v15422_v16 = vld [vmem:[#allocation75_spill] sm:$0xff]  ;;  %v15423_v47 = vld [vmem:[#allocation86_spill] sm:$0xff] }
 0x32e   :  { %10418 = vrcp.f32 %v2555_v3  ;;  %v2558_v27 = vpop.xlane.xlu0 %2557 }
 0x32f   :  { %10420 = vpow2.f32 %v2521_v34 }
 0x330   :  { %10422 = vrcp.f32 %v2558_v27  ;;  %v15424_v27 = vld [vmem:[#allocation77_spill] sm:$0xff] }
 0x337   :  { %v12215_v9 = vpop.eup %10416  ;;  %v2561_v30 = vpop.xlane.xlu1 %2560 }
 0x338   :  { %v10419_v14 = vpop.eup %10418  ;;  %v2583_v37 = vsel %vm2390_vm0, %v12215_v9, 0.0  ;;  %10424 = vrcp.f32 %v2561_v30  ;;  %v15425_v30 = vld [vmem:[#allocation88_spill] sm:$0xff] }
 0x339   :  { %v12219_v40 = vpop.eup %10420  ;;  %2584 = vadd.xlane.f32.xlu1 %v2583_v37  ;;  %v2637_v38 = vmul.f32 %v10419_v14, %v12056_v41  ;;  %v15426_v37 = vld [vmem:[#allocation79_spill] sm:$0xff] }
 0x33a   :  { %v10423_v29 = vpop.eup %10422  ;;  %v2586_v46 = vsel %vm2390_vm0, %v12219_v40, 0.0 }
 0x33b   :  { %v2638_v15 = vmul.f32 %v10423_v29, %v12060_v42  ;;  %v2564_v32 = vpop.xlane.xlu0 %2563  ;;  %2587 = vadd.xlane.f32.xlu0 %v2586_v46  ;;  %v15427_v29 = vld [vmem:[#allocation90_spill] sm:$0xff]  ;;  %v15428_v46 = vld [vmem:[#allocation81_spill] sm:$0xff] }
 0x33c   :  { %10426 = vrcp.f32 %v2564_v32  ;;  %v15431_v32 = vld [vmem:[#allocation94_spill] sm:$0xff] }
 0x33d   :  { %v2658_v0 = vpack.c.bf16 %v2638_v15, %v2637_v38  ;;  %v15429_v38 = vld [vmem:[#allocation92_spill] sm:$0xff]  ;;  %v15430_v15 = vld [vmem:[#allocation83_spill] sm:$0xff] }
 0x33f   :  { %9137 = vmatmul.mubr.msk.bf16.vlgmr.msra.gmra.mrb[88].mxu1 %vm2390_vm0, %v2658_v0  ;;  %9138 = vmatmul.mubr.msk.bf16.vlgmr.msra.gmra.mrb[92].mxu0 %vm2390_vm0, %v2658_v0 }
 0x340   :  { %3153 = vmatpush1.bf16.msra.mxu1 %v15404_v28  ;;  %3199 = vmatpush1.bf16.msra.mxu0 %v15405_v4  ;;  %v15433_v28 = vld [vmem:[#allocation96_spill] sm:$0xff]  ;;  %v15434_v4 = vld [vmem:[#allocation87_spill] sm:$0xff] }
 0x341   :  { %3154 = vmatprep.subr.bf16.mxu1 %v15406_v21  ;;  %3200 = vmatprep.subr.bf16.mxu0 %v15407_v19  ;;  %v15435_v21 = vld [vmem:[#allocation98_spill] sm:$0xff]  ;;  %v15436_v19 = vld [vmem:[#allocation89_spill] sm:$0xff] }
 0x342   :  { %v2447_v17 = vpop.xlane.xlu1 %2446  ;;  %3184 = vmatprep.mubr.bf16.mxu1 %v15361_v31  ;;  %3230 = vmatprep.mubr.bf16.mxu0 %v15361_v31  ;;  %v10425_v42 = vpop.eup %10424 }
 0x343   :  { %v2481_v41 = vsub.f32 %v12077_v44, %v2447_v17  ;;  %v2639_v6 = vmul.f32 %v10425_v42, %v12067_v12  ;;  %v15417_v12 = vld [vmem:[#allocation80_spill] sm:$0xff]  ;;  %v15439_v42 = vld [vmem:[#allocation102_spill] sm:$0xff] }
 0x344   :  { %3155 = vmatpush1.bf16.msra.mxu1 %v15408_v43  ;;  %3201 = vmatpush1.bf16.msra.mxu0 %v15409_v54  ;;  %v2450_v22 = vpop.xlane.xlu0 %2449  ;;  %v15437_v17 = vld [vmem:[#allocation100_spill] sm:$0xff] }
 0x345   :  { %v2523_v62 = vmul.f32 1.442695, %v2481_v41  ;;  %v2482_v26 = vsub.f32 %v12081_v18, %v2450_v22  ;;  %3156 = vmatprep.subr.bf16.mxu1 %v15410_v5  ;;  %3202 = vmatprep.subr.bf16.mxu0 %v15411_v50  ;;  %v15438_v41 = vld [vmem:[#allocation91_spill] sm:$0xff] }
 0x346   :  { %v10427_v55 = vpop.eup %10426 }
 0x347   :  { %v2640_v10 = vmul.f32 %v10427_v55, %v12071_v20  ;;  %10428 = vpow2.f32 %v2523_v62  ;;  %v2525_v44 = vmul.f32 1.442695, %v2482_v26  ;;  %v15418_v20 = vld [vmem:[#allocation71_spill] sm:$0xff] }
 0x348   :  { %3157 = vmatpush1.bf16.msra.mxu1 %v15412_v7  ;;  %3203 = vmatpush1.bf16.msra.mxu0 %v15413_v59 }
 0x349   :  { %10430 = vpow2.f32 %v2525_v44  ;;  %3241 = vmatprep.subr.bf16.mxu1 %v15414_v8  ;;  %3284 = vmatprep.subr.bf16.mxu0 %v15415_v60  ;;  %v2659_v18 = vpack.c.bf16 %v2640_v10, %v2639_v6 }
 0x34b   :  { %9139 = vmatmul.mubr.msk.bf16.vlgmr.msra.gmra.mrb[92].mxu1 %vm2390_vm0, %v2658_v0  ;;  %9140 = vmatmul.mubr.msk.bf16.vlgmr.msra.gmra.mrb[96].mxu0 %vm2390_vm0, %v2659_v18  ;;  %v15432_v0 = vld [vmem:[#allocation85_spill] sm:$0xff] }
 0x34c   :  { %3242 = vmatpush1.bf16.msra.mxu1 %v15416_v13  ;;  %3285 = vmatpush1.bf16.msra.mxu0 %v15417_v12  ;;  %v15440_v12 = vld [vmem:[#allocation93_spill] sm:$0xff] }
 0x34d   :  { %3243 = vmatprep.subr.bf16.mxu1 %v15418_v20  ;;  %3286 = vmatprep.subr.bf16.mxu0 %v15419_v24  ;;  %v15441_v20 = vld [vmem:[#allocation104_spill] sm:$0xff]  ;;  %v15442_v24 = vld [vmem:[#allocation95_spill] sm:$0xff] }
 0x34e   :  { %3273 = vmatprep.mubr.bf16.mxu1 %v15361_v31  ;;  %3316 = vmatprep.mubr.bf16.mxu0 %v15361_v31 }
 0x350   :  { %3244 = vmatpush1.bf16.msra.mxu1 %v15420_v61  ;;  %3287 = vmatpush1.bf16.msra.mxu0 %v15421_v35  ;;  %v15443_v61 = vld [vmem:[#allocation106_spill] sm:$0xff] }
 0x351   :  { %v12255_v33 = vpop.eup %10428  ;;  %3245 = vmatprep.subr.bf16.mxu1 %v15422_v16  ;;  %3288 = vmatprep.subr.bf16.mxu0 %v15423_v47  ;;  %v15444_v47 = vld [vmem:[#allocation97_spill] sm:$0xff] }
 0x352   :  { %v2589_v3 = vsel %vm2390_vm0, %v12255_v33, 0.0 }
 0x353   :  { %v12261_v34 = vpop.eup %10430  ;;  %2590 = vadd.xlane.f32.xlu1 %v2589_v3  ;;  %v15445_v3 = vld [vmem:[#allocation108_spill] sm:$0xff] }
 0x354   :  { %3246 = vmatpush1.bf16.msra.mxu1 %v15424_v27  ;;  %3289 = vmatpush1.bf16.msra.mxu0 %v15425_v30  ;;  %v2592_v14 = vsel %vm2390_vm0, %v12261_v34, 0.0 }
 0x355   :  { %2593 = vadd.xlane.f32.xlu0 %v2592_v14  ;;  %3330 = vmatprep.subr.bf16.mxu1 %v15426_v37 }
 0x356   :  { %3373 = vmatprep.subr.bf16.mxu0 %v15427_v29  ;;  %v15446_v29 = vld [vmem:[#allocation99_spill] sm:$0xff] }
 0x357   :  { %9141 = vmatmul.mubr.msk.bf16.vlgmr.msra.gmra.mrb[96].mxu1 %vm2390_vm0, %v2659_v18  ;;  %9142 = vmatmul.mubr.msk.bf16.vlgmr.msra.gmra.mrb[100].mxu0 %vm2390_vm0, %v2659_v18 }
 0x358   :  { %3331 = vmatpush1.bf16.msra.mxu1 %v15428_v46  ;;  %3374 = vmatpush1.bf16.msra.mxu0 %v15429_v38  ;;  %v15447_v46 = vld [vmem:[#allocation110_spill] sm:$0xff] }
 0x359   :  { %3332 = vmatprep.subr.bf16.mxu1 %v15430_v15  ;;  %3375 = vmatprep.subr.bf16.mxu0 %v15431_v32 }
 0x35a   :  { %3362 = vmatprep.mubr.bf16.mxu1 %v15361_v31  ;;  %3405 = vmatprep.mubr.bf16.mxu0 %v15361_v31 }
 0x35c   :  { %3333 = vmatpush1.bf16.msra.mxu1 %v15432_v0  ;;  %3376 = vmatpush1.bf16.msra.mxu0 %v15433_v28 }
 0x35d   :  { %3334 = vmatprep.subr.bf16.mxu1 %v15434_v4  ;;  %3377 = vmatprep.subr.bf16.mxu0 %v15435_v21  ;;  %v15452_v4 = vld [vmem:[#allocation101_spill] sm:$0xff] }
 0x360   :  { %3335 = vmatpush1.bf16.msra.mxu1 %v15436_v19  ;;  %3378 = vmatpush1.bf16.msra.mxu0 %v15437_v17 }
 0x361   :  { %3416 = vmatprep.subr.bf16.mxu1 %v15438_v41  ;;  %3462 = vmatprep.subr.bf16.mxu0 %v15439_v42 }
 0x370   :  { %v2453_v43 = vpop.xlane.xlu1 %2452 }
 0x371   :  { %v2483_v54 = vsub.f32 %v12115_v2, %v2453_v43  ;;  %v15458_v43 = vld [vmem:[#allocation103_spill] sm:$0xff] }
 0x372   :  { %v2456_v22 = vpop.xlane.xlu0 %2455 }
 0x373   :  { %v2527_v62 = vmul.f32 1.442695, %v2483_v54  ;;  %v2484_v26 = vsub.f32 %v12120_v57, %v2456_v22  ;;  %v15459_v54 = vld [vmem:[#allocation114_spill] sm:$0xff] }
 0x374   :  { %v2567_v5 = vpop.xlane.xlu1 %2566 }
 0x375   :  { %10432 = vpow2.f32 %v2527_v62  ;;  %v2529_v50 = vmul.f32 1.442695, %v2484_v26  ;;  %v15460_v26 = vld [vmem:[#allocation105_spill] sm:$0xff] }
 0x376   :  { %10434 = vrcp.f32 %v2567_v5  ;;  %v2570_v55 = vpop.xlane.xlu0 %2569  ;;  %v15461_v5 = vld [vmem:[#allocation116_spill] sm:$0xff] }
 0x377   :  { %10436 = vpow2.f32 %v2529_v50  ;;  %v15462_v50 = vld [vmem:[#allocation107_spill] sm:$0xff] }
 0x378   :  { %10438 = vrcp.f32 %v2570_v55  ;;  %v15463_v55 = vld [vmem:[#allocation118_spill] sm:$0xff] }
 0x37f   :  { %v12287_v6 = vpop.eup %10432  ;;  %v2573_v10 = vpop.xlane.xlu1 %2572 }
 0x380   :  { %v10435_v44 = vpop.eup %10434  ;;  %10440 = vrcp.f32 %v2573_v10  ;;  %v2576_v7 = vpop.xlane.xlu0 %2575  ;;  %v2595_v2 = vsel %vm2390_vm0, %v12287_v6, 0.0  ;;  %v15464_v10 = vld [vmem:[#allocation109_spill] sm:$0xff] }
 0x381   :  { %v12291_v59 = vpop.eup %10436  ;;  %10442 = vrcp.f32 %v2576_v7  ;;  %2596 = vadd.xlane.f32.xlu1 %v2595_v2  ;;  %v2641_v60 = vmul.f32 %v10435_v44, %v12122_v58  ;;  %v15465_v44 = vld [vmem:[#allocation120_spill] sm:$0xff]  ;;  %v15466_v2 = vld [vmem:[#allocation111_spill] sm:$0xff] }
 0x382   :  { %v10439_v57 = vpop.eup %10438  ;;  %v2598_v8 = vsel %vm2390_vm0, %v12291_v59, 0.0 }
 0x383   :  { %v2642_v18 = vmul.f32 %v10439_v57, %v12127_v11  ;;  %2599 = vadd.xlane.f32.xlu0 %v2598_v8  ;;  %v15467_v57 = vld [vmem:[#allocation122_spill] sm:$0xff] }
 0x385   :  { %v2660_v13 = vpack.c.bf16 %v2642_v18, %v2641_v60 }
 0x387   :  { %9143 = vmatmul.mubr.msk.bf16.vlgmr.msra.gmra.mrb[100].mxu1 %vm2390_vm0, %v2660_v13  ;;  %9144 = vmatmul.mubr.msk.bf16.vlgmr.msra.gmra.mrb[104].mxu0 %vm2390_vm0, %v2660_v13 }
 0x388   :  { %3417 = vmatpush1.bf16.msra.mxu1 %v15440_v12  ;;  %3463 = vmatpush1.bf16.msra.mxu0 %v15441_v20 }
 0x389   :  { %3418 = vmatprep.subr.bf16.mxu1 %v15442_v24  ;;  %3464 = vmatprep.subr.bf16.mxu0 %v15443_v61  ;;  %v15471_v61 = vld [vmem:[#allocation113_spill] sm:$0xff] }
 0x38a   :  { %v10441_v35 = vpop.eup %10440  ;;  %3448 = vmatprep.mubr.bf16.mxu1 %v15361_v31  ;;  %3494 = vmatprep.mubr.bf16.mxu0 %v15361_v31 }
 0x38b   :  { %v10443_v58 = vpop.eup %10442  ;;  %v2459_v11 = vpop.xlane.xlu1 %2458  ;;  %v2643_v14 = vmul.f32 %v10441_v35, %v12133_v25  ;;  %v15453_v25 = vld [vmem:[#allocation112_spill] sm:$0xff] }
 0x38c   :  { %v2644_v16 = vmul.f32 %v10443_v58, %v12135_v51  ;;  %3419 = vmatpush1.bf16.msra.mxu1 %v15444_v47  ;;  %3465 = vmatpush1.bf16.msra.mxu0 %v15445_v3  ;;  %v2485_v27 = vsub.f32 %v12151_v56, %v2459_v11  ;;  %v2462_v30 = vpop.xlane.xlu0 %2461  ;;  %v15472_v35 = vld [vmem:[#allocation124_spill] sm:$0xff]  ;;  %v15476_v3 = vld [vmem:[#allocation115_spill] sm:$0xff] }
 0x38d   :  { %v2486_v37 = vsub.f32 %v12158_v23, %v2462_v30  ;;  %3420 = vmatprep.subr.bf16.mxu1 %v15446_v29  ;;  %3466 = vmatprep.subr.bf16.mxu0 %v15447_v46  ;;  %v15478_v30 = vld [vmem:[#allocation117_spill] sm:$0xff]  ;;  %v15481_v29 = vld [vmem:[#allocation130_spill] sm:$0xff] }
 0x38e   :  { %v2531_v38 = vmul.f32 1.442695, %v2485_v27  ;;  %v12313_v15 = vpop.f32.mrb[72].mxu0  ;;  %v12315_v32 = vpop.f32.mrb[72].mxu1  ;;  %v2661_v56 = vpack.c.bf16 %v2644_v16, %v2643_v14  ;;  %v15477_v27 = vld [vmem:[#allocation126_spill] sm:$0xff]  ;;  %v15479_v14 = vld [vmem:[#allocation128_spill] sm:$0xff] }
 0x38f   :  { %15448 = vst [vmem:[#allocation20_spill] sm:$0xff] %v12313_v15  ;;  %15449 = vst [vmem:[#allocation22_spill] sm:$0xff] %v12315_v32  ;;  %v2533_v51 = vmul.f32 1.442695, %v2486_v37  ;;  %v12317_v0 = vpop.f32.mrb[73].mxu0  ;;  %v12319_v28 = vpop.f32.mrb[73].mxu1 }
 0x390   :  { %15450 = vst [vmem:[#allocation24_spill] sm:$0xff] %v12317_v0  ;;  %15451 = vst [vmem:[#allocation26_spill] sm:$0xff] %v12319_v28  ;;  %10444 = vpow2.f32 %v2531_v38  ;;  %3421 = vmatpush1.bf16.msra.mxu1 %v15452_v4  ;;  %3467 = vmatpush1.bf16.msra.mxu0 %v15453_v25  ;;  %v12323_v23 = vpop.f32.mrb[74].mxu0  ;;  %v12325_v21 = vpop.f32.mrb[74].mxu1  ;;  %v15480_v37 = vld [vmem:[#allocation119_spill] sm:$0xff]  ;;  %v15482_v38 = vld [vmem:[#allocation121_spill] sm:$0xff] }
 0x391   :  { %15454 = vst [vmem:[#allocation28_spill] sm:$0xff] %v12323_v23  ;;  %15455 = vst [vmem:[#allocation30_spill] sm:$0xff] %v12325_v21  ;;  %10446 = vpow2.f32 %v2533_v51  ;;  %v12329_v19 = vpack.c.bf16 %v12323_v23, %v12313_v15  ;;  %v12333_v17 = vpack.c.bf16 %v12325_v21, %v12315_v32  ;;  %v12335_v41 = vpop.f32.mrb[75].mxu0  ;;  %v12337_v42 = vpop.f32.mrb[75].mxu1  ;;  %3505 = vmatprep.subr.bf16.mxu1 %v15458_v43  ;;  %3548 = vmatprep.subr.bf16.mxu0 %v15459_v54  ;;  %v15483_v51 = vld [vmem:[#allocation132_spill] sm:$0xff]  ;;  %v15484_v4 = vld [vmem:[#allocation123_spill] sm:$0xff] }
 0x392   :  { %15456 = vst [vmem:[#allocation21_spill] sm:$0xff] %v12335_v41  ;;  %15457 = vst [vmem:[#allocation32_spill] sm:$0xff] %v12337_v42  ;;  %v12343_v22 = vpack.c.bf16 %v12335_v41, %v12317_v0  ;;  %v12347_v62 = vpack.c.bf16 %v12337_v42, %v12319_v28  ;;  %v10036_v21 = vld [vmem:[#allocation9 + $0x600] ss:$24 sps:$4 sm:$0xff]   ;;  %v10080_v28 = vld [vmem:[#allocation9 + $0x754] ss:$24 sps:$4 sm:$0xff]  }
 0x393   :  { %9145 = vmatmul.mubr.msk.bf16.vlgmr.msra.gmra.mrb[104].mxu1 %vm2390_vm0, %v2660_v13  ;;  %9146 = vmatmul.mubr.msk.bf16.vlgmr.msra.gmra.mrb[108].mxu0 %vm2390_vm0, %v2661_v56  ;;  %v10107_v15 = vld [vmem:[#allocation9 + $0x21c] ss:$24 sps:$4 sm:$0xff]  }
 0x394   :  { %3506 = vmatpush1.bf16.msra.mxu1 %v15460_v26  ;;  %3549 = vmatpush1.bf16.msra.mxu0 %v15461_v5  ;;  %v15486_v26 = vld [vmem:[#allocation125_spill] sm:$0xff]  ;;  %v15487_v5 = vld [vmem:[#allocation136_spill] sm:$0xff] }
 0x395   :  { %3507 = vmatprep.subr.bf16.mxu1 %v15462_v50  ;;  %3550 = vmatprep.subr.bf16.mxu0 %v15463_v55  ;;  %v15488_v50 = vld [vmem:[#allocation127_spill] sm:$0xff] }
 0x396   :  { %3537 = vmatprep.mubr.bf16.mxu1 %v15361_v31  ;;  %3580 = vmatprep.mubr.bf16.mxu0 %v15361_v31 }
 0x398   :  { %3508 = vmatpush1.bf16.msra.mxu1 %v15464_v10  ;;  %3551 = vmatpush1.bf16.msra.mxu0 %v15465_v44  ;;  %v2579_v7 = vpop.xlane.xlu1 %2578  ;;  %v15489_v10 = vld [vmem:[#allocation138_spill] sm:$0xff]  ;;  %v15490_v44 = vld [vmem:[#allocation129_spill] sm:$0xff] }
 0x399   :  { %3509 = vmatprep.subr.bf16.mxu1 %v15466_v2  ;;  %3552 = vmatprep.subr.bf16.mxu0 %v15467_v57  ;;  %10448 = vrcp.f32 %v2579_v7  ;;  %v15493_v7 = vld [vmem:[#allocation142_spill] sm:$0xff]  ;;  %v15494_v2 = vld [vmem:[#allocation133_spill] sm:$0xff]  ;;  %v15495_v57 = vld [vmem:[#allocation135_spill] sm:$0xff] }
 0x39a   :  { %v12361_v8 = vpop.eup %10444  ;;  %v12363_v60 = vpop.f32.mrb[76].mxu0 }
 0x39b   :  { %15468 = vst [vmem:[#allocation23_spill] sm:$0xff] %v12363_v60  ;;  %v12365_v18 = vpop.eup %10446  ;;  %v12367_v13 = vpop.f32.mrb[77].mxu0  ;;  %v2601_v20 = vsel %vm2390_vm0, %v12361_v8, 0.0 }
 0x39c   :  { %15469 = vst [vmem:[#allocation34_spill] sm:$0xff] %v12367_v13  ;;  %v2582_v12 = vpop.xlane.xlu0 %2581  ;;  %v12371_v24 = vpop.f32.mrb[78].mxu0  ;;  %3510 = vmatpush1.bf16.msra.mxu1 %v15471_v61  ;;  %3553 = vmatpush1.bf16.msra.mxu0 %v15472_v35  ;;  %v2604_v58 = vsel %vm2390_vm0, %v12365_v18, 0.0  ;;  %v15498_v61 = vld [vmem:[#allocation137_spill] sm:$0xff]  ;;  %v15499_v35 = vld [vmem:[#allocation139_spill] sm:$0xff] }
 0x39d   :  { %10450 = vrcp.f32 %v2582_v12  ;;  %15470 = vst [vmem:[#allocation25_spill] sm:$0xff] %v12371_v24  ;;  %v12379_v11 = vpack.c.bf16 %v12371_v24, %v12363_v60  ;;  %v12381_v16 = vpop.f32.mrb[79].mxu0  ;;  %2602 = vadd.xlane.f32.xlu1 %v2601_v20  ;;  %2605 = vadd.xlane.f32.xlu0 %v2604_v58  ;;  %v15496_v12 = vld [vmem:[#allocation144_spill] sm:$0xff]  ;;  %v15497_v20 = vld [vmem:[#allocation146_spill] sm:$0xff] }
 0x39e   :  { %15474 = vst [vmem:[#allocation27_spill] sm:$0xff] %v12381_v16  ;;  %v12385_v47 = vpack.c.bf16 %v12381_v16, %v12367_v13  ;;  %3594 = vmatprep.subr.bf16.mxu1 %v15476_v3  ;;  %3637 = vmatprep.subr.bf16.mxu0 %v15477_v27  ;;  %v15500_v58 = vld [vmem:[#allocation148_spill] sm:$0xff]  ;;  %v15501_v3 = vld [vmem:[#allocation150_spill] sm:$0xff]  ;;  %v15502_v27 = vld [vmem:[#allocation141_spill] sm:$0xff] }
 0x39f   :  { %15473 = vst [vmem:[#allocation36_spill] sm:$0xff] %v12379_v11  ;;  %9147 = vmatmul.mubr.msk.bf16.vlgmr.msra.gmra.mrb[108].mxu1 %vm2390_vm0, %v2661_v56  ;;  %9148 = vmatmul.mubr.msk.bf16.vlgmr.msra.gmra.mrb[112].mxu0 %vm2390_vm0, %v2661_v56  ;;  %v15485_v56 = vld [vmem:[#allocation134_spill] sm:$0xff] }
 0x3a0   :  { %15475 = vst [vmem:[#allocation38_spill] sm:$0xff] %v12385_v47  ;;  %3595 = vmatpush1.bf16.msra.mxu1 %v15478_v30  ;;  %3638 = vmatpush1.bf16.msra.mxu0 %v15479_v14  ;;  %v15503_v30 = vld [vmem:[#allocation143_spill] sm:$0xff]  ;;  %v15504_v14 = vld [vmem:[#allocation145_spill] sm:$0xff] }
 0x3a1   :  { %3596 = vmatprep.subr.bf16.mxu1 %v15480_v37  ;;  %3639 = vmatprep.subr.bf16.mxu0 %v15481_v29  ;;  %v15505_v37 = vld [vmem:[#allocation147_spill] sm:$0xff]  ;;  %v15506_v29 = vld [vmem:[#allocation149_spill] sm:$0xff] }
 0x3a2   :  { %3626 = vmatprep.mubr.bf16.mxu1 %v15361_v31  ;;  %3669 = vmatprep.mubr.bf16.mxu0 %v15361_v31  ;;  %v10021_v24 = vld [vmem:[#allocation9 + $0x240] ss:$24 sps:$4 sm:$0xff]   ;;  %v10074_v60 = vld [vmem:[#allocation9 + $0x724] ss:$24 sps:$4 sm:$0xff]  }
 0x3a3   :  { %v10449_v46 = vpop.eup %10448 }
 0x3a4   :  { %3597 = vmatpush1.bf16.msra.mxu1 %v15482_v38  ;;  %3640 = vmatpush1.bf16.msra.mxu0 %v15483_v51  ;;  %v2645_v43 = vmul.f32 %v10449_v46, %v12181_v49  ;;  %v15491_v49 = vld [vmem:[#allocation131_spill] sm:$0xff] }
 0x3a5   :  { %3598 = vmatprep.subr.bf16.mxu1 %v15484_v4  ;;  %3641 = vmatprep.subr.bf16.mxu0 %v15485_v56  ;;  %v15507_v46 = vld [vmem:[#allocation151_spill] sm:$0xff] }
 0x3a7   :  { %v10451_v25 = vpop.eup %10450 }
 0x3a8   :  { %v2646_v54 = vmul.f32 %v10451_v25, %v12189_v53  ;;  %3599 = vmatpush1.bf16.msra.mxu1 %v15486_v26  ;;  %3642 = vmatpush1.bf16.msra.mxu0 %v15487_v5  ;;  %v15492_v53 = vld [vmem:[#allocation140_spill] sm:$0xff] }
 0x3a9   :  { %3680 = vmatprep.subr.bf16.mxu1 %v15488_v50  ;;  %3726 = vmatprep.subr.bf16.mxu0 %v15489_v10 }
 0x3aa   :  { %v2662_v55 = vpack.c.bf16 %v2646_v54, %v2645_v43 }
 0x3ac   :  { %9149 = vmatmul.mubr.msk.bf16.vlgmr.msra.gmra.mrb[112].mxu1 %vm2390_vm0, %v2662_v55  ;;  %9150 = vmatmul.mubr.msk.bf16.vlgmr.msra.gmra.mrb[116].mxu0 %vm2390_vm0, %v2662_v55 }
 0x3ad   :  { %3681 = vmatpush1.bf16.msra.mxu1 %v15490_v44  ;;  %3712 = vmatprep.mubr.bf16.mxu1 %v15361_v31 }
 0x3ae   :  { %3682 = vmatprep.subr.bf16.mxu1 %v15491_v49  ;;  %3727 = vmatpush1.bf16.msra.mxu0 %v15492_v53 }
 0x3af   :  { %3728 = vmatprep.subr.bf16.mxu0 %v15493_v7  ;;  %3758 = vmatprep.mubr.bf16.mxu0 %v15361_v31 }
 0x3b1   :  { %3683 = vmatpush1.bf16.msra.mxu1 %v15494_v2 }
 0x3b2   :  { %3684 = vmatprep.subr.bf16.mxu1 %v15495_v57  ;;  %3729 = vmatpush1.bf16.msra.mxu0 %v15496_v12 }
 0x3b3   :  { %3730 = vmatprep.subr.bf16.mxu0 %v15497_v20 }
 0x3b5   :  { %3685 = vmatpush1.bf16.msra.mxu1 %v15498_v61 }
 0x3b6   :  { %3769 = vmatprep.subr.bf16.mxu1 %v15499_v35  ;;  %3731 = vmatpush1.bf16.msra.mxu0 %v15500_v58 }
 0x3b7   :  { %3812 = vmatprep.subr.bf16.mxu0 %v15501_v3 }
 0x3b8   :  { %9151 = vmatmul.mubr.msk.bf16.vlgmr.msra.gmra.mrb[116].mxu1 %vm2390_vm0, %v2662_v55 }
 0x3b9   :  { %3770 = vmatpush1.bf16.msra.mxu1 %v15502_v27  ;;  %3801 = vmatprep.mubr.bf16.mxu1 %v15361_v31 }
 0x3ba   :  { %3771 = vmatprep.subr.bf16.mxu1 %v15503_v30 }
 0x3bd   :  { %3772 = vmatpush1.bf16.msra.mxu1 %v15504_v14 }
 0x3be   :  { %3773 = vmatprep.subr.bf16.mxu1 %v15505_v37 }
 0x3c1   :  { %3774 = vmatpush1.bf16.msra.mxu1 %v15506_v29  ;;  %v15525_v29 = vld [vmem:[#allocation154_spill] sm:$0xff] }
 0x3c2   :  { %3858 = vmatprep.subr.bf16.mxu1 %v15507_v46  ;;  %v15526_v46 = vld [vmem:[#allocation153_spill] sm:$0xff] }
 0x3c6   :  { %v2585_v38 = vpop.xlane.xlu1 %2584 }
 0x3c7   :  { %10452 = vrcp.f32 %v2585_v38 }
 0x3c8   :  { %v2588_v51 = vpop.xlane.xlu0 %2587 }
 0x3c9   :  { %10454 = vrcp.f32 %v2588_v51 }
 0x3cb   :  { %v12431_v4 = vpop.f32.mrb[76].mxu1  ;;  %v12433_v56 = vpop.f32.mrb[80].mxu0 }
 0x3cc   :  { %15508 = vst [vmem:[#allocation29_spill] sm:$0xff] %v12431_v4  ;;  %15509 = vst [vmem:[#allocation40_spill] sm:$0xff] %v12433_v56  ;;  %v12435_v25 = vpop.f32.mrb[77].mxu1  ;;  %v12437_v43 = vpop.f32.mrb[81].mxu0 }
 0x3cd   :  { %15510 = vst [vmem:[#allocation31_spill] sm:$0xff] %v12435_v25  ;;  %15511 = vst [vmem:[#allocation42_spill] sm:$0xff] %v12437_v43  ;;  %v12439_v54 = vpop.f32.mrb[78].mxu1  ;;  %v12441_v26 = vpop.f32.mrb[82].mxu0 }
 0x3ce   :  { %15512 = vst [vmem:[#allocation33_spill] sm:$0xff] %v12439_v54  ;;  %15513 = vst [vmem:[#allocation44_spill] sm:$0xff] %v12441_v26  ;;  %v12445_v5 = vpack.c.bf16 %v12439_v54, %v12431_v4  ;;  %v12449_v50 = vpack.c.bf16 %v12441_v26, %v12433_v56  ;;  %v12451_v55 = vpop.f32.mrb[79].mxu1  ;;  %v12453_v10 = vpop.f32.mrb[83].mxu0  ;;  %v15550_v26 = vld [vmem:[#allocation174_spill] sm:$0xff] }
 0x3cf   :  { %15514 = vst [vmem:[#allocation35_spill] sm:$0xff] %v12451_v55  ;;  %15515 = vst [vmem:[#allocation46_spill] sm:$0xff] %v12453_v10  ;;  %v12457_v44 = vpack.c.bf16 %v12451_v55, %v12435_v25  ;;  %v12461_v49 = vpack.c.bf16 %v12453_v10, %v12437_v43  ;;  %v10003_v56 = vld [vmem:[#allocation9 + $0x1b0] ss:$24 sps:$4 sm:$0xff]   ;;  %v10017_v4 = vld [vmem:[#allocation9 + $0x214] ss:$24 sps:$4 sm:$0xff]  }
 0x3d1   :  { %v10453_v53 = vpop.eup %10452 }
 0x3d2   :  { %v2647_v2 = vmul.f32 %v10453_v53, %v12215_v9  ;;  %v15522_v9 = vld [vmem:[#allocation152_spill] sm:$0xff]  ;;  %v15527_v53 = vld [vmem:[#allocation155_spill] sm:$0xff] }
 0x3d3   :  { %v10455_v7 = vpop.eup %10454 }
 0x3d4   :  { %v2648_v57 = vmul.f32 %v10455_v7, %v12219_v40  ;;  %v15528_v7 = vld [vmem:[#allocation156_spill] sm:$0xff] }
 0x3d6   :  { %v2663_v12 = vpack.c.bf16 %v2648_v57, %v2647_v2  ;;  %v15529_v2 = vld [vmem:[#allocation158_spill] sm:$0xff]  ;;  %v15530_v57 = vld [vmem:[#allocation157_spill] sm:$0xff] }
 0x3d7   :  { %v12465_v20 = vpop.f32.mrb[80].mxu1  ;;  %v12467_v61 = vpop.f32.mrb[84].mxu0 }
 0x3d8   :  { %15516 = vst [vmem:[#allocation37_spill] sm:$0xff] %v12465_v20  ;;  %15517 = vst [vmem:[#allocation48_spill] sm:$0xff] %v12467_v61  ;;  %v12469_v35 = vpop.f32.mrb[81].mxu1  ;;  %v12471_v58 = vpop.f32.mrb[85].mxu0  ;;  %9152 = vmatmul.mubr.msk.bf16.vlgmr.msra.gmra.mrb[120].mxu0 %vm2390_vm0, %v2663_v12  ;;  %9153 = vmatmul.mubr.msk.bf16.vlgmr.msra.gmra.mrb[120].mxu1 %vm2390_vm0, %v2663_v12 }
 0x3d9   :  { %15518 = vst [vmem:[#allocation39_spill] sm:$0xff] %v12469_v35  ;;  %15519 = vst [vmem:[#allocation50_spill] sm:$0xff] %v12471_v58  ;;  %v12475_v3 = vpop.f32.mrb[82].mxu1  ;;  %v12477_v27 = vpop.f32.mrb[86].mxu0  ;;  %3813 = vmatpush1.bf16.msra.mxu0 %v15522_v9  ;;  %3844 = vmatprep.mubr.bf16.mxu0 %v15361_v31  ;;  %v15531_v9 = vld [vmem:[#allocation159_spill] sm:$0xff] }
 0x3da   :  { %15520 = vst [vmem:[#allocation41_spill] sm:$0xff] %v12475_v3  ;;  %15521 = vst [vmem:[#allocation52_spill] sm:$0xff] %v12477_v27  ;;  %v12483_v40 = vpack.c.bf16 %v12475_v3, %v12465_v20  ;;  %v12485_v30 = vpop.f32.mrb[83].mxu1  ;;  %v12489_v14 = vpack.c.bf16 %v12477_v27, %v12467_v61  ;;  %v12491_v37 = vpop.f32.mrb[87].mxu0  ;;  %3814 = vmatprep.subr.bf16.mxu0 %v15525_v29  ;;  %3859 = vmatpush1.bf16.msra.mxu1 %v15526_v46  ;;  %v15532_v46 = vld [vmem:[#allocation160_spill] sm:$0xff]  ;;  %v15533_v61 = vld [vmem:[#allocation162_spill] sm:$0xff] }
 0x3db   :  { %15523 = vst [vmem:[#allocation43_spill] sm:$0xff] %v12485_v30  ;;  %15524 = vst [vmem:[#allocation54_spill] sm:$0xff] %v12491_v37  ;;  %v12497_v38 = vpack.c.bf16 %v12485_v30, %v12469_v35  ;;  %v12501_v51 = vpack.c.bf16 %v12491_v37, %v12471_v58  ;;  %3860 = vmatprep.subr.bf16.mxu1 %v15527_v53  ;;  %3890 = vmatprep.mubr.bf16.mxu1 %v15361_v31  ;;  %v15534_v37 = vld [vmem:[#allocation161_spill] sm:$0xff]  ;;  %v15549_v3 = vld [vmem:[#allocation172_spill] sm:$0xff] }
 0x3dd   :  { %3815 = vmatpush1.bf16.msra.mxu0 %v15528_v7  ;;  %v15537_v7 = vld [vmem:[#allocation163_spill] sm:$0xff] }
 0x3de   :  { %3816 = vmatprep.subr.bf16.mxu0 %v15529_v2  ;;  %3861 = vmatpush1.bf16.msra.mxu1 %v15530_v57 }
 0x3df   :  { %3862 = vmatprep.subr.bf16.mxu1 %v15531_v9 }
 0x3e0   :  { %v2591_v29 = vpop.xlane.xlu1 %2590 }
 0x3e1   :  { %3817 = vmatpush1.bf16.msra.mxu0 %v15532_v46  ;;  %10456 = vrcp.f32 %v2591_v29 }
 0x3e2   :  { %v2594_v27 = vpop.xlane.xlu0 %2593  ;;  %3901 = vmatprep.subr.bf16.mxu0 %v15533_v61  ;;  %3863 = vmatpush1.bf16.msra.mxu1 %v15534_v37  ;;  %v15542_v61 = vld [vmem:[#allocation164_spill] sm:$0xff] }
 0x3e3   :  { %v12512_v53 = vpop.f32.mrb[84].mxu1  ;;  %v12514_v58 = vpop.f32.mrb[88].mxu0  ;;  %10458 = vrcp.f32 %v2594_v27  ;;  %3944 = vmatprep.subr.bf16.mxu1 %v15537_v7 }
 0x3e4   :  { %15535 = vst [vmem:[#allocation45_spill] sm:$0xff] %v12512_v53  ;;  %15536 = vst [vmem:[#allocation56_spill] sm:$0xff] %v12514_v58  ;;  %v12517_v2 = vpop.f32.mrb[85].mxu1  ;;  %v12519_v57 = vpop.f32.mrb[89].mxu0  ;;  %9154 = vmatmul.mubr.msk.bf16.vlgmr.msra.gmra.mrb[124].mxu0 %vm2390_vm0, %v2663_v12  ;;  %v15546_v12 = vld [vmem:[#allocation166_spill] sm:$0xff] }
 0x3e5   :  { %15538 = vst [vmem:[#allocation47_spill] sm:$0xff] %v12517_v2  ;;  %15539 = vst [vmem:[#allocation58_spill] sm:$0xff] %v12519_v57  ;;  %v12522_v9 = vpop.f32.mrb[86].mxu1  ;;  %v12524_v29 = vpop.f32.mrb[90].mxu0  ;;  %3902 = vmatpush1.bf16.msra.mxu0 %v15542_v61  ;;  %3933 = vmatprep.mubr.bf16.mxu0 %v15361_v31 }
 0x3e6   :  { %15540 = vst [vmem:[#allocation49_spill] sm:$0xff] %v12522_v9  ;;  %15541 = vst [vmem:[#allocation60_spill] sm:$0xff] %v12524_v29  ;;  %v12530_v37 = vpack.c.bf16 %v12522_v9, %v12512_v53  ;;  %v12534_v27 = vpack.c.bf16 %v12524_v29, %v12514_v58  ;;  %v12536_v46 = vpop.f32.mrb[87].mxu1  ;;  %v12538_v7 = vpop.f32.mrb[91].mxu0  ;;  %3903 = vmatprep.subr.bf16.mxu0 %v15546_v12  ;;  %v15547_v9 = vld [vmem:[#allocation168_spill] sm:$0xff]  ;;  %v15548_v53 = vld [vmem:[#allocation170_spill] sm:$0xff] }
 0x3e7   :  { %15544 = vst [vmem:[#allocation62_spill] sm:$0xff] %v12536_v46  ;;  %15545 = vst [vmem:[#allocation53_spill] sm:$0xff] %v12538_v7  ;;  %v12543_v30 = vpack.c.bf16 %v12536_v46, %v12517_v2  ;;  %v12547_v61 = vpack.c.bf16 %v12538_v7, %v12519_v57  ;;  %v15551_v7 = vld [vmem:[#allocation165_spill] sm:$0xff] }
 0x3e8   :  { %15543 = vst [vmem:[#allocation51_spill] sm:$0xff] %v12534_v27 }
 0x3e9   :  { %3904 = vmatpush1.bf16.msra.mxu0 %v15547_v9  ;;  %v15553_v9 = vld [vmem:[#allocation176_spill] sm:$0xff] }
 0x3ea   :  { %3905 = vmatprep.subr.bf16.mxu0 %v15548_v53  ;;  %v15552_v53 = vld [vmem:[#allocation167_spill] sm:$0xff] }
 0x3eb   :  { %v10457_v29 = vpop.eup %10456 }
 0x3ec   :  { %v2649_v10 = vmul.f32 %v10457_v29, %v12255_v33  ;;  %v15555_v33 = vld [vmem:[#allocation169_spill] sm:$0xff]  ;;  %v15560_v29 = vld [vmem:[#allocation175_spill] sm:$0xff] }
 0x3ed   :  { %v10459_v58 = vpop.eup %10458  ;;  %3906 = vmatpush1.bf16.msra.mxu0 %v15549_v3  ;;  %v15554_v3 = vld [vmem:[#allocation178_spill] sm:$0xff] }
 0x3ee   :  { %v2650_v12 = vmul.f32 %v10459_v58, %v12261_v34  ;;  %3990 = vmatprep.subr.bf16.mxu0 %v15550_v26  ;;  %v15556_v34 = vld [vmem:[#allocation171_spill] sm:$0xff]  ;;  %v15557_v26 = vld [vmem:[#allocation180_spill] sm:$0xff]  ;;  %v15559_v58 = vld [vmem:[#allocation173_spill] sm:$0xff] }
 0x3f0   :  { %v2664_v46 = vpack.c.bf16 %v2650_v12, %v2649_v10  ;;  %v15558_v10 = vld [vmem:[#allocation182_spill] sm:$0xff] }
 0x3f1   :  { %v15562_v12 = vld [vmem:[#allocation186_spill] sm:$0xff] }
 0x3f2   :  { %9155 = vmatmul.mubr.msk.bf16.vlgmr.msra.gmra.mrb[124].mxu1 %vm2390_vm0, %v2664_v46  ;;  %9156 = vmatmul.mubr.msk.bf16.vlgmr.msra.gmra.mrb[128].mxu0 %vm2390_vm0, %v2664_v46 }
 0x3f3   :  { %3945 = vmatpush1.bf16.msra.mxu1 %v15551_v7  ;;  %3976 = vmatprep.mubr.bf16.mxu1 %v15361_v31  ;;  %v15561_v7 = vld [vmem:[#allocation184_spill] sm:$0xff] }
 0x3f4   :  { %3946 = vmatprep.subr.bf16.mxu1 %v15552_v53  ;;  %3991 = vmatpush1.bf16.msra.mxu0 %v15553_v9  ;;  %v15563_v53 = vld [vmem:[#allocation177_spill] sm:$0xff]  ;;  %v15564_v9 = vld [vmem:[#allocation179_spill] sm:$0xff] }
 0x3f5   :  { %3992 = vmatprep.subr.bf16.mxu0 %v15554_v3  ;;  %4022 = vmatprep.mubr.bf16.mxu0 %v15361_v31  ;;  %v15565_v3 = vld [vmem:[#allocation181_spill] sm:$0xff] }
 0x3f7   :  { %3947 = vmatpush1.bf16.msra.mxu1 %v15555_v33  ;;  %v15566_v33 = vld [vmem:[#allocation183_spill] sm:$0xff] }
 0x3f8   :  { %3948 = vmatprep.subr.bf16.mxu1 %v15556_v34  ;;  %3993 = vmatpush1.bf16.msra.mxu0 %v15557_v26  ;;  %v15567_v34 = vld [vmem:[#allocation185_spill] sm:$0xff]  ;;  %v15568_v26 = vld [vmem:[#allocation187_spill] sm:$0xff] }
 0x3f9   :  { %3994 = vmatprep.subr.bf16.mxu0 %v15558_v10 }
 0x3fb   :  { %3949 = vmatpush1.bf16.msra.mxu1 %v15559_v58 }
 0x3fc   :  { %4033 = vmatprep.subr.bf16.mxu1 %v15560_v29  ;;  %3995 = vmatpush1.bf16.msra.mxu0 %v15561_v7 }
 0x3fd   :  { %4076 = vmatprep.subr.bf16.mxu0 %v15562_v12 }
 0x3fe   :  { %9157 = vmatmul.mubr.msk.bf16.vlgmr.msra.gmra.mrb[128].mxu1 %vm2390_vm0, %v2664_v46 }
 0x3ff   :  { %4034 = vmatpush1.bf16.msra.mxu1 %v15563_v53  ;;  %4065 = vmatprep.mubr.bf16.mxu1 %v15361_v31 }
 0x400   :  { %4035 = vmatprep.subr.bf16.mxu1 %v15564_v9 }
 0x403   :  { %4036 = vmatpush1.bf16.msra.mxu1 %v15565_v3 }
 0x404   :  { %4037 = vmatprep.subr.bf16.mxu1 %v15566_v33 }
 0x407   :  { %4038 = vmatpush1.bf16.msra.mxu1 %v15567_v34 }
 0x408   :  { %4122 = vmatprep.subr.bf16.mxu1 %v15568_v26 }
 0x40e   :  { %v2597_v10 = vpop.xlane.xlu1 %2596 }
 0x40f   :  { %10460 = vrcp.f32 %v2597_v10 }
 0x410   :  { %v2600_v58 = vpop.xlane.xlu0 %2599 }
 0x411   :  { %10462 = vrcp.f32 %v2600_v58 }
 0x412   :  { %v12579_v29 = vpop.f32.mrb[88].mxu1  ;;  %v12581_v46 = vpop.f32.mrb[92].mxu0 }
 0x413   :  { %15569 = vst [vmem:[#allocation64_spill] sm:$0xff] %v12579_v29  ;;  %15570 = vst [vmem:[#allocation55_spill] sm:$0xff] %v12581_v46  ;;  %v12583_v7 = vpop.f32.mrb[89].mxu1  ;;  %v12585_v12 = vpop.f32.mrb[93].mxu0 }
 0x414   :  { %15571 = vst [vmem:[#allocation66_spill] sm:$0xff] %v12583_v7  ;;  %15572 = vst [vmem:[#allocation57_spill] sm:$0xff] %v12585_v12  ;;  %v12587_v53 = vpop.f32.mrb[90].mxu1  ;;  %v12589_v9 = vpop.f32.mrb[94].mxu0 }
 0x415   :  { %15573 = vst [vmem:[#allocation68_spill] sm:$0xff] %v12587_v53  ;;  %15574 = vst [vmem:[#allocation59_spill] sm:$0xff] %v12589_v9  ;;  %v12593_v3 = vpack.c.bf16 %v12587_v53, %v12579_v29  ;;  %v12597_v33 = vpack.c.bf16 %v12589_v9, %v12581_v46  ;;  %v12599_v34 = vpop.f32.mrb[91].mxu1  ;;  %v12601_v26 = vpop.f32.mrb[95].mxu0 }
 0x416   :  { %15576 = vst [vmem:[#allocation61_spill] sm:$0xff] %v12599_v34  ;;  %15577 = vst [vmem:[#allocation72_spill] sm:$0xff] %v12601_v26  ;;  %v12605_v10 = vpack.c.bf16 %v12599_v34, %v12583_v7  ;;  %v12609_v58 = vpack.c.bf16 %v12601_v26, %v12585_v12  ;;  %v15589_v26 = vld [vmem:[#allocation190_spill] sm:$0xff]  ;;  %v15594_v12 = vld [vmem:[#allocation193_spill] sm:$0xff] }
 0x417   :  { %15575 = vst [vmem:[#allocation70_spill] sm:$0xff] %v12597_v33 }
 0x418   :  { %15578 = vst [vmem:[#allocation63_spill] sm:$0xff] %v12609_v58 }
 0x419   :  { %v10461_v57 = vpop.eup %10460 }
 0x41a   :  { %v2651_v53 = vmul.f32 %v10461_v57, %v12287_v6 }
 0x41b   :  { %v10463_v2 = vpop.eup %10462 }
 0x41c   :  { %v2652_v29 = vmul.f32 %v10463_v2, %v12291_v59 }
 0x41e   :  { %v12613_v9 = vpop.f32.mrb[92].mxu1  ;;  %v12615_v46 = vpop.f32.mrb[96].mxu0  ;;  %v2665_v55 = vpack.c.bf16 %v2652_v29, %v2651_v53  ;;  %v15587_v29 = vld [vmem:[#allocation188_spill] sm:$0xff] }
 0x41f   :  { %15579 = vst [vmem:[#allocation74_spill] sm:$0xff] %v12613_v9  ;;  %15580 = vst [vmem:[#allocation65_spill] sm:$0xff] %v12615_v46  ;;  %v12617_v54 = vpop.f32.mrb[93].mxu1  ;;  %v12619_v35 = vpop.f32.mrb[97].mxu0 }
 0x420   :  { %15581 = vst [vmem:[#allocation76_spill] sm:$0xff] %v12617_v54  ;;  %15582 = vst [vmem:[#allocation67_spill] sm:$0xff] %v12619_v35  ;;  %v12621_v34 = vpop.f32.mrb[94].mxu1  ;;  %v12623_v7 = vpop.f32.mrb[98].mxu0  ;;  %9158 = vmatmul.mubr.msk.bf16.vlgmr.msra.gmra.mrb[132].mxu0 %vm2390_vm0, %v2665_v55  ;;  %9159 = vmatmul.mubr.msk.bf16.vlgmr.msra.gmra.mrb[132].mxu1 %vm2390_vm0, %v2665_v55 }
 0x421   :  { %15583 = vst [vmem:[#allocation78_spill] sm:$0xff] %v12621_v34  ;;  %15584 = vst [vmem:[#allocation69_spill] sm:$0xff] %v12623_v7  ;;  %v12629_v6 = vpack.c.bf16 %v12621_v34, %v12613_v9  ;;  %v12631_v59 = vpop.f32.mrb[95].mxu1  ;;  %v12635_v2 = vpack.c.bf16 %v12623_v7, %v12615_v46  ;;  %v12637_v57 = vpop.f32.mrb[99].mxu0  ;;  %4077 = vmatpush1.bf16.msra.mxu0 %v15587_v29  ;;  %4108 = vmatprep.mubr.bf16.mxu0 %v15361_v31  ;;  %v15590_v9 = vld [vmem:[#allocation189_spill] sm:$0xff]  ;;  %v15591_v7 = vld [vmem:[#allocation191_spill] sm:$0xff] }
 0x422   :  { %15585 = vst [vmem:[#allocation80_spill] sm:$0xff] %v12631_v59  ;;  %15586 = vst [vmem:[#allocation71_spill] sm:$0xff] %v12637_v57  ;;  %v12643_v53 = vpack.c.bf16 %v12631_v59, %v12617_v54  ;;  %v12647_v34 = vpack.c.bf16 %v12637_v57, %v12619_v35  ;;  %4078 = vmatprep.subr.bf16.mxu0 %v15589_v26  ;;  %4123 = vmatpush1.bf16.msra.mxu1 %v15590_v9  ;;  %v15592_v46 = vld [vmem:[#allocation192_spill] sm:$0xff]  ;;  %v15593_v29 = vld [vmem:[#allocation194_spill] sm:$0xff] }
 0x423   :  { %4124 = vmatprep.subr.bf16.mxu1 %v15591_v7  ;;  %4154 = vmatprep.mubr.bf16.mxu1 %v15361_v31  ;;  %v15595_v59 = vld [vmem:[#allocation195_spill] sm:$0xff]  ;;  %v15596_v54 = vld [vmem:[#allocation196_spill] sm:$0xff]  ;;  %v15599_v26 = vld [vmem:[#allocation198_spill] sm:$0xff] }
 0x424   :  { %15588 = vst [vmem:[#allocation82_spill] sm:$0xff] %v12643_v53  ;;  %v15600_v9 = vld [vmem:[#allocation197_spill] sm:$0xff] }
 0x425   :  { %4079 = vmatpush1.bf16.msra.mxu0 %v15592_v46  ;;  %v15602_v46 = vld [vmem:[#allocation199_spill] sm:$0xff] }
 0x426   :  { %4080 = vmatprep.subr.bf16.mxu0 %v15593_v29  ;;  %4125 = vmatpush1.bf16.msra.mxu1 %v15594_v12 }
 0x427   :  { %4126 = vmatprep.subr.bf16.mxu1 %v15595_v59 }
 0x429   :  { %4081 = vmatpush1.bf16.msra.mxu0 %v15596_v54 }
 0x42a   :  { %v12658_v57 = vpop.f32.mrb[96].mxu1  ;;  %v12660_v35 = vpop.f32.mrb[100].mxu0  ;;  %4165 = vmatprep.subr.bf16.mxu0 %v15599_v26  ;;  %4127 = vmatpush1.bf16.msra.mxu1 %v15600_v9 }
 0x42b   :  { %15597 = vst [vmem:[#allocation73_spill] sm:$0xff] %v12658_v57  ;;  %15598 = vst [vmem:[#allocation84_spill] sm:$0xff] %v12660_v35  ;;  %v2603_v7 = vpop.xlane.xlu1 %2602  ;;  %v12664_v20 = vpop.f32.mrb[97].mxu1  ;;  %4208 = vmatprep.subr.bf16.mxu1 %v15602_v46 }
 0x42c   :  { %15601 = vst [vmem:[#allocation75_spill] sm:$0xff] %v12664_v20  ;;  %10464 = vrcp.f32 %v2603_v7  ;;  %v12667_v29 = vpop.f32.mrb[101].mxu0  ;;  %v2606_v12 = vpop.xlane.xlu0 %2605  ;;  %9160 = vmatmul.mubr.msk.bf16.vlgmr.msra.gmra.mrb[136].mxu0 %vm2390_vm0, %v2665_v55 }
 0x42d   :  { %15603 = vst [vmem:[#allocation86_spill] sm:$0xff] %v12667_v29  ;;  %10466 = vrcp.f32 %v2606_v12  ;;  %v12670_v54 = vpop.f32.mrb[98].mxu1  ;;  %v12672_v59 = vpop.f32.mrb[102].mxu0  ;;  %4166 = vmatpush1.bf16.msra.mxu0 %v11920_v63  ;;  %4197 = vmatprep.mubr.bf16.mxu0 %v15361_v31  ;;  %v9942_v12 = vld [vmem:[#allocation9 + $0x304] ss:$24 sps:$4 sm:$0xff]  }
 0x42e   :  { %15604 = vst [vmem:[#allocation77_spill] sm:$0xff] %v12670_v54  ;;  %15605 = vst [vmem:[#allocation88_spill] sm:$0xff] %v12672_v59  ;;  %v12678_v26 = vpack.c.bf16 %v12670_v54, %v12658_v57  ;;  %v12682_v9 = vpack.c.bf16 %v12672_v59, %v12660_v35  ;;  %v12684_v7 = vpop.f32.mrb[99].mxu1  ;;  %v12686_v55 = vpop.f32.mrb[103].mxu0  ;;  %4167 = vmatprep.subr.bf16.mxu0 %v11928_v45  ;;  %v9945_v57 = vld [vmem:[#allocation9 + $0x334] ss:$24 sps:$4 sm:$0xff]  }
 0x42f   :  { %15607 = vst [vmem:[#allocation90_spill] sm:$0xff] %v12684_v7  ;;  %15608 = vst [vmem:[#allocation81_spill] sm:$0xff] %v12686_v55  ;;  %v12691_v46 = vpack.c.bf16 %v12684_v7, %v12664_v20  ;;  %v12695_v63 = vpack.c.bf16 %v12686_v55, %v12667_v29  ;;  %v9940_v7 = vld [vmem:[#allocation9 + $0x300] ss:$24 sps:$4 sm:$0xff]   ;;  %v9999_v29 = vld [vmem:[#allocation9 + $0x184] ss:$24 sps:$4 sm:$0xff]  }
 0x430   :  { %15606 = vst [vmem:[#allocation79_spill] sm:$0xff] %v12678_v26  ;;  %v9994_v55 = vld [vmem:[#allocation9 + $0x4e0] ss:$24 sps:$4 sm:$0xff]  }
 0x431   :  { %15609 = vst [vmem:[#allocation92_spill] sm:$0xff] %v12691_v46  ;;  %4168 = vmatpush1.bf16.msra.mxu0 %v11949_v36  ;;  %v9943_v36 = vld [vmem:[#allocation9 + $0x330] ss:$24 sps:$4 sm:$0xff]  }
 0x432   :  { %4169 = vmatprep.subr.bf16.mxu0 %v11953_v1  ;;  %v9948_v1 = vld [vmem:[#allocation9 + $0x364] ss:$24 sps:$4 sm:$0xff]  }
 0x435   :  { %4170 = vmatpush1.bf16.msra.mxu0 %v11961_v52  ;;  %v15610_v52 = vld [vmem:[#allocation200_spill] sm:$0xff] }
 0x436   :  { %v10465_v59 = vpop.eup %10464  ;;  %6236 = vmatprep.subr.bf16.mxu0 %v9942_v12  ;;  %v9958_v12 = vld [vmem:[#allocation9 + $0x3c0] ss:$24 sps:$4 sm:$0xff]  }
 0x437   :  { %v10467_v54 = vpop.eup %10466  ;;  %v2653_v45 = vmul.f32 %v10465_v59, %v12361_v8  ;;  %v9946_v8 = vld [vmem:[#allocation9 + $0x360] ss:$24 sps:$4 sm:$0xff]  }
 0x438   :  { %v2654_v35 = vmul.f32 %v10467_v54, %v12365_v18  ;;  %v15611_v18 = vld [vmem:[#allocation201_spill] sm:$0xff] }
 0x439   :  { %v9954_v54 = vld [vmem:[#allocation9 + $0x394] ss:$24 sps:$4 sm:$0xff]   ;;  %v9949_v59 = vld [vmem:[#allocation9] ss:$24 sps:$4 sm:$0xff]  }
 0x43a   :  { %v2666_v20 = vpack.c.bf16 %v2654_v35, %v2653_v45  ;;  %v9951_v35 = vld [vmem:[#allocation9 + $0x4] ss:$24 sps:$4 sm:$0xff]  }
 0x43b   :  { %v9963_v45 = vld [vmem:[#allocation9 + $0x64] ss:$24 sps:$4 sm:$0xff]  }
 0x43c   :  { %9161 = vmatmul.mubr.msk.bf16.vlgmr.msra.gmra.mrb[136].mxu1 %vm2390_vm0, %v2666_v20  ;;  %9162 = vmatmul.mubr.msk.bf16.vlgmr.msra.gmra.mrb[140].mxu0 %vm2390_vm0, %v2666_v20 }
 0x43d   :  { %4209 = vmatpush1.bf16.msra.mxu1 %v11924_v39  ;;  %6237 = vmatpush1.bf16.msra.mxu0 %v9940_v7  ;;  %v15612_v39 = vld [vmem:[#allocation202_spill] sm:$0xff]  ;;  %v9952_v7 = vld [vmem:[#allocation9 + $0x390] ss:$24 sps:$4 sm:$0xff]  }
 0x43e   :  { %6268 = vmatprep.mubr.bf16.mxu0 %v12347_v62  ;;  %4210 = vmatprep.subr.bf16.mxu1 %v11930_v48  ;;  %v9957_v48 = vld [vmem:[#allocation9 + $0x34] ss:$24 sps:$4 sm:$0xff]  }
 0x43f   :  { %6238 = vmatprep.subr.bf16.mxu0 %v9945_v57  ;;  %4240 = vmatprep.mubr.bf16.mxu1 %v15361_v31  ;;  %v9960_v57 = vld [vmem:[#allocation9 + $0x3c4] ss:$24 sps:$4 sm:$0xff]   ;;  %v9955_v31 = vld [vmem:[#allocation9 + $0x30] ss:$24 sps:$4 sm:$0xff]  }
 0x441   :  { %4211 = vmatpush1.bf16.msra.mxu1 %v15610_v52  ;;  %6239 = vmatpush1.bf16.msra.mxu0 %v9943_v36  ;;  %v9966_v36 = vld [vmem:[#allocation9 + $0x3f4] ss:$24 sps:$4 sm:$0xff]   ;;  %v9964_v52 = vld [vmem:[#allocation9 + $0x3f0] ss:$24 sps:$4 sm:$0xff]  }
 0x442   :  { %4212 = vmatprep.subr.bf16.mxu1 %v15611_v18  ;;  %6240 = vmatprep.subr.bf16.mxu0 %v9948_v1  ;;  %v9961_v1 = vld [vmem:[#allocation9 + $0x60] ss:$24 sps:$4 sm:$0xff]   ;;  %v9972_v18 = vld [vmem:[#allocation9 + $0x424] ss:$24 sps:$4 sm:$0xff]  }
 0x445   :  { %4213 = vmatpush1.bf16.msra.mxu1 %v15612_v39  ;;  %6241 = vmatpush1.bf16.msra.mxu0 %v9946_v8  ;;  %v9969_v8 = vld [vmem:[#allocation9 + $0x94] ss:$24 sps:$4 sm:$0xff]  }
 0x446   :  { %6083 = vmatprep.subr.bf16.mxu1 %v9951_v35  ;;  %6242 = vmatprep.subr.bf16.mxu0 %v9954_v54  ;;  %v9970_v35 = vld [vmem:[#allocation9 + $0x420] ss:$24 sps:$4 sm:$0xff]   ;;  %v9975_v54 = vld [vmem:[#allocation9 + $0xc4] ss:$24 sps:$4 sm:$0xff]   ;;  %v9978_v39 = vld [vmem:[#allocation9 + $0x454] ss:$24 sps:$4 sm:$0xff]  }
 0x448   :  { %9163 = vmatmul.mubr.msk.bf16.vlgmr.msra.gmra.mrb[140].mxu1 %vm2390_vm0, %v2666_v20  ;;  %v9967_v20 = vld [vmem:[#allocation9 + $0x90] ss:$24 sps:$4 sm:$0xff]  }
 0x449   :  { %6084 = vmatpush1.bf16.msra.mxu1 %v9949_v59  ;;  %6115 = vmatprep.mubr.bf16.mxu1 %v12343_v22  ;;  %v9973_v59 = vld [vmem:[#allocation9 + $0xc0] ss:$24 sps:$4 sm:$0xff]  }
 0x44a   :  { %6243 = vmatpush1.bf16.msra.mxu0 %v9952_v7  ;;  %6085 = vmatprep.subr.bf16.mxu1 %v9957_v48  ;;  %v9976_v7 = vld [vmem:[#allocation9 + $0x450] ss:$24 sps:$4 sm:$0xff]   ;;  %v9981_v48 = vld [vmem:[#allocation9 + $0xf4] ss:$24 sps:$4 sm:$0xff]  }
 0x44b   :  { %6244 = vmatprep.subr.bf16.mxu0 %v9960_v57  ;;  %v9984_v57 = vld [vmem:[#allocation9 + $0x484] ss:$24 sps:$4 sm:$0xff]  }
 0x44d   :  { %6086 = vmatpush1.bf16.msra.mxu1 %v9955_v31  ;;  %v9979_v31 = vld [vmem:[#allocation9 + $0xf0] ss:$24 sps:$4 sm:$0xff]  }
 0x44e   :  { %6245 = vmatpush1.bf16.msra.mxu0 %v9958_v12  ;;  %6087 = vmatprep.subr.bf16.mxu1 %v9963_v45 }
 0x44f   :  { %6246 = vmatprep.subr.bf16.mxu0 %v9966_v36  ;;  %v9982_v36 = vld [vmem:[#allocation9 + $0x480] ss:$24 sps:$4 sm:$0xff]  }
 0x451   :  { %6088 = vmatpush1.bf16.msra.mxu1 %v9961_v1  ;;  %v9987_v1 = vld [vmem:[#allocation9 + $0x124] ss:$24 sps:$4 sm:$0xff]  }
 0x452   :  { %6247 = vmatpush1.bf16.msra.mxu0 %v9964_v52  ;;  %6089 = vmatprep.subr.bf16.mxu1 %v9969_v8 }
 0x453   :  { %6248 = vmatprep.subr.bf16.mxu0 %v9972_v18  ;;  %v9990_v18 = vld [vmem:[#allocation9 + $0x4b4] ss:$24 sps:$4 sm:$0xff]  }
 0x455   :  { %6090 = vmatpush1.bf16.msra.mxu1 %v9967_v20 }
 0x456   :  { %6249 = vmatpush1.bf16.msra.mxu0 %v9970_v35  ;;  %6091 = vmatprep.subr.bf16.mxu1 %v9975_v54 }
 0x457   :  { %6250 = vmatprep.subr.bf16.mxu0 %v9978_v39 }
 0x459   :  { %6092 = vmatpush1.bf16.msra.mxu1 %v9973_v59 }
 0x45a   :  { %6251 = vmatpush1.bf16.msra.mxu0 %v9976_v7  ;;  %v12713_v12 = vpop.f32.mrb[100].mxu1  ;;  %v12715_v45 = vpop.f32.mrb[104].mxu0  ;;  %6093 = vmatprep.subr.bf16.mxu1 %v9981_v48  ;;  %v9985_v48 = vld [vmem:[#allocation9 + $0x120] ss:$24 sps:$4 sm:$0xff]  }
 0x45b   :  { %15613 = vst [vmem:[#allocation83_spill] sm:$0xff] %v12713_v12  ;;  %15614 = vst [vmem:[#allocation94_spill] sm:$0xff] %v12715_v45  ;;  %6252 = vmatprep.subr.bf16.mxu0 %v9984_v57  ;;  %v12717_v52 = vpop.f32.mrb[101].mxu1  ;;  %v12719_v8 = vpop.f32.mrb[105].mxu0 }
 0x45c   :  { %15615 = vst [vmem:[#allocation85_spill] sm:$0xff] %v12717_v52  ;;  %15616 = vst [vmem:[#allocation96_spill] sm:$0xff] %v12719_v8  ;;  %v12721_v20 = vpop.f32.mrb[102].mxu1  ;;  %v12723_v35 = vpop.f32.mrb[106].mxu0 }
 0x45d   :  { %15617 = vst [vmem:[#allocation87_spill] sm:$0xff] %v12721_v20  ;;  %15618 = vst [vmem:[#allocation98_spill] sm:$0xff] %v12723_v35  ;;  %6094 = vmatpush1.bf16.msra.mxu1 %v9979_v31  ;;  %v12727_v54 = vpack.c.bf16 %v12721_v20, %v12713_v12  ;;  %v12731_v39 = vpack.c.bf16 %v12723_v35, %v12715_v45  ;;  %v12733_v59 = vpop.f32.mrb[103].mxu1  ;;  %v12735_v7 = vpop.f32.mrb[107].mxu0  ;;  %v9988_v20 = vld [vmem:[#allocation9 + $0x4b0] ss:$24 sps:$4 sm:$0xff]  }
 0x45e   :  { %15620 = vst [vmem:[#allocation100_spill] sm:$0xff] %v12733_v59  ;;  %15621 = vst [vmem:[#allocation91_spill] sm:$0xff] %v12735_v7  ;;  %6253 = vmatpush1.bf16.msra.mxu0 %v9982_v36  ;;  %v12739_v57 = vpack.c.bf16 %v12733_v59, %v12717_v52  ;;  %v12743_v31 = vpack.c.bf16 %v12735_v7, %v12719_v8  ;;  %6095 = vmatprep.subr.bf16.mxu1 %v9987_v1  ;;  %v9993_v12 = vld [vmem:[#allocation9 + $0x154] ss:$24 sps:$4 sm:$0xff]   ;;  %v9996_v35 = vld [vmem:[#allocation9 + $0x4e4] ss:$24 sps:$4 sm:$0xff]  }
 0x45f   :  { %15619 = vst [vmem:[#allocation89_spill] sm:$0xff] %v12731_v39  ;;  %6254 = vmatprep.subr.bf16.mxu0 %v9990_v18  ;;  %v9991_v45 = vld [vmem:[#allocation9 + $0x150] ss:$24 sps:$4 sm:$0xff]   ;;  %v10002_v36 = vld [vmem:[#allocation9 + $0x514] ss:$24 sps:$4 sm:$0xff]  }
 0x460   :  { %15622 = vst [vmem:[#allocation102_spill] sm:$0xff] %v12743_v31  ;;  %v9997_v59 = vld [vmem:[#allocation9 + $0x180] ss:$24 sps:$4 sm:$0xff]   ;;  %v10000_v1 = vld [vmem:[#allocation9 + $0x510] ss:$24 sps:$4 sm:$0xff]  }
 0x461   :  { %6096 = vmatpush1.bf16.msra.mxu1 %v9985_v48  ;;  %v10005_v8 = vld [vmem:[#allocation9 + $0x1b4] ss:$24 sps:$4 sm:$0xff]  }
 0x462   :  { %6255 = vmatpush1.bf16.msra.mxu0 %v9988_v20  ;;  %6097 = vmatprep.subr.bf16.mxu1 %v9993_v12  ;;  %v10008_v12 = vld [vmem:[#allocation9 + $0x544] ss:$24 sps:$4 sm:$0xff]  }
 0x463   :  { %6256 = vmatprep.subr.bf16.mxu0 %v9996_v35 }
 0x465   :  { %6098 = vmatpush1.bf16.msra.mxu1 %v9991_v45 }
 0x466   :  { %6257 = vmatpush1.bf16.msra.mxu0 %v9994_v55  ;;  %v12745_v52 = vpop.f32.mrb[104].mxu1  ;;  %v12747_v7 = vpop.f32.mrb[108].mxu0  ;;  %6099 = vmatprep.subr.bf16.mxu1 %v9999_v29 }
 0x467   :  { %15623 = vst [vmem:[#allocation93_spill] sm:$0xff] %v12745_v52  ;;  %15624 = vst [vmem:[#allocation104_spill] sm:$0xff] %v12747_v7  ;;  %v12749_v18 = vpop.f32.mrb[105].mxu1  ;;  %v12751_v48 = vpop.f32.mrb[109].mxu0  ;;  %6258 = vmatprep.subr.bf16.mxu0 %v10002_v36 }
 0x468   :  { %15625 = vst [vmem:[#allocation95_spill] sm:$0xff] %v12749_v18  ;;  %15626 = vst [vmem:[#allocation106_spill] sm:$0xff] %v12751_v48  ;;  %v12753_v20 = vpop.f32.mrb[106].mxu1  ;;  %v12755_v35 = vpop.f32.mrb[110].mxu0 }
 0x469   :  { %15627 = vst [vmem:[#allocation97_spill] sm:$0xff] %v12753_v20  ;;  %15628 = vst [vmem:[#allocation108_spill] sm:$0xff] %v12755_v35  ;;  %v12759_v55 = vpack.c.bf16 %v12753_v20, %v12745_v52  ;;  %v12763_v45 = vpack.c.bf16 %v12755_v35, %v12747_v7  ;;  %6100 = vmatpush1.bf16.msra.mxu1 %v9997_v59  ;;  %v12765_v29 = vpop.f32.mrb[107].mxu1  ;;  %v12767_v43 = vpop.f32.mrb[111].mxu0  ;;  %v10006_v20 = vld [vmem:[#allocation9 + $0x540] ss:$24 sps:$4 sm:$0xff]  }
 0x46a   :  { %15629 = vst [vmem:[#allocation99_spill] sm:$0xff] %v12765_v29  ;;  %15630 = vst [vmem:[#allocation110_spill] sm:$0xff] %v12767_v43  ;;  %6259 = vmatpush1.bf16.msra.mxu0 %v10000_v1  ;;  %v12771_v36 = vpack.c.bf16 %v12765_v29, %v12749_v18  ;;  %v12775_v25 = vpack.c.bf16 %v12767_v43, %v12751_v48  ;;  %6101 = vmatprep.subr.bf16.mxu1 %v10005_v8  ;;  %v10011_v52 = vld [vmem:[#allocation9 + $0x1e4] ss:$24 sps:$4 sm:$0xff]   ;;  %v10014_v35 = vld [vmem:[#allocation9 + $0x574] ss:$24 sps:$4 sm:$0xff]  }
 0x46b   :  { %6260 = vmatprep.subr.bf16.mxu0 %v10008_v12  ;;  %v10009_v59 = vld [vmem:[#allocation9 + $0x1e0] ss:$24 sps:$4 sm:$0xff]   ;;  %v10012_v7 = vld [vmem:[#allocation9 + $0x570] ss:$24 sps:$4 sm:$0xff]   ;;  %v10020_v1 = vld [vmem:[#allocation9 + $0x5a4] ss:$24 sps:$4 sm:$0xff]  }
 0x46c   :  { %v10015_v29 = vld [vmem:[#allocation9 + $0x210] ss:$24 sps:$4 sm:$0xff]   ;;  %v10018_v8 = vld [vmem:[#allocation9 + $0x5a0] ss:$24 sps:$4 sm:$0xff]   ;;  %v10023_v48 = vld [vmem:[#allocation9 + $0x244] ss:$24 sps:$4 sm:$0xff]  }
 0x46d   :  { %6102 = vmatpush1.bf16.msra.mxu1 %v10003_v56 }
 0x46e   :  { %6261 = vmatpush1.bf16.msra.mxu0 %v10006_v20  ;;  %6103 = vmatprep.subr.bf16.mxu1 %v10011_v52  ;;  %v10026_v52 = vld [vmem:[#allocation9 + $0x5d4] ss:$24 sps:$4 sm:$0xff]  }
 0x46f   :  { %6262 = vmatprep.subr.bf16.mxu0 %v10014_v35 }
 0x471   :  { %6104 = vmatpush1.bf16.msra.mxu1 %v10009_v59 }
 0x472   :  { %6263 = vmatpush1.bf16.msra.mxu0 %v10012_v7  ;;  %v12777_v18 = vpop.f32.mrb[108].mxu1  ;;  %v12779_v43 = vpop.f32.mrb[112].mxu0  ;;  %6105 = vmatprep.subr.bf16.mxu1 %v10017_v4 }
 0x473   :  { %15631 = vst [vmem:[#allocation101_spill] sm:$0xff] %v12777_v18  ;;  %15632 = vst [vmem:[#allocation112_spill] sm:$0xff] %v12779_v43  ;;  %v12781_v12 = vpop.f32.mrb[109].mxu1  ;;  %v12783_v56 = vpop.f32.mrb[113].mxu0  ;;  %6264 = vmatprep.subr.bf16.mxu0 %v10020_v1 }
 0x474   :  { %15633 = vst [vmem:[#allocation103_spill] sm:$0xff] %v12781_v12  ;;  %15634 = vst [vmem:[#allocation114_spill] sm:$0xff] %v12783_v56  ;;  %v12785_v20 = vpop.f32.mrb[110].mxu1  ;;  %v12787_v35 = vpop.f32.mrb[114].mxu0 }
 0x475   :  { %15635 = vst [vmem:[#allocation105_spill] sm:$0xff] %v12785_v20  ;;  %15636 = vst [vmem:[#allocation116_spill] sm:$0xff] %v12787_v35  ;;  %v12791_v7 = vpack.c.bf16 %v12785_v20, %v12777_v18  ;;  %v12795_v59 = vpack.c.bf16 %v12787_v35, %v12779_v43  ;;  %6106 = vmatpush1.bf16.msra.mxu1 %v10015_v29  ;;  %v12797_v4 = vpop.f32.mrb[111].mxu1  ;;  %v12799_v16 = vpop.f32.mrb[115].mxu0  ;;  %v10024_v20 = vld [vmem:[#allocation9 + $0x5d0] ss:$24 sps:$4 sm:$0xff]  }
 0x476   :  { %15639 = vst [vmem:[#allocation109_spill] sm:$0xff] %v12797_v4  ;;  %15640 = vst [vmem:[#allocation120_spill] sm:$0xff] %v12799_v16  ;;  %6265 = vmatpush1.bf16.msra.mxu0 %v10018_v8  ;;  %v12803_v1 = vpack.c.bf16 %v12797_v4, %v12781_v12  ;;  %v12807_v42 = vpack.c.bf16 %v12799_v16, %v12783_v56  ;;  %6107 = vmatprep.subr.bf16.mxu1 %v10023_v48  ;;  %v10029_v18 = vld [vmem:[#allocation9 + $0x274] ss:$24 sps:$4 sm:$0xff]   ;;  %v10038_v35 = vld [vmem:[#allocation9 + $0x604] ss:$24 sps:$4 sm:$0xff]  }
 0x477   :  { %15637 = vst [vmem:[#allocation107_spill] sm:$0xff] %v12791_v7  ;;  %15638 = vst [vmem:[#allocation118_spill] sm:$0xff] %v12795_v59  ;;  %6266 = vmatprep.subr.bf16.mxu0 %v10026_v52  ;;  %v10027_v29 = vld [vmem:[#allocation9 + $0x270] ss:$24 sps:$4 sm:$0xff]   ;;  %v10032_v43 = vld [vmem:[#allocation9 + $0x2a4] ss:$24 sps:$4 sm:$0xff]  }
 0x478   :  { %15641 = vst [vmem:[#allocation111_spill] sm:$0xff] %v12803_v1  ;;  %v10044_v8 = vld [vmem:[#allocation9 + $0x634] ss:$24 sps:$4 sm:$0xff]   ;;  %v10030_v4 = vld [vmem:[#allocation9 + $0x2a0] ss:$24 sps:$4 sm:$0xff]  }
 0x479   :  { %6108 = vmatpush1.bf16.msra.mxu1 %v10021_v24  ;;  %v10035_v52 = vld [vmem:[#allocation9 + $0x2d4] ss:$24 sps:$4 sm:$0xff]  }
 0x47a   :  { %6267 = vmatpush1.bf16.msra.mxu0 %v10024_v20  ;;  %6109 = vmatprep.subr.bf16.mxu1 %v10029_v18  ;;  %v10042_v18 = vld [vmem:[#allocation9 + $0x630] ss:$24 sps:$4 sm:$0xff]  }
 0x47b   :  { %6389 = vmatprep.subr.bf16.mxu0 %v10038_v35 }
 0x47d   :  { %6269 = vmatmul.mubr.bf16.vlgmr.msra.gmra.mrb[144].mxu0 %v12333_v17  ;;  %6110 = vmatpush1.bf16.msra.mxu1 %v10027_v29  ;;  %v10050_v29 = vld [vmem:[#allocation9 + $0x664] ss:$24 sps:$4 sm:$0xff]  }
 0x47e   :  { %6278 = vmatprep.mubr.bf16.mxu0 %v12461_v49  ;;  %6111 = vmatprep.subr.bf16.mxu1 %v10032_v43 }
 0x47f   :  { %v12811_v16 = vpop.f32.mrb[112].mxu1  ;;  %v12813_v48 = vpop.f32.mrb[116].mxu0  ;;  %6390 = vmatpush1.bf16.msra.mxu0 %v10036_v21  ;;  %v10033_v21 = vld [vmem:[#allocation9 + $0x2d0] ss:$24 sps:$4 sm:$0xff]  }
 0x480   :  { %15642 = vst [vmem:[#allocation122_spill] sm:$0xff] %v12811_v16  ;;  %15643 = vst [vmem:[#allocation113_spill] sm:$0xff] %v12813_v48  ;;  %v12815_v24 = vpop.f32.mrb[113].mxu1  ;;  %v12817_v20 = vpop.f32.mrb[117].mxu0  ;;  %6391 = vmatprep.subr.bf16.mxu0 %v10044_v8  ;;  %v10041_v8 = vld [vmem:[#allocation9 + $0xc] ss:$24 sps:$4 sm:$0xff]  }
 0x481   :  { %15644 = vst [vmem:[#allocation124_spill] sm:$0xff] %v12815_v24  ;;  %15645 = vst [vmem:[#allocation115_spill] sm:$0xff] %v12817_v20  ;;  %v12819_v35 = vpop.f32.mrb[114].mxu1  ;;  %v12821_v56 = vpop.f32.mrb[118].mxu0  ;;  %6112 = vmatpush1.bf16.msra.mxu1 %v10030_v4 }
 0x482   :  { %15646 = vst [vmem:[#allocation126_spill] sm:$0xff] %v12819_v35  ;;  %15647 = vst [vmem:[#allocation117_spill] sm:$0xff] %v12821_v56  ;;  %v12825_v12 = vpack.c.bf16 %v12819_v35, %v12811_v16  ;;  %v12829_v43 = vpack.c.bf16 %v12821_v56, %v12813_v48  ;;  %v12831_v41 = vpop.f32.mrb[115].mxu1  ;;  %v12833_v23 = vpop.f32.mrb[119].mxu0  ;;  %6113 = vmatprep.subr.bf16.mxu1 %v10035_v52  ;;  %v10048_v35 = vld [vmem:[#allocation9 + $0x660] ss:$24 sps:$4 sm:$0xff]  }
 0x483   :  { %15649 = vst [vmem:[#allocation119_spill] sm:$0xff] %v12831_v41  ;;  %15650 = vst [vmem:[#allocation130_spill] sm:$0xff] %v12833_v23  ;;  %v12837_v13 = vpack.c.bf16 %v12831_v41, %v12815_v24  ;;  %v12841_v4 = vpack.c.bf16 %v12833_v23, %v12817_v20  ;;  %6392 = vmatpush1.bf16.msra.mxu0 %v10042_v18  ;;  %v10056_v56 = vld [vmem:[#allocation9 + $0x694] ss:$24 sps:$4 sm:$0xff]   ;;  %v10039_v48 = vld [vmem:[#allocation9 + $0x8] ss:$24 sps:$4 sm:$0xff]  }
 0x484   :  { %15648 = vst [vmem:[#allocation128_spill] sm:$0xff] %v12829_v43  ;;  %6393 = vmatprep.subr.bf16.mxu0 %v10050_v29  ;;  %v10047_v16 = vld [vmem:[#allocation9 + $0x3c] ss:$24 sps:$4 sm:$0xff]   ;;  %v10054_v41 = vld [vmem:[#allocation9 + $0x690] ss:$24 sps:$4 sm:$0xff]  }
 0x485   :  { %15651 = vst [vmem:[#allocation121_spill] sm:$0xff] %v12841_v4  ;;  %6279 = vmatmul.mubr.bf16.gmra.mrb[148].mxu0 %v12449_v50  ;;  %6114 = vmatpush1.bf16.msra.mxu1 %v10033_v21  ;;  %v10062_v23 = vld [vmem:[#allocation9 + $0x6c4] ss:$24 sps:$4 sm:$0xff]   ;;  %v10045_v52 = vld [vmem:[#allocation9 + $0x38] ss:$24 sps:$4 sm:$0xff]  }
 0x486   :  { %6288 = vmatprep.mubr.bf16.mxu0 %v12543_v30  ;;  %6542 = vmatprep.subr.bf16.mxu1 %v10041_v8  ;;  %v10053_v29 = vld [vmem:[#allocation9 + $0x6c] ss:$24 sps:$4 sm:$0xff]   ;;  %v10060_v20 = vld [vmem:[#allocation9 + $0x6c0] ss:$24 sps:$4 sm:$0xff]  }
 0x487   :  { %6394 = vmatpush1.bf16.msra.mxu0 %v10048_v35  ;;  %v10068_v35 = vld [vmem:[#allocation9 + $0x6f4] ss:$24 sps:$4 sm:$0xff]   ;;  %v10051_v24 = vld [vmem:[#allocation9 + $0x68] ss:$24 sps:$4 sm:$0xff]  }
 0x488   :  { %6116 = vmatmul.mubr.bf16.vlgmr.msra.gmra.mrb[144].mxu1 %v12329_v19  ;;  %6395 = vmatprep.subr.bf16.mxu0 %v10056_v56 }
 0x489   :  { %6125 = vmatprep.mubr.bf16.mxu1 %v12457_v44  ;;  %6543 = vmatpush1.bf16.msra.mxu1 %v10039_v48 }
 0x48a   :  { %6544 = vmatprep.subr.bf16.mxu1 %v10047_v16  ;;  %v10059_v16 = vld [vmem:[#allocation9 + $0x9c] ss:$24 sps:$4 sm:$0xff]  }
 0x48b   :  { %v12847_v18 = vpop.f32.mrb[116].mxu1  ;;  %6396 = vmatpush1.bf16.msra.mxu0 %v10054_v41 }
 0x48c   :  { %15652 = vst [vmem:[#allocation132_spill] sm:$0xff] %v12847_v18  ;;  %v12849_v21 = vpop.f32.mrb[117].mxu1  ;;  %6397 = vmatprep.subr.bf16.mxu0 %v10062_v23  ;;  %v10066_v23 = vld [vmem:[#allocation9 + $0x6f0] ss:$24 sps:$4 sm:$0xff]  }
 0x48d   :  { %15653 = vst [vmem:[#allocation123_spill] sm:$0xff] %v12849_v21  ;;  %v12851_v8 = vpop.f32.mrb[118].mxu1  ;;  %6289 = vmatmul.mubr.bf16.gmra.mrb[152].mxu0 %v12530_v37  ;;  %6545 = vmatpush1.bf16.msra.mxu1 %v10045_v52  ;;  %v10065_v52 = vld [vmem:[#allocation9 + $0xcc] ss:$24 sps:$4 sm:$0xff]  }
 0x48e   :  { %15654 = vst [vmem:[#allocation134_spill] sm:$0xff] %v12851_v8  ;;  %v12856_v56 = vpack.c.bf16 %v12851_v8, %v12847_v18  ;;  %v12858_v48 = vpop.f32.mrb[119].mxu1  ;;  %6298 = vmatprep.mubr.bf16.mxu0 %v12609_v58  ;;  %6546 = vmatprep.subr.bf16.mxu1 %v10053_v29  ;;  %v10057_v8 = vld [vmem:[#allocation9 + $0x98] ss:$24 sps:$4 sm:$0xff]   ;;  %v10063_v29 = vld [vmem:[#allocation9 + $0xc8] ss:$24 sps:$4 sm:$0xff]  }
 0x48f   :  { %15656 = vst [vmem:[#allocation136_spill] sm:$0xff] %v12858_v48  ;;  %v12863_v41 = vpack.c.bf16 %v12858_v48, %v12849_v21  ;;  %6398 = vmatpush1.bf16.msra.mxu0 %v10060_v20  ;;  %v10072_v18 = vld [vmem:[#allocation9 + $0x720] ss:$24 sps:$4 sm:$0xff]   ;;  %v10071_v20 = vld [vmem:[#allocation9 + $0xfc] ss:$24 sps:$4 sm:$0xff]  }
 0x490   :  { %15655 = vst [vmem:[#allocation125_spill] sm:$0xff] %v12856_v56  ;;  %6126 = vmatmul.mubr.bf16.gmra.mrb[148].mxu1 %v12445_v5  ;;  %6399 = vmatprep.subr.bf16.mxu0 %v10068_v35  ;;  %v10078_v35 = vld [vmem:[#allocation9 + $0x750] ss:$24 sps:$4 sm:$0xff]   ;;  %v10108_v48 = vld [vmem:[#allocation9 + $0x840] ss:$24 sps:$4 sm:$0xff]  }
 0x491   :  { %15657 = vst [vmem:[#allocation127_spill] sm:$0xff] %v12863_v41  ;;  %6135 = vmatprep.mubr.bf16.mxu1 %v12501_v51  ;;  %6547 = vmatpush1.bf16.msra.mxu1 %v10051_v24  ;;  %v10086_v24 = vld [vmem:[#allocation9 + $0x784] ss:$24 sps:$4 sm:$0xff]   ;;  %v10116_v21 = vld [vmem:[#allocation9 + $0x874] ss:$24 sps:$4 sm:$0xff]  }
 0x492   :  { %6548 = vmatprep.subr.bf16.mxu1 %v10059_v16  ;;  %v10069_v16 = vld [vmem:[#allocation9 + $0xf8] ss:$24 sps:$4 sm:$0xff]   ;;  %v10147_v58 = vld [vmem:[#allocation9 + $0x368] ss:$24 sps:$4 sm:$0xff]  }
 0x493   :  { %6400 = vmatpush1.bf16.msra.mxu0 %v10066_v23  ;;  %v10084_v23 = vld [vmem:[#allocation9 + $0x780] ss:$24 sps:$4 sm:$0xff]  }
 0x494   :  { %6401 = vmatprep.subr.bf16.mxu0 %v10074_v60  ;;  %v10077_v60 = vld [vmem:[#allocation9 + $0x12c] ss:$24 sps:$4 sm:$0xff]  }
 0x495   :  { %6299 = vmatmul.mubr.bf16.gmra.mrb[156].mxu0 %v12597_v33  ;;  %6549 = vmatpush1.bf16.msra.mxu1 %v10057_v8  ;;  %v10092_v8 = vld [vmem:[#allocation9 + $0x7b4] ss:$24 sps:$4 sm:$0xff]   ;;  %v10141_v33 = vld [vmem:[#allocation9 + $0x338] ss:$24 sps:$4 sm:$0xff]  }
 0x496   :  { %6308 = vmatprep.mubr.bf16.mxu0 %v12691_v46  ;;  %6550 = vmatprep.subr.bf16.mxu1 %v10065_v52  ;;  %v10075_v52 = vld [vmem:[#allocation9 + $0x128] ss:$24 sps:$4 sm:$0xff]  }
 0x497   :  { %6402 = vmatpush1.bf16.msra.mxu0 %v10072_v18  ;;  %v10083_v18 = vld [vmem:[#allocation9 + $0x15c] ss:$24 sps:$4 sm:$0xff]  }
 0x498   :  { %6136 = vmatmul.mubr.bf16.gmra.mrb[152].mxu1 %v12489_v14  ;;  %6403 = vmatprep.subr.bf16.mxu0 %v10080_v28  ;;  %v10090_v28 = vld [vmem:[#allocation9 + $0x7b0] ss:$24 sps:$4 sm:$0xff]  }
 0x499   :  { %6145 = vmatprep.mubr.bf16.mxu1 %v12605_v10  ;;  %6551 = vmatpush1.bf16.msra.mxu1 %v10063_v29  ;;  %v10098_v29 = vld [vmem:[#allocation9 + $0x7e4] ss:$24 sps:$4 sm:$0xff]  }
 0x49a   :  { %6552 = vmatprep.subr.bf16.mxu1 %v10071_v20  ;;  %v10081_v20 = vld [vmem:[#allocation9 + $0x158] ss:$24 sps:$4 sm:$0xff]  }
 0x49b   :  { %6404 = vmatpush1.bf16.msra.mxu0 %v10078_v35  ;;  %v10089_v35 = vld [vmem:[#allocation9 + $0x18c] ss:$24 sps:$4 sm:$0xff]  }
 0x49c   :  { %6405 = vmatprep.subr.bf16.mxu0 %v10086_v24  ;;  %v10096_v24 = vld [vmem:[#allocation9 + $0x7e0] ss:$24 sps:$4 sm:$0xff]  }
 0x49d   :  { %6309 = vmatmul.mubr.bf16.gmra.mrb[160].mxu0 %v12678_v26  ;;  %6553 = vmatpush1.bf16.msra.mxu1 %v10069_v16  ;;  %v10104_v16 = vld [vmem:[#allocation9 + $0x814] ss:$24 sps:$4 sm:$0xff]  }
 0x49e   :  { %6318 = vmatprep.mubr.bf16.mxu0 %v12743_v31  ;;  %6554 = vmatprep.subr.bf16.mxu1 %v10077_v60  ;;  %v10087_v60 = vld [vmem:[#allocation9 + $0x188] ss:$24 sps:$4 sm:$0xff]  }
 0x49f   :  { %6406 = vmatpush1.bf16.msra.mxu0 %v10084_v23  ;;  %v10095_v23 = vld [vmem:[#allocation9 + $0x1bc] ss:$24 sps:$4 sm:$0xff]  }
 0x4a0   :  { %6146 = vmatmul.mubr.bf16.gmra.mrb[156].mxu1 %v12593_v3  ;;  %6407 = vmatprep.subr.bf16.mxu0 %v10092_v8  ;;  %v10102_v8 = vld [vmem:[#allocation9 + $0x810] ss:$24 sps:$4 sm:$0xff]  }
 0x4a1   :  { %6155 = vmatprep.mubr.bf16.mxu1 %v12647_v34  ;;  %6555 = vmatpush1.bf16.msra.mxu1 %v10075_v52  ;;  %v10110_v52 = vld [vmem:[#allocation9 + $0x844] ss:$24 sps:$4 sm:$0xff]  }
 0x4a2   :  { %6556 = vmatprep.subr.bf16.mxu1 %v10083_v18  ;;  %v10093_v18 = vld [vmem:[#allocation9 + $0x1b8] ss:$24 sps:$4 sm:$0xff]  }
 0x4a3   :  { %6408 = vmatpush1.bf16.msra.mxu0 %v10090_v28  ;;  %v10101_v28 = vld [vmem:[#allocation9 + $0x1ec] ss:$24 sps:$4 sm:$0xff]  }
 0x4a4   :  { %6409 = vmatprep.subr.bf16.mxu0 %v10098_v29 }
 0x4a5   :  { %6319 = vmatmul.mubr.bf16.gmra.mrb[164].mxu0 %v12731_v39  ;;  %6557 = vmatpush1.bf16.msra.mxu1 %v10081_v20 }
 0x4a6   :  { %6328 = vmatprep.mubr.bf16.mxu0 %v12803_v1  ;;  %6558 = vmatprep.subr.bf16.mxu1 %v10089_v35 }
 0x4a7   :  { %6410 = vmatpush1.bf16.msra.mxu0 %v10096_v24 }
 0x4a8   :  { %6156 = vmatmul.mubr.bf16.gmra.mrb[160].mxu1 %v12635_v2  ;;  %6411 = vmatprep.subr.bf16.mxu0 %v10104_v16 }
 0x4a9   :  { %6165 = vmatprep.mubr.bf16.mxu1 %v12739_v57  ;;  %6559 = vmatpush1.bf16.msra.mxu1 %v10087_v60 }
 0x4aa   :  { %6560 = vmatprep.subr.bf16.mxu1 %v10095_v23  ;;  %v10099_v23 = vld [vmem:[#allocation9 + $0x1e8] ss:$24 sps:$4 sm:$0xff]  }
 0x4ab   :  { %v12879_v29 = vpop.f32.mrb[120].mxu0  ;;  %v12881_v20 = vpop.f32.mrb[120].mxu1  ;;  %6412 = vmatpush1.bf16.msra.mxu0 %v10102_v8 }
 0x4ac   :  { %15658 = vst [vmem:[#allocation138_spill] sm:$0xff] %v12879_v29  ;;  %15659 = vst [vmem:[#allocation129_spill] sm:$0xff] %v12881_v20  ;;  %v12883_v35 = vpop.f32.mrb[121].mxu0  ;;  %v12885_v24 = vpop.f32.mrb[121].mxu1  ;;  %6413 = vmatprep.subr.bf16.mxu0 %v10110_v52 }
 0x4ad   :  { %15660 = vst [vmem:[#allocation131_spill] sm:$0xff] %v12883_v35  ;;  %15661 = vst [vmem:[#allocation140_spill] sm:$0xff] %v12885_v24  ;;  %6329 = vmatmul.mubr.bf16.gmra.mrb[168].mxu0 %v12791_v7  ;;  %v12888_v16 = vpop.f32.mrb[122].mxu0  ;;  %v12890_v60 = vpop.f32.mrb[122].mxu1  ;;  %6561 = vmatpush1.bf16.msra.mxu1 %v10093_v18 }
 0x4ae   :  { %15662 = vst [vmem:[#allocation142_spill] sm:$0xff] %v12888_v16  ;;  %15663 = vst [vmem:[#allocation133_spill] sm:$0xff] %v12890_v60  ;;  %6338 = vmatprep.mubr.bf16.mxu0 %v12841_v4  ;;  %v12895_v8 = vpack.c.bf16 %v12888_v16, %v12879_v29  ;;  %v12899_v32 = vpack.c.bf16 %v12890_v60, %v12881_v20  ;;  %v12901_v52 = vpop.f32.mrb[123].mxu0  ;;  %v12903_v0 = vpop.f32.mrb[123].mxu1  ;;  %6562 = vmatprep.subr.bf16.mxu1 %v10101_v28  ;;  %v10114_v16 = vld [vmem:[#allocation9 + $0x870] ss:$24 sps:$4 sm:$0xff]  }
 0x4af   :  { %15665 = vst [vmem:[#allocation144_spill] sm:$0xff] %v12901_v52  ;;  %15666 = vst [vmem:[#allocation146_spill] sm:$0xff] %v12903_v0  ;;  %v12907_v18 = vpack.c.bf16 %v12901_v52, %v12883_v35  ;;  %v12911_v4 = vpack.c.bf16 %v12903_v0, %v12885_v24  ;;  %6414 = vmatpush1.bf16.msra.mxu0 %v10108_v48  ;;  %v10122_v60 = vld [vmem:[#allocation9 + $0x8a4] ss:$24 sps:$4 sm:$0xff]   ;;  %v10105_v20 = vld [vmem:[#allocation9 + $0x218] ss:$24 sps:$4 sm:$0xff]  }
 0x4b0   :  { %15664 = vst [vmem:[#allocation135_spill] sm:$0xff] %v12899_v32  ;;  %6166 = vmatmul.mubr.bf16.gmra.mrb[164].mxu1 %v12727_v54  ;;  %6415 = vmatprep.subr.bf16.mxu0 %v10116_v21  ;;  %v10113_v28 = vld [vmem:[#allocation9 + $0x24c] ss:$24 sps:$4 sm:$0xff]   ;;  %v10120_v29 = vld [vmem:[#allocation9 + $0x8a0] ss:$24 sps:$4 sm:$0xff]  }
 0x4b1   :  { %15667 = vst [vmem:[#allocation137_spill] sm:$0xff] %v12911_v4  ;;  %6175 = vmatprep.mubr.bf16.mxu1 %v12775_v25  ;;  %6563 = vmatpush1.bf16.msra.mxu1 %v10099_v23  ;;  %v10128_v52 = vld [vmem:[#allocation9 + $0x8d4] ss:$24 sps:$4 sm:$0xff]   ;;  %v10111_v0 = vld [vmem:[#allocation9 + $0x248] ss:$24 sps:$4 sm:$0xff]  }
 0x4b2   :  { %6564 = vmatprep.subr.bf16.mxu1 %v10107_v15  ;;  %v10119_v48 = vld [vmem:[#allocation9 + $0x27c] ss:$24 sps:$4 sm:$0xff]   ;;  %v10126_v24 = vld [vmem:[#allocation9 + $0x8d0] ss:$24 sps:$4 sm:$0xff]  }
 0x4b3   :  { %6416 = vmatpush1.bf16.msra.mxu0 %v10114_v16  ;;  %v10134_v16 = vld [vmem:[#allocation9 + $0x14] ss:$24 sps:$4 sm:$0xff]  }
 0x4b4   :  { %6417 = vmatprep.subr.bf16.mxu0 %v10122_v60 }
 0x4b5   :  { %6339 = vmatmul.mubr.bf16.gmra.mrb[172].mxu0 %v12829_v43  ;;  %6565 = vmatpush1.bf16.msra.mxu1 %v10105_v20  ;;  %v10117_v20 = vld [vmem:[#allocation9 + $0x278] ss:$24 sps:$4 sm:$0xff]  }
 0x4b6   :  { %6348 = vmatprep.mubr.bf16.mxu0 %v12911_v4  ;;  %6566 = vmatprep.subr.bf16.mxu1 %v10113_v28 }
 0x4b7   :  { %v12917_v21 = vpop.f32.mrb[124].mxu0  ;;  %6418 = vmatpush1.bf16.msra.mxu0 %v10120_v29  ;;  %v10125_v29 = vld [vmem:[#allocation9 + $0x2ac] ss:$24 sps:$4 sm:$0xff]  }
 0x4b8   :  { %15668 = vst [vmem:[#allocation139_spill] sm:$0xff] %v12917_v21  ;;  %6176 = vmatmul.mubr.bf16.gmra.mrb[168].mxu1 %v12763_v45  ;;  %v12920_v15 = vpop.f32.mrb[125].mxu0  ;;  %6419 = vmatprep.subr.bf16.mxu0 %v10128_v52  ;;  %v10123_v52 = vld [vmem:[#allocation9 + $0x2a8] ss:$24 sps:$4 sm:$0xff]  }
 0x4b9   :  { %15669 = vst [vmem:[#allocation148_spill] sm:$0xff] %v12920_v15  ;;  %6185 = vmatprep.mubr.bf16.mxu1 %v12837_v13  ;;  %v12923_v60 = vpop.f32.mrb[126].mxu0  ;;  %6567 = vmatpush1.bf16.msra.mxu1 %v10111_v0  ;;  %v10131_v0 = vld [vmem:[#allocation9 + $0x2dc] ss:$24 sps:$4 sm:$0xff]  }
 0x4ba   :  { %15670 = vst [vmem:[#allocation150_spill] sm:$0xff] %v12923_v60  ;;  %v12927_v23 = vpack.c.bf16 %v12923_v60, %v12917_v21  ;;  %v12929_v28 = vpop.f32.mrb[127].mxu0  ;;  %6568 = vmatprep.subr.bf16.mxu1 %v10119_v48  ;;  %v10129_v60 = vld [vmem:[#allocation9 + $0x2d8] ss:$24 sps:$4 sm:$0xff]   ;;  %v10137_v48 = vld [vmem:[#allocation9 + $0x30c] ss:$24 sps:$4 sm:$0xff]  }
 0x4bb   :  { %15672 = vst [vmem:[#allocation143_spill] sm:$0xff] %v12929_v28  ;;  %v12933_v35 = vpack.c.bf16 %v12929_v28, %v12920_v15  ;;  %6420 = vmatpush1.bf16.msra.mxu0 %v10126_v24 }
 0x4bc   :  { %15671 = vst [vmem:[#allocation141_spill] sm:$0xff] %v12927_v23  ;;  %7001 = vmatprep.subr.bf16.mxu0 %v10134_v16 }
 0x4bd   :  { %15673 = vst [vmem:[#allocation145_spill] sm:$0xff] %v12933_v35  ;;  %6349 = vmatmul.mubr.bf16.gmra.mrb[176].mxu0 %v12899_v32  ;;  %6569 = vmatpush1.bf16.msra.mxu1 %v10117_v20 }
 0x4be   :  { %6570 = vmatprep.subr.bf16.mxu1 %v10125_v29 }
 0x4c0   :  { %6186 = vmatmul.mubr.bf16.gmra.mrb[172].mxu1 %v12825_v12 }
 0x4c1   :  { %6195 = vmatprep.mubr.bf16.mxu1 %v12907_v18  ;;  %6571 = vmatpush1.bf16.msra.mxu1 %v10123_v52 }
 0x4c2   :  { %6572 = vmatprep.subr.bf16.mxu1 %v10131_v0 }
 0x4c5   :  { %v12938_v21 = vpop.f32.mrb[124].mxu1  ;;  %v12940_v28 = vpop.f32.mrb[128].mxu0  ;;  %6573 = vmatpush1.bf16.msra.mxu1 %v10129_v60 }
 0x4c6   :  { %15674 = vst [vmem:[#allocation147_spill] sm:$0xff] %v12938_v21  ;;  %15675 = vst [vmem:[#allocation149_spill] sm:$0xff] %v12940_v28  ;;  %v12942_v24 = vpop.f32.mrb[125].mxu1  ;;  %v12944_v16 = vpop.f32.mrb[129].mxu0  ;;  %6695 = vmatprep.subr.bf16.mxu1 %v10137_v48 }
 0x4c7   :  { %15676 = vst [vmem:[#allocation151_spill] sm:$0xff] %v12942_v24  ;;  %15677 = vst [vmem:[#allocation152_spill] sm:$0xff] %v12944_v16  ;;  %v12946_v20 = vpop.f32.mrb[126].mxu1  ;;  %v12948_v29 = vpop.f32.mrb[130].mxu0 }
 0x4c8   :  { %15678 = vst [vmem:[#allocation154_spill] sm:$0xff] %v12946_v20  ;;  %15679 = vst [vmem:[#allocation153_spill] sm:$0xff] %v12948_v29  ;;  %6196 = vmatmul.mubr.bf16.gmra.mrb[176].mxu1 %v12895_v8  ;;  %v12953_v52 = vpack.c.bf16 %v12946_v20, %v12938_v21  ;;  %v12957_v0 = vpack.c.bf16 %v12948_v29, %v12940_v28  ;;  %v12959_v60 = vpop.f32.mrb[127].mxu1  ;;  %v12961_v15 = vpop.f32.mrb[131].mxu0 }
 0x4c9   :  { %15681 = vst [vmem:[#allocation156_spill] sm:$0xff] %v12959_v60  ;;  %15682 = vst [vmem:[#allocation158_spill] sm:$0xff] %v12961_v15  ;;  %v12965_v48 = vpack.c.bf16 %v12959_v60, %v12942_v24  ;;  %v12969_v32 = vpack.c.bf16 %v12961_v15, %v12944_v16 }
 0x4ca   :  { %15680 = vst [vmem:[#allocation155_spill] sm:$0xff] %v12957_v0 }
 0x4cb   :  { %15683 = vst [vmem:[#allocation157_spill] sm:$0xff] %v12969_v32  ;;  %6205 = vmatprep.mubr.bf16.mxu1 %v12965_v48  ;;  %6358 = vmatprep.mubr.bf16.mxu0 %v12969_v32 }
 0x4cc   :  { %6359 = vmatmul.mubr.bf16.gmra.mrb[180].mxu0 %v12957_v0 }
 0x4d0   :  { %6206 = vmatmul.mubr.bf16.gmra.mrb[180].mxu1 %v12953_v52 }
 0x4d1   :  { %v12975_v29 = vpop.f32.mrb[128].mxu1 }
 0x4d2   :  { %15684 = vst [vmem:[#allocation159_spill] sm:$0xff] %v12975_v29  ;;  %v12977_v20 = vpop.f32.mrb[129].mxu1 }
 0x4d3   :  { %15685 = vst [vmem:[#allocation160_spill] sm:$0xff] %v12977_v20  ;;  %v12979_v28 = vpop.f32.mrb[130].mxu1 }
 0x4d4   :  { %15686 = vst [vmem:[#allocation162_spill] sm:$0xff] %v12979_v28  ;;  %v12983_v60 = vpack.c.bf16 %v12979_v28, %v12975_v29  ;;  %v12985_v15 = vpop.f32.mrb[131].mxu1 }
 0x4d5   :  { %15688 = vst [vmem:[#allocation163_spill] sm:$0xff] %v12985_v15  ;;  %v12989_v16 = vpack.c.bf16 %v12985_v15, %v12977_v20 }
 0x4d6   :  { %15687 = vst [vmem:[#allocation161_spill] sm:$0xff] %v12983_v60 }
 0x4d7   :  { %15689 = vst [vmem:[#allocation164_spill] sm:$0xff] %v12989_v16 }
 0x4f3   :  { %v12991_v24 = vpop.f32.mrb[132].mxu0  ;;  %v12993_v21 = vpop.f32.mrb[132].mxu1 }
 0x4f4   :  { %15690 = vst [vmem:[#allocation166_spill] sm:$0xff] %v12991_v24  ;;  %15691 = vst [vmem:[#allocation168_spill] sm:$0xff] %v12993_v21  ;;  %v12995_v0 = vpop.f32.mrb[133].mxu0  ;;  %v12997_v32 = vpop.f32.mrb[133].mxu1 }
 0x4f5   :  { %15692 = vst [vmem:[#allocation170_spill] sm:$0xff] %v12995_v0  ;;  %15693 = vst [vmem:[#allocation172_spill] sm:$0xff] %v12997_v32  ;;  %v12999_v4 = vpop.f32.mrb[134].mxu0  ;;  %v13001_v43 = vpop.f32.mrb[134].mxu1 }
 0x4f6   :  { %15694 = vst [vmem:[#allocation174_spill] sm:$0xff] %v12999_v4  ;;  %15695 = vst [vmem:[#allocation165_spill] sm:$0xff] %v13001_v43  ;;  %v13005_v28 = vpack.c.bf16 %v12999_v4, %v12991_v24  ;;  %v13009_v15 = vpack.c.bf16 %v13001_v43, %v12993_v21  ;;  %v13011_v20 = vpop.f32.mrb[135].mxu0  ;;  %v13013_v29 = vpop.f32.mrb[135].mxu1 }
 0x4f7   :  { %15697 = vst [vmem:[#allocation176_spill] sm:$0xff] %v13011_v20  ;;  %15698 = vst [vmem:[#allocation178_spill] sm:$0xff] %v13013_v29  ;;  %v13017_v7 = vpack.c.bf16 %v13011_v20, %v12995_v0  ;;  %v13021_v1 = vpack.c.bf16 %v13013_v29, %v12997_v32 }
 0x4f8   :  { %15696 = vst [vmem:[#allocation167_spill] sm:$0xff] %v13009_v15 }
 0x4f9   :  { %15699 = vst [vmem:[#allocation169_spill] sm:$0xff] %v13021_v1  ;;  %6215 = vmatprep.mubr.bf16.mxu1 %v13017_v7  ;;  %6368 = vmatprep.mubr.bf16.mxu0 %v13021_v1 }
 0x4fa   :  { %6216 = vmatmul.mubr.bf16.gmra.mrb[184].mxu1 %v13005_v28  ;;  %6369 = vmatmul.mubr.bf16.gmra.mrb[184].mxu0 %v13009_v15 }
 0x4ff   :  { %v13027_v43 = vpop.f32.mrb[136].mxu0 }
 0x500   :  { %15700 = vst [vmem:[#allocation171_spill] sm:$0xff] %v13027_v43  ;;  %v13029_v4 = vpop.f32.mrb[137].mxu0 }
 0x501   :  { %15701 = vst [vmem:[#allocation180_spill] sm:$0xff] %v13029_v4  ;;  %v13031_v21 = vpop.f32.mrb[138].mxu0 }
 0x502   :  { %15702 = vst [vmem:[#allocation182_spill] sm:$0xff] %v13031_v21  ;;  %v13035_v20 = vpack.c.bf16 %v13031_v21, %v13027_v43  ;;  %v13037_v29 = vpop.f32.mrb[139].mxu0 }
 0x503   :  { %15704 = vst [vmem:[#allocation175_spill] sm:$0xff] %v13037_v29  ;;  %v13041_v32 = vpack.c.bf16 %v13037_v29, %v13029_v4 }
 0x504   :  { %15703 = vst [vmem:[#allocation173_spill] sm:$0xff] %v13035_v20 }
 0x505   :  { %15705 = vst [vmem:[#allocation184_spill] sm:$0xff] %v13041_v32 }
 0x50f   :  { %v13043_v0 = vpop.f32.mrb[136].mxu1  ;;  %v13045_v24 = vpop.f32.mrb[140].mxu0 }
 0x510   :  { %15706 = vst [vmem:[#allocation186_spill] sm:$0xff] %v13043_v0  ;;  %15707 = vst [vmem:[#allocation177_spill] sm:$0xff] %v13045_v24  ;;  %v13047_v15 = vpop.f32.mrb[137].mxu1  ;;  %v13049_v1 = vpop.f32.mrb[141].mxu0 }
 0x511   :  { %15708 = vst [vmem:[#allocation179_spill] sm:$0xff] %v13047_v15  ;;  %15709 = vst [vmem:[#allocation181_spill] sm:$0xff] %v13049_v1  ;;  %v13051_v39 = vpop.f32.mrb[138].mxu1  ;;  %v13053_v31 = vpop.f32.mrb[142].mxu0 }
 0x512   :  { %15710 = vst [vmem:[#allocation183_spill] sm:$0xff] %v13051_v39  ;;  %15711 = vst [vmem:[#allocation185_spill] sm:$0xff] %v13053_v31  ;;  %v13057_v21 = vpack.c.bf16 %v13051_v39, %v13043_v0  ;;  %v13061_v29 = vpack.c.bf16 %v13053_v31, %v13045_v24  ;;  %v13063_v4 = vpop.f32.mrb[139].mxu1  ;;  %v13065_v43 = vpop.f32.mrb[143].mxu0  ;;  %v10135_v24 = vld [vmem:[#allocation9 + $0x308] ss:$24 sps:$4 sm:$0xff]  }
 0x513   :  { %15713 = vst [vmem:[#allocation188_spill] sm:$0xff] %v13063_v4  ;;  %15714 = vst [vmem:[#allocation190_spill] sm:$0xff] %v13065_v43  ;;  %v13069_v26 = vpack.c.bf16 %v13063_v4, %v13047_v15  ;;  %v13073_v46 = vpack.c.bf16 %v13065_v43, %v13049_v1  ;;  %v10132_v4 = vld [vmem:[#allocation9 + $0x10] ss:$24 sps:$4 sm:$0xff]   ;;  %v10140_v1 = vld [vmem:[#allocation9 + $0x44] ss:$24 sps:$4 sm:$0xff]  }
 0x514   :  { %15712 = vst [vmem:[#allocation187_spill] sm:$0xff] %v13061_v29  ;;  %v10143_v15 = vld [vmem:[#allocation9 + $0x33c] ss:$24 sps:$4 sm:$0xff]  }
 0x515   :  { %15715 = vst [vmem:[#allocation189_spill] sm:$0xff] %v13073_v46  ;;  %6225 = vmatprep.mubr.bf16.mxu1 %v13069_v26  ;;  %6378 = vmatprep.mubr.bf16.mxu0 %v13073_v46 }
 0x516   :  { %6226 = vmatmul.mubr.bf16.gmra.mrb[188].mxu1 %v13057_v21  ;;  %6379 = vmatmul.mubr.bf16.gmra.mrb[188].mxu0 %v13061_v29  ;;  %v10138_v29 = vld [vmem:[#allocation9 + $0x40] ss:$24 sps:$4 sm:$0xff]  }
 0x517   :  { %6421 = vmatprep.mubr.bf16.mxu0 %v12385_v47  ;;  %6574 = vmatprep.mubr.bf16.mxu1 %v12343_v22 }
 0x51b   :  { %v13081_v31 = vpop.f32.mrb[140].mxu1 }
 0x51c   :  { %15716 = vst [vmem:[#allocation191_spill] sm:$0xff] %v13081_v31  ;;  %v13083_v39 = vpop.f32.mrb[141].mxu1 }
 0x51d   :  { %15717 = vst [vmem:[#allocation192_spill] sm:$0xff] %v13083_v39  ;;  %v13085_v43 = vpop.f32.mrb[142].mxu1 }
 0x51e   :  { %15718 = vst [vmem:[#allocation194_spill] sm:$0xff] %v13085_v43  ;;  %v13089_v0 = vpack.c.bf16 %v13085_v43, %v13081_v31  ;;  %v13091_v46 = vpop.f32.mrb[143].mxu1  ;;  %6422 = vmatmul.mubr.bf16.vlgmr.msra.gmra.mrb[144].mxu0 %v12379_v11  ;;  %6575 = vmatmul.mubr.bf16.vlgmr.msra.gmra.mrb[192].mxu1 %v12329_v19  ;;  %v10146_v43 = vld [vmem:[#allocation9 + $0x74] ss:$24 sps:$4 sm:$0xff]   ;;  %v10144_v11 = vld [vmem:[#allocation9 + $0x70] ss:$24 sps:$4 sm:$0xff]  }
 0x51f   :  { %15720 = vst [vmem:[#allocation195_spill] sm:$0xff] %v13091_v46  ;;  %v13097_v47 = vpack.c.bf16 %v13091_v46, %v13083_v39  ;;  %7002 = vmatpush1.bf16.msra.mxu0 %v10132_v4  ;;  %6431 = vmatprep.mubr.bf16.mxu0 %v12497_v38  ;;  %v10149_v31 = vld [vmem:[#allocation9 + $0x36c] ss:$24 sps:$4 sm:$0xff]   ;;  %v10155_v39 = vld [vmem:[#allocation9 + $0x39c] ss:$24 sps:$4 sm:$0xff]  }
 0x520   :  { %15719 = vst [vmem:[#allocation193_spill] sm:$0xff] %v13089_v0  ;;  %6584 = vmatprep.mubr.bf16.mxu1 %v12457_v44  ;;  %6696 = vmatpush1.bf16.msra.mxu1 %v10135_v24  ;;  %v10152_v46 = vld [vmem:[#allocation9 + $0xa4] ss:$24 sps:$4 sm:$0xff]   ;;  %v10153_v4 = vld [vmem:[#allocation9 + $0x398] ss:$24 sps:$4 sm:$0xff]  }
 0x521   :  { %15721 = vst [vmem:[#allocation196_spill] sm:$0xff] %v13097_v47  ;;  %7003 = vmatprep.subr.bf16.mxu0 %v10140_v1  ;;  %6697 = vmatprep.subr.bf16.mxu1 %v10143_v15  ;;  %v10150_v1 = vld [vmem:[#allocation9 + $0xa0] ss:$24 sps:$4 sm:$0xff]   ;;  %v10164_v24 = vld [vmem:[#allocation9 + $0x104] ss:$24 sps:$4 sm:$0xff]  }
 0x522   :  { %v10159_v15 = vld [vmem:[#allocation9 + $0x3c8] ss:$24 sps:$4 sm:$0xff]  }
 0x523   :  { %7004 = vmatpush1.bf16.msra.mxu0 %v10138_v29  ;;  %v10167_v29 = vld [vmem:[#allocation9 + $0x3fc] ss:$24 sps:$4 sm:$0xff]  }
 0x524   :  { %6698 = vmatpush1.bf16.msra.mxu1 %v10141_v33  ;;  %7005 = vmatprep.subr.bf16.mxu0 %v10146_v43  ;;  %v10158_v33 = vld [vmem:[#allocation9 + $0xd4] ss:$24 sps:$4 sm:$0xff]  }
 0x525   :  { %6699 = vmatprep.subr.bf16.mxu1 %v10149_v31  ;;  %v10161_v43 = vld [vmem:[#allocation9 + $0x3cc] ss:$24 sps:$4 sm:$0xff]   ;;  %v10156_v31 = vld [vmem:[#allocation9 + $0xd0] ss:$24 sps:$4 sm:$0xff]  }
 0x526   :  { %6432 = vmatmul.mubr.bf16.gmra.mrb[148].mxu0 %v12483_v40  ;;  %6585 = vmatmul.mubr.bf16.gmra.mrb[196].mxu1 %v12445_v5 }
 0x527   :  { %6441 = vmatprep.mubr.bf16.mxu0 %v12547_v61  ;;  %6594 = vmatprep.mubr.bf16.mxu1 %v12501_v51 }
 0x528   :  { %7006 = vmatpush1.bf16.msra.mxu0 %v10144_v11  ;;  %6700 = vmatpush1.bf16.msra.mxu1 %v10147_v58  ;;  %v10162_v11 = vld [vmem:[#allocation9 + $0x100] ss:$24 sps:$4 sm:$0xff]  }
 0x529   :  { %7007 = vmatprep.subr.bf16.mxu0 %v10152_v46  ;;  %6701 = vmatprep.subr.bf16.mxu1 %v10155_v39  ;;  %v10165_v58 = vld [vmem:[#allocation9 + $0x3f8] ss:$24 sps:$4 sm:$0xff]   ;;  %v10170_v46 = vld [vmem:[#allocation9 + $0x134] ss:$24 sps:$4 sm:$0xff]  }
 0x52a   :  { %v10173_v39 = vld [vmem:[#allocation9 + $0x42c] ss:$24 sps:$4 sm:$0xff]  }
 0x52c   :  { %7008 = vmatpush1.bf16.msra.mxu0 %v10150_v1  ;;  %6702 = vmatpush1.bf16.msra.mxu1 %v10153_v4  ;;  %v10168_v1 = vld [vmem:[#allocation9 + $0x130] ss:$24 sps:$4 sm:$0xff]  }
 0x52d   :  { %7009 = vmatprep.subr.bf16.mxu0 %v10158_v33  ;;  %6703 = vmatprep.subr.bf16.mxu1 %v10161_v43  ;;  %v10171_v4 = vld [vmem:[#allocation9 + $0x428] ss:$24 sps:$4 sm:$0xff]   ;;  %v10176_v33 = vld [vmem:[#allocation9 + $0x164] ss:$24 sps:$4 sm:$0xff]  }
 0x52e   :  { %6442 = vmatmul.mubr.bf16.gmra.mrb[152].mxu0 %v12534_v27  ;;  %6595 = vmatmul.mubr.bf16.gmra.mrb[200].mxu1 %v12489_v14  ;;  %v10179_v43 = vld [vmem:[#allocation9 + $0x45c] ss:$24 sps:$4 sm:$0xff]  }
 0x52f   :  { %6451 = vmatprep.mubr.bf16.mxu0 %v12643_v53  ;;  %6604 = vmatprep.mubr.bf16.mxu1 %v12605_v10 }
 0x530   :  { %7010 = vmatpush1.bf16.msra.mxu0 %v10156_v31  ;;  %6704 = vmatpush1.bf16.msra.mxu1 %v10159_v15  ;;  %v10174_v31 = vld [vmem:[#allocation9 + $0x160] ss:$24 sps:$4 sm:$0xff]  }
 0x531   :  { %7011 = vmatprep.subr.bf16.mxu0 %v10164_v24  ;;  %6705 = vmatprep.subr.bf16.mxu1 %v10167_v29  ;;  %v10177_v15 = vld [vmem:[#allocation9 + $0x458] ss:$24 sps:$4 sm:$0xff]   ;;  %v10182_v24 = vld [vmem:[#allocation9 + $0x194] ss:$24 sps:$4 sm:$0xff]  }
 0x532   :  { %v10185_v29 = vld [vmem:[#allocation9 + $0x48c] ss:$24 sps:$4 sm:$0xff]  }
 0x534   :  { %7012 = vmatpush1.bf16.msra.mxu0 %v10162_v11  ;;  %6706 = vmatpush1.bf16.msra.mxu1 %v10165_v58  ;;  %v10180_v11 = vld [vmem:[#allocation9 + $0x190] ss:$24 sps:$4 sm:$0xff]  }
 0x535   :  { %7013 = vmatprep.subr.bf16.mxu0 %v10170_v46  ;;  %6707 = vmatprep.subr.bf16.mxu1 %v10173_v39  ;;  %v10183_v58 = vld [vmem:[#allocation9 + $0x488] ss:$24 sps:$4 sm:$0xff]   ;;  %v10188_v46 = vld [vmem:[#allocation9 + $0x1c4] ss:$24 sps:$4 sm:$0xff]  }
 0x536   :  { %6452 = vmatmul.mubr.bf16.gmra.mrb[156].mxu0 %v12629_v6  ;;  %6605 = vmatmul.mubr.bf16.gmra.mrb[204].mxu1 %v12593_v3  ;;  %v10191_v39 = vld [vmem:[#allocation9 + $0x4bc] ss:$24 sps:$4 sm:$0xff]  }
 0x537   :  { %6461 = vmatprep.mubr.bf16.mxu0 %v12695_v63  ;;  %6614 = vmatprep.mubr.bf16.mxu1 %v12647_v34 }
 0x538   :  { %7014 = vmatpush1.bf16.msra.mxu0 %v10168_v1  ;;  %6708 = vmatpush1.bf16.msra.mxu1 %v10171_v4  ;;  %v10186_v1 = vld [vmem:[#allocation9 + $0x1c0] ss:$24 sps:$4 sm:$0xff]  }
 0x539   :  { %7015 = vmatprep.subr.bf16.mxu0 %v10176_v33  ;;  %6709 = vmatprep.subr.bf16.mxu1 %v10179_v43  ;;  %v10189_v4 = vld [vmem:[#allocation9 + $0x4b8] ss:$24 sps:$4 sm:$0xff]   ;;  %v10194_v33 = vld [vmem:[#allocation9 + $0x1f4] ss:$24 sps:$4 sm:$0xff]  }
 0x53a   :  { %v10197_v43 = vld [vmem:[#allocation9 + $0x4ec] ss:$24 sps:$4 sm:$0xff]  }
 0x53c   :  { %7016 = vmatpush1.bf16.msra.mxu0 %v10174_v31  ;;  %6710 = vmatpush1.bf16.msra.mxu1 %v10177_v15  ;;  %v10192_v31 = vld [vmem:[#allocation9 + $0x1f0] ss:$24 sps:$4 sm:$0xff]  }
 0x53d   :  { %7017 = vmatprep.subr.bf16.mxu0 %v10182_v24  ;;  %6711 = vmatprep.subr.bf16.mxu1 %v10185_v29  ;;  %v10195_v15 = vld [vmem:[#allocation9 + $0x4e8] ss:$24 sps:$4 sm:$0xff]   ;;  %v10200_v24 = vld [vmem:[#allocation9 + $0x224] ss:$24 sps:$4 sm:$0xff]  }
 0x53e   :  { %6462 = vmatmul.mubr.bf16.gmra.mrb[160].mxu0 %v12682_v9  ;;  %6615 = vmatmul.mubr.bf16.gmra.mrb[208].mxu1 %v12635_v2  ;;  %v10203_v29 = vld [vmem:[#allocation9 + $0x51c] ss:$24 sps:$4 sm:$0xff]  }
 0x53f   :  { %6471 = vmatprep.mubr.bf16.mxu0 %v12771_v36  ;;  %6624 = vmatprep.mubr.bf16.mxu1 %v12739_v57 }
 0x540   :  { %7018 = vmatpush1.bf16.msra.mxu0 %v10180_v11  ;;  %6712 = vmatpush1.bf16.msra.mxu1 %v10183_v58  ;;  %v10198_v11 = vld [vmem:[#allocation9 + $0x220] ss:$24 sps:$4 sm:$0xff]  }
 0x541   :  { %7019 = vmatprep.subr.bf16.mxu0 %v10188_v46  ;;  %6713 = vmatprep.subr.bf16.mxu1 %v10191_v39  ;;  %v10201_v58 = vld [vmem:[#allocation9 + $0x518] ss:$24 sps:$4 sm:$0xff]   ;;  %v10206_v46 = vld [vmem:[#allocation9 + $0x254] ss:$24 sps:$4 sm:$0xff]  }
 0x542   :  { %v10209_v39 = vld [vmem:[#allocation9 + $0x54c] ss:$24 sps:$4 sm:$0xff]  }
 0x544   :  { %7020 = vmatpush1.bf16.msra.mxu0 %v10186_v1  ;;  %6714 = vmatpush1.bf16.msra.mxu1 %v10189_v4  ;;  %v10204_v1 = vld [vmem:[#allocation9 + $0x250] ss:$24 sps:$4 sm:$0xff]  }
 0x545   :  { %7021 = vmatprep.subr.bf16.mxu0 %v10194_v33  ;;  %6715 = vmatprep.subr.bf16.mxu1 %v10197_v43  ;;  %v10207_v4 = vld [vmem:[#allocation9 + $0x548] ss:$24 sps:$4 sm:$0xff]   ;;  %v10212_v33 = vld [vmem:[#allocation9 + $0x284] ss:$24 sps:$4 sm:$0xff]  }
 0x546   :  { %6472 = vmatmul.mubr.bf16.gmra.mrb[164].mxu0 %v12759_v55  ;;  %6625 = vmatmul.mubr.bf16.gmra.mrb[212].mxu1 %v12727_v54  ;;  %v10215_v43 = vld [vmem:[#allocation9 + $0x57c] ss:$24 sps:$4 sm:$0xff]  }
 0x547   :  { %6481 = vmatprep.mubr.bf16.mxu0 %v12807_v42  ;;  %6634 = vmatprep.mubr.bf16.mxu1 %v12775_v25 }
 0x548   :  { %7022 = vmatpush1.bf16.msra.mxu0 %v10192_v31  ;;  %6716 = vmatpush1.bf16.msra.mxu1 %v10195_v15  ;;  %v10210_v31 = vld [vmem:[#allocation9 + $0x280] ss:$24 sps:$4 sm:$0xff]  }
 0x549   :  { %7023 = vmatprep.subr.bf16.mxu0 %v10200_v24  ;;  %6717 = vmatprep.subr.bf16.mxu1 %v10203_v29  ;;  %v10213_v15 = vld [vmem:[#allocation9 + $0x578] ss:$24 sps:$4 sm:$0xff]   ;;  %v10218_v24 = vld [vmem:[#allocation9 + $0x2b4] ss:$24 sps:$4 sm:$0xff]  }
 0x54a   :  { %v10221_v29 = vld [vmem:[#allocation9 + $0x5ac] ss:$24 sps:$4 sm:$0xff]  }
 0x54c   :  { %7024 = vmatpush1.bf16.msra.mxu0 %v10198_v11  ;;  %6718 = vmatpush1.bf16.msra.mxu1 %v10201_v58  ;;  %v10216_v11 = vld [vmem:[#allocation9 + $0x2b0] ss:$24 sps:$4 sm:$0xff]  }
 0x54d   :  { %7025 = vmatprep.subr.bf16.mxu0 %v10206_v46  ;;  %6719 = vmatprep.subr.bf16.mxu1 %v10209_v39  ;;  %v10219_v58 = vld [vmem:[#allocation9 + $0x5a8] ss:$24 sps:$4 sm:$0xff]   ;;  %v10224_v46 = vld [vmem:[#allocation9 + $0x2e4] ss:$24 sps:$4 sm:$0xff]  }
 0x54e   :  { %6482 = vmatmul.mubr.bf16.gmra.mrb[168].mxu0 %v12795_v59  ;;  %6635 = vmatmul.mubr.bf16.gmra.mrb[216].mxu1 %v12763_v45  ;;  %v10227_v39 = vld [vmem:[#allocation9 + $0x5dc] ss:$24 sps:$4 sm:$0xff]  }
 0x54f   :  { %6491 = vmatprep.mubr.bf16.mxu0 %v12863_v41  ;;  %6644 = vmatprep.mubr.bf16.mxu1 %v12837_v13  ;;  %v10236_v59 = vld [vmem:[#allocation9 + $0x344] ss:$24 sps:$4 sm:$0xff]  }
 0x550   :  { %7026 = vmatpush1.bf16.msra.mxu0 %v10204_v1  ;;  %6720 = vmatpush1.bf16.msra.mxu1 %v10207_v4  ;;  %v10222_v1 = vld [vmem:[#allocation9 + $0x2e0] ss:$24 sps:$4 sm:$0xff]  }
 0x551   :  { %7027 = vmatprep.subr.bf16.mxu0 %v10212_v33  ;;  %6721 = vmatprep.subr.bf16.mxu1 %v10215_v43  ;;  %v10225_v4 = vld [vmem:[#allocation9 + $0x5d8] ss:$24 sps:$4 sm:$0xff]   ;;  %v10230_v33 = vld [vmem:[#allocation9 + $0x314] ss:$24 sps:$4 sm:$0xff]  }
 0x552   :  { %v10233_v43 = vld [vmem:[#allocation9 + $0x60c] ss:$24 sps:$4 sm:$0xff]  }
 0x554   :  { %7028 = vmatpush1.bf16.msra.mxu0 %v10210_v31  ;;  %6722 = vmatpush1.bf16.msra.mxu1 %v10213_v15 }
 0x555   :  { %7029 = vmatprep.subr.bf16.mxu0 %v10218_v24  ;;  %6723 = vmatprep.subr.bf16.mxu1 %v10221_v29 }
 0x556   :  { %6492 = vmatmul.mubr.bf16.gmra.mrb[172].mxu0 %v12856_v56  ;;  %6645 = vmatmul.mubr.bf16.gmra.mrb[220].mxu1 %v12825_v12  ;;  %v10231_v56 = vld [vmem:[#allocation9 + $0x608] ss:$24 sps:$4 sm:$0xff]  }
 0x557   :  { %6501 = vmatprep.mubr.bf16.mxu0 %v12933_v35  ;;  %6654 = vmatprep.mubr.bf16.mxu1 %v12907_v18 }
 0x558   :  { %7030 = vmatpush1.bf16.msra.mxu0 %v10216_v11  ;;  %6724 = vmatpush1.bf16.msra.mxu1 %v10219_v58 }
 0x559   :  { %7031 = vmatprep.subr.bf16.mxu0 %v10224_v46  ;;  %6725 = vmatprep.subr.bf16.mxu1 %v10227_v39 }
 0x55b   :  { %v13129_v31 = vpop.f32.mrb[144].mxu1 }
 0x55c   :  { %v13131_v15 = vpop.f32.mrb[145].mxu1  ;;  %7032 = vmatpush1.bf16.msra.mxu0 %v10222_v1  ;;  %6726 = vmatpush1.bf16.msra.mxu1 %v10225_v4 }
 0x55d   :  { %v13133_v24 = vpop.f32.mrb[146].mxu1  ;;  %7154 = vmatprep.subr.bf16.mxu0 %v10230_v33  ;;  %6848 = vmatprep.subr.bf16.mxu1 %v10233_v43 }
 0x55e   :  { %v13135_v29 = vpop.f32.mrb[147].mxu1  ;;  %6502 = vmatmul.mubr.bf16.gmra.mrb[176].mxu0 %v12927_v23  ;;  %6655 = vmatmul.mubr.bf16.gmra.mrb[224].mxu1 %v12895_v8 }
 0x55f   :  { %6511 = vmatprep.mubr.bf16.mxu0 %v12989_v16  ;;  %6664 = vmatprep.mubr.bf16.mxu1 %v12965_v48 }
 0x563   :  { %v13141_v11 = vpop.f32.mrb[148].mxu1 }
 0x564   :  { %v13143_v58 = vpop.f32.mrb[149].mxu1 }
 0x565   :  { %v13145_v46 = vpop.f32.mrb[150].mxu1 }
 0x566   :  { %v13147_v39 = vpop.f32.mrb[151].mxu1  ;;  %6512 = vmatmul.mubr.bf16.gmra.mrb[180].mxu0 %v12983_v60  ;;  %6665 = vmatmul.mubr.bf16.gmra.mrb[228].mxu1 %v12953_v52 }
 0x567   :  { %6521 = vmatprep.mubr.bf16.mxu0 %v13041_v32  ;;  %6674 = vmatprep.mubr.bf16.mxu1 %v13017_v7 }
 0x56b   :  { %v13153_v1 = vpop.f32.mrb[152].mxu1 }
 0x56c   :  { %v13155_v4 = vpop.f32.mrb[153].mxu1 }
 0x56d   :  { %v13157_v33 = vpop.f32.mrb[154].mxu1 }
 0x56e   :  { %v13159_v43 = vpop.f32.mrb[155].mxu1  ;;  %6522 = vmatmul.mubr.bf16.gmra.mrb[184].mxu0 %v13035_v20  ;;  %6675 = vmatmul.mubr.bf16.gmra.mrb[232].mxu1 %v13005_v28 }
 0x56f   :  { %6531 = vmatprep.mubr.bf16.mxu0 %v13097_v47  ;;  %6684 = vmatprep.mubr.bf16.mxu1 %v13069_v26  ;;  %v10228_v47 = vld [vmem:[#allocation9 + $0x310] ss:$24 sps:$4 sm:$0xff]  }
 0x573   :  { %v13165_v60 = vpop.f32.mrb[156].mxu1 }
 0x574   :  { %15722 = vst [vmem:[#allocation198_spill] sm:$0xff] %v13165_v60  ;;  %v13167_v32 = vpop.f32.mrb[157].mxu1  ;;  %v10248_v60 = vld [vmem:[#allocation9 + $0x3a4] ss:$24 sps:$4 sm:$0xff]  }
 0x575   :  { %15723 = vst [vmem:[#allocation197_spill] sm:$0xff] %v13167_v32  ;;  %v13169_v16 = vpop.f32.mrb[158].mxu1 }
 0x576   :  { %15724 = vst [vmem:[#allocation199_spill] sm:$0xff] %v13169_v16  ;;  %v13171_v23 = vpop.f32.mrb[159].mxu1  ;;  %6532 = vmatmul.mubr.bf16.gmra.mrb[188].mxu0 %v13089_v0  ;;  %6685 = vmatmul.mubr.bf16.gmra.mrb[236].mxu1 %v13057_v21  ;;  %v10239_v16 = vld [vmem:[#allocation9 + $0x63c] ss:$24 sps:$4 sm:$0xff]   ;;  %v10237_v0 = vld [vmem:[#allocation9 + $0x638] ss:$24 sps:$4 sm:$0xff]  }
 0x577   :  { %15725 = vst [vmem:[#allocation200_spill] sm:$0xff] %v13171_v23  ;;  %6727 = vmatprep.mubr.bf16.mxu1 %v12347_v62  ;;  %7033 = vmatprep.mubr.bf16.mxu0 %v12343_v22  ;;  %v10234_v22 = vld [vmem:[#allocation9 + $0x340] ss:$24 sps:$4 sm:$0xff]   ;;  %v10240_v23 = vld [vmem:[#allocation9 + $0x370] ss:$24 sps:$4 sm:$0xff]  }
 0x57b   :  { %v13177_v20 = vpop.f32.mrb[160].mxu1 }
 0x57c   :  { %15726 = vst [vmem:[#allocation201_spill] sm:$0xff] %v13177_v20  ;;  %v13179_v35 = vpop.f32.mrb[161].mxu1 }
 0x57d   :  { %15727 = vst [vmem:[#allocation202_spill] sm:$0xff] %v13179_v35  ;;  %v13181_v41 = vpop.f32.mrb[162].mxu1  ;;  %v10242_v35 = vld [vmem:[#allocation9 + $0x374] ss:$24 sps:$4 sm:$0xff]  }
 0x57e   :  { %15728 = vst [vmem:[#allocation203_spill] sm:$0xff] %v13181_v41  ;;  %v13183_v32 = vpop.f32.mrb[163].mxu1  ;;  %6728 = vmatmul.mubr.bf16.vlgmr.msra.gmra.mrb[192].mxu1 %v12333_v17  ;;  %7034 = vmatmul.mubr.bf16.vlgmr.msra.gmra.mrb[192].mxu0 %v12329_v19  ;;  %v10245_v41 = vld [vmem:[#allocation9 + $0x66c] ss:$24 sps:$4 sm:$0xff]   ;;  %v10243_v19 = vld [vmem:[#allocation9 + $0x668] ss:$24 sps:$4 sm:$0xff]  }
 0x57f   :  { %15729 = vst [vmem:[#allocation204_spill] sm:$0xff] %v13183_v32  ;;  %7155 = vmatpush1.bf16.msra.mxu0 %v10228_v47  ;;  %6737 = vmatprep.mubr.bf16.mxu1 %v12461_v49 }
 0x580   :  { %7043 = vmatprep.mubr.bf16.mxu0 %v12457_v44  ;;  %6849 = vmatpush1.bf16.msra.mxu1 %v10231_v56  ;;  %v10251_v44 = vld [vmem:[#allocation9 + $0x69c] ss:$24 sps:$4 sm:$0xff]  }
 0x581   :  { %7156 = vmatprep.subr.bf16.mxu0 %v10236_v59  ;;  %6850 = vmatprep.subr.bf16.mxu1 %v10239_v16  ;;  %v10246_v59 = vld [vmem:[#allocation9 + $0x3a0] ss:$24 sps:$4 sm:$0xff]   ;;  %v10254_v16 = vld [vmem:[#allocation9 + $0x3d4] ss:$24 sps:$4 sm:$0xff]  }
 0x583   :  { %v13189_v20 = vpop.f32.mrb[164].mxu1  ;;  %7157 = vmatpush1.bf16.msra.mxu0 %v10234_v22 }
 0x584   :  { %v13191_v32 = vpop.f32.mrb[165].mxu1  ;;  %6851 = vmatpush1.bf16.msra.mxu1 %v10237_v0  ;;  %7158 = vmatprep.subr.bf16.mxu0 %v10242_v35  ;;  %v10249_v35 = vld [vmem:[#allocation9 + $0x698] ss:$24 sps:$4 sm:$0xff]  }
 0x585   :  { %v13193_v47 = vpop.f32.mrb[166].mxu1  ;;  %6852 = vmatprep.subr.bf16.mxu1 %v10245_v41  ;;  %v10257_v41 = vld [vmem:[#allocation9 + $0x6cc] ss:$24 sps:$4 sm:$0xff]  }
 0x586   :  { %15730 = vst [vmem:[#allocation205_spill] sm:$0xff] %v13193_v47  ;;  %v13195_v56 = vpop.f32.mrb[167].mxu1  ;;  %6738 = vmatmul.mubr.bf16.gmra.mrb[196].mxu1 %v12449_v50  ;;  %7044 = vmatmul.mubr.bf16.gmra.mrb[196].mxu0 %v12445_v5  ;;  %v10255_v5 = vld [vmem:[#allocation9 + $0x6c8] ss:$24 sps:$4 sm:$0xff]  }
 0x587   :  { %15731 = vst [vmem:[#allocation206_spill] sm:$0xff] %v13195_v56  ;;  %6747 = vmatprep.mubr.bf16.mxu1 %v12543_v30  ;;  %7053 = vmatprep.mubr.bf16.mxu0 %v12501_v51  ;;  %v10252_v56 = vld [vmem:[#allocation9 + $0x3d0] ss:$24 sps:$4 sm:$0xff]   ;;  %v10260_v51 = vld [vmem:[#allocation9 + $0x404] ss:$24 sps:$4 sm:$0xff]  }
 0x588   :  { %7159 = vmatpush1.bf16.msra.mxu0 %v10240_v23  ;;  %6853 = vmatpush1.bf16.msra.mxu1 %v10243_v19  ;;  %v10263_v23 = vld [vmem:[#allocation9 + $0x6fc] ss:$24 sps:$4 sm:$0xff]  }
 0x589   :  { %7160 = vmatprep.subr.bf16.mxu0 %v10248_v60  ;;  %6854 = vmatprep.subr.bf16.mxu1 %v10251_v44  ;;  %v15735_v60 = vld [vmem:[#allocation63_spill] sm:$0xff]  ;;  %v10258_v44 = vld [vmem:[#allocation9 + $0x400] ss:$24 sps:$4 sm:$0xff]  }
 0x58b   :  { %v13201_v0 = vpop.f32.mrb[168].mxu1 }
 0x58c   :  { %v13203_v22 = vpop.f32.mrb[169].mxu1  ;;  %7161 = vmatpush1.bf16.msra.mxu0 %v10246_v59  ;;  %6855 = vmatpush1.bf16.msra.mxu1 %v10249_v35  ;;  %v10261_v59 = vld [vmem:[#allocation9 + $0x6f8] ss:$24 sps:$4 sm:$0xff]   ;;  %v10266_v35 = vld [vmem:[#allocation9 + $0x434] ss:$24 sps:$4 sm:$0xff]  }
 0x58d   :  { %15732 = vst [vmem:[#allocation207_spill] sm:$0xff] %v13203_v22  ;;  %v13205_v47 = vpop.f32.mrb[170].mxu1  ;;  %7162 = vmatprep.subr.bf16.mxu0 %v10254_v16  ;;  %6856 = vmatprep.subr.bf16.mxu1 %v10257_v41  ;;  %v10269_v16 = vld [vmem:[#allocation9 + $0x72c] ss:$24 sps:$4 sm:$0xff]  }
 0x58e   :  { %15733 = vst [vmem:[#allocation208_spill] sm:$0xff] %v13205_v47  ;;  %v13207_v19 = vpop.f32.mrb[171].mxu1  ;;  %6748 = vmatmul.mubr.bf16.gmra.mrb[200].mxu1 %v12530_v37  ;;  %7054 = vmatmul.mubr.bf16.gmra.mrb[200].mxu0 %v12489_v14  ;;  %v10267_v14 = vld [vmem:[#allocation9 + $0x728] ss:$24 sps:$4 sm:$0xff]  }
 0x58f   :  { %15734 = vst [vmem:[#allocation209_spill] sm:$0xff] %v13207_v19  ;;  %6757 = vmatprep.mubr.bf16.mxu1 %v15735_v60  ;;  %7063 = vmatprep.mubr.bf16.mxu0 %v12605_v10  ;;  %v10264_v19 = vld [vmem:[#allocation9 + $0x430] ss:$24 sps:$4 sm:$0xff]   ;;  %v10272_v10 = vld [vmem:[#allocation9 + $0x464] ss:$24 sps:$4 sm:$0xff]  }
 0x590   :  { %7163 = vmatpush1.bf16.msra.mxu0 %v10252_v56  ;;  %6857 = vmatpush1.bf16.msra.mxu1 %v10255_v5  ;;  %v10275_v56 = vld [vmem:[#allocation9 + $0x75c] ss:$24 sps:$4 sm:$0xff]  }
 0x591   :  { %7164 = vmatprep.subr.bf16.mxu0 %v10260_v51  ;;  %6858 = vmatprep.subr.bf16.mxu1 %v10263_v23  ;;  %v15740_v51 = vld [vmem:[#allocation70_spill] sm:$0xff]  ;;  %v15741_v23 = vld [vmem:[#allocation92_spill] sm:$0xff] }
 0x593   :  { %v13213_v41 = vpop.f32.mrb[172].mxu1 }
 0x594   :  { %15736 = vst [vmem:[#allocation63_spill] sm:$0xff] %v13213_v41  ;;  %v13215_v47 = vpop.f32.mrb[173].mxu1  ;;  %7165 = vmatpush1.bf16.msra.mxu0 %v10258_v44  ;;  %6859 = vmatpush1.bf16.msra.mxu1 %v10261_v59  ;;  %v10270_v44 = vld [vmem:[#allocation9 + $0x460] ss:$24 sps:$4 sm:$0xff]  }
 0x595   :  { %15737 = vst [vmem:[#allocation210_spill] sm:$0xff] %v13215_v47  ;;  %v13217_v22 = vpop.f32.mrb[174].mxu1  ;;  %7166 = vmatprep.subr.bf16.mxu0 %v10266_v35  ;;  %6860 = vmatprep.subr.bf16.mxu1 %v10269_v16  ;;  %v10273_v59 = vld [vmem:[#allocation9 + $0x758] ss:$24 sps:$4 sm:$0xff]   ;;  %v10278_v35 = vld [vmem:[#allocation9 + $0x494] ss:$24 sps:$4 sm:$0xff]  }
 0x596   :  { %15738 = vst [vmem:[#allocation211_spill] sm:$0xff] %v13217_v22  ;;  %v13219_v5 = vpop.f32.mrb[175].mxu1  ;;  %6758 = vmatmul.mubr.bf16.gmra.mrb[204].mxu1 %v15740_v51  ;;  %7064 = vmatmul.mubr.bf16.gmra.mrb[204].mxu0 %v12593_v3  ;;  %v10281_v16 = vld [vmem:[#allocation9 + $0x78c] ss:$24 sps:$4 sm:$0xff]   ;;  %v10279_v3 = vld [vmem:[#allocation9 + $0x788] ss:$24 sps:$4 sm:$0xff]  }
 0x597   :  { %15739 = vst [vmem:[#allocation212_spill] sm:$0xff] %v13219_v5  ;;  %6767 = vmatprep.mubr.bf16.mxu1 %v15741_v23  ;;  %7073 = vmatprep.mubr.bf16.mxu0 %v12647_v34  ;;  %v10276_v5 = vld [vmem:[#allocation9 + $0x490] ss:$24 sps:$4 sm:$0xff]   ;;  %v10284_v34 = vld [vmem:[#allocation9 + $0x4c4] ss:$24 sps:$4 sm:$0xff]  }
 0x598   :  { %7167 = vmatpush1.bf16.msra.mxu0 %v10264_v19  ;;  %6861 = vmatpush1.bf16.msra.mxu1 %v10267_v14  ;;  %v10287_v19 = vld [vmem:[#allocation9 + $0x7bc] ss:$24 sps:$4 sm:$0xff]  }
 0x599   :  { %7168 = vmatprep.subr.bf16.mxu0 %v10272_v10  ;;  %6862 = vmatprep.subr.bf16.mxu1 %v10275_v56  ;;  %v15746_v10 = vld [vmem:[#allocation79_spill] sm:$0xff]  ;;  %v15747_v56 = vld [vmem:[#allocation102_spill] sm:$0xff] }
 0x59b   :  { %v13225_v22 = vpop.f32.mrb[176].mxu1 }
 0x59c   :  { %15742 = vst [vmem:[#allocation70_spill] sm:$0xff] %v13225_v22  ;;  %v13227_v47 = vpop.f32.mrb[177].mxu1  ;;  %7169 = vmatpush1.bf16.msra.mxu0 %v10270_v44  ;;  %6863 = vmatpush1.bf16.msra.mxu1 %v10273_v59  ;;  %v10282_v44 = vld [vmem:[#allocation9 + $0x4c0] ss:$24 sps:$4 sm:$0xff]  }
 0x59d   :  { %15743 = vst [vmem:[#allocation92_spill] sm:$0xff] %v13227_v47  ;;  %v13229_v41 = vpop.f32.mrb[178].mxu1  ;;  %7170 = vmatprep.subr.bf16.mxu0 %v10278_v35  ;;  %6864 = vmatprep.subr.bf16.mxu1 %v10281_v16  ;;  %v10285_v59 = vld [vmem:[#allocation9 + $0x7b8] ss:$24 sps:$4 sm:$0xff]   ;;  %v10290_v35 = vld [vmem:[#allocation9 + $0x4f4] ss:$24 sps:$4 sm:$0xff]  }
 0x59e   :  { %15744 = vst [vmem:[#allocation213_spill] sm:$0xff] %v13229_v41  ;;  %v13231_v14 = vpop.f32.mrb[179].mxu1  ;;  %6768 = vmatmul.mubr.bf16.gmra.mrb[208].mxu1 %v15746_v10  ;;  %7074 = vmatmul.mubr.bf16.gmra.mrb[208].mxu0 %v12635_v2  ;;  %v10293_v16 = vld [vmem:[#allocation9 + $0x7ec] ss:$24 sps:$4 sm:$0xff]   ;;  %v10291_v2 = vld [vmem:[#allocation9 + $0x7e8] ss:$24 sps:$4 sm:$0xff]  }
 0x59f   :  { %15745 = vst [vmem:[#allocation214_spill] sm:$0xff] %v13231_v14  ;;  %6777 = vmatprep.mubr.bf16.mxu1 %v15747_v56  ;;  %7083 = vmatprep.mubr.bf16.mxu0 %v12739_v57  ;;  %v10288_v14 = vld [vmem:[#allocation9 + $0x4f0] ss:$24 sps:$4 sm:$0xff]   ;;  %v10296_v57 = vld [vmem:[#allocation9 + $0x524] ss:$24 sps:$4 sm:$0xff]  }
 0x5a0   :  { %7171 = vmatpush1.bf16.msra.mxu0 %v10276_v5  ;;  %6865 = vmatpush1.bf16.msra.mxu1 %v10279_v3  ;;  %v10299_v5 = vld [vmem:[#allocation9 + $0x81c] ss:$24 sps:$4 sm:$0xff]  }
 0x5a1   :  { %7172 = vmatprep.subr.bf16.mxu0 %v10284_v34  ;;  %6866 = vmatprep.subr.bf16.mxu1 %v10287_v19  ;;  %v15752_v34 = vld [vmem:[#allocation89_spill] sm:$0xff]  ;;  %v15753_v19 = vld [vmem:[#allocation111_spill] sm:$0xff] }
 0x5a3   :  { %v13237_v41 = vpop.f32.mrb[180].mxu1 }
 0x5a4   :  { %15748 = vst [vmem:[#allocation79_spill] sm:$0xff] %v13237_v41  ;;  %v13239_v47 = vpop.f32.mrb[181].mxu1  ;;  %7173 = vmatpush1.bf16.msra.mxu0 %v10282_v44  ;;  %6867 = vmatpush1.bf16.msra.mxu1 %v10285_v59  ;;  %v10294_v44 = vld [vmem:[#allocation9 + $0x520] ss:$24 sps:$4 sm:$0xff]   ;;  %v15754_v41 = vld [vmem:[#allocation107_spill] sm:$0xff] }
 0x5a5   :  { %15749 = vst [vmem:[#allocation102_spill] sm:$0xff] %v13239_v47  ;;  %v13241_v22 = vpop.f32.mrb[182].mxu1  ;;  %7174 = vmatprep.subr.bf16.mxu0 %v10290_v35  ;;  %6868 = vmatprep.subr.bf16.mxu1 %v10293_v16  ;;  %v10297_v59 = vld [vmem:[#allocation9 + $0x818] ss:$24 sps:$4 sm:$0xff]   ;;  %v10302_v35 = vld [vmem:[#allocation9 + $0x554] ss:$24 sps:$4 sm:$0xff]  }
 0x5a6   :  { %15750 = vst [vmem:[#allocation215_spill] sm:$0xff] %v13241_v22  ;;  %v13243_v3 = vpop.f32.mrb[183].mxu1  ;;  %6778 = vmatmul.mubr.bf16.gmra.mrb[212].mxu1 %v15752_v34  ;;  %7084 = vmatmul.mubr.bf16.gmra.mrb[212].mxu0 %v12727_v54  ;;  %v10305_v16 = vld [vmem:[#allocation9 + $0x84c] ss:$24 sps:$4 sm:$0xff]   ;;  %v10300_v22 = vld [vmem:[#allocation9 + $0x550] ss:$24 sps:$4 sm:$0xff]  }
 0x5a7   :  { %15751 = vst [vmem:[#allocation216_spill] sm:$0xff] %v13243_v3  ;;  %6787 = vmatprep.mubr.bf16.mxu1 %v15753_v19  ;;  %7093 = vmatprep.mubr.bf16.mxu0 %v12775_v25  ;;  %v10303_v3 = vld [vmem:[#allocation9 + $0x848] ss:$24 sps:$4 sm:$0xff]   ;;  %v10308_v47 = vld [vmem:[#allocation9 + $0x584] ss:$24 sps:$4 sm:$0xff]   ;;  %v15755_v25 = vld [vmem:[#allocation121_spill] sm:$0xff] }
 0x5a8   :  { %7175 = vmatpush1.bf16.msra.mxu0 %v10288_v14  ;;  %6869 = vmatpush1.bf16.msra.mxu1 %v10291_v2  ;;  %v10311_v54 = vld [vmem:[#allocation9 + $0x87c] ss:$24 sps:$4 sm:$0xff]   ;;  %v10306_v14 = vld [vmem:[#allocation9 + $0x580] ss:$24 sps:$4 sm:$0xff]  }
 0x5a9   :  { %7176 = vmatprep.subr.bf16.mxu0 %v10296_v57  ;;  %6870 = vmatprep.subr.bf16.mxu1 %v10299_v5  ;;  %v10309_v2 = vld [vmem:[#allocation9 + $0x878] ss:$24 sps:$4 sm:$0xff]   ;;  %v10314_v57 = vld [vmem:[#allocation9 + $0x5b4] ss:$24 sps:$4 sm:$0xff]  }
 0x5aa   :  { %v10317_v5 = vld [vmem:[#allocation9 + $0x8ac] ss:$24 sps:$4 sm:$0xff]  }
 0x5ac   :  { %7177 = vmatpush1.bf16.msra.mxu0 %v10294_v44  ;;  %6871 = vmatpush1.bf16.msra.mxu1 %v10297_v59  ;;  %v10312_v44 = vld [vmem:[#allocation9 + $0x5b0] ss:$24 sps:$4 sm:$0xff]  }
 0x5ad   :  { %7178 = vmatprep.subr.bf16.mxu0 %v10302_v35  ;;  %6872 = vmatprep.subr.bf16.mxu1 %v10305_v16  ;;  %v10315_v59 = vld [vmem:[#allocation9 + $0x8a8] ss:$24 sps:$4 sm:$0xff]   ;;  %v10320_v35 = vld [vmem:[#allocation9 + $0x5e4] ss:$24 sps:$4 sm:$0xff]   ;;  %v15756_v16 = vld [vmem:[#allocation128_spill] sm:$0xff] }
 0x5ae   :  { %6788 = vmatmul.mubr.bf16.gmra.mrb[216].mxu1 %v15754_v41  ;;  %7094 = vmatmul.mubr.bf16.gmra.mrb[216].mxu0 %v12763_v45  ;;  %v10323_v45 = vld [vmem:[#allocation9 + $0x8dc] ss:$24 sps:$4 sm:$0xff]  }
 0x5af   :  { %6797 = vmatprep.mubr.bf16.mxu1 %v15755_v25  ;;  %7103 = vmatprep.mubr.bf16.mxu0 %v12837_v13  ;;  %v15757_v13 = vld [vmem:[#allocation137_spill] sm:$0xff] }
 0x5b0   :  { %7179 = vmatpush1.bf16.msra.mxu0 %v10300_v22  ;;  %6873 = vmatpush1.bf16.msra.mxu1 %v10303_v3  ;;  %v10321_v22 = vld [vmem:[#allocation9 + $0x8d8] ss:$24 sps:$4 sm:$0xff]   ;;  %v10326_v3 = vld [vmem:[#allocation9 + $0x614] ss:$24 sps:$4 sm:$0xff]  }
 0x5b1   :  { %7180 = vmatprep.subr.bf16.mxu0 %v10308_v47  ;;  %6874 = vmatprep.subr.bf16.mxu1 %v10311_v54  ;;  %v10318_v47 = vld [vmem:[#allocation9 + $0x5e0] ss:$24 sps:$4 sm:$0xff]   ;;  %v15758_v54 = vld [vmem:[#allocation135_spill] sm:$0xff] }
 0x5b4   :  { %7181 = vmatpush1.bf16.msra.mxu0 %v10306_v14  ;;  %6875 = vmatpush1.bf16.msra.mxu1 %v10309_v2  ;;  %v15761_v14 = vld [vmem:[#allocation169_spill] sm:$0xff] }
 0x5b5   :  { %7182 = vmatprep.subr.bf16.mxu0 %v10314_v57  ;;  %6876 = vmatprep.subr.bf16.mxu1 %v10317_v5  ;;  %v15762_v57 = vld [vmem:[#allocation167_spill] sm:$0xff] }
 0x5b6   :  { %6798 = vmatmul.mubr.bf16.gmra.mrb[220].mxu1 %v15756_v16  ;;  %7104 = vmatmul.mubr.bf16.gmra.mrb[220].mxu0 %v12825_v12  ;;  %v15759_v12 = vld [vmem:[#allocation157_spill] sm:$0xff] }
 0x5b7   :  { %6807 = vmatprep.mubr.bf16.mxu1 %v15757_v13  ;;  %7113 = vmatprep.mubr.bf16.mxu0 %v12907_v18  ;;  %v15760_v18 = vld [vmem:[#allocation155_spill] sm:$0xff] }
 0x5b8   :  { %7183 = vmatpush1.bf16.msra.mxu0 %v10312_v44  ;;  %6877 = vmatpush1.bf16.msra.mxu1 %v10315_v59  ;;  %v10324_v59 = vld [vmem:[#allocation9 + $0x610] ss:$24 sps:$4 sm:$0xff]  }
 0x5b9   :  { %7184 = vmatprep.subr.bf16.mxu0 %v10320_v35  ;;  %6878 = vmatprep.subr.bf16.mxu1 %v10323_v45  ;;  %v15766_v35 = vld [vmem:[#allocation36_spill] sm:$0xff]  ;;  %v4613_v45 = vlaneseq }
 0x5bc   :  { %7185 = vmatpush1.bf16.msra.mxu0 %v10318_v47  ;;  %6879 = vmatpush1.bf16.msra.mxu1 %v10321_v22  ;;  %v10332_v47 = vld [vmem:[#allocation9 + $0x674] ss:$24 sps:$4 sm:$0xff]   ;;  %v10335_v22 = vld [vmem:[#allocation9 + $0x6a4] ss:$24 sps:$4 sm:$0xff]  }
 0x5bd   :  { %7307 = vmatprep.subr.bf16.mxu0 %v10326_v3  ;;  %9452 = vmatprep.subr.bf16.mxu1 %v10326_v3  ;;  %v13292_v3 = vld [vmem:[#allocation11] sm:$0x3f] }
 0x5be   :  { %6808 = vmatmul.mubr.bf16.gmra.mrb[224].mxu1 %v15758_v54  ;;  %7114 = vmatmul.mubr.bf16.gmra.mrb[224].mxu0 %v12895_v8  ;;  %v15763_v8 = vld [vmem:[#allocation189_spill] sm:$0xff]  ;;  %15768 = vst [vmem:[#allocation111_spill] sm:$0xff] %v13292_v3 }
 0x5bf   :  { %6817 = vmatprep.mubr.bf16.mxu1 %v15759_v12  ;;  %7123 = vmatprep.mubr.bf16.mxu0 %v12965_v48 }
 0x5c6   :  { %6818 = vmatmul.mubr.bf16.gmra.mrb[228].mxu1 %v15760_v18  ;;  %7124 = vmatmul.mubr.bf16.gmra.mrb[228].mxu0 %v12953_v52  ;;  %v15764_v52 = vld [vmem:[#allocation187_spill] sm:$0xff] }
 0x5c7   :  { %6827 = vmatprep.mubr.bf16.mxu1 %v15761_v14  ;;  %7133 = vmatprep.mubr.bf16.mxu0 %v13017_v7  ;;  %v15765_v7 = vld [vmem:[#allocation38_spill] sm:$0xff] }
 0x5cd   :  { %v13265_v2 = vpop.f32.mrb[184].mxu1 }
 0x5ce   :  { %6828 = vmatmul.mubr.bf16.gmra.mrb[232].mxu1 %v15762_v57  ;;  %7134 = vmatmul.mubr.bf16.gmra.mrb[232].mxu0 %v13005_v28  ;;  %v13269_v5 = vpop.f32.mrb[185].mxu1  ;;  %v10329_v28 = vld [vmem:[#allocation9 + $0x644] ss:$24 sps:$4 sm:$0xff]  }
 0x5cf   :  { %6837 = vmatprep.mubr.bf16.mxu1 %v15763_v8  ;;  %7143 = vmatprep.mubr.bf16.mxu0 %v13069_v26  ;;  %v13273_v48 = vpop.f32.mrb[186].mxu1  ;;  %v10327_v26 = vld [vmem:[#allocation9 + $0x640] ss:$24 sps:$4 sm:$0xff]  }
 0x5d0   :  { %v13275_v44 = vpop.f32.mrb[187].mxu1 }
 0x5d6   :  { %6838 = vmatmul.mubr.bf16.gmra.mrb[236].mxu1 %v15764_v52  ;;  %7144 = vmatmul.mubr.bf16.gmra.mrb[236].mxu0 %v13057_v21  ;;  %v13285_v21 = vshrl.u32 %v4613_v45, 7 }
 0x5d7   :  { %6880 = vmatprep.mubr.bf16.mxu1 %v15765_v7  ;;  %7186 = vmatprep.mubr.bf16.mxu0 %v12347_v62  ;;  %v10330_v62 = vld [vmem:[#allocation9 + $0x670] ss:$24 sps:$4 sm:$0xff]  }
 0x5d8   :  { %15767 = vst [vmem:[#allocation89_spill] sm:$0xff] %v13285_v21 }
 0x5de   :  { %6881 = vmatmul.mubr.bf16.vlgmr.msra.gmra.mrb[192].mxu1 %v15766_v35  ;;  %7187 = vmatmul.mubr.bf16.vlgmr.msra.gmra.mrb[192].mxu0 %v12333_v17  ;;  %v15167_v17 = vsub.s32 0, %v13285_v21 }
 0x5df   :  { %7308 = vmatpush1.bf16.msra.mxu0 %v10324_v59  ;;  %6890 = vmatprep.mubr.bf16.mxu1 %v12497_v38 }
 0x5e0   :  { %7196 = vmatprep.mubr.bf16.mxu0 %v12461_v49  ;;  %9468 = vmatpush1.bf16.msra.mxu1 %v10324_v59  ;;  %v10333_v49 = vld [vmem:[#allocation9 + $0x6a0] ss:$24 sps:$4 sm:$0xff]   ;;  %v15168_v59 = vsub.s32 1, %v13285_v21 }
 0x5e1   :  { %7309 = vmatprep.subr.bf16.mxu0 %v10329_v28  ;;  %9453 = vmatprep.subr.bf16.mxu1 %v10329_v28 }
 0x5e3   :  { %7310 = vmatpush1.bf16.msra.mxu0 %v10327_v26 }
 0x5e4   :  { %9469 = vmatpush1.bf16.msra.mxu1 %v10327_v26  ;;  %7311 = vmatprep.subr.bf16.mxu0 %v10332_v47  ;;  %v10338_v26 = vld [vmem:[#allocation9 + $0x6d4] ss:$24 sps:$4 sm:$0xff]  }
 0x5e5   :  { %9454 = vmatprep.subr.bf16.mxu1 %v10332_v47 }
 0x5e6   :  { %6891 = vmatmul.mubr.bf16.gmra.mrb[196].mxu1 %v12483_v40  ;;  %7197 = vmatmul.mubr.bf16.gmra.mrb[196].mxu0 %v12449_v50 }
 0x5e7   :  { %6900 = vmatprep.mubr.bf16.mxu1 %v12547_v61  ;;  %7206 = vmatprep.mubr.bf16.mxu0 %v12543_v30  ;;  %v13304_v30 = vrot.slane %v13292_v3, %v15167_v17  ;;  %v10339_v17 = vld [vmem:[#allocation9 + $0x700] ss:$24 sps:$4 sm:$0xff]  }
 0x5e8   :  { %7312 = vmatpush1.bf16.msra.mxu0 %v10330_v62  ;;  %9470 = vmatpush1.bf16.msra.mxu1 %v10330_v62  ;;  %v10336_v62 = vld [vmem:[#allocation9 + $0x6d0] ss:$24 sps:$4 sm:$0xff]  }
 0x5e9   :  { %v13295_v28 = vpop.f32.mrb[188].mxu1  ;;  %7313 = vmatprep.subr.bf16.mxu0 %v10335_v22  ;;  %9455 = vmatprep.subr.bf16.mxu1 %v10335_v22  ;;  %v10341_v22 = vld [vmem:[#allocation9 + $0x704] ss:$24 sps:$4 sm:$0xff]  }
 0x5ea   :  { %15769 = vst [vmem:[#allocation107_spill] sm:$0xff] %v13295_v28  ;;  %v13297_v45 = vpop.f32.mrb[189].mxu1  ;;  %v13311_v28 = vrot.slane %v13292_v3, %v15168_v59 }
 0x5eb   :  { %15770 = vst [vmem:[#allocation121_spill] sm:$0xff] %v13297_v45  ;;  %v13299_v50 = vpop.f32.mrb[190].mxu1 }
 0x5ec   :  { %15771 = vst [vmem:[#allocation128_spill] sm:$0xff] %v13299_v50  ;;  %v13306_v47 = vpop.f32.mrb[191].mxu1  ;;  %7314 = vmatpush1.bf16.msra.mxu0 %v10333_v49  ;;  %9471 = vmatpush1.bf16.msra.mxu1 %v10333_v49  ;;  %v6118_v49 = vadd.f32 %v13129_v31, %v13304_v30  ;;  %v6120_v59 = vadd.f32 %v13131_v15, %v13311_v28  ;;  %v10342_v15 = vld [vmem:[#allocation9 + $0x730] ss:$24 sps:$4 sm:$0xff]  }
 0x5ed   :  { %15772 = vst [vmem:[#allocation137_spill] sm:$0xff] %v13306_v47  ;;  %7315 = vmatprep.subr.bf16.mxu0 %v10338_v26  ;;  %9456 = vmatprep.subr.bf16.mxu1 %v10338_v26  ;;  %v10344_v26 = vld [vmem:[#allocation9 + $0x734] ss:$24 sps:$4 sm:$0xff]  }
 0x5ee   :  { %6901 = vmatmul.mubr.bf16.gmra.mrb[200].mxu1 %v12534_v27  ;;  %7207 = vmatmul.mubr.bf16.gmra.mrb[200].mxu0 %v12530_v37  ;;  %v6122_v37 = vadd.f32 %v13133_v24, %v13304_v30  ;;  %v13331_v24 = vld [vmem:[#allocation12] sm:$0x3f] }
 0x5ef   :  { %6910 = vmatprep.mubr.bf16.mxu1 %v12643_v53  ;;  %7216 = vmatprep.mubr.bf16.mxu0 %v15735_v60  ;;  %v6124_v60 = vadd.f32 %v13135_v29, %v13311_v28  ;;  %v6130_v29 = vadd.f32 %v13143_v58, %v13311_v28 }
 0x5f0   :  { %7316 = vmatpush1.bf16.msra.mxu0 %v10336_v62  ;;  %9472 = vmatpush1.bf16.msra.mxu1 %v10336_v62 }
 0x5f1   :  { %v6423_v3 = vpop.f32.mrb[144].mxu0  ;;  %7317 = vmatprep.subr.bf16.mxu0 %v10341_v22  ;;  %9457 = vmatprep.subr.bf16.mxu1 %v10341_v22  ;;  %v10347_v22 = vld [vmem:[#allocation9 + $0x764] ss:$24 sps:$4 sm:$0xff]  }
 0x5f2   :  { %v9485_v27 = vadd.f32 %v6423_v3, %v6118_v49  ;;  %v6425_v53 = vpop.f32.mrb[145].mxu0  ;;  %v6132_v3 = vadd.f32 %v13145_v46, %v13304_v30  ;;  %v15774_v46 = vsub.s32 1, %v13285_v21 }
 0x5f3   :  { %v9487_v47 = vadd.f32 %v6425_v53, %v6120_v59  ;;  %v6427_v31 = vpop.f32.mrb[146].mxu0  ;;  %v10345_v53 = vld [vmem:[#allocation9 + $0x760] ss:$24 sps:$4 sm:$0xff]  }
 0x5f4   :  { %10468 = vtanh.f32 %v9485_v27  ;;  %v9489_v62 = vadd.f32 %v6427_v31, %v6122_v37  ;;  %v6429_v50 = vpop.f32.mrb[147].mxu0  ;;  %7318 = vmatpush1.bf16.msra.mxu0 %v10339_v17  ;;  %9473 = vmatpush1.bf16.msra.mxu1 %v10339_v17  ;;  %v6128_v27 = vadd.f32 %v13141_v11, %v13304_v30  ;;  %v6134_v11 = vadd.f32 %v13147_v39, %v13311_v28  ;;  %v10348_v37 = vld [vmem:[#allocation9 + $0x790] ss:$24 sps:$4 sm:$0xff]   ;;  %v10353_v31 = vld [vmem:[#allocation9 + $0x7c4] ss:$24 sps:$4 sm:$0xff]  }
 0x5f5   :  { %10470 = vtanh.f32 %v9487_v47  ;;  %v9491_v45 = vadd.f32 %v6429_v50, %v6124_v60  ;;  %7319 = vmatprep.subr.bf16.mxu0 %v10344_v26  ;;  %9458 = vmatprep.subr.bf16.mxu1 %v10344_v26  ;;  %v15773_v47 = vsub.s32 0, %v13285_v21  ;;  %v13347_v60 = vrot.slane %v13331_v24, %v15774_v46  ;;  %v10354_v46 = vld [vmem:[#allocation9 + $0x7f0] ss:$24 sps:$4 sm:$0xff]  }
 0x5f6   :  { %10472 = vtanh.f32 %v9489_v62  ;;  %6911 = vmatmul.mubr.bf16.gmra.mrb[204].mxu1 %v12629_v6  ;;  %7217 = vmatmul.mubr.bf16.gmra.mrb[204].mxu0 %v15740_v51  ;;  %v10350_v51 = vld [vmem:[#allocation9 + $0x794] ss:$24 sps:$4 sm:$0xff]  }
 0x5f7   :  { %10474 = vtanh.f32 %v9491_v45  ;;  %6920 = vmatprep.mubr.bf16.mxu1 %v12695_v63  ;;  %7226 = vmatprep.mubr.bf16.mxu0 %v15741_v23  ;;  %v13342_v49 = vrot.slane %v13331_v24, %v15773_v47  ;;  %v6144_v47 = vadd.f32 %v13159_v43, %v13311_v28 }
 0x5f8   :  { %7320 = vmatpush1.bf16.msra.mxu0 %v10342_v15  ;;  %9474 = vmatpush1.bf16.msra.mxu1 %v10342_v15 }
 0x5f9   :  { %v6433_v17 = vpop.f32.mrb[148].mxu0  ;;  %7321 = vmatprep.subr.bf16.mxu0 %v10347_v22  ;;  %9459 = vmatprep.subr.bf16.mxu1 %v10347_v22 }
 0x5fa   :  { %v9493_v59 = vadd.f32 %v6433_v17, %v6128_v27  ;;  %v6435_v23 = vpop.f32.mrb[149].mxu0 }
 0x5fb   :  { %v9495_v45 = vadd.f32 %v6435_v23, %v6130_v29  ;;  %v6437_v50 = vpop.f32.mrb[150].mxu0  ;;  %v10351_v29 = vld [vmem:[#allocation9 + $0x7c0] ss:$24 sps:$4 sm:$0xff]   ;;  %v6142_v23 = vadd.f32 %v13157_v33, %v13304_v30 }
 0x5fc   :  { %10476 = vtanh.f32 %v9493_v59  ;;  %v9497_v58 = vadd.f32 %v6437_v50, %v6132_v3  ;;  %v6439_v26 = vpop.f32.mrb[151].mxu0  ;;  %7322 = vmatpush1.bf16.msra.mxu0 %v10345_v53  ;;  %9475 = vmatpush1.bf16.msra.mxu1 %v10345_v53  ;;  %v6138_v53 = vadd.f32 %v13153_v1, %v13304_v30  ;;  %v10356_v59 = vld [vmem:[#allocation9 + $0x7f4] ss:$24 sps:$4 sm:$0xff]  }
 0x5fd   :  { %10478 = vtanh.f32 %v9495_v45  ;;  %v9499_v39 = vadd.f32 %v6439_v26, %v6134_v11  ;;  %7323 = vmatprep.subr.bf16.mxu0 %v10350_v51  ;;  %9460 = vmatprep.subr.bf16.mxu1 %v10350_v51 }
 0x5fe   :  { %v10469_v62 = vpop.eup %10468  ;;  %10480 = vtanh.f32 %v9497_v58  ;;  %6921 = vmatmul.mubr.bf16.gmra.mrb[208].mxu1 %v12682_v9  ;;  %7227 = vmatmul.mubr.bf16.gmra.mrb[208].mxu0 %v15746_v10  ;;  %v6140_v10 = vadd.f32 %v13155_v4, %v13311_v28 }
 0x5ff   :  { %v10471_v15 = vpop.eup %10470  ;;  %10482 = vtanh.f32 %v9499_v39  ;;  %6930 = vmatprep.mubr.bf16.mxu1 %v12771_v36  ;;  %7236 = vmatprep.mubr.bf16.mxu0 %v15747_v56  ;;  %v7636_v22 = vmul.f32 %v10469_v62, %v13342_v49 }
 0x600   :  { %v10473_v27 = vpop.eup %10472  ;;  %7324 = vmatpush1.bf16.msra.mxu0 %v10348_v37  ;;  %9476 = vmatpush1.bf16.msra.mxu1 %v10348_v37  ;;  %v7637_v17 = vmul.f32 %v10471_v15, %v13347_v60 }
 0x601   :  { %v10475_v51 = vpop.eup %10474  ;;  %v6443_v3 = vpop.f32.mrb[152].mxu0  ;;  %7325 = vmatprep.subr.bf16.mxu0 %v10353_v31  ;;  %9461 = vmatprep.subr.bf16.mxu1 %v10353_v31  ;;  %v7642_v56 = vmul.f32 %v10473_v27, %v13342_v49  ;;  %v10359_v31 = vld [vmem:[#allocation9 + $0x824] ss:$24 sps:$4 sm:$0xff]  }
 0x602   :  { %v9501_v11 = vadd.f32 %v6443_v3, %v6138_v53  ;;  %v6445_v1 = vpop.f32.mrb[153].mxu0  ;;  %v13362_v45 = vadd.f32 %v7637_v17, %v7636_v22  ;;  %v7643_v50 = vmul.f32 %v10475_v51, %v13347_v60  ;;  %v15775_v27 = vld [vmem:[#allocation198_spill] sm:$0xff] }
 0x603   :  { %v9503_v58 = vadd.f32 %v6445_v1, %v6140_v10  ;;  %v6447_v4 = vpop.f32.mrb[154].mxu0  ;;  %v6148_v53 = vadd.f32 %v15775_v27, %v13304_v30  ;;  %v15779_v27 = vld [vmem:[#allocation118_spill] sm:$0xff] }
 0x604   :  { %10484 = vtanh.f32 %v9501_v11  ;;  %v9505_v26 = vadd.f32 %v6447_v4, %v6142_v23  ;;  %v6449_v37 = vpop.f32.mrb[155].mxu0  ;;  %7326 = vmatpush1.bf16.msra.mxu0 %v10351_v29  ;;  %9477 = vmatpush1.bf16.msra.mxu1 %v10351_v29  ;;  %v13367_v39 = vadd.f32 %v7643_v50, %v7642_v56  ;;  %v10357_v29 = vld [vmem:[#allocation9 + $0x820] ss:$24 sps:$4 sm:$0xff]   ;;  %v15777_v56 = vld [vmem:[#allocation199_spill] sm:$0xff] }
 0x605   :  { %10486 = vtanh.f32 %v9503_v58  ;;  %v9507_v33 = vadd.f32 %v6449_v37, %v6144_v47  ;;  %7327 = vmatprep.subr.bf16.mxu0 %v10356_v59  ;;  %9462 = vmatprep.subr.bf16.mxu1 %v10356_v59  ;;  %v10362_v59 = vld [vmem:[#allocation9 + $0x854] ss:$24 sps:$4 sm:$0xff]   ;;  %v6152_v23 = vadd.f32 %v15777_v56, %v13304_v30 }
 0x606   :  { %v10477_v62 = vpop.eup %10476  ;;  %10488 = vtanh.f32 %v9505_v26  ;;  %6931 = vmatmul.mubr.bf16.gmra.mrb[212].mxu1 %v12759_v55  ;;  %7237 = vmatmul.mubr.bf16.gmra.mrb[212].mxu0 %v15752_v34  ;;  %v15776_v34 = vld [vmem:[#allocation197_spill] sm:$0xff]  ;;  %v15778_v58 = vld [vmem:[#allocation200_spill] sm:$0xff] }
 0x607   :  { %v10479_v43 = vpop.eup %10478  ;;  %10490 = vtanh.f32 %v9507_v33  ;;  %6940 = vmatprep.mubr.bf16.mxu1 %v12807_v42  ;;  %7246 = vmatprep.mubr.bf16.mxu0 %v15753_v19  ;;  %v7648_v15 = vmul.f32 %v10477_v62, %v13342_v49  ;;  %v6150_v10 = vadd.f32 %v15776_v34, %v13311_v28  ;;  %v6154_v4 = vadd.f32 %v15778_v58, %v13311_v28  ;;  %v15781_v34 = vld [vmem:[#allocation201_spill] sm:$0xff] }
 0x608   :  { %v10481_v22 = vpop.eup %10480  ;;  %7328 = vmatpush1.bf16.msra.mxu0 %v10354_v46  ;;  %9478 = vmatpush1.bf16.msra.mxu1 %v10354_v46  ;;  %v7649_v17 = vmul.f32 %v10479_v43, %v13347_v60 }
 0x609   :  { %v10483_v51 = vpop.eup %10482  ;;  %v6453_v3 = vpop.f32.mrb[156].mxu0  ;;  %7329 = vmatprep.subr.bf16.mxu0 %v10359_v31  ;;  %9463 = vmatprep.subr.bf16.mxu1 %v10359_v31  ;;  %v7654_v19 = vmul.f32 %v10481_v22, %v13342_v49  ;;  %v10360_v31 = vld [vmem:[#allocation9 + $0x850] ss:$24 sps:$4 sm:$0xff]  }
 0x60a   :  { %v9509_v11 = vadd.f32 %v6453_v3, %v6148_v53  ;;  %v6455_v1 = vpop.f32.mrb[157].mxu0  ;;  %v13382_v50 = vadd.f32 %v7649_v17, %v7648_v15  ;;  %v7655_v47 = vmul.f32 %v10483_v51, %v13347_v60  ;;  %v10365_v15 = vld [vmem:[#allocation9 + $0x884] ss:$24 sps:$4 sm:$0xff]   ;;  %v10363_v3 = vld [vmem:[#allocation9 + $0x880] ss:$24 sps:$4 sm:$0xff]  }
 0x60b   :  { %v9511_v26 = vadd.f32 %v6455_v1, %v6150_v10  ;;  %v6457_v37 = vpop.f32.mrb[158].mxu0  ;;  %v15780_v17 = vld [vmem:[#allocation127_spill] sm:$0xff]  ;;  %v6158_v10 = vadd.f32 %v15781_v34, %v13304_v30 }
 0x60c   :  { %10492 = vtanh.f32 %v9509_v11  ;;  %v9513_v46 = vadd.f32 %v6457_v37, %v6152_v23  ;;  %v6459_v33 = vpop.f32.mrb[159].mxu0  ;;  %7330 = vmatpush1.bf16.msra.mxu0 %v10357_v29  ;;  %9479 = vmatpush1.bf16.msra.mxu1 %v10357_v29  ;;  %v13387_v62 = vadd.f32 %v7655_v47, %v7654_v19  ;;  %v10368_v11 = vld [vmem:[#allocation9 + $0x8b4] ss:$24 sps:$4 sm:$0xff]   ;;  %v15783_v1 = vld [vmem:[#allocation203_spill] sm:$0xff] }
 0x60d   :  { %10494 = vtanh.f32 %v9511_v26  ;;  %v9515_v43 = vadd.f32 %v6459_v33, %v6154_v4  ;;  %7331 = vmatprep.subr.bf16.mxu0 %v10362_v59  ;;  %9464 = vmatprep.subr.bf16.mxu1 %v10362_v59  ;;  %v6162_v47 = vadd.f32 %v15783_v1, %v13304_v30 }
 0x60e   :  { %v10485_v22 = vpop.eup %10484  ;;  %10496 = vtanh.f32 %v9513_v46  ;;  %6941 = vmatmul.mubr.bf16.gmra.mrb[216].mxu1 %v15779_v27  ;;  %7247 = vmatmul.mubr.bf16.gmra.mrb[216].mxu0 %v15754_v41  ;;  %v15782_v41 = vld [vmem:[#allocation202_spill] sm:$0xff]  ;;  %v15784_v46 = vld [vmem:[#allocation204_spill] sm:$0xff] }
 0x60f   :  { %v10487_v53 = vpop.eup %10486  ;;  %10498 = vtanh.f32 %v9515_v43  ;;  %6950 = vmatprep.mubr.bf16.mxu1 %v15780_v17  ;;  %7256 = vmatprep.mubr.bf16.mxu0 %v15755_v25  ;;  %v7660_v29 = vmul.f32 %v10485_v22, %v13342_v49  ;;  %v6160_v56 = vadd.f32 %v15782_v41, %v13311_v28  ;;  %v6164_v33 = vadd.f32 %v15784_v46, %v13311_v28  ;;  %v15786_v41 = vld [vmem:[#allocation145_spill] sm:$0xff] }
 0x610   :  { %v10489_v51 = vpop.eup %10488  ;;  %7332 = vmatpush1.bf16.msra.mxu0 %v10360_v31  ;;  %9480 = vmatpush1.bf16.msra.mxu1 %v10360_v31  ;;  %v7661_v59 = vmul.f32 %v10487_v53, %v13347_v60  ;;  %v10366_v53 = vld [vmem:[#allocation9 + $0x8b0] ss:$24 sps:$4 sm:$0xff]  }
 0x611   :  { %v10491_v19 = vpop.eup %10490  ;;  %v6463_v23 = vpop.f32.mrb[160].mxu0  ;;  %7333 = vmatprep.subr.bf16.mxu0 %v10365_v15  ;;  %9465 = vmatprep.subr.bf16.mxu1 %v10365_v15  ;;  %v7666_v25 = vmul.f32 %v10489_v51, %v13342_v49 }
 0x612   :  { %v9517_v58 = vadd.f32 %v6463_v23, %v6158_v10  ;;  %v6465_v4 = vpop.f32.mrb[161].mxu0  ;;  %v7667_v26 = vmul.f32 %v10491_v19, %v13347_v60  ;;  %v13403_v37 = vadd.f32 %v7661_v59, %v7660_v29  ;;  %v10371_v10 = vld [vmem:[#allocation9 + $0x8e4] ss:$24 sps:$4 sm:$0xff]   ;;  %v15785_v59 = vld [vmem:[#allocation125_spill] sm:$0xff]  ;;  %v6168_v23 = vadd.f32 %v13189_v20, %v13304_v30 }
 0x613   :  { %v9519_v31 = vadd.f32 %v6465_v4, %v6160_v56  ;;  %v6467_v43 = vpop.f32.mrb[162].mxu0 }
 0x614   :  { %10500 = vtanh.f32 %v9517_v58  ;;  %v9521_v22 = vadd.f32 %v6467_v43, %v6162_v47  ;;  %v6469_v15 = vpop.f32.mrb[163].mxu0  ;;  %7334 = vmatpush1.bf16.msra.mxu0 %v10363_v3  ;;  %9481 = vmatpush1.bf16.msra.mxu1 %v10363_v3  ;;  %v13407_v51 = vadd.f32 %v7667_v26, %v7666_v25  ;;  %v15787_v58 = vld [vmem:[#allocation205_spill] sm:$0xff] }
 0x615   :  { %10502 = vtanh.f32 %v9519_v31  ;;  %v9523_v34 = vadd.f32 %v6469_v15, %v6164_v33  ;;  %7335 = vmatprep.subr.bf16.mxu0 %v10368_v11  ;;  %9466 = vmatprep.subr.bf16.mxu1 %v10368_v11  ;;  %v10369_v11 = vld [vmem:[#allocation9 + $0x8e0] ss:$24 sps:$4 sm:$0xff]   ;;  %v6172_v4 = vadd.f32 %v15787_v58, %v13304_v30 }
 0x616   :  { %v10493_v29 = vpop.eup %10492  ;;  %10504 = vtanh.f32 %v9521_v22  ;;  %6951 = vmatmul.mubr.bf16.gmra.mrb[220].mxu1 %v15785_v59  ;;  %7257 = vmatmul.mubr.bf16.gmra.mrb[220].mxu0 %v15756_v16  ;;  %v6170_v16 = vadd.f32 %v13191_v32, %v13311_v28  ;;  %v15788_v31 = vld [vmem:[#allocation206_spill] sm:$0xff] }
 0x617   :  { %v10495_v19 = vpop.eup %10494  ;;  %10506 = vtanh.f32 %v9523_v34  ;;  %6960 = vmatprep.mubr.bf16.mxu1 %v15786_v41  ;;  %7266 = vmatprep.mubr.bf16.mxu0 %v15757_v13  ;;  %v7672_v3 = vmul.f32 %v10493_v29, %v13342_v49  ;;  %v6174_v43 = vadd.f32 %v15788_v31, %v13311_v28 }
 0x618   :  { %v10497_v56 = vpop.eup %10496  ;;  %7336 = vmatpush1.bf16.msra.mxu0 %v10366_v53  ;;  %9482 = vmatpush1.bf16.msra.mxu1 %v10366_v53  ;;  %v7673_v25 = vmul.f32 %v10495_v19, %v13347_v60  ;;  %v15789_v19 = vld [vmem:[#allocation141_spill] sm:$0xff] }
 0x619   :  { %v10499_v1 = vpop.eup %10498  ;;  %v6473_v47 = vpop.f32.mrb[164].mxu0  ;;  %7337 = vmatprep.subr.bf16.mxu0 %v10371_v10  ;;  %9467 = vmatprep.subr.bf16.mxu1 %v10371_v10  ;;  %v7678_v13 = vmul.f32 %v10497_v56, %v13342_v49  ;;  %v15790_v56 = vld [vmem:[#allocation164_spill] sm:$0xff] }
 0x61a   :  { %v9525_v26 = vadd.f32 %v6473_v47, %v6168_v23  ;;  %v6475_v46 = vpop.f32.mrb[165].mxu0  ;;  %v7679_v20 = vmul.f32 %v10499_v1, %v13347_v60  ;;  %v13423_v33 = vadd.f32 %v7673_v25, %v7672_v3  ;;  %v15791_v47 = vld [vmem:[#allocation207_spill] sm:$0xff] }
 0x61b   :  { %v9527_v22 = vadd.f32 %v6475_v46, %v6170_v16  ;;  %v6477_v15 = vpop.f32.mrb[166].mxu0 }
 0x61c   :  { %10508 = vtanh.f32 %v9525_v26  ;;  %v9529_v32 = vadd.f32 %v6477_v15, %v6172_v4  ;;  %v6479_v53 = vpop.f32.mrb[167].mxu0  ;;  %7338 = vmatpush1.bf16.msra.mxu0 %v10369_v11  ;;  %9483 = vmatpush1.bf16.msra.mxu1 %v10369_v11  ;;  %v13427_v34 = vadd.f32 %v7679_v20, %v7678_v13  ;;  %v6178_v11 = vadd.f32 %v13201_v0, %v13304_v30  ;;  %v15792_v4 = vld [vmem:[#allocation208_spill] sm:$0xff]  ;;  %v15793_v0 = vld [vmem:[#allocation209_spill] sm:$0xff] }
 0x61d   :  { %10510 = vtanh.f32 %v9527_v22  ;;  %v9531_v10 = vadd.f32 %v6479_v53, %v6174_v43  ;;  %v6180_v13 = vadd.f32 %v15791_v47, %v13311_v28  ;;  %v6182_v26 = vadd.f32 %v15792_v4, %v13304_v30  ;;  %v15796_v47 = vld [vmem:[#allocation63_spill] sm:$0xff]  ;;  %v15797_v4 = vld [vmem:[#allocation210_spill] sm:$0xff] }
 0x61e   :  { %v10501_v29 = vpop.eup %10500  ;;  %10512 = vtanh.f32 %v9529_v32  ;;  %6961 = vmatmul.mubr.bf16.gmra.mrb[224].mxu1 %v15789_v19  ;;  %7267 = vmatmul.mubr.bf16.gmra.mrb[224].mxu0 %v15758_v54  ;;  %v6184_v43 = vadd.f32 %v15793_v0, %v13311_v28 }
 0x61f   :  { %v10503_v3 = vpop.eup %10502  ;;  %10514 = vtanh.f32 %v9531_v10  ;;  %6970 = vmatprep.mubr.bf16.mxu1 %v15790_v56  ;;  %7276 = vmatprep.mubr.bf16.mxu0 %v15759_v12  ;;  %v7684_v23 = vmul.f32 %v10501_v29, %v13342_v49 }
 0x620   :  { %v10505_v25 = vpop.eup %10504  ;;  %v7685_v1 = vmul.f32 %v10503_v3, %v13347_v60 }
 0x621   :  { %v10507_v16 = vpop.eup %10506  ;;  %v6483_v58 = vpop.f32.mrb[168].mxu0  ;;  %v7690_v54 = vmul.f32 %v10505_v25, %v13342_v49  ;;  %v15794_v25 = vld [vmem:[#allocation161_spill] sm:$0xff] }
 0x622   :  { %v9533_v46 = vadd.f32 %v6483_v58, %v6178_v11  ;;  %v6485_v12 = vpop.f32.mrb[169].mxu0  ;;  %v13442_v20 = vadd.f32 %v7685_v1, %v7684_v23  ;;  %v7691_v31 = vmul.f32 %v10507_v16, %v13347_v60  ;;  %v15795_v11 = vld [vmem:[#allocation184_spill] sm:$0xff] }
 0x623   :  { %v9535_v22 = vadd.f32 %v6485_v12, %v6180_v13  ;;  %v6487_v15 = vpop.f32.mrb[170].mxu0  ;;  %v6188_v13 = vadd.f32 %v15796_v47, %v13304_v30  ;;  %v15798_v12 = vld [vmem:[#allocation211_spill] sm:$0xff] }
 0x624   :  { %10516 = vtanh.f32 %v9533_v46  ;;  %v9537_v32 = vadd.f32 %v6487_v15, %v6182_v26  ;;  %v6489_v53 = vpop.f32.mrb[171].mxu0  ;;  %v13447_v10 = vadd.f32 %v7691_v31, %v7690_v54  ;;  %v6190_v26 = vadd.f32 %v15797_v4, %v13311_v28  ;;  %v15800_v15 = vld [vmem:[#allocation212_spill] sm:$0xff] }
 0x625   :  { %10518 = vtanh.f32 %v9535_v22  ;;  %v9539_v29 = vadd.f32 %v6489_v53, %v6184_v43  ;;  %v6192_v31 = vadd.f32 %v15798_v12, %v13304_v30 }
 0x626   :  { %v10509_v3 = vpop.eup %10508  ;;  %10520 = vtanh.f32 %v9537_v32  ;;  %6971 = vmatmul.mubr.bf16.gmra.mrb[228].mxu1 %v15794_v25  ;;  %7277 = vmatmul.mubr.bf16.gmra.mrb[228].mxu0 %v15760_v18  ;;  %v6194_v32 = vadd.f32 %v15800_v15, %v13311_v28  ;;  %v15806_v15 = vld [vmem:[#allocation213_spill] sm:$0xff] }
 0x627   :  { %v10511_v23 = vpop.eup %10510  ;;  %10522 = vtanh.f32 %v9539_v29  ;;  %6980 = vmatprep.mubr.bf16.mxu1 %v15795_v11  ;;  %7286 = vmatprep.mubr.bf16.mxu0 %v15761_v14  ;;  %v7696_v1 = vmul.f32 %v10509_v3, %v13342_v49 }
 0x628   :  { %v10513_v16 = vpop.eup %10512  ;;  %v7697_v58 = vmul.f32 %v10511_v23, %v13347_v60 }
 0x629   :  { %v10515_v54 = vpop.eup %10514  ;;  %v6493_v46 = vpop.f32.mrb[172].mxu0  ;;  %v7702_v18 = vmul.f32 %v10513_v16, %v13342_v49 }
 0x62a   :  { %v9541_v0 = vadd.f32 %v6493_v46, %v6188_v13  ;;  %v6495_v14 = vpop.f32.mrb[173].mxu0  ;;  %v13462_v43 = vadd.f32 %v7697_v58, %v7696_v1  ;;  %v7703_v22 = vmul.f32 %v10515_v54, %v13347_v60  ;;  %v15802_v13 = vld [vmem:[#allocation173_spill] sm:$0xff]  ;;  %v15803_v58 = vld [vmem:[#allocation196_spill] sm:$0xff]  ;;  %v15804_v46 = vld [vmem:[#allocation70_spill] sm:$0xff] }
 0x62b   :  { %v9543_v53 = vadd.f32 %v6495_v14, %v6190_v26  ;;  %v6497_v29 = vpop.f32.mrb[174].mxu0 }
 0x62c   :  { %15799 = vst [vmem:[#allocation135_spill] sm:$0xff] %v13462_v43  ;;  %10524 = vtanh.f32 %v9541_v0  ;;  %v9545_v3 = vadd.f32 %v6497_v29, %v6192_v31  ;;  %v6499_v23 = vpop.f32.mrb[175].mxu0  ;;  %v13467_v47 = vadd.f32 %v7703_v22, %v7702_v18  ;;  %v6198_v18 = vadd.f32 %v15804_v46, %v13304_v30  ;;  %v15805_v0 = vld [vmem:[#allocation92_spill] sm:$0xff] }
 0x62d   :  { %10526 = vtanh.f32 %v9543_v53  ;;  %v9547_v16 = vadd.f32 %v6499_v23, %v6194_v32  ;;  %v6200_v14 = vadd.f32 %v15805_v0, %v13311_v28  ;;  %v6202_v32 = vadd.f32 %v15806_v15, %v13304_v30  ;;  %v15807_v23 = vld [vmem:[#allocation214_spill] sm:$0xff] }
 0x62e   :  { %15801 = vst [vmem:[#allocation157_spill] sm:$0xff] %v13467_v47  ;;  %v10517_v4 = vpop.eup %10516  ;;  %10528 = vtanh.f32 %v9545_v3  ;;  %6981 = vmatmul.mubr.bf16.gmra.mrb[232].mxu1 %v15802_v13  ;;  %7287 = vmatmul.mubr.bf16.gmra.mrb[232].mxu0 %v15762_v57 }
 0x62f   :  { %v10519_v1 = vpop.eup %10518  ;;  %10530 = vtanh.f32 %v9547_v16  ;;  %6990 = vmatprep.mubr.bf16.mxu1 %v15803_v58  ;;  %7296 = vmatprep.mubr.bf16.mxu0 %v15763_v8  ;;  %v7708_v54 = vmul.f32 %v10517_v4, %v13342_v49  ;;  %v6204_v16 = vadd.f32 %v15807_v23, %v13311_v28 }
 0x630   :  { %v10521_v26 = vpop.eup %10520  ;;  %v7709_v12 = vmul.f32 %v10519_v1, %v13347_v60 }
 0x631   :  { %v10523_v31 = vpop.eup %10522  ;;  %v6503_v22 = vpop.f32.mrb[176].mxu0  ;;  %v7714_v57 = vmul.f32 %v10521_v26, %v13342_v49 }
 0x632   :  { %v9549_v53 = vadd.f32 %v6503_v22, %v6198_v18  ;;  %v6505_v8 = vpop.f32.mrb[177].mxu0  ;;  %v13482_v29 = vadd.f32 %v7709_v12, %v7708_v54  ;;  %v7715_v3 = vmul.f32 %v10523_v31, %v13347_v60  ;;  %v15808_v18 = vld [vmem:[#allocation193_spill] sm:$0xff] }
 0x633   :  { %v9551_v4 = vadd.f32 %v6505_v8, %v6200_v14  ;;  %v6507_v1 = vpop.f32.mrb[178].mxu0  ;;  %v15809_v14 = vld [vmem:[#allocation79_spill] sm:$0xff] }
 0x634   :  { %10532 = vtanh.f32 %v9549_v53  ;;  %v9553_v46 = vadd.f32 %v6507_v1, %v6202_v32  ;;  %v6509_v0 = vpop.f32.mrb[179].mxu0  ;;  %v13487_v47 = vadd.f32 %v7715_v3, %v7714_v57  ;;  %v6208_v22 = vadd.f32 %v15809_v14, %v13304_v30  ;;  %v15810_v32 = vld [vmem:[#allocation102_spill] sm:$0xff]  ;;  %v15811_v3 = vld [vmem:[#allocation215_spill] sm:$0xff] }
 0x635   :  { %10534 = vtanh.f32 %v9551_v4  ;;  %v9555_v26 = vadd.f32 %v6509_v0, %v6204_v16  ;;  %v6210_v53 = vadd.f32 %v15810_v32, %v13311_v28  ;;  %v15812_v4 = vld [vmem:[#allocation216_spill] sm:$0xff] }
 0x636   :  { %v10525_v43 = vpop.eup %10524  ;;  %10536 = vtanh.f32 %v9553_v46  ;;  %6991 = vmatmul.mubr.bf16.gmra.mrb[236].mxu1 %v15808_v18  ;;  %7297 = vmatmul.mubr.bf16.gmra.mrb[236].mxu0 %v15764_v52  ;;  %v6214_v1 = vadd.f32 %v15812_v4, %v13311_v28 }
 0x637   :  { %v10527_v54 = vpop.eup %10526  ;;  %10538 = vtanh.f32 %v9555_v26  ;;  %7339 = vmatprep.mubr.bf16.mxu0 %v15765_v7  ;;  %7399 = vmatprep.mubr.bf16.mxu1 %v12807_v42  ;;  %v7720_v12 = vmul.f32 %v10525_v43, %v13342_v49  ;;  %v6212_v7 = vadd.f32 %v15811_v3, %v13304_v30 }
 0x638   :  { %v10529_v31 = vpop.eup %10528  ;;  %v7721_v57 = vmul.f32 %v10527_v54, %v13347_v60 }
 0x639   :  { %v10531_v15 = vpop.eup %10530  ;;  %v6513_v8 = vpop.f32.mrb[180].mxu0  ;;  %v7726_v52 = vmul.f32 %v10529_v31, %v13342_v49 }
 0x63a   :  { %v9557_v23 = vadd.f32 %v6513_v8, %v6208_v22  ;;  %v6515_v42 = vpop.f32.mrb[181].mxu0  ;;  %v7727_v43 = vmul.f32 %v10531_v15, %v13347_v60  ;;  %v13503_v16 = vadd.f32 %v7721_v57, %v7720_v12  ;;  %v6218_v15 = vadd.f32 %v13265_v2, %v13304_v30 }
 0x63b   :  { %v9559_v46 = vadd.f32 %v6515_v42, %v6210_v53  ;;  %v6517_v0 = vpop.f32.mrb[182].mxu0  ;;  %v6224_v2 = vadd.f32 %v13275_v44, %v13311_v28 }
 0x63c   :  { %10540 = vtanh.f32 %v9557_v23  ;;  %v9561_v26 = vadd.f32 %v6517_v0, %v6212_v7  ;;  %v6519_v54 = vpop.f32.mrb[183].mxu0  ;;  %v13507_v14 = vadd.f32 %v7727_v43, %v7726_v52 }
 0x63d   :  { %10542 = vtanh.f32 %v9559_v46  ;;  %v9563_v31 = vadd.f32 %v6519_v54, %v6214_v1  ;;  %v15813_v54 = vld [vmem:[#allocation107_spill] sm:$0xff] }
 0x63e   :  { %v10533_v32 = vpop.eup %10532  ;;  %10544 = vtanh.f32 %v9561_v26  ;;  %7340 = vmatmul.mubr.bf16.vlgmr.msra.gmra.mrb[192].mxu0 %v15766_v35  ;;  %7400 = vmatmul.mubr.bf16.vlgmr.msra.gmra.mrb[240].mxu1 %v15779_v27  ;;  %v6220_v35 = vadd.f32 %v13269_v5, %v13311_v28 }
 0x63f   :  { %v10535_v12 = vpop.eup %10534  ;;  %10546 = vtanh.f32 %v9563_v31  ;;  %7349 = vmatprep.mubr.bf16.mxu0 %v12497_v38  ;;  %7409 = vmatprep.mubr.bf16.mxu1 %v15780_v17  ;;  %v7732_v22 = vmul.f32 %v10533_v32, %v13342_v49  ;;  %v6222_v38 = vadd.f32 %v13273_v48, %v13304_v30  ;;  %v6228_v31 = vadd.f32 %v15813_v54, %v13304_v30 }
 0x640   :  { %v10537_v57 = vpop.eup %10536  ;;  %v7733_v53 = vmul.f32 %v10535_v12, %v13347_v60 }
 0x641   :  { %v10539_v8 = vpop.eup %10538  ;;  %v6523_v52 = vpop.f32.mrb[184].mxu0  ;;  %v7738_v27 = vmul.f32 %v10537_v57, %v13342_v49 }
 0x642   :  { %v9565_v3 = vadd.f32 %v6523_v52, %v6218_v15  ;;  %v6525_v17 = vpop.f32.mrb[185].mxu0  ;;  %v13522_v7 = vadd.f32 %v7733_v53, %v7732_v22  ;;  %v7739_v23 = vmul.f32 %v10539_v8, %v13347_v60  ;;  %v15814_v22 = vld [vmem:[#allocation121_spill] sm:$0xff]  ;;  %v15815_v15 = vld [vmem:[#allocation128_spill] sm:$0xff] }
 0x643   :  { %v9567_v42 = vadd.f32 %v6525_v17, %v6220_v35  ;;  %v6527_v43 = vpop.f32.mrb[186].mxu0  ;;  %v15816_v52 = vld [vmem:[#allocation137_spill] sm:$0xff] }
 0x644   :  { %10548 = vtanh.f32 %v9565_v3  ;;  %v9569_v4 = vadd.f32 %v6527_v43, %v6222_v38  ;;  %v6529_v5 = vpop.f32.mrb[187].mxu0  ;;  %v13527_v1 = vadd.f32 %v7739_v23, %v7738_v27  ;;  %v6234_v27 = vadd.f32 %v15816_v52, %v13311_v28 }
 0x645   :  { %10550 = vtanh.f32 %v9567_v42  ;;  %v9571_v46 = vadd.f32 %v6529_v5, %v6224_v2  ;;  %v15818_v5 = vld [vmem:[#allocation82_spill] sm:$0xff] }
 0x646   :  { %v10541_v0 = vpop.eup %10540  ;;  %10552 = vtanh.f32 %v9569_v4  ;;  %7350 = vmatmul.mubr.bf16.gmra.mrb[196].mxu0 %v12483_v40  ;;  %7410 = vmatmul.mubr.bf16.gmra.mrb[244].mxu1 %v15785_v59  ;;  %v6230_v40 = vadd.f32 %v15814_v22, %v13311_v28 }
 0x647   :  { %v10543_v48 = vpop.eup %10542  ;;  %10554 = vtanh.f32 %v9571_v46  ;;  %7359 = vmatprep.mubr.bf16.mxu0 %v12547_v61  ;;  %7419 = vmatprep.mubr.bf16.mxu1 %v15786_v41  ;;  %v7744_v44 = vmul.f32 %v10541_v0, %v13342_v49  ;;  %v6232_v61 = vadd.f32 %v15815_v15, %v13304_v30  ;;  %v15817_v30 = vld [vmem:[#allocation51_spill] sm:$0xff] }
 0x648   :  { %v10545_v26 = vpop.eup %10544  ;;  %v7745_v32 = vmul.f32 %v10543_v48, %v13347_v60 }
 0x649   :  { %v10547_v12 = vpop.eup %10546  ;;  %v6533_v57 = vpop.f32.mrb[188].mxu0  ;;  %v7750_v59 = vmul.f32 %v10545_v26, %v13342_v49 }
 0x64a   :  { %v9573_v53 = vadd.f32 %v6533_v57, %v6228_v31  ;;  %v6535_v41 = vpop.f32.mrb[189].mxu0  ;;  %v13542_v8 = vadd.f32 %v7745_v32, %v7744_v44  ;;  %v7751_v35 = vmul.f32 %v10547_v12, %v13347_v60 }
 0x64b   :  { %v9575_v38 = vadd.f32 %v6535_v41, %v6230_v40  ;;  %v6537_v3 = vpop.f32.mrb[190].mxu0 }
 0x64c   :  { %10556 = vtanh.f32 %v9573_v53  ;;  %v9577_v17 = vadd.f32 %v6537_v3, %v6232_v61  ;;  %v6539_v23 = vpop.f32.mrb[191].mxu0  ;;  %v13547_v2 = vadd.f32 %v7751_v35, %v7750_v59 }
 0x64d   :  { %10558 = vtanh.f32 %v9575_v38  ;;  %v9579_v42 = vadd.f32 %v6539_v23, %v6234_v27 }
 0x64e   :  { %v10549_v43 = vpop.eup %10548  ;;  %10560 = vtanh.f32 %v9577_v17  ;;  %7360 = vmatmul.mubr.bf16.gmra.mrb[200].mxu0 %v15817_v30  ;;  %7420 = vmatmul.mubr.bf16.gmra.mrb[248].mxu1 %v15789_v19 }
 0x64f   :  { %v10551_v4 = vpop.eup %10550  ;;  %10562 = vtanh.f32 %v9579_v42  ;;  %7369 = vmatprep.mubr.bf16.mxu0 %v15818_v5  ;;  %7429 = vmatprep.mubr.bf16.mxu1 %v15790_v56  ;;  %v7756_v28 = vmul.f32 %v10549_v43, %v13342_v49 }
 0x650   :  { %v10553_v46 = vpop.eup %10552  ;;  %v7757_v0 = vmul.f32 %v10551_v4, %v13347_v60 }
 0x651   :  { %v10555_v48 = vpop.eup %10554  ;;  %v7762_v44 = vmul.f32 %v10553_v46, %v13342_v49 }
 0x652   :  { %v13556_v26 = vadd.f32 %v7757_v0, %v7756_v28  ;;  %v7763_v54 = vmul.f32 %v10555_v48, %v13347_v60 }
 0x654   :  { %v13559_v31 = vadd.f32 %v7763_v54, %v7762_v44 }
 0x656   :  { %v10557_v19 = vpop.eup %10556  ;;  %7370 = vmatmul.mubr.bf16.gmra.mrb[204].mxu0 %v12629_v6  ;;  %7430 = vmatmul.mubr.bf16.gmra.mrb[252].mxu1 %v15794_v25 }
 0x657   :  { %v10559_v56 = vpop.eup %10558  ;;  %7379 = vmatprep.mubr.bf16.mxu0 %v12695_v63  ;;  %7439 = vmatprep.mubr.bf16.mxu1 %v15795_v11  ;;  %v7768_v32 = vmul.f32 %v10557_v19, %v13342_v49  ;;  %v4623_v63 = vsub.s32 2, %v13285_v21 }
 0x658   :  { %v10561_v12 = vpop.eup %10560  ;;  %v7769_v22 = vmul.f32 %v10559_v56, %v13347_v60 }
 0x659   :  { %v10563_v40 = vpop.eup %10562  ;;  %v7774_v57 = vmul.f32 %v10561_v12, %v13342_v49  ;;  %v4627_v49 = vsub.s32 3, %v13285_v21  ;;  %v13594_v3 = vrot.slane %v13331_v24, %v4623_v63 }
 0x65a   :  { %v7775_v59 = vmul.f32 %v10563_v40, %v13347_v60  ;;  %v13569_v15 = vadd.f32 %v7769_v22, %v7768_v32  ;;  %v15819_v60 = vld [vmem:[#allocation111_spill] sm:$0xff] }
 0x65b   :  { %v13582_v25 = vrot.slane %v15819_v60, %v4623_v63  ;;  %v13585_v11 = vrot.slane %v15819_v60, %v4627_v49  ;;  %v13598_v42 = vrot.slane %v13331_v24, %v4627_v49 }
 0x65c   :  { %v13571_v6 = vadd.f32 %v7775_v59, %v7774_v57 }
 0x65e   :  { %7380 = vmatmul.mubr.bf16.gmra.mrb[208].mxu0 %v12682_v9  ;;  %7440 = vmatmul.mubr.bf16.gmra.mrb[0].mxu1 %v15802_v13 }
 0x65f   :  { %7389 = vmatprep.mubr.bf16.mxu0 %v12771_v36  ;;  %7449 = vmatprep.mubr.bf16.mxu1 %v15803_v58 }
 0x666   :  { %7390 = vmatmul.mubr.bf16.gmra.mrb[212].mxu0 %v12759_v55  ;;  %7450 = vmatmul.mubr.bf16.gmra.mrb[4].mxu1 %v15808_v18 }
 0x6b1   :  { %v6882_v9 = vpop.f32.mrb[192].mxu1 }
 0x6b2   :  { %v9580_v13 = vadd.f32 %v6882_v9, %v13582_v25  ;;  %v6884_v36 = vpop.f32.mrb[193].mxu1 }
 0x6b3   :  { %v9581_v58 = vadd.f32 %v6884_v36, %v13585_v11  ;;  %v6886_v61 = vpop.f32.mrb[194].mxu1 }
 0x6b4   :  { %10564 = vtanh.f32 %v9580_v13  ;;  %v9582_v55 = vadd.f32 %v6886_v61, %v13582_v25  ;;  %v6888_v18 = vpop.f32.mrb[195].mxu1 }
 0x6b5   :  { %10566 = vtanh.f32 %v9581_v58  ;;  %v9583_v53 = vadd.f32 %v6888_v18, %v13585_v11 }
 0x6b6   :  { %10568 = vtanh.f32 %v9582_v55 }
 0x6b7   :  { %10570 = vtanh.f32 %v9583_v53 }
 0x6b9   :  { %v6892_v41 = vpop.f32.mrb[196].mxu1 }
 0x6ba   :  { %v9584_v35 = vadd.f32 %v6892_v41, %v13582_v25  ;;  %v6894_v52 = vpop.f32.mrb[197].mxu1 }
 0x6bb   :  { %v9585_v27 = vadd.f32 %v6894_v52, %v13585_v11  ;;  %v6896_v38 = vpop.f32.mrb[198].mxu1 }
 0x6bc   :  { %10572 = vtanh.f32 %v9584_v35  ;;  %v9586_v17 = vadd.f32 %v6896_v38, %v13582_v25  ;;  %v6898_v23 = vpop.f32.mrb[199].mxu1 }
 0x6bd   :  { %10574 = vtanh.f32 %v9585_v27  ;;  %v9587_v43 = vadd.f32 %v6898_v23, %v13585_v11 }
 0x6be   :  { %v10565_v30 = vpop.eup %10564  ;;  %10576 = vtanh.f32 %v9586_v17 }
 0x6bf   :  { %v10567_v4 = vpop.eup %10566  ;;  %10578 = vtanh.f32 %v9587_v43  ;;  %v7638_v5 = vmul.f32 %v10565_v30, %v13594_v3 }
 0x6c0   :  { %v10569_v28 = vpop.eup %10568  ;;  %v7639_v46 = vmul.f32 %v10567_v4, %v13598_v42 }
 0x6c1   :  { %v10571_v0 = vpop.eup %10570  ;;  %v6902_v48 = vpop.f32.mrb[200].mxu1  ;;  %v7781_v44 = vadd.f32 %v13362_v45, %v7638_v5  ;;  %v7644_v54 = vmul.f32 %v10569_v28, %v13594_v3 }
 0x6c2   :  { %v9588_v24 = vadd.f32 %v6902_v48, %v13582_v25  ;;  %v6904_v19 = vpop.f32.mrb[201].mxu1  ;;  %v7645_v56 = vmul.f32 %v10571_v0, %v13598_v42 }
 0x6c3   :  { %v9589_v32 = vadd.f32 %v6904_v19, %v13585_v11  ;;  %v6906_v12 = vpop.f32.mrb[202].mxu1  ;;  %v13608_v22 = vadd.f32 %v7781_v44, %v7639_v46  ;;  %v7788_v40 = vadd.f32 %v13367_v39, %v7644_v54 }
 0x6c4   :  { %10580 = vtanh.f32 %v9588_v24  ;;  %v9590_v57 = vadd.f32 %v6906_v12, %v13582_v25  ;;  %v6908_v59 = vpop.f32.mrb[203].mxu1 }
 0x6c5   :  { %10582 = vtanh.f32 %v9589_v32  ;;  %v9591_v45 = vadd.f32 %v6908_v59, %v13585_v11  ;;  %v13613_v63 = vadd.f32 %v7788_v40, %v7645_v56 }
 0x6c6   :  { %v10573_v49 = vpop.eup %10572  ;;  %10584 = vtanh.f32 %v9590_v57 }
 0x6c7   :  { %v10575_v60 = vpop.eup %10574  ;;  %10586 = vtanh.f32 %v9591_v45  ;;  %v7650_v9 = vmul.f32 %v10573_v49, %v13594_v3 }
 0x6c8   :  { %v10577_v13 = vpop.eup %10576  ;;  %v7651_v36 = vmul.f32 %v10575_v60, %v13598_v42 }
 0x6c9   :  { %v10579_v58 = vpop.eup %10578  ;;  %v6912_v39 = vpop.f32.mrb[204].mxu1  ;;  %v7795_v61 = vadd.f32 %v13382_v50, %v7650_v9  ;;  %v7656_v55 = vmul.f32 %v10577_v13, %v13594_v3 }
 0x6ca   :  { %v9592_v18 = vadd.f32 %v6912_v39, %v13582_v25  ;;  %v6914_v53 = vpop.f32.mrb[205].mxu1  ;;  %v7657_v41 = vmul.f32 %v10579_v58, %v13598_v42 }
 0x6cb   :  { %v9593_v35 = vadd.f32 %v6914_v53, %v13585_v11  ;;  %v6916_v52 = vpop.f32.mrb[206].mxu1  ;;  %v13622_v27 = vadd.f32 %v7795_v61, %v7651_v36  ;;  %v7802_v38 = vadd.f32 %v13387_v62, %v7656_v55 }
 0x6cc   :  { %10588 = vtanh.f32 %v9592_v18  ;;  %v9594_v17 = vadd.f32 %v6916_v52, %v13582_v25  ;;  %v6918_v23 = vpop.f32.mrb[207].mxu1 }
 0x6cd   :  { %10590 = vtanh.f32 %v9593_v35  ;;  %v9595_v50 = vadd.f32 %v6918_v23, %v13585_v11  ;;  %v13627_v43 = vadd.f32 %v7802_v38, %v7657_v41 }
 0x6ce   :  { %v10581_v30 = vpop.eup %10580  ;;  %10592 = vtanh.f32 %v9594_v17 }
 0x6cf   :  { %v10583_v4 = vpop.eup %10582  ;;  %10594 = vtanh.f32 %v9595_v50  ;;  %v7662_v5 = vmul.f32 %v10581_v30, %v13594_v3 }
 0x6d0   :  { %v10585_v28 = vpop.eup %10584  ;;  %v7663_v46 = vmul.f32 %v10583_v4, %v13598_v42 }
 0x6d1   :  { %v10587_v0 = vpop.eup %10586  ;;  %v6922_v62 = vpop.f32.mrb[208].mxu1  ;;  %v7668_v48 = vmul.f32 %v10585_v28, %v13594_v3  ;;  %v7809_v44 = vadd.f32 %v13403_v37, %v7662_v5 }
 0x6d2   :  { %v9596_v54 = vadd.f32 %v6922_v62, %v13582_v25  ;;  %v6924_v24 = vpop.f32.mrb[209].mxu1  ;;  %v7669_v19 = vmul.f32 %v10587_v0, %v13598_v42 }
 0x6d3   :  { %v9597_v56 = vadd.f32 %v6924_v24, %v13585_v11  ;;  %v6926_v32 = vpop.f32.mrb[210].mxu1  ;;  %v7816_v12 = vadd.f32 %v13407_v51, %v7668_v48  ;;  %v13637_v40 = vadd.f32 %v7809_v44, %v7663_v46 }
 0x6d4   :  { %10596 = vtanh.f32 %v9596_v54  ;;  %v9598_v57 = vadd.f32 %v6926_v32, %v13582_v25  ;;  %v6928_v59 = vpop.f32.mrb[211].mxu1 }
 0x6d5   :  { %10598 = vtanh.f32 %v9597_v56  ;;  %v9599_v45 = vadd.f32 %v6928_v59, %v13585_v11  ;;  %v13641_v37 = vadd.f32 %v7816_v12, %v7669_v19 }
 0x6d6   :  { %v10589_v49 = vpop.eup %10588  ;;  %10600 = vtanh.f32 %v9598_v57 }
 0x6d7   :  { %v10591_v60 = vpop.eup %10590  ;;  %10602 = vtanh.f32 %v9599_v45  ;;  %v7674_v9 = vmul.f32 %v10589_v49, %v13594_v3 }
 0x6d8   :  { %v10593_v13 = vpop.eup %10592  ;;  %v7675_v51 = vmul.f32 %v10591_v60, %v13598_v42 }
 0x6d9   :  { %v10595_v36 = vpop.eup %10594  ;;  %v6932_v58 = vpop.f32.mrb[212].mxu1  ;;  %v7680_v39 = vmul.f32 %v10593_v13, %v13594_v3  ;;  %v7823_v61 = vadd.f32 %v13423_v33, %v7674_v9 }
 0x6da   :  { %v9600_v55 = vadd.f32 %v6932_v58, %v13582_v25  ;;  %v6934_v18 = vpop.f32.mrb[213].mxu1  ;;  %v7681_v53 = vmul.f32 %v10595_v36, %v13598_v42 }
 0x6db   :  { %v9601_v41 = vadd.f32 %v6934_v18, %v13585_v11  ;;  %v6936_v35 = vpop.f32.mrb[214].mxu1  ;;  %v7830_v52 = vadd.f32 %v13427_v34, %v7680_v39  ;;  %v13651_v38 = vadd.f32 %v7823_v61, %v7675_v51 }
 0x6dc   :  { %10604 = vtanh.f32 %v9600_v55  ;;  %v9602_v17 = vadd.f32 %v6936_v35, %v13582_v25  ;;  %v6938_v23 = vpop.f32.mrb[215].mxu1 }
 0x6dd   :  { %15820 = vst [vmem:[#allocation155_spill] sm:$0xff] %v13651_v38  ;;  %10606 = vtanh.f32 %v9601_v41  ;;  %v9603_v50 = vadd.f32 %v6938_v23, %v13585_v11  ;;  %v13655_v33 = vadd.f32 %v7830_v52, %v7681_v53  ;;  %v15824_v53 = vld [vmem:[#allocation135_spill] sm:$0xff] }
 0x6de   :  { %v10597_v30 = vpop.eup %10596  ;;  %10608 = vtanh.f32 %v9602_v17 }
 0x6df   :  { %15821 = vst [vmem:[#allocation169_spill] sm:$0xff] %v13655_v33  ;;  %v10599_v4 = vpop.eup %10598  ;;  %10610 = vtanh.f32 %v9603_v50  ;;  %v7686_v5 = vmul.f32 %v10597_v30, %v13594_v3 }
 0x6e0   :  { %v10601_v28 = vpop.eup %10600  ;;  %v7687_v34 = vmul.f32 %v10599_v4, %v13598_v42 }
 0x6e1   :  { %v10603_v46 = vpop.eup %10602  ;;  %v6942_v0 = vpop.f32.mrb[216].mxu1  ;;  %v7837_v48 = vadd.f32 %v13442_v20, %v7686_v5  ;;  %v7692_v44 = vmul.f32 %v10601_v28, %v13594_v3 }
 0x6e2   :  { %v13659_v62 = vpop.f32.mrb[216].mxu0  ;;  %v9604_v54 = vadd.f32 %v6942_v0, %v13582_v25  ;;  %v6944_v24 = vpop.f32.mrb[217].mxu1  ;;  %v7693_v56 = vmul.f32 %v10603_v46, %v13598_v42 }
 0x6e3   :  { %v13664_v19 = vpop.f32.mrb[217].mxu0  ;;  %v9605_v32 = vadd.f32 %v6944_v24, %v13585_v11  ;;  %v6946_v12 = vpop.f32.mrb[218].mxu1  ;;  %v13670_v59 = vadd.f32 %v7837_v48, %v7687_v34  ;;  %v7844_v45 = vadd.f32 %v13447_v10, %v7692_v44  ;;  %v15826_v34 = vld [vmem:[#allocation157_spill] sm:$0xff] }
 0x6e4   :  { %v13668_v57 = vpop.f32.mrb[218].mxu0  ;;  %10612 = vtanh.f32 %v9604_v54  ;;  %v9606_v20 = vadd.f32 %v6946_v12, %v13582_v25  ;;  %v6948_v49 = vpop.f32.mrb[219].mxu1 }
 0x6e5   :  { %15822 = vst [vmem:[#allocation167_spill] sm:$0xff] %v13670_v59  ;;  %v13674_v60 = vpop.f32.mrb[219].mxu0  ;;  %10614 = vtanh.f32 %v9605_v32  ;;  %v9607_v9 = vadd.f32 %v6948_v49, %v13585_v11  ;;  %v13677_v13 = vadd.f32 %v7844_v45, %v7693_v56  ;;  %v10840_v59 = vld [vmem:[#allocation11] sm:$0x3f] }
 0x6e6   :  { %v10605_v51 = vpop.eup %10604  ;;  %10616 = vtanh.f32 %v9606_v20 }
 0x6e7   :  { %15823 = vst [vmem:[#allocation189_spill] sm:$0xff] %v13677_v13  ;;  %v10607_v36 = vpop.eup %10606  ;;  %10618 = vtanh.f32 %v9607_v9  ;;  %v7698_v58 = vmul.f32 %v10605_v51, %v13594_v3 }
 0x6e8   :  { %v10609_v39 = vpop.eup %10608  ;;  %v7699_v10 = vmul.f32 %v10607_v36, %v13598_v42 }
 0x6e9   :  { %v10611_v61 = vpop.eup %10610  ;;  %v6952_v55 = vpop.f32.mrb[220].mxu1  ;;  %v7851_v41 = vadd.f32 %v15824_v53, %v7698_v58  ;;  %v7704_v35 = vmul.f32 %v10609_v39, %v13594_v3 }
 0x6ea   :  { %v13681_v18 = vpop.f32.mrb[220].mxu0  ;;  %v9608_v52 = vadd.f32 %v6952_v55, %v13582_v25  ;;  %v6954_v17 = vpop.f32.mrb[221].mxu1  ;;  %v7705_v50 = vmul.f32 %v10611_v61, %v13598_v42 }
 0x6eb   :  { %v13686_v23 = vpop.f32.mrb[221].mxu0  ;;  %v9609_v30 = vadd.f32 %v6954_v17, %v13585_v11  ;;  %v6956_v4 = vpop.f32.mrb[222].mxu1  ;;  %v13692_v28 = vadd.f32 %v7851_v41, %v7699_v10  ;;  %v7858_v46 = vadd.f32 %v15826_v34, %v7704_v35 }
 0x6ec   :  { %v13690_v5 = vpop.f32.mrb[222].mxu0  ;;  %10620 = vtanh.f32 %v9608_v52  ;;  %v9610_v0 = vadd.f32 %v6956_v4, %v13582_v25  ;;  %v6958_v48 = vpop.f32.mrb[223].mxu1 }
 0x6ed   :  { %15825 = vst [vmem:[#allocation187_spill] sm:$0xff] %v13692_v28  ;;  %v13696_v44 = vpop.f32.mrb[223].mxu0  ;;  %10622 = vtanh.f32 %v9609_v30  ;;  %v9611_v54 = vadd.f32 %v6958_v48, %v13585_v11  ;;  %v13699_v24 = vadd.f32 %v7858_v46, %v7705_v50 }
 0x6ee   :  { %v10613_v56 = vpop.eup %10612  ;;  %10624 = vtanh.f32 %v9610_v0 }
 0x6ef   :  { %15827 = vst [vmem:[#allocation38_spill] sm:$0xff] %v13699_v24  ;;  %v10615_v32 = vpop.eup %10614  ;;  %10626 = vtanh.f32 %v9611_v54  ;;  %v7710_v12 = vmul.f32 %v10613_v56, %v13594_v3 }
 0x6f0   :  { %v10617_v45 = vpop.eup %10616  ;;  %v7711_v20 = vmul.f32 %v10615_v32, %v13598_v42 }
 0x6f1   :  { %v10619_v49 = vpop.eup %10618  ;;  %v6962_v9 = vpop.f32.mrb[224].mxu1  ;;  %v7865_v36 = vadd.f32 %v13482_v29, %v7710_v12  ;;  %v7716_v58 = vmul.f32 %v10617_v45, %v13594_v3 }
 0x6f2   :  { %v13703_v51 = vpop.f32.mrb[224].mxu0  ;;  %v9612_v39 = vadd.f32 %v6962_v9, %v13582_v25  ;;  %v6964_v10 = vpop.f32.mrb[225].mxu1  ;;  %v7717_v55 = vmul.f32 %v10619_v49, %v13598_v42 }
 0x6f3   :  { %v13708_v61 = vpop.f32.mrb[225].mxu0  ;;  %v9613_v53 = vadd.f32 %v6964_v10, %v13585_v11  ;;  %v6966_v41 = vpop.f32.mrb[226].mxu1  ;;  %v13714_v52 = vadd.f32 %v7865_v36, %v7711_v20  ;;  %v7872_v17 = vadd.f32 %v13487_v47, %v7716_v58 }
 0x6f4   :  { %v13712_v35 = vpop.f32.mrb[226].mxu0  ;;  %10628 = vtanh.f32 %v9612_v39  ;;  %v9614_v29 = vadd.f32 %v6966_v41, %v13582_v25  ;;  %v6968_v50 = vpop.f32.mrb[227].mxu1 }
 0x6f5   :  { %v13718_v30 = vpop.f32.mrb[227].mxu0  ;;  %10630 = vtanh.f32 %v9613_v53  ;;  %v9615_v4 = vadd.f32 %v6968_v50, %v13585_v11  ;;  %v13721_v34 = vadd.f32 %v7872_v17, %v7717_v55 }
 0x6f6   :  { %v10621_v46 = vpop.eup %10620  ;;  %10632 = vtanh.f32 %v9614_v29 }
 0x6f7   :  { %v10623_v0 = vpop.eup %10622  ;;  %10634 = vtanh.f32 %v9615_v4  ;;  %v7722_v48 = vmul.f32 %v10621_v46, %v13594_v3 }
 0x6f8   :  { %v10625_v54 = vpop.eup %10624  ;;  %v7723_v47 = vmul.f32 %v10623_v0, %v13598_v42 }
 0x6f9   :  { %v10627_v56 = vpop.eup %10626  ;;  %v6972_v32 = vpop.f32.mrb[228].mxu1  ;;  %v7728_v45 = vmul.f32 %v10625_v54, %v13594_v3  ;;  %v7879_v20 = vadd.f32 %v13503_v16, %v7722_v48 }
 0x6fa   :  { %v13725_v12 = vpop.f32.mrb[228].mxu0  ;;  %v9616_v49 = vadd.f32 %v6972_v32, %v13582_v25  ;;  %v6974_v9 = vpop.f32.mrb[229].mxu1  ;;  %v7729_v58 = vmul.f32 %v10627_v56, %v13598_v42 }
 0x6fb   :  { %v13730_v36 = vpop.f32.mrb[229].mxu0  ;;  %v9617_v39 = vadd.f32 %v6974_v9, %v13585_v11  ;;  %v6976_v10 = vpop.f32.mrb[230].mxu1  ;;  %v7886_v53 = vadd.f32 %v13507_v14, %v7728_v45  ;;  %v13737_v41 = vadd.f32 %v7879_v20, %v7723_v47 }
 0x6fc   :  { %v13734_v55 = vpop.f32.mrb[230].mxu0  ;;  %10636 = vtanh.f32 %v9616_v49  ;;  %v9618_v17 = vadd.f32 %v6976_v10, %v13582_v25  ;;  %v6978_v16 = vpop.f32.mrb[231].mxu1 }
 0x6fd   :  { %v13740_v29 = vpop.f32.mrb[231].mxu0  ;;  %10638 = vtanh.f32 %v9617_v39  ;;  %v9619_v50 = vadd.f32 %v6978_v16, %v13585_v11  ;;  %v13743_v4 = vadd.f32 %v7886_v53, %v7729_v58 }
 0x6fe   :  { %v10629_v46 = vpop.eup %10628  ;;  %10640 = vtanh.f32 %v9618_v17 }
 0x6ff   :  { %v10631_v0 = vpop.eup %10630  ;;  %10642 = vtanh.f32 %v9619_v50  ;;  %v7734_v48 = vmul.f32 %v10629_v46, %v13594_v3 }
 0x700   :  { %v10633_v14 = vpop.eup %10632  ;;  %v7735_v54 = vmul.f32 %v10631_v0, %v13598_v42 }
 0x701   :  { %v10635_v47 = vpop.eup %10634  ;;  %v6982_v56 = vpop.f32.mrb[232].mxu1  ;;  %v7893_v45 = vadd.f32 %v13522_v7, %v7734_v48  ;;  %v7740_v20 = vmul.f32 %v10633_v14, %v13594_v3 }
 0x702   :  { %v13747_v32 = vpop.f32.mrb[232].mxu0  ;;  %v9620_v49 = vadd.f32 %v6982_v56, %v13582_v25  ;;  %v6984_v9 = vpop.f32.mrb[233].mxu1  ;;  %v7741_v39 = vmul.f32 %v10635_v47, %v13598_v42 }
 0x703   :  { %v13752_v58 = vpop.f32.mrb[233].mxu0  ;;  %v9621_v10 = vadd.f32 %v6984_v9, %v13585_v11  ;;  %v6986_v53 = vpop.f32.mrb[234].mxu1  ;;  %v13758_v16 = vadd.f32 %v7893_v45, %v7735_v54  ;;  %v7900_v50 = vadd.f32 %v13527_v1, %v7740_v20  ;;  %v4631_v1 = vsub.s32 4, %v13285_v21 }
 0x704   :  { %v13756_v17 = vpop.f32.mrb[234].mxu0  ;;  %10644 = vtanh.f32 %v9620_v49  ;;  %v9622_v7 = vadd.f32 %v6986_v53, %v13582_v25  ;;  %v6988_v46 = vpop.f32.mrb[235].mxu1  ;;  %v4635_v20 = vsub.s32 5, %v13285_v21 }
 0x705   :  { %v13762_v0 = vpop.f32.mrb[235].mxu0  ;;  %10646 = vtanh.f32 %v9621_v10  ;;  %v9623_v48 = vadd.f32 %v6988_v46, %v13585_v11  ;;  %v13765_v14 = vadd.f32 %v7900_v50, %v7741_v39 }
 0x706   :  { %v10637_v47 = vpop.eup %10636  ;;  %10648 = vtanh.f32 %v9622_v7 }
 0x707   :  { %15828 = vst [vmem:[#allocation36_spill] sm:$0xff] %v13765_v14  ;;  %v10639_v56 = vpop.eup %10638  ;;  %10650 = vtanh.f32 %v9623_v48  ;;  %v7746_v54 = vmul.f32 %v10637_v47, %v13594_v3 }
 0x708   :  { %v10641_v45 = vpop.eup %10640  ;;  %v7747_v49 = vmul.f32 %v10639_v56, %v13598_v42 }
 0x709   :  { %v10643_v9 = vpop.eup %10642  ;;  %v6992_v53 = vpop.f32.mrb[236].mxu1  ;;  %v7907_v39 = vadd.f32 %v13542_v8, %v7746_v54  ;;  %v7752_v50 = vmul.f32 %v10641_v45, %v13594_v3  ;;  %v13785_v8 = vrot.slane %v10840_v59, %v4631_v1  ;;  %v13787_v54 = vrot.slane %v10840_v59, %v4635_v20 }
 0x70a   :  { %v13771_v10 = vpop.f32.mrb[236].mxu0  ;;  %v9624_v7 = vadd.f32 %v6992_v53, %v13582_v25  ;;  %v6994_v46 = vpop.f32.mrb[237].mxu1  ;;  %v7753_v47 = vmul.f32 %v10643_v9, %v13598_v42 }
 0x70b   :  { %v13776_v48 = vpop.f32.mrb[237].mxu0  ;;  %v9625_v24 = vadd.f32 %v6994_v46, %v13585_v11  ;;  %v6996_v21 = vpop.f32.mrb[238].mxu1  ;;  %v13782_v56 = vadd.f32 %v7907_v39, %v7747_v49  ;;  %v7914_v13 = vadd.f32 %v13547_v2, %v7752_v50  ;;  %v10841_v2 = vld [vmem:[#allocation12] sm:$0x3f] }
 0x70c   :  { %v13780_v28 = vpop.f32.mrb[238].mxu0  ;;  %10652 = vtanh.f32 %v9624_v7  ;;  %v9626_v45 = vadd.f32 %v6996_v21, %v13582_v25  ;;  %v6998_v53 = vpop.f32.mrb[239].mxu1  ;;  %v13795_v50 = vrot.slane %v10841_v2, %v4631_v1  ;;  %v13797_v59 = vrot.slane %v10841_v2, %v4635_v20 }
 0x70d   :  { %15829 = vst [vmem:[#allocation198_spill] sm:$0xff] %v13782_v56  ;;  %v13790_v33 = vpop.f32.mrb[239].mxu0  ;;  %10654 = vtanh.f32 %v9625_v24  ;;  %v9627_v9 = vadd.f32 %v6998_v53, %v13585_v11  ;;  %v13793_v46 = vadd.f32 %v7914_v13, %v7753_v47  ;;  %v9652_v25 = vadd.f32 %v13659_v62, %v13785_v8 }
 0x70e   :  { %v10645_v49 = vpop.eup %10644  ;;  %10656 = vtanh.f32 %v9626_v45  ;;  %v9654_v11 = vadd.f32 %v13664_v19, %v13787_v54  ;;  %v9656_v13 = vadd.f32 %v13668_v57, %v13785_v8  ;;  %v9658_v1 = vadd.f32 %v13674_v60, %v13787_v54 }
 0x70f   :  { %15830 = vst [vmem:[#allocation197_spill] sm:$0xff] %v13793_v46  ;;  %v10647_v39 = vpop.eup %10646  ;;  %10658 = vtanh.f32 %v9627_v9  ;;  %v7758_v7 = vmul.f32 %v10645_v49, %v13594_v3  ;;  %v9660_v20 = vadd.f32 %v13681_v18, %v13785_v8  ;;  %v9662_v19 = vadd.f32 %v13686_v23, %v13787_v54 }
 0x710   :  { %v10649_v21 = vpop.eup %10648  ;;  %v7759_v24 = vmul.f32 %v10647_v39, %v13598_v42 }
 0x711   :  { %v10651_v47 = vpop.eup %10650  ;;  %v7341_v45 = vpop.f32.mrb[192].mxu0  ;;  %v7921_v9 = vadd.f32 %v13556_v26, %v7758_v7  ;;  %v7764_v62 = vmul.f32 %v10649_v21, %v13594_v3  ;;  %v9664_v7 = vadd.f32 %v13690_v5, %v13785_v8  ;;  %v13834_v5 = vadd.f32 %v13708_v61, %v13787_v54 }
 0x712   :  { %v7401_v53 = vpop.f32.mrb[240].mxu1  ;;  %v9628_v57 = vadd.f32 %v7341_v45, %v13785_v8  ;;  %v7343_v39 = vpop.f32.mrb[193].mxu0  ;;  %v7765_v46 = vmul.f32 %v10651_v47, %v13598_v42  ;;  %v9666_v47 = vadd.f32 %v13696_v44, %v13787_v54  ;;  %v13839_v44 = vadd.f32 %v13712_v35, %v13785_v8 }
 0x713   :  { %v9653_v49 = vadd.f32 %v9652_v25, %v7401_v53  ;;  %v7403_v2 = vpop.f32.mrb[241].mxu1  ;;  %v9629_v60 = vadd.f32 %v7343_v39, %v13787_v54  ;;  %v7345_v18 = vpop.f32.mrb[194].mxu0  ;;  %v13818_v14 = vadd.f32 %v7921_v9, %v7759_v24  ;;  %v7928_v26 = vadd.f32 %v13559_v31, %v7764_v62 }
 0x714   :  { %v9655_v56 = vadd.f32 %v9654_v11, %v7403_v2  ;;  %v7405_v38 = vpop.f32.mrb[242].mxu1  ;;  %10660 = vtanh.f32 %v9628_v57  ;;  %v9630_v23 = vadd.f32 %v7345_v18, %v13785_v8  ;;  %v7347_v25 = vpop.f32.mrb[195].mxu0  ;;  %v13830_v31 = vadd.f32 %v13703_v51, %v13785_v8 }
 0x715   :  { %v9657_v21 = vadd.f32 %v9656_v13, %v7405_v38  ;;  %v7407_v45 = vpop.f32.mrb[243].mxu1  ;;  %10662 = vtanh.f32 %v9653_v49  ;;  %v13826_v53 = vadd.f32 %v7928_v26, %v7765_v46  ;;  %v9631_v38 = vadd.f32 %v7347_v25, %v13787_v54 }
 0x716   :  { %v9659_v11 = vadd.f32 %v9658_v1, %v7407_v45  ;;  %v10653_v24 = vpop.eup %10652  ;;  %10664 = vtanh.f32 %v9629_v60  ;;  %v13843_v46 = vadd.f32 %v13718_v30, %v13787_v54  ;;  %v13848_v61 = vadd.f32 %v13725_v12, %v13785_v8 }
 0x717   :  { %v10655_v13 = vpop.eup %10654  ;;  %10666 = vtanh.f32 %v9655_v56  ;;  %v7770_v51 = vmul.f32 %v10653_v24, %v13594_v3  ;;  %v13852_v9 = vadd.f32 %v13730_v36, %v13787_v54  ;;  %v13857_v30 = vadd.f32 %v13734_v55, %v13785_v8 }
 0x718   :  { %v10657_v1 = vpop.eup %10656  ;;  %10668 = vtanh.f32 %v9630_v23  ;;  %v7771_v35 = vmul.f32 %v10655_v13, %v13598_v42 }
 0x719   :  { %v10659_v62 = vpop.eup %10658  ;;  %10670 = vtanh.f32 %v9657_v21  ;;  %v7351_v56 = vpop.f32.mrb[196].mxu0  ;;  %v7776_v49 = vmul.f32 %v10657_v1, %v13594_v3  ;;  %v7935_v12 = vadd.f32 %v13569_v15, %v7770_v51 }
 0x71a   :  { %v7411_v57 = vpop.f32.mrb[244].mxu1  ;;  %10672 = vtanh.f32 %v9631_v38  ;;  %v9632_v39 = vadd.f32 %v7351_v56, %v13785_v8  ;;  %v7353_v2 = vpop.f32.mrb[197].mxu0  ;;  %v7777_v18 = vmul.f32 %v10659_v62, %v13598_v42 }
 0x71b   :  { %v9661_v36 = vadd.f32 %v9660_v20, %v7411_v57  ;;  %v7413_v60 = vpop.f32.mrb[245].mxu1  ;;  %10674 = vtanh.f32 %v9659_v11  ;;  %v9633_v26 = vadd.f32 %v7353_v2, %v13787_v54  ;;  %v7355_v23 = vpop.f32.mrb[198].mxu0  ;;  %v7942_v25 = vadd.f32 %v13571_v6, %v7776_v49 }
 0x71c   :  { %v9663_v55 = vadd.f32 %v9662_v19, %v7413_v60  ;;  %v7415_v21 = vpop.f32.mrb[246].mxu1  ;;  %10676 = vtanh.f32 %v9632_v39  ;;  %v9634_v3 = vadd.f32 %v7355_v23, %v13785_v8  ;;  %v7357_v45 = vpop.f32.mrb[199].mxu0  ;;  %v13866_v38 = vadd.f32 %v7935_v12, %v7771_v35 }
 0x71d   :  { %v9665_v15 = vadd.f32 %v9664_v7, %v7415_v21  ;;  %v7417_v24 = vpop.f32.mrb[247].mxu1  ;;  %v13870_v20 = vadd.f32 %v13740_v29, %v13787_v54  ;;  %10678 = vtanh.f32 %v9661_v36  ;;  %v13872_v11 = vadd.f32 %v7942_v25, %v7777_v18 }
 0x71e   :  { %v9667_v42 = vadd.f32 %v9666_v47, %v7417_v24  ;;  %v10661_v19 = vpop.eup %10660  ;;  %v13876_v6 = vadd.f32 %v13747_v32, %v13785_v8  ;;  %v13880_v7 = vadd.f32 %v13752_v58, %v13787_v54  ;;  %10680 = vtanh.f32 %v9633_v26 }
 0x71f   :  { %v9635_v13 = vadd.f32 %v7357_v45, %v13787_v54  ;;  %v10663_v51 = vpop.eup %10662  ;;  %v13885_v29 = vadd.f32 %v13756_v17, %v13785_v8  ;;  %v13889_v47 = vadd.f32 %v13762_v0, %v13787_v54  ;;  %10682 = vtanh.f32 %v9663_v55 }
 0x720   :  { %v7640_v32 = vmul.f32 %v10661_v19, %v13795_v50  ;;  %v10665_v1 = vpop.eup %10664  ;;  %v13894_v58 = vadd.f32 %v13771_v10, %v13785_v8  ;;  %v13898_v35 = vadd.f32 %v13776_v48, %v13787_v54  ;;  %10684 = vtanh.f32 %v9634_v3 }
 0x721   :  { %v7712_v17 = vmul.f32 %v10663_v51, %v13795_v50  ;;  %v10667_v62 = vpop.eup %10666  ;;  %v13903_v0 = vadd.f32 %v13780_v28, %v13785_v8  ;;  %10686 = vtanh.f32 %v9665_v15  ;;  %v7361_v56 = vpop.f32.mrb[200].mxu0  ;;  %v7641_v49 = vmul.f32 %v10665_v1, %v13797_v59 }
 0x722   :  { %v7421_v57 = vpop.f32.mrb[248].mxu1  ;;  %v7783_v10 = vadd.f32 %v13608_v22, %v7640_v32  ;;  %v10669_v12 = vpop.eup %10668  ;;  %10688 = vtanh.f32 %v9635_v13  ;;  %v9636_v48 = vadd.f32 %v7361_v56, %v13785_v8  ;;  %v7713_v60 = vmul.f32 %v10667_v62, %v13797_v59 }
 0x723   :  { %v9669_v39 = vadd.f32 %v13830_v31, %v7421_v57  ;;  %v7363_v36 = vpop.f32.mrb[201].mxu0  ;;  %v7423_v2 = vpop.f32.mrb[249].mxu1  ;;  %10690 = vtanh.f32 %v9667_v42  ;;  %v7867_v45 = vadd.f32 %v13714_v52, %v7712_v17 }
 0x724   :  { %v10671_v18 = vpop.eup %10670  ;;  %v9637_v28 = vadd.f32 %v7363_v36, %v13787_v54  ;;  %v9671_v26 = vadd.f32 %v13834_v5, %v7423_v2  ;;  %v7365_v55 = vpop.f32.mrb[202].mxu0  ;;  %v7784_v21 = vadd.f32 %v7783_v10, %v7641_v49  ;;  %10692 = vtanh.f32 %v9636_v48 }
 0x725   :  { %v7425_v23 = vpop.f32.mrb[250].mxu1  ;;  %v10673_v22 = vpop.eup %10672  ;;  %v9638_v25 = vadd.f32 %v7365_v55, %v13785_v8  ;;  %10694 = vtanh.f32 %v9669_v39  ;;  %v7646_v5 = vmul.f32 %v10669_v12, %v13795_v50  ;;  %v7868_v51 = vadd.f32 %v7867_v45, %v7713_v60 }
 0x726   :  { %v9673_v3 = vadd.f32 %v13839_v44, %v7425_v23  ;;  %v7367_v31 = vpop.f32.mrb[203].mxu0  ;;  %v7427_v15 = vpop.f32.mrb[251].mxu1  ;;  %7785 = vadd.xlane.f32.xlu1 %v7784_v21  ;;  %10696 = vtanh.f32 %v9637_v28  ;;  %v7647_v32 = vmul.f32 %v10673_v22, %v13797_v59  ;;  %v7718_v44 = vmul.f32 %v10671_v18, %v13795_v50 }
 0x727   :  { %v10675_v24 = vpop.eup %10674  ;;  %v9639_v42 = vadd.f32 %v7367_v31, %v13787_v54  ;;  %v9675_v19 = vadd.f32 %v13843_v46, %v7427_v15  ;;  %10698 = vtanh.f32 %v9671_v26  ;;  %v7790_v17 = vadd.f32 %v13613_v63, %v7646_v5 }
 0x728   :  { %v10677_v13 = vpop.eup %10676  ;;  %v7719_v62 = vmul.f32 %v10675_v24, %v13797_v59  ;;  %v13925_v46 = vadd.f32 %v13790_v33, %v13787_v54  ;;  %10700 = vtanh.f32 %v9638_v25  ;;  %v7874_v57 = vadd.f32 %v13721_v34, %v7718_v44 }
 0x729   :  { %v10679_v1 = vpop.eup %10678  ;;  %v7652_v52 = vmul.f32 %v10677_v13, %v13795_v50  ;;  %10702 = vtanh.f32 %v9673_v3  ;;  %v7371_v12 = vpop.f32.mrb[204].mxu0  ;;  %v7791_v36 = vadd.f32 %v7790_v17, %v7647_v32 }
 0x72a   :  { %v10681_v56 = vpop.eup %10680  ;;  %v7724_v49 = vmul.f32 %v10679_v1, %v13795_v50  ;;  %v7431_v48 = vpop.f32.mrb[252].mxu1  ;;  %7869 = vadd.xlane.f32.xlu1 %v7868_v51  ;;  %10704 = vtanh.f32 %v9639_v42  ;;  %v9640_v33 = vadd.f32 %v7371_v12, %v13785_v8  ;;  %v7875_v28 = vadd.f32 %v7874_v57, %v7719_v62 }
 0x72b   :  { %v10683_v10 = vpop.eup %10682  ;;  %v7653_v39 = vmul.f32 %v10681_v56, %v13797_v59  ;;  %v7797_v63 = vadd.f32 %v13622_v27, %v7652_v52  ;;  %v9677_v60 = vadd.f32 %v13848_v61, %v7431_v48  ;;  %v7373_v18 = vpop.f32.mrb[205].mxu0  ;;  %10706 = vtanh.f32 %v9675_v19 }
 0x72c   :  { %v10685_v2 = vpop.eup %10684  ;;  %v7433_v34 = vpop.f32.mrb[253].mxu1  ;;  %v9641_v55 = vadd.f32 %v7373_v18, %v13787_v54  ;;  %10708 = vtanh.f32 %v9640_v33  ;;  %v7725_v1 = vmul.f32 %v10683_v10, %v13797_v59 }
 0x72d   :  { %v10687_v26 = vpop.eup %10686  ;;  %v9679_v23 = vadd.f32 %v13852_v9, %v7433_v34  ;;  %v7375_v21 = vpop.f32.mrb[206].mxu0  ;;  %v7798_v25 = vadd.f32 %v7797_v63, %v7653_v39  ;;  %v7658_v45 = vmul.f32 %v10685_v2, %v13795_v50  ;;  %10710 = vtanh.f32 %v9677_v60 }
 0x72e   :  { %v7435_v22 = vpop.f32.mrb[254].mxu1  ;;  %v10689_v27 = vpop.eup %10688  ;;  %v9642_v3 = vadd.f32 %v7375_v21, %v13785_v8  ;;  %7792 = vadd.xlane.f32.xlu1 %v7791_v36  ;;  %10712 = vtanh.f32 %v9641_v55 }
 0x72f   :  { %v9681_v31 = vadd.f32 %v13857_v30, %v7435_v22  ;;  %v7377_v15 = vpop.f32.mrb[207].mxu0  ;;  %v7437_v61 = vpop.f32.mrb[255].mxu1  ;;  %7799 = vadd.xlane.f32.xlu0 %v7798_v25  ;;  %v7659_v9 = vmul.f32 %v10689_v27, %v13797_v59  ;;  %v7804_v13 = vadd.f32 %v13627_v43, %v7658_v45  ;;  %v7730_v30 = vmul.f32 %v10687_v26, %v13795_v50 }
 0x730   :  { %v10691_v24 = vpop.eup %10690  ;;  %v9643_v42 = vadd.f32 %v7377_v15, %v13787_v54  ;;  %v9683_v19 = vadd.f32 %v13870_v20, %v7437_v61  ;;  %10714 = vtanh.f32 %v9679_v23  ;;  %v7881_v20 = vadd.f32 %v13737_v41, %v7724_v49 }
 0x731   :  { %v10693_v5 = vpop.eup %10692  ;;  %v7731_v51 = vmul.f32 %v10691_v24, %v13797_v59  ;;  %10716 = vtanh.f32 %v9642_v3  ;;  %v7805_v17 = vadd.f32 %v7804_v13, %v7659_v9  ;;  %v7888_v62 = vadd.f32 %v13743_v4, %v7730_v30  ;;  %v7381_v57 = vpop.f32.mrb[208].mxu0 }
 0x732   :  { %v10695_v32 = vpop.eup %10694  ;;  %v7664_v44 = vmul.f32 %v10693_v5, %v13795_v50  ;;  %10718 = vtanh.f32 %v9681_v31  ;;  %v7441_v12 = vpop.f32.mrb[0].mxu1  ;;  %7876 = vadd.xlane.f32.xlu1 %v7875_v28  ;;  %v13951_v63 = vadd.f32 %v7881_v20, %v7725_v1  ;;  %v9644_v41 = vadd.f32 %v7381_v57, %v13785_v8  ;;  %v15832_v1 = vld [vmem:[#allocation155_spill] sm:$0xff] }
 0x733   :  { %v10697_v52 = vpop.eup %10696  ;;  %v7736_v56 = vmul.f32 %v10695_v32, %v13795_v50  ;;  %10720 = vtanh.f32 %v9643_v42  ;;  %v9685_v49 = vadd.f32 %v13876_v6, %v7441_v12  ;;  %7806 = vadd.xlane.f32.xlu0 %v7805_v17  ;;  %v7383_v4 = vpop.f32.mrb[209].mxu0  ;;  %v7889_v2 = vadd.f32 %v7888_v62, %v7731_v51  ;;  %v15831_v32 = vld [vmem:[#allocation36_spill] sm:$0xff] }
 0x734   :  { %v10699_v43 = vpop.eup %10698  ;;  %v7665_v48 = vmul.f32 %v10697_v52, %v13797_v59  ;;  %v7811_v39 = vadd.f32 %v13637_v40, %v7664_v44  ;;  %v7443_v36 = vpop.f32.mrb[1].mxu1  ;;  %10722 = vtanh.f32 %v9683_v19  ;;  %v9645_v60 = vadd.f32 %v7383_v4, %v13787_v54 }
 0x735   :  { %v10701_v10 = vpop.eup %10700  ;;  %v9687_v18 = vadd.f32 %v13880_v7, %v7443_v36  ;;  %v7385_v34 = vpop.f32.mrb[210].mxu0  ;;  %10724 = vtanh.f32 %v9644_v41  ;;  %v7737_v61 = vmul.f32 %v10699_v43, %v13797_v59 }
 0x736   :  { %v10703_v33 = vpop.eup %10702  ;;  %v7445_v40 = vpop.f32.mrb[2].mxu1  ;;  %v7670_v28 = vmul.f32 %v10701_v10, %v13795_v50  ;;  %v9646_v55 = vadd.f32 %v7385_v34, %v13785_v8  ;;  %v7812_v22 = vadd.f32 %v7811_v39, %v7665_v48  ;;  %10726 = vtanh.f32 %v9685_v49  ;;  %v15833_v49 = vld [vmem:[#allocation198_spill] sm:$0xff] }
 0x737   :  { %v10705_v26 = vpop.eup %10704  ;;  %v9689_v6 = vadd.f32 %v13885_v29, %v7445_v40  ;;  %v7387_v23 = vpop.f32.mrb[211].mxu0  ;;  %10728 = vtanh.f32 %v9645_v60  ;;  %7890 = vadd.xlane.f32.xlu0 %v7889_v2  ;;  %v7895_v29 = vadd.f32 %v13758_v16, %v7736_v56  ;;  %v7742_v24 = vmul.f32 %v10703_v33, %v13795_v50 }
 0x738   :  { %v7447_v21 = vpop.f32.mrb[3].mxu1  ;;  %v10707_v25 = vpop.eup %10706  ;;  %v9647_v27 = vadd.f32 %v7387_v23, %v13787_v54  ;;  %v7671_v7 = vmul.f32 %v10705_v26, %v13797_v59  ;;  %v7818_v15 = vadd.f32 %v13641_v37, %v7670_v28  ;;  %10730 = vtanh.f32 %v9687_v18 }
 0x739   :  { %v9691_v3 = vadd.f32 %v13889_v47, %v7447_v21  ;;  %v10709_v31 = vpop.eup %10708  ;;  %v7743_v42 = vmul.f32 %v10707_v25, %v13797_v59  ;;  %10732 = vtanh.f32 %v9646_v55  ;;  %v7896_v5 = vadd.f32 %v7895_v29, %v7737_v61  ;;  %v7391_v37 = vpop.f32.mrb[212].mxu0  ;;  %v15836_v61 = vld [vmem:[#allocation167_spill] sm:$0xff] }
 0x73a   :  { %v10711_v45 = vpop.eup %10710  ;;  %v7676_v19 = vmul.f32 %v10709_v31, %v13795_v50  ;;  %v7819_v9 = vadd.f32 %v7818_v15, %v7671_v7  ;;  %10734 = vtanh.f32 %v9689_v6  ;;  %v7451_v51 = vpop.f32.mrb[4].mxu1  ;;  %v7902_v16 = vadd.f32 %v15831_v32, %v7742_v24  ;;  %v15835_v7 = vld [vmem:[#allocation197_spill] sm:$0xff] }
 0x73b   :  { %v10713_v47 = vpop.eup %10712  ;;  %v7748_v13 = vmul.f32 %v10711_v45, %v13795_v50  ;;  %10736 = vtanh.f32 %v9647_v27  ;;  %v9648_v17 = vadd.f32 %v7391_v37, %v13785_v8  ;;  %v9693_v62 = vadd.f32 %v13894_v58, %v7451_v51  ;;  %7813 = vadd.xlane.f32.xlu0 %v7812_v22  ;;  %v7393_v56 = vpop.f32.mrb[213].mxu0 }
 0x73c   :  { %v10715_v30 = vpop.eup %10714  ;;  %v7677_v44 = vmul.f32 %v10713_v47, %v13797_v59  ;;  %v7825_v20 = vadd.f32 %v15832_v1, %v7676_v19  ;;  %7820 = vadd.xlane.f32.xlu1 %v7819_v9  ;;  %v7453_v43 = vpop.f32.mrb[5].mxu1  ;;  %10738 = vtanh.f32 %v9691_v3  ;;  %v9649_v48 = vadd.f32 %v7393_v56, %v13787_v54 }
 0x73d   :  { %v10717_v52 = vpop.eup %10716  ;;  %v7749_v57 = vmul.f32 %v10715_v30, %v13797_v59  ;;  %v9695_v39 = vadd.f32 %v13898_v35, %v7453_v43  ;;  %v7395_v10 = vpop.f32.mrb[214].mxu0  ;;  %v7909_v4 = vadd.f32 %v15833_v49, %v7748_v13  ;;  %10740 = vtanh.f32 %v9648_v17 }
 0x73e   :  { %v10719_v12 = vpop.eup %10718  ;;  %v7455_v41 = vpop.f32.mrb[6].mxu1  ;;  %v9650_v2 = vadd.f32 %v7395_v10, %v13785_v8  ;;  %v7903_v18 = vadd.f32 %v7902_v16, %v7743_v42  ;;  %10742 = vtanh.f32 %v9693_v62  ;;  %v7682_v55 = vmul.f32 %v10717_v52, %v13795_v50  ;;  %v15838_v10 = vld [vmem:[#allocation187_spill] sm:$0xff] }
 0x73f   :  { %v10721_v36 = vpop.eup %10720  ;;  %v9697_v58 = vadd.f32 %v13903_v0, %v7455_v41  ;;  %v7397_v33 = vpop.f32.mrb[215].mxu0  ;;  %v7910_v35 = vadd.f32 %v7909_v4, %v7749_v57  ;;  %10744 = vtanh.f32 %v9649_v48  ;;  %7897 = vadd.xlane.f32.xlu0 %v7896_v5  ;;  %v7826_v8 = vadd.f32 %v7825_v20, %v7677_v44  ;;  %v15837_v44 = vld [vmem:[#allocation189_spill] sm:$0xff] }
 0x740   :  { %v7457_v60 = vpop.f32.mrb[7].mxu1  ;;  %v10723_v34 = vpop.eup %10722  ;;  %v9651_v40 = vadd.f32 %v7397_v33, %v13787_v54  ;;  %v7683_v6 = vmul.f32 %v10721_v36, %v13797_v59  ;;  %10746 = vtanh.f32 %v9695_v39  ;;  %v7754_v0 = vmul.f32 %v10719_v12, %v13795_v50 }
 0x741   :  { %v9699_v28 = vadd.f32 %v13925_v46, %v7457_v60  ;;  %v10725_v26 = vpop.eup %10724  ;;  %7911 = vadd.xlane.f32.xlu1 %v7910_v35  ;;  %v7755_v21 = vmul.f32 %v10723_v34, %v13797_v59  ;;  %10748 = vtanh.f32 %v9650_v2  ;;  %v15834_v46 = vld [vmem:[#allocation169_spill] sm:$0xff] }
 0x742   :  { %v10727_v23 = vpop.eup %10726  ;;  %v7688_v54 = vmul.f32 %v10725_v26, %v13795_v50  ;;  %v7832_v25 = vadd.f32 %v15834_v46, %v7682_v55  ;;  %10750 = vtanh.f32 %v9697_v58  ;;  %v7916_v31 = vadd.f32 %v15835_v7, %v7754_v0 }
 0x743   :  { %v10729_v22 = vpop.eup %10728  ;;  %v7760_v27 = vmul.f32 %v10727_v23, %v13795_v50  ;;  %10752 = vtanh.f32 %v9651_v40  ;;  %7904 = vadd.xlane.f32.xlu0 %v7903_v18  ;;  %v15840_v23 = vld [vmem:[#allocation89_spill] sm:$0xff] }
 0x744   :  { %v10731_v3 = vpop.eup %10730  ;;  %v7689_v15 = vmul.f32 %v10729_v22, %v13797_v59  ;;  %v7839_v29 = vadd.f32 %v15836_v61, %v7688_v54  ;;  %v7833_v24 = vadd.f32 %v7832_v25, %v7683_v6  ;;  %10754 = vtanh.f32 %v9699_v28  ;;  %v15839_v28 = vld [vmem:[#allocation38_spill] sm:$0xff] }
 0x745   :  { %v10733_v45 = vpop.eup %10732  ;;  %v7761_v42 = vmul.f32 %v10731_v3, %v13797_v59  ;;  %v7923_v19 = vadd.f32 %v13818_v14, %v7760_v27  ;;  %v7917_v9 = vadd.f32 %v7916_v31, %v7755_v21  ;;  %v14015_v0 = vadd.s32 8, %v15840_v23 }
 0x746   :  { %v10735_v47 = vpop.eup %10734  ;;  %v7840_v5 = vadd.f32 %v7839_v29, %v7689_v15  ;;  %v7694_v13 = vmul.f32 %v10733_v45, %v13795_v50  ;;  %7834 = vadd.xlane.f32.xlu1 %v7833_v24 }
 0x747   :  { %v10737_v30 = vpop.eup %10736  ;;  %v7924_v37 = vadd.f32 %v7923_v19, %v7761_v42  ;;  %v7766_v51 = vmul.f32 %v10735_v47, %v13795_v50  ;;  %7827 = vadd.xlane.f32.xlu0 %v7826_v8  ;;  %vm7978_vm1 = vcmp.lt.s32.totalorder %v14015_v0, 10 }
 0x748   :  { %v10739_v32 = vpop.eup %10738  ;;  %v7695_v16 = vmul.f32 %v10737_v30, %v13797_v59  ;;  %v7846_v1 = vadd.f32 %v15837_v44, %v7694_v13 }
 0x749   :  { %v10741_v20 = vpop.eup %10740  ;;  %v7767_v14 = vmul.f32 %v10739_v32, %v13797_v59  ;;  %v7930_v52 = vadd.f32 %v13826_v53, %v7766_v51 }
 0x74a   :  { %v10743_v17 = vpop.eup %10742  ;;  %v7847_v62 = vadd.f32 %v7846_v1, %v7695_v16  ;;  %v7700_v56 = vmul.f32 %v10741_v20, %v13795_v50  ;;  %7918 = vadd.xlane.f32.xlu1 %v7917_v9 }
 0x74b   :  { %v10745_v43 = vpop.eup %10744  ;;  %v7931_v57 = vadd.f32 %v7930_v52, %v7767_v14  ;;  %v7772_v12 = vmul.f32 %v10743_v17, %v13795_v50  ;;  %7841 = vadd.xlane.f32.xlu0 %v7840_v5 }
 0x74c   :  { %v10747_v48 = vpop.eup %10746  ;;  %v7701_v39 = vmul.f32 %v10745_v43, %v13797_v59  ;;  %v7853_v41 = vadd.f32 %v15838_v10, %v7700_v56 }
 0x74d   :  { %v10749_v49 = vpop.eup %10748  ;;  %v7773_v4 = vmul.f32 %v10747_v48, %v13797_v59  ;;  %v7937_v53 = vadd.f32 %v13866_v38, %v7772_v12 }
 0x74e   :  { %v10751_v36 = vpop.eup %10750  ;;  %v7854_v2 = vadd.f32 %v7853_v41, %v7701_v39  ;;  %v7706_v58 = vmul.f32 %v10749_v49, %v13795_v50  ;;  %7925 = vadd.xlane.f32.xlu1 %v7924_v37 }
 0x74f   :  { %v10753_v33 = vpop.eup %10752  ;;  %v7778_v60 = vmul.f32 %v10751_v36, %v13795_v50  ;;  %v7938_v18 = vadd.f32 %v7937_v53, %v7773_v4  ;;  %7932 = vadd.xlane.f32.xlu0 %v7931_v57 }
 0x750   :  { %v10755_v34 = vpop.eup %10754  ;;  %v7707_v40 = vmul.f32 %v10753_v33, %v13797_v59  ;;  %v7860_v35 = vadd.f32 %v15839_v28, %v7706_v58 }
 0x751   :  { %v7779_v26 = vmul.f32 %v10755_v34, %v13797_v59  ;;  %v7944_v55 = vadd.f32 %v13872_v11, %v7778_v60  ;;  %v14020_v59 = vstv %s14774_s7  ;;  %s11019_s7 = smov [#allocation14]  }
 0x752   :  { %v7861_v38 = vadd.f32 %v7860_v35, %v7707_v40  ;;  %7848 = vadd.xlane.f32.xlu1 %v7847_v62  ;;  %s9095_s16 = sshll.u32 %s11019_s7, 4  ;;  %s9096_s16 = int_to_ptr.vmem [resolvable:$true] %s9095_s16 }
 0x753   :  { %v7945_v6 = vadd.f32 %v7944_v55, %v7779_v26  ;;  %7855 = vadd.xlane.f32.xlu0 %v7854_v2  ;;  %s10974_s17 = scalar_lea.vmem %s9096_s16, 1536  ;;  %p10979_p7 = scmp.lt.s32.totalorder %s9096_s16, %s9096_s16 }
 0x754   :  { %p10975_p6 = scmp.ne.s32.totalorder %s9096_s16, %s10974_s17  ;;  %p10980_p8 = scmp.lt.s32.totalorder %s10974_s17, %s10974_s17 }
 0x756   :  { %7862 = vadd.xlane.f32.xlu1 %v7861_v38  ;;  %p10981_p9 = por %p10980_p8, %p10979_p7 }
 0x757   :  { %7946 = vadd.xlane.f32.xlu0 %v7945_v6 }
 0x758   :  { %p10982_p10 = pnand %p10981_p9, %p10975_p6 }
 0x75a   :  { %7883 = vadd.xlane.f32.xlu1 %v13951_v63 }
 0x75b   :  { %7939 = vadd.xlane.f32.xlu0 %v7938_v18 }
 0x7b3   :  { %v7786_v50 = vpop.xlane.xlu1 %7785 }
 0x7b4   :  { %v7950_v22 = vadd.f32 %v14020_v59, %v7786_v50 }
 0x7b7   :  { %v7870_v8 = vpop.xlane.xlu1 %7869 }
 0x7b8   :  { %v7962_v7 = vadd.f32 %v14020_v59, %v7870_v8 }
 0x7bb   :  { %v7793_v21 = vpop.xlane.xlu1 %7792 }
 0x7bc   :  { %v7800_v11 = vpop.xlane.xlu0 %7799  ;;  %v7951_v54 = vadd.f32 %v14020_v59, %v7793_v21 }
 0x7bd   :  { %v7952_v61 = vadd.f32 %v14020_v59, %v7800_v11 }
 0x7be   :  { %v7980_v63 = vsel %vm7978_vm1, %v7951_v54, -1e+09 }
 0x7bf   :  { %v8003_v46 = vmax.f32 %v7950_v22, %v7980_v63  ;;  %v7877_v25 = vpop.xlane.xlu1 %7876 }
 0x7c0   :  { %v7807_v27 = vpop.xlane.xlu0 %7806  ;;  %v7963_v3 = vadd.f32 %v14020_v59, %v7877_v25 }
 0x7c1   :  { %v8004_v31 = vrot.slane %v8003_v46, 4  ;;  %v7953_v15 = vadd.f32 %v14020_v59, %v7807_v27 }
 0x7c2   :  { %v7992_v29 = vsel %vm7978_vm1, %v7963_v3, -1e+09 }
 0x7c3   :  { %v8005_v45 = vmax.f32 %v8003_v46, %v8004_v31  ;;  %v7982_v24 = vsel %vm7978_vm1, %v7953_v15, -1e+09  ;;  %v8045_v42 = vmax.f32 %v7962_v7, %v7992_v29 }
 0x7c4   :  { %v8010_v19 = vmax.f32 %v7952_v61, %v7982_v24  ;;  %v14035_v47 = vpop.xlane.xlu0 %7890 }
 0x7c5   :  { %v8006_v9 = vrot.slane %v8005_v45, 2  ;;  %v8046_v5 = vrot.slane %v8045_v42, 4 }
 0x7c6   :  { %v8011_v13 = vrot.slane %v8010_v19, 4 }
 0x7c7   :  { %v8007_v30 = vmax.f32 %v8005_v45, %v8006_v9  ;;  %v8047_v37 = vmax.f32 %v8045_v42, %v8046_v5 }
 0x7c8   :  { %v8012_v51 = vmax.f32 %v8010_v19, %v8011_v13  ;;  %v7814_v16 = vpop.xlane.xlu0 %7813 }
 0x7c9   :  { %v7821_v32 = vpop.xlane.xlu1 %7820  ;;  %v8008_v44 = vrot.slane %v8007_v30, 1  ;;  %v8048_v1 = vrot.slane %v8047_v37, 2  ;;  %v14039_v14 = vadd.f32 %v14020_v59, %v7814_v16 }
 0x7ca   :  { %v7955_v20 = vadd.f32 %v14020_v59, %v7821_v32  ;;  %v8013_v52 = vrot.slane %v8012_v51, 2 }
 0x7cb   :  { %v8009_v17 = vmax.f32 %v8007_v30, %v8008_v44  ;;  %v8049_v62 = vmax.f32 %v8047_v37, %v8048_v1 }
 0x7cc   :  { %v7984_v56 = vsel %vm7978_vm1, %v7955_v20, -1e+09  ;;  %v8014_v43 = vmax.f32 %v8012_v51, %v8013_v52  ;;  %v7898_v12 = vpop.xlane.xlu0 %7897 }
 0x7cd   :  { %v8017_v57 = vmax.f32 %v14039_v14, %v7984_v56  ;;  %v8087_v48 = vsub.f32 %v7950_v22, %v8009_v17  ;;  %v8088_v39 = vsub.f32 %v7980_v63, %v8009_v17  ;;  %v8050_v10 = vrot.slane %v8049_v62, 1 }
 0x7ce   :  { %v7912_v41 = vpop.xlane.xlu1 %7911  ;;  %v8015_v49 = vrot.slane %v8014_v43, 1  ;;  %v14045_v60 = vadd.f32 %v14020_v59, %v7898_v12 }
 0x7cf   :  { %v8018_v4 = vrot.slane %v8017_v57, 4  ;;  %v8111_v53 = vmul.f32 1.442695, %v8087_v48  ;;  %v8113_v36 = vmul.f32 1.442695, %v8088_v39  ;;  %v8051_v2 = vmax.f32 %v8049_v62, %v8050_v10 }
 0x7d0   :  { %v8016_v58 = vmax.f32 %v8014_v43, %v8015_v49  ;;  %v7905_v18 = vpop.xlane.xlu0 %7904 }
 0x7d1   :  { %v8019_v33 = vmax.f32 %v8017_v57, %v8018_v4  ;;  %10756 = vpow2.f32 %v8111_v53  ;;  %v8099_v34 = vsub.f32 %v7962_v7, %v8051_v2  ;;  %v8100_v40 = vsub.f32 %v7992_v29, %v8051_v2 }
 0x7d2   :  { %v7967_v28 = vadd.f32 %v14020_v59, %v7905_v18  ;;  %10758 = vpow2.f32 %v8113_v36  ;;  %v8089_v35 = vsub.f32 %v7952_v61, %v8016_v58  ;;  %v8090_v26 = vsub.f32 %v7982_v24, %v8016_v58 }
 0x7d3   :  { %v8020_v55 = vrot.slane %v8019_v33, 2  ;;  %v7835_v38 = vpop.xlane.xlu1 %7834  ;;  %v8135_v6 = vmul.f32 1.442695, %v8099_v34  ;;  %v8137_v50 = vmul.f32 1.442695, %v8100_v40  ;;  %v14066_v29 = vadd.f32 %v14020_v59, %v7912_v41 }
 0x7d4   :  { %v14050_v8 = vsel %vm7978_vm1, %v7967_v28, -1e+09  ;;  %v7957_v23 = vadd.f32 %v14020_v59, %v7835_v38  ;;  %v8115_v11 = vmul.f32 1.442695, %v8089_v35  ;;  %v8117_v21 = vmul.f32 1.442695, %v8090_v26  ;;  %v7828_v63 = vpop.xlane.xlu0 %7827 }
 0x7d5   :  { %v8021_v54 = vmax.f32 %v8019_v33, %v8020_v55  ;;  %v8059_v22 = vmax.f32 %v14045_v60, %v14050_v8  ;;  %10760 = vpow2.f32 %v8135_v6  ;;  %v14056_v46 = vadd.f32 %v14020_v59, %v7828_v63 }
 0x7d6   :  { %10762 = vpow2.f32 %v8115_v11  ;;  %v14060_v3 = vsel %vm7978_vm1, %v7957_v23, -1e+09 }
 0x7d7   :  { %v8022_v25 = vrot.slane %v8021_v54, 1  ;;  %v8060_v27 = vrot.slane %v8059_v22, 4  ;;  %v7919_v7 = vpop.xlane.xlu1 %7918  ;;  %10764 = vpow2.f32 %v8117_v21  ;;  %v8024_v31 = vmax.f32 %v14056_v46, %v14060_v3 }
 0x7d8   :  { %v7969_v15 = vadd.f32 %v14020_v59, %v7919_v7  ;;  %10766 = vpow2.f32 %v8137_v50  ;;  %v14068_v24 = vpop.xlane.xlu0 %7841 }
 0x7d9   :  { %v8023_v61 = vmax.f32 %v8021_v54, %v8022_v25  ;;  %v8061_v45 = vmax.f32 %v8059_v22, %v8060_v27  ;;  %v8025_v42 = vrot.slane %v8024_v31, 4 }
 0x7da   :  { %v14072_v19 = vsel %vm7978_vm1, %v7969_v15, -1e+09 }
 0x7db   :  { %v8091_v9 = vsub.f32 %v14039_v14, %v8023_v61  ;;  %v8092_v5 = vsub.f32 %v7984_v56, %v8023_v61  ;;  %v8062_v13 = vrot.slane %v8061_v45, 2  ;;  %v8066_v30 = vmax.f32 %v14066_v29, %v14072_v19  ;;  %v14077_v37 = vpop.eup %10756  ;;  %v7926_v14 = vpop.xlane.xlu1 %7925 }
 0x7dc   :  { %v8026_v51 = vmax.f32 %v8024_v31, %v8025_v42  ;;  %v14079_v32 = vpop.eup %10758  ;;  %v7933_v52 = vpop.xlane.xlu0 %7932  ;;  %v14093_v53 = vadd.f32 %v14020_v59, %v7926_v14 }
 0x7dd   :  { %v8119_v16 = vmul.f32 1.442695, %v8091_v9  ;;  %v8121_v44 = vmul.f32 1.442695, %v8092_v5  ;;  %v8063_v1 = vmax.f32 %v8061_v45, %v8062_v13  ;;  %v8067_v20 = vrot.slane %v8066_v30, 4 }
 0x7de   :  { %v8159_v17 = vadd.f32 %v14079_v32, %v14077_v37  ;;  %v8027_v62 = vrot.slane %v8026_v51, 2  ;;  %v7971_v56 = vadd.f32 %v14020_v59, %v7933_v52 }
 0x7df   :  { %10768 = vpow2.f32 %v8119_v16  ;;  %v8064_v43 = vrot.slane %v8063_v1, 1  ;;  %v8068_v57 = vmax.f32 %v8066_v30, %v8067_v20  ;;  %v14084_v12 = vpop.eup %10760  ;;  %v7849_v16 = vpop.xlane.xlu1 %7848 }
 0x7e0   :  { %v8160_v48 = vrot.slane %v8159_v17, 4  ;;  %10770 = vpow2.f32 %v8121_v44  ;;  %v8028_v39 = vmax.f32 %v8026_v51, %v8027_v62  ;;  %v14088_v10 = vsel %vm7978_vm1, %v7971_v56, -1e+09  ;;  %v14090_v41 = vpop.eup %10762 }
 0x7e1   :  { %v8065_v49 = vmax.f32 %v8063_v1, %v8064_v43  ;;  %v8069_v4 = vrot.slane %v8068_v57, 2  ;;  %v14095_v36 = vpop.eup %10764  ;;  %v8073_v28 = vmax.f32 %v14093_v53, %v14088_v10  ;;  %v7959_v62 = vadd.f32 %v14020_v59, %v7849_v16 }
 0x7e2   :  { %v8161_v2 = vadd.f32 %v8160_v48, %v8159_v17  ;;  %v8029_v58 = vrot.slane %v8028_v39, 1  ;;  %v14097_v33 = vpop.eup %10766  ;;  %v8166_v18 = vadd.f32 %v14095_v36, %v14090_v41 }
 0x7e3   :  { %v8103_v34 = vsub.f32 %v14045_v60, %v8065_v49  ;;  %v8104_v40 = vsub.f32 %v14050_v8, %v8065_v49  ;;  %v8201_v26 = vadd.f32 %v14097_v33, %v14084_v12  ;;  %v8070_v23 = vmax.f32 %v8068_v57, %v8069_v4 }
 0x7e4   :  { %v8162_v35 = vrot.slane %v8161_v2, 2  ;;  %v8030_v55 = vmax.f32 %v8028_v39, %v8029_v58  ;;  %v8167_v38 = vrot.slane %v8166_v18, 4  ;;  %v8074_v8 = vrot.slane %v8073_v28, 4 }
 0x7e5   :  { %v8143_v6 = vmul.f32 1.442695, %v8103_v34  ;;  %v8145_v50 = vmul.f32 1.442695, %v8104_v40  ;;  %v8202_v21 = vrot.slane %v8201_v26, 4  ;;  %v8071_v9 = vrot.slane %v8070_v23, 1 }
 0x7e6   :  { %v8163_v11 = vadd.f32 %v8162_v35, %v8161_v2  ;;  %v8093_v54 = vsub.f32 %v14056_v46, %v8030_v55  ;;  %v8094_v60 = vsub.f32 %v14060_v3, %v8030_v55  ;;  %v8168_v22 = vadd.f32 %v8167_v38, %v8166_v18 }
 0x7e7   :  { %10772 = vpow2.f32 %v8143_v6  ;;  %v8203_v25 = vadd.f32 %v8202_v21, %v8201_v26  ;;  %v8075_v5 = vmax.f32 %v8073_v28, %v8074_v8  ;;  %v14115_v44 = vmax.f32 %v8070_v23, %v8071_v9 }
 0x7e8   :  { %v8164_v63 = vrot.slane %v8163_v11, 1  ;;  %10774 = vpow2.f32 %v8145_v50  ;;  %v8123_v27 = vmul.f32 1.442695, %v8093_v54  ;;  %v8169_v31 = vrot.slane %v8168_v22, 2  ;;  %v15844_v54 = vld [vmem:[#allocation20_spill] sm:$0xff] }
 0x7e9   :  { %v14109_v7 = vpop.eup %10768  ;;  %v8125_v15 = vmul.f32 1.442695, %v8094_v60  ;;  %v8204_v42 = vrot.slane %v8203_v25, 2  ;;  %v8076_v52 = vrot.slane %v8075_v5, 2  ;;  %v8105_v57 = vsub.f32 %v14066_v29, %v14115_v44 }
 0x7ea   :  { %v14111_v61 = vpop.eup %10770  ;;  %v8165_v45 = vadd.f32 %v8164_v63, %v8163_v11  ;;  %10776 = vpow2.f32 %v8123_v27  ;;  %v8170_v46 = vadd.f32 %v8169_v31, %v8168_v22  ;;  %v14132_v58 = vsel %vm7978_vm1, %v7959_v62, -1e+09  ;;  %v15845_v22 = vld [vmem:[#allocation24_spill] sm:$0xff]  ;;  %v15848_v27 = vld [vmem:[#allocation23_spill] sm:$0xff] }
 0x7eb   :  { %v8173_v3 = vadd.f32 %v14111_v61, %v14109_v7  ;;  %10778 = vpow2.f32 %v8125_v15  ;;  %v8205_v13 = vadd.f32 %v8204_v42, %v8203_v25  ;;  %v14126_v49 = vmax.f32 %v8075_v5, %v8076_v52  ;;  %15841 = vst [vmem:[#allocation199_spill] sm:$0xff] %v14132_v58  ;;  %v15849_v15 = vld [vmem:[#allocation34_spill] sm:$0xff]  ;;  %v15850_v42 = vld [vmem:[#allocation28_spill] sm:$0xff]  ;;  %v15855_v52 = vld [vmem:[#allocation27_spill] sm:$0xff] }
 0x7ec   :  { %10780 = vrcp.f32 %v8165_v45  ;;  %v8171_v30 = vrot.slane %v8170_v46, 1  ;;  %v14138_v29 = vadd.f32 %v14020_v59, %v14068_v24  ;;  %v14146_v55 = vmul.f32 1.442695, %v8105_v57 }
 0x7ed   :  { %v8174_v51 = vrot.slane %v8173_v3, 4  ;;  %v8206_v17 = vrot.slane %v8205_v13, 1 }
 0x7ee   :  { %v8172_v1 = vadd.f32 %v8171_v30, %v8170_v46  ;;  %15843 = vst [vmem:[#allocation118_spill] sm:$0xff] %v14138_v29  ;;  %v14153_v24 = vmax.f32 %v14138_v29, %v14132_v58  ;;  %v15851_v46 = vld [vmem:[#allocation21_spill] sm:$0xff] }
 0x7ef   :  { %v8175_v20 = vadd.f32 %v8174_v51, %v8173_v3  ;;  %v8207_v2 = vadd.f32 %v8206_v17, %v8205_v13  ;;  %v15852_v13 = vld [vmem:[#allocation30_spill] sm:$0xff]  ;;  %v15853_v51 = vld [vmem:[#allocation32_spill] sm:$0xff]  ;;  %v15876_v29 = vld [vmem:[#allocation105_spill] sm:$0xff] }
 0x7f0   :  { %10782 = vrcp.f32 %v8172_v1  ;;  %v15854_v1 = vld [vmem:[#allocation25_spill] sm:$0xff] }
 0x7f1   :  { %v14118_v14 = vpop.eup %10772  ;;  %v8176_v56 = vrot.slane %v8175_v20, 2  ;;  %10784 = vrcp.f32 %v8207_v2 }
 0x7f2   :  { %v14120_v43 = vpop.eup %10774 }
 0x7f3   :  { %v8177_v48 = vadd.f32 %v8176_v56, %v8175_v20  ;;  %v8215_v39 = vadd.f32 %v14120_v43, %v14118_v14 }
 0x7f4   :  { %v14128_v4 = vpop.eup %10776 }
 0x7f5   :  { %v14134_v18 = vpop.eup %10778  ;;  %v8178_v34 = vrot.slane %v8177_v48, 1  ;;  %v8216_v40 = vrot.slane %v8215_v39, 4 }
 0x7f6   :  { %15842 = vst [vmem:[#allocation200_spill] sm:$0xff] %v14134_v18  ;;  %v10781_v28 = vpop.eup %10780  ;;  %v14142_v35 = vadd.f32 %v14134_v18, %v14128_v4  ;;  %v15877_v18 = vld [vmem:[#allocation109_spill] sm:$0xff] }
 0x7f7   :  { %v8255_v38 = vmul.f32 %v10781_v28, %v14077_v37  ;;  %v8256_v6 = vmul.f32 %v10781_v28, %v14079_v32  ;;  %v14155_v23 = vadd.f32 %v8178_v34, %v8177_v48  ;;  %v14157_v11 = vadd.f32 %v8216_v40, %v8215_v39  ;;  %v15846_v37 = vld [vmem:[#allocation22_spill] sm:$0xff] }
 0x7f8   :  { %v15847_v32 = vld [vmem:[#allocation26_spill] sm:$0xff] }
 0x7f9   :  { %v8279_v60 = vmul.f32 %v8255_v38, %v15844_v54  ;;  %v8280_v8 = vmul.f32 %v8255_v38, %v15845_v22  ;;  %v8281_v63 = vmul.f32 %v8255_v38, %v15846_v37  ;;  %v8282_v25 = vmul.f32 %v8255_v38, %v15847_v32  ;;  %v15856_v54 = vld [vmem:[#allocation29_spill] sm:$0xff]  ;;  %v15857_v37 = vld [vmem:[#allocation31_spill] sm:$0xff] }
 0x7fa   :  { %v8283_v31 = vmul.f32 %v8255_v38, %v15848_v27  ;;  %v8284_v45 = vmul.f32 %v8255_v38, %v15849_v15  ;;  %v8285_v9 = vmul.f32 %v8256_v6, %v15850_v42  ;;  %v8286_v3 = vmul.f32 %v8256_v6, %v15851_v46  ;;  %v10783_v5 = vpop.eup %10782  ;;  %v15859_v46 = vld [vmem:[#allocation42_spill] sm:$0xff] }
 0x7fb   :  { %v8287_v30 = vmul.f32 %v8256_v6, %v15852_v13  ;;  %v8288_v16 = vmul.f32 %v8256_v6, %v15853_v51  ;;  %v8289_v20 = vmul.f32 %v8256_v6, %v15854_v1  ;;  %v8290_v17 = vmul.f32 %v8256_v6, %v15855_v52 }
 0x7fc   :  { %v8423_v62 = vadd.f32 %v8285_v9, %v8279_v60  ;;  %v8430_v56 = vadd.f32 %v8286_v3, %v8280_v8  ;;  %v8257_v57 = vmul.f32 %v10783_v5, %v14090_v41  ;;  %v8258_v48 = vmul.f32 %v10783_v5, %v14095_v36  ;;  %v15858_v9 = vld [vmem:[#allocation40_spill] sm:$0xff]  ;;  %v10785_v3 = vpop.eup %10784 }
 0x7fd   :  { %v8437_v39 = vadd.f32 %v8287_v30, %v8281_v63  ;;  %v8444_v2 = vadd.f32 %v8288_v16, %v8282_v25  ;;  %v8451_v34 = vadd.f32 %v8289_v20, %v8283_v31  ;;  %v8458_v40 = vadd.f32 %v8290_v17, %v8284_v45  ;;  %v15860_v30 = vld [vmem:[#allocation37_spill] sm:$0xff]  ;;  %v15861_v16 = vld [vmem:[#allocation39_spill] sm:$0xff] }
 0x7fe   :  { %v8424_v28 = vrot.slane %v8423_v62, 4  ;;  %v8431_v38 = vrot.slane %v8430_v56, 4  ;;  %v8291_v22 = vmul.f32 %v8257_v57, %v15856_v54  ;;  %v8292_v32 = vmul.f32 %v8257_v57, %v15857_v37  ;;  %v15863_v37 = vld [vmem:[#allocation35_spill] sm:$0xff] }
 0x7ff   :  { %v8438_v27 = vrot.slane %v8437_v39, 4  ;;  %v8445_v15 = vrot.slane %v8444_v2, 4  ;;  %v8452_v42 = vrot.slane %v8451_v34, 4  ;;  %v8459_v6 = vrot.slane %v8458_v40, 4 }
 0x800   :  { %v8425_v60 = vadd.f32 %v8424_v28, %v8423_v62  ;;  %v8432_v8 = vadd.f32 %v8431_v38, %v8430_v56  ;;  %v8293_v41 = vmul.f32 %v8257_v57, %v15858_v9  ;;  %v8294_v36 = vmul.f32 %v8257_v57, %v15859_v46  ;;  %v15862_v38 = vld [vmem:[#allocation33_spill] sm:$0xff]  ;;  %v15865_v46 = vld [vmem:[#allocation46_spill] sm:$0xff] }
 0x801   :  { %v8439_v63 = vadd.f32 %v8438_v27, %v8437_v39  ;;  %v8446_v25 = vadd.f32 %v8445_v15, %v8444_v2  ;;  %v8453_v31 = vadd.f32 %v8452_v42, %v8451_v34  ;;  %v8460_v45 = vadd.f32 %v8459_v6, %v8458_v40  ;;  %v15864_v6 = vld [vmem:[#allocation44_spill] sm:$0xff] }
 0x802   :  { %v8426_v5 = vrot.slane %v8425_v60, 2  ;;  %v8433_v13 = vrot.slane %v8432_v8, 2  ;;  %v8295_v51 = vmul.f32 %v8257_v57, %v15860_v30  ;;  %v8296_v1 = vmul.f32 %v8257_v57, %v15861_v16 }
 0x803   :  { %v8440_v20 = vrot.slane %v8439_v63, 2  ;;  %v8447_v52 = vrot.slane %v8446_v25, 2  ;;  %v8454_v17 = vrot.slane %v8453_v31, 2  ;;  %v8461_v62 = vrot.slane %v8460_v45, 2 }
 0x804   :  { %v8427_v56 = vadd.f32 %v8426_v5, %v8425_v60  ;;  %v8434_v28 = vadd.f32 %v8433_v13, %v8432_v8  ;;  %v8297_v54 = vmul.f32 %v8258_v48, %v15862_v38  ;;  %v8298_v39 = vmul.f32 %v8258_v48, %v15863_v37  ;;  %v15866_v5 = vld [vmem:[#allocation41_spill] sm:$0xff] }
 0x805   :  { %v8441_v2 = vadd.f32 %v8440_v20, %v8439_v63  ;;  %v8448_v34 = vadd.f32 %v8447_v52, %v8446_v25  ;;  %v8455_v40 = vadd.f32 %v8454_v17, %v8453_v31  ;;  %v8462_v27 = vadd.f32 %v8461_v62, %v8460_v45  ;;  %v15867_v63 = vld [vmem:[#allocation43_spill] sm:$0xff] }
 0x806   :  { %v8428_v15 = vrot.slane %v8427_v56, 1  ;;  %v8435_v42 = vrot.slane %v8434_v28, 1  ;;  %v8299_v9 = vmul.f32 %v8258_v48, %v15864_v6  ;;  %v8300_v57 = vmul.f32 %v8258_v48, %v15865_v46 }
 0x807   :  { %v8442_v30 = vrot.slane %v8441_v2, 1  ;;  %v8449_v16 = vrot.slane %v8448_v34, 1  ;;  %v8456_v21 = vrot.slane %v8455_v40, 1  ;;  %v8463_v50 = vrot.slane %v8462_v27, 1 }
 0x808   :  { %v14184_v60 = vadd.f32 %v8428_v15, %v8427_v56  ;;  %v14186_v8 = vadd.f32 %v8435_v42, %v8434_v28  ;;  %v8301_v13 = vmul.f32 %v8258_v48, %v15866_v5  ;;  %v8302_v25 = vmul.f32 %v8258_v48, %v15867_v63  ;;  %v15872_v63 = vld [vmem:[#allocation112_spill] sm:$0xff] }
 0x809   :  { %v14190_v31 = vadd.f32 %v8442_v30, %v8441_v2  ;;  %v14192_v45 = vadd.f32 %v8449_v16, %v8448_v34  ;;  %v14194_v20 = vadd.f32 %v8456_v21, %v8455_v40  ;;  %v14196_v52 = vadd.f32 %v8463_v50, %v8462_v27  ;;  %v15868_v40 = vld [vmem:[#allocation104_spill] sm:$0xff]  ;;  %v15869_v27 = vld [vmem:[#allocation106_spill] sm:$0xff] }
 0x80a   :  { %v8465_v17 = vadd.f32 %v8297_v54, %v8291_v22  ;;  %v8472_v62 = vadd.f32 %v8298_v39, %v8292_v32  ;;  %v8479_v38 = vadd.f32 %v8299_v9, %v8293_v41  ;;  %v8486_v37 = vadd.f32 %v8300_v57, %v8294_v36 }
 0x80b   :  { %v8493_v56 = vadd.f32 %v8301_v13, %v8295_v51  ;;  %v8500_v15 = vadd.f32 %v8302_v25, %v8296_v1  ;;  %v8267_v28 = vmul.f32 %v10785_v3, %v14084_v12  ;;  %v8268_v42 = vmul.f32 %v10785_v3, %v14097_v33  ;;  %v15870_v12 = vld [vmem:[#allocation101_spill] sm:$0xff]  ;;  %v15871_v33 = vld [vmem:[#allocation103_spill] sm:$0xff] }
 0x80c   :  { %v8466_v6 = vrot.slane %v8465_v17, 4  ;;  %v8473_v48 = vrot.slane %v8472_v62, 4  ;;  %v8480_v2 = vrot.slane %v8479_v38, 4  ;;  %v8487_v46 = vrot.slane %v8486_v37, 4 }
 0x80d   :  { %v8494_v34 = vrot.slane %v8493_v56, 4  ;;  %v8501_v21 = vrot.slane %v8500_v15, 4  ;;  %v8351_v50 = vmul.f32 %v8267_v28, %v15868_v40  ;;  %v8352_v22 = vmul.f32 %v8267_v28, %v15869_v27  ;;  %v15873_v40 = vld [vmem:[#allocation114_spill] sm:$0xff] }
 0x80e   :  { %v8467_v32 = vadd.f32 %v8466_v6, %v8465_v17  ;;  %v8474_v41 = vadd.f32 %v8473_v48, %v8472_v62  ;;  %v8481_v36 = vadd.f32 %v8480_v2, %v8479_v38  ;;  %v8488_v51 = vadd.f32 %v8487_v46, %v8486_v37  ;;  %v15874_v6 = vld [vmem:[#allocation108_spill] sm:$0xff]  ;;  %v15875_v2 = vld [vmem:[#allocation110_spill] sm:$0xff] }
 0x80f   :  { %v8495_v1 = vadd.f32 %v8494_v34, %v8493_v56  ;;  %v8502_v54 = vadd.f32 %v8501_v21, %v8500_v15  ;;  %v8353_v39 = vmul.f32 %v8267_v28, %v15870_v12  ;;  %v8354_v3 = vmul.f32 %v8267_v28, %v15871_v33 }
 0x810   :  { %v8468_v9 = vrot.slane %v8467_v32, 2  ;;  %v8475_v57 = vrot.slane %v8474_v41, 2  ;;  %v8482_v30 = vrot.slane %v8481_v36, 2  ;;  %v8489_v16 = vrot.slane %v8488_v51, 2 }
 0x811   :  { %v8496_v5 = vrot.slane %v8495_v1, 2  ;;  %v8503_v13 = vrot.slane %v8502_v54, 2  ;;  %v8355_v25 = vmul.f32 %v8267_v28, %v15872_v63  ;;  %v8356_v27 = vmul.f32 %v8267_v28, %v15873_v40 }
 0x812   :  { %v8469_v17 = vadd.f32 %v8468_v9, %v8467_v32  ;;  %v8476_v62 = vadd.f32 %v8475_v57, %v8474_v41  ;;  %v8483_v38 = vadd.f32 %v8482_v30, %v8481_v36  ;;  %v8490_v37 = vadd.f32 %v8489_v16, %v8488_v51  ;;  %v15878_v9 = vld [vmem:[#allocation116_spill] sm:$0xff] }
 0x813   :  { %v8497_v56 = vadd.f32 %v8496_v5, %v8495_v1  ;;  %v8504_v15 = vadd.f32 %v8503_v13, %v8502_v54  ;;  %v8357_v48 = vmul.f32 %v8268_v42, %v15874_v6  ;;  %v8358_v46 = vmul.f32 %v8268_v42, %v15875_v2  ;;  %v15879_v30 = vld [vmem:[#allocation120_spill] sm:$0xff] }
 0x814   :  { %v8470_v34 = vrot.slane %v8469_v17, 1  ;;  %v8477_v21 = vrot.slane %v8476_v62, 1  ;;  %v8484_v12 = vrot.slane %v8483_v38, 1  ;;  %v8491_v33 = vrot.slane %v8490_v37, 1 }
 0x815   :  { %v8498_v26 = vrot.slane %v8497_v56, 1  ;;  %v8505_v58 = vrot.slane %v8504_v15, 1  ;;  %v8359_v63 = vmul.f32 %v8268_v42, %v15876_v29  ;;  %v8360_v28 = vmul.f32 %v8268_v42, %v15877_v18 }
 0x816   :  { %v8471_v32 = vadd.f32 %v8470_v34, %v8469_v17  ;;  %v8478_v41 = vadd.f32 %v8477_v21, %v8476_v62  ;;  %v8485_v36 = vadd.f32 %v8484_v12, %v8483_v38  ;;  %v8492_v51 = vadd.f32 %v8491_v33, %v8490_v37 }
 0x817   :  { %v8499_v1 = vadd.f32 %v8498_v26, %v8497_v56  ;;  %v8506_v54 = vadd.f32 %v8505_v58, %v8504_v15  ;;  %v8361_v57 = vmul.f32 %v8268_v42, %v15878_v9  ;;  %v8362_v16 = vmul.f32 %v8268_v42, %v15879_v30  ;;  %v7856_v15 = vpop.xlane.xlu0 %7855  ;;  %v15888_v9 = vld [vmem:[#allocation56_spill] sm:$0xff]  ;;  %v15889_v30 = vld [vmem:[#allocation58_spill] sm:$0xff] }
 0x818   :  { %v14214_v5 = vsel %vm8999_vm2, %v8471_v32, %v14184_v60  ;;  %v14218_v13 = vsel %vm8999_vm2, %v8478_v41, %v14186_v8  ;;  %v14222_v18 = vsel %vm8999_vm2, %v8485_v36, %v14190_v31  ;;  %v14226_v29 = vsel %vm8999_vm2, %v8492_v51, %v14192_v45  ;;  %v15884_v32 = vld [vmem:[#allocation48_spill] sm:$0xff]  ;;  %v15885_v36 = vld [vmem:[#allocation50_spill] sm:$0xff] }
 0x819   :  { %v14230_v58 = vsel %vm8999_vm2, %v8499_v1, %v14194_v20  ;;  %v14234_v26 = vsel %vm8999_vm2, %v8506_v54, %v14196_v52  ;;  %v14236_v60 = vadd.f32 %v8357_v48, %v8351_v50  ;;  %v14238_v8 = vadd.f32 %v8358_v46, %v8352_v22 }
 0x81a   :  { %v14240_v42 = vadd.f32 %v8359_v63, %v8353_v39  ;;  %v14242_v31 = vadd.f32 %v8360_v28, %v8354_v3  ;;  %v14244_v40 = vadd.f32 %v8361_v57, %v8355_v25  ;;  %v14246_v45 = vadd.f32 %v8362_v16, %v8356_v27 }
 0x81b   :  { %10786 = vrcp.f32 %v14155_v23  ;;  %v8218_v20 = vrot.slane %v14157_v11, 2  ;;  %v15881_v52 = vsub.f32 %v14072_v19, %v14115_v44  ;;  %v15882_v50 = vrot.slane %v14126_v49, 1  ;;  %v7863_v23 = vpop.xlane.xlu1 %7862 }
 0x81c   :  { %15880 = vst [vmem:[#allocation127_spill] sm:$0xff] %v14246_v45  ;;  %v8032_v39 = vrot.slane %v14153_v24, 4  ;;  %v15883_v25 = vrot.slane %v14142_v35, 4  ;;  %10788 = vpow2.f32 %v14146_v55  ;;  %v14269_v46 = vadd.f32 %v14020_v59, %v7856_v15 }
 0x81d   :  { %v8149_v17 = vmul.f32 1.442695, %v15881_v52  ;;  %v8079_v22 = vmax.f32 %v14126_v49, %v15882_v50  ;;  %v8219_v3 = vadd.f32 %v8218_v20, %v14157_v11  ;;  %v7961_v11 = vadd.f32 %v14020_v59, %v7863_v23  ;;  %v15890_v20 = vld [vmem:[#allocation52_spill] sm:$0xff] }
 0x81e   :  { %v8182_v27 = vadd.f32 %v15883_v25, %v14142_v35  ;;  %v8033_v49 = vmax.f32 %v14153_v24, %v8032_v39  ;;  %v7965_v35 = vadd.f32 %v14020_v59, %v14035_v47 }
 0x81f   :  { %v8220_v62 = vrot.slane %v8219_v3, 1  ;;  %10790 = vpow2.f32 %v8149_v17  ;;  %v8107_v19 = vsub.f32 %v14093_v53, %v8079_v22  ;;  %v8108_v44 = vsub.f32 %v14088_v10, %v8079_v22  ;;  %v15891_v17 = vld [vmem:[#allocation54_spill] sm:$0xff]  ;;  %v15892_v22 = vld [vmem:[#allocation49_spill] sm:$0xff] }
 0x820   :  { %v8183_v38 = vrot.slane %v8182_v27, 2  ;;  %v8034_v2 = vrot.slane %v8033_v49, 2  ;;  %v14273_v10 = vsel %vm7978_vm1, %v7961_v11, -1e+09  ;;  %v14277_v24 = vsel %vm7978_vm1, %v7965_v35, -1e+09 }
 0x821   :  { %v8221_v37 = vadd.f32 %v8220_v62, %v8219_v3  ;;  %v8151_v55 = vmul.f32 1.442695, %v8107_v19  ;;  %v8153_v48 = vmul.f32 1.442695, %v8108_v44  ;;  %v14287_v63 = vmax.f32 %v14269_v46, %v14273_v10  ;;  %v15893_v3 = vld [vmem:[#allocation62_spill] sm:$0xff]  ;;  %v15895_v62 = vld [vmem:[#allocation53_spill] sm:$0xff] }
 0x822   :  { %v8184_v56 = vadd.f32 %v8183_v38, %v8182_v27  ;;  %v14283_v33 = vmax.f32 %v8033_v49, %v8034_v2  ;;  %v15894_v27 = vld [vmem:[#allocation60_spill] sm:$0xff] }
 0x823   :  { %10792 = vrcp.f32 %v8221_v37 }
 0x824   :  { %v8185_v6 = vrot.slane %v8184_v56, 1  ;;  %10794 = vpow2.f32 %v8151_v55 }
 0x825   :  { %v10787_v53 = vpop.eup %10786  ;;  %10796 = vpow2.f32 %v8153_v48 }
 0x826   :  { %v8259_v34 = vmul.f32 %v10787_v53, %v14109_v7  ;;  %v8260_v47 = vmul.f32 %v10787_v53, %v14111_v61  ;;  %v14281_v21 = vpop.eup %10788  ;;  %v8186_v12 = vadd.f32 %v8185_v6, %v8184_v56  ;;  %v15886_v7 = vld [vmem:[#allocation45_spill] sm:$0xff]  ;;  %v15887_v61 = vld [vmem:[#allocation47_spill] sm:$0xff] }
 0x828   :  { %v8303_v41 = vmul.f32 %v8259_v34, %v15884_v32  ;;  %v8304_v51 = vmul.f32 %v8259_v34, %v15885_v36  ;;  %v8305_v1 = vmul.f32 %v8259_v34, %v15886_v7  ;;  %v8306_v54 = vmul.f32 %v8259_v34, %v15887_v61  ;;  %v15896_v36 = vld [vmem:[#allocation138_spill] sm:$0xff]  ;;  %v15897_v7 = vld [vmem:[#allocation131_spill] sm:$0xff] }
 0x829   :  { %v14289_v28 = vpop.eup %10790  ;;  %v8307_v57 = vmul.f32 %v8259_v34, %v15888_v9  ;;  %v8308_v16 = vmul.f32 %v8259_v34, %v15889_v30  ;;  %v8309_v52 = vmul.f32 %v8260_v47, %v15890_v20  ;;  %v8310_v50 = vmul.f32 %v8260_v47, %v15891_v17  ;;  %v15898_v20 = vld [vmem:[#allocation129_spill] sm:$0xff]  ;;  %v15899_v17 = vld [vmem:[#allocation140_spill] sm:$0xff] }
 0x82a   :  { %v8311_v39 = vmul.f32 %v8260_v47, %v15892_v22  ;;  %v8312_v25 = vmul.f32 %v8260_v47, %v15893_v3  ;;  %v8313_v23 = vmul.f32 %v8260_v47, %v15894_v27  ;;  %v8314_v38 = vmul.f32 %v8260_v47, %v15895_v62  ;;  %v15900_v62 = vld [vmem:[#allocation139_spill] sm:$0xff] }
 0x82b   :  { %v8507_v19 = vadd.f32 %v8309_v52, %v8303_v41  ;;  %v8514_v44 = vadd.f32 %v8310_v50, %v8304_v51  ;;  %10798 = vrcp.f32 %v8186_v12  ;;  %v14305_v49 = vadd.f32 %v14289_v28, %v14281_v21 }
 0x82c   :  { %v8521_v56 = vadd.f32 %v8311_v39, %v8305_v1  ;;  %v8528_v15 = vadd.f32 %v8312_v25, %v8306_v54  ;;  %v8535_v11 = vadd.f32 %v8313_v23, %v8307_v57  ;;  %v8542_v35 = vadd.f32 %v8314_v38, %v8308_v16 }
 0x82d   :  { %v10793_v37 = vpop.eup %10792  ;;  %v8508_v55 = vrot.slane %v8507_v19, 4  ;;  %v8515_v6 = vrot.slane %v8514_v44, 4 }
 0x82e   :  { %v8271_v48 = vmul.f32 %v10793_v37, %v14118_v14  ;;  %v8272_v2 = vmul.f32 %v10793_v37, %v14120_v43  ;;  %v8522_v53 = vrot.slane %v8521_v56, 4  ;;  %v8529_v34 = vrot.slane %v8528_v15, 4  ;;  %v14311_v61 = vpop.eup %10794 }
 0x82f   :  { %v8536_v47 = vrot.slane %v8535_v11, 4  ;;  %v8543_v12 = vrot.slane %v8542_v35, 4  ;;  %v8509_v32 = vadd.f32 %v8508_v55, %v8507_v19  ;;  %v8516_v41 = vadd.f32 %v8515_v6, %v8514_v44  ;;  %v14313_v14 = vpop.eup %10796  ;;  %v15901_v19 = vld [vmem:[#allocation148_spill] sm:$0xff] }
 0x830   :  { %v8375_v51 = vmul.f32 %v8271_v48, %v15896_v36  ;;  %v8376_v1 = vmul.f32 %v8271_v48, %v15897_v7  ;;  %v8523_v54 = vadd.f32 %v8522_v53, %v8521_v56  ;;  %v8530_v9 = vadd.f32 %v8529_v34, %v8528_v15  ;;  %v15902_v53 = vld [vmem:[#allocation142_spill] sm:$0xff] }
 0x831   :  { %v8537_v57 = vadd.f32 %v8536_v47, %v8535_v11  ;;  %v8544_v30 = vadd.f32 %v8543_v12, %v8542_v35  ;;  %v8510_v43 = vrot.slane %v8509_v32, 2  ;;  %v8517_v16 = vrot.slane %v8516_v41, 2  ;;  %v15903_v47 = vld [vmem:[#allocation144_spill] sm:$0xff] }
 0x832   :  { %v8377_v52 = vmul.f32 %v8271_v48, %v15898_v20  ;;  %v8378_v50 = vmul.f32 %v8271_v48, %v15899_v17  ;;  %v8524_v22 = vrot.slane %v8523_v54, 2  ;;  %v8531_v39 = vrot.slane %v8530_v9, 2 }
 0x833   :  { %v8538_v3 = vrot.slane %v8537_v57, 2  ;;  %v8545_v25 = vrot.slane %v8544_v30, 2  ;;  %v8511_v27 = vadd.f32 %v8510_v43, %v8509_v32  ;;  %v8518_v23 = vadd.f32 %v8517_v16, %v8516_v41  ;;  %v15904_v16 = vld [vmem:[#allocation133_spill] sm:$0xff] }
 0x834   :  { %v8379_v38 = vmul.f32 %v8271_v48, %v15900_v62  ;;  %v8380_v44 = vmul.f32 %v8271_v48, %v15901_v19  ;;  %v8525_v37 = vadd.f32 %v8524_v22, %v8523_v54  ;;  %v8532_v56 = vadd.f32 %v8531_v39, %v8530_v9  ;;  %v15905_v48 = vld [vmem:[#allocation146_spill] sm:$0xff] }
 0x835   :  { %v8539_v15 = vadd.f32 %v8538_v3, %v8537_v57  ;;  %v8546_v11 = vadd.f32 %v8545_v25, %v8544_v30  ;;  %v10799_v35 = vpop.eup %10798  ;;  %v8512_v55 = vrot.slane %v8511_v27, 1  ;;  %v8519_v6 = vrot.slane %v8518_v23, 1  ;;  %v15906_v25 = vld [vmem:[#allocation150_spill] sm:$0xff] }
 0x836   :  { %v8381_v34 = vmul.f32 %v8272_v2, %v15902_v53  ;;  %v8382_v12 = vmul.f32 %v8272_v2, %v15903_v47  ;;  %v8526_v36 = vrot.slane %v8525_v37, 1  ;;  %v8533_v7 = vrot.slane %v8532_v56, 1 }
 0x837   :  { %v8540_v20 = vrot.slane %v8539_v15, 1  ;;  %v8547_v32 = vrot.slane %v8546_v11, 1  ;;  %v8513_v41 = vadd.f32 %v8512_v55, %v8511_v27  ;;  %v8520_v43 = vadd.f32 %v8519_v6, %v8518_v23  ;;  %v15907_v27 = vld [vmem:[#allocation143_spill] sm:$0xff] }
 0x838   :  { %v8383_v17 = vmul.f32 %v8272_v2, %v15904_v16  ;;  %v8384_v54 = vmul.f32 %v8272_v2, %v15905_v48  ;;  %v8527_v9 = vadd.f32 %v8526_v36, %v8525_v37  ;;  %v8534_v57 = vadd.f32 %v8533_v7, %v8532_v56  ;;  %v15908_v48 = vld [vmem:[#allocation200_spill] sm:$0xff] }
 0x839   :  { %v8541_v30 = vadd.f32 %v8540_v20, %v8539_v15  ;;  %v8548_v22 = vadd.f32 %v8547_v32, %v8546_v11  ;;  %v14325_v39 = vsel %vm9001_vm3, %v8513_v41, %v14214_v5  ;;  %v14329_v3 = vsel %vm9001_vm3, %v8520_v43, %v14218_v13 }
 0x83a   :  { %v8385_v62 = vmul.f32 %v8272_v2, %v15906_v25  ;;  %v8386_v23 = vmul.f32 %v8272_v2, %v15907_v27  ;;  %v14335_v19 = vsel %vm9001_vm3, %v8527_v9, %v14222_v18  ;;  %v14339_v37 = vsel %vm9001_vm3, %v8534_v57, %v14226_v29 }
 0x83b   :  { %v14343_v5 = vsel %vm9001_vm3, %v8541_v30, %v14230_v58  ;;  %v14347_v13 = vsel %vm9001_vm3, %v8548_v22, %v14234_v26  ;;  %v8759_v56 = vadd.f32 %v8381_v34, %v8375_v51  ;;  %v8766_v15 = vadd.f32 %v8382_v12, %v8376_v1  ;;  %v7884_v58 = vpop.xlane.xlu1 %7883 }
 0x83c   :  { %v8773_v11 = vadd.f32 %v8383_v17, %v8377_v52  ;;  %v8780_v2 = vadd.f32 %v8384_v54, %v8378_v50  ;;  %v8787_v55 = vadd.f32 %v8385_v62, %v8379_v38  ;;  %v8794_v6 = vadd.f32 %v8386_v23, %v8380_v44 }
 0x83d   :  { %v8036_v18 = vrot.slane %v14283_v33, 1  ;;  %v8039_v53 = vrot.slane %v14287_v63, 4  ;;  %v8760_v29 = vrot.slane %v8759_v56, 4  ;;  %v8767_v47 = vrot.slane %v8766_v15, 4 }
 0x83e   :  { %v8774_v36 = vrot.slane %v8773_v11, 4  ;;  %v8781_v7 = vrot.slane %v8780_v2, 4  ;;  %v8788_v20 = vrot.slane %v8787_v55, 4  ;;  %v8795_v32 = vrot.slane %v8794_v6, 4 }
 0x83f   :  { %v8223_v26 = vrot.slane %v14305_v49, 4  ;;  %v8229_v51 = vadd.f32 %v14313_v14, %v14311_v61  ;;  %v8761_v1 = vadd.f32 %v8760_v29, %v8759_v56  ;;  %v8768_v52 = vadd.f32 %v8767_v47, %v8766_v15  ;;  %v15909_v15 = vld [vmem:[#allocation64_spill] sm:$0xff]  ;;  %v15915_v47 = vld [vmem:[#allocation74_spill] sm:$0xff] }
 0x840   :  { %v8775_v50 = vadd.f32 %v8774_v36, %v8773_v11  ;;  %v8782_v38 = vadd.f32 %v8781_v7, %v8780_v2  ;;  %v8789_v44 = vadd.f32 %v8788_v20, %v8787_v55  ;;  %v8796_v34 = vadd.f32 %v8795_v32, %v8794_v6  ;;  %v15910_v11 = vld [vmem:[#allocation66_spill] sm:$0xff]  ;;  %v15911_v2 = vld [vmem:[#allocation55_spill] sm:$0xff]  ;;  %v15916_v7 = vld [vmem:[#allocation76_spill] sm:$0xff] }
 0x841   :  { %v8261_v12 = vmul.f32 %v10799_v35, %v14128_v4  ;;  %v14356_v41 = vadd.f32 %v14020_v59, %v7884_v58  ;;  %v8762_v43 = vrot.slane %v8761_v1, 2  ;;  %v8769_v16 = vrot.slane %v8768_v52, 2  ;;  %v15917_v20 = vld [vmem:[#allocation59_spill] sm:$0xff] }
 0x842   :  { %v8776_v17 = vrot.slane %v8775_v50, 2  ;;  %v8262_v54 = vmul.f32 %v10799_v35, %v15908_v48  ;;  %v8224_v9 = vadd.f32 %v8223_v26, %v14305_v49  ;;  %v8230_v57 = vrot.slane %v8229_v51, 4  ;;  %v15918_v26 = vld [vmem:[#allocation72_spill] sm:$0xff] }
 0x843   :  { %v14361_v30 = vmax.f32 %v14283_v33, %v8036_v18  ;;  %v14364_v22 = vmax.f32 %v14287_v63, %v8039_v53  ;;  %v14366_v25 = vadd.f32 %v8762_v43, %v8761_v1  ;;  %v8783_v4 = vrot.slane %v8782_v38, 2  ;;  %v15912_v33 = vld [vmem:[#allocation57_spill] sm:$0xff]  ;;  %v15913_v18 = vld [vmem:[#allocation68_spill] sm:$0xff] }
 0x844   :  { %v8790_v62 = vrot.slane %v8789_v44, 2  ;;  %v8797_v27 = vrot.slane %v8796_v34, 2  ;;  %v14368_v23 = vadd.f32 %v8769_v16, %v8768_v52  ;;  %v14370_v56 = vadd.f32 %v8776_v17, %v8775_v50  ;;  %v15914_v53 = vld [vmem:[#allocation61_spill] sm:$0xff] }
 0x845   :  { %v8315_v35 = vmul.f32 %v8261_v12, %v15909_v15  ;;  %v8316_v49 = vmul.f32 %v8261_v12, %v15910_v11  ;;  %v8317_v55 = vmul.f32 %v8261_v12, %v15911_v2  ;;  %v8318_v6 = vmul.f32 %v8261_v12, %v15912_v33  ;;  %v15919_v15 = vld [vmem:[#allocation78_spill] sm:$0xff]  ;;  %v15920_v2 = vld [vmem:[#allocation80_spill] sm:$0xff] }
 0x846   :  { %v8321_v63 = vmul.f32 %v8262_v54, %v15913_v18  ;;  %v8322_v29 = vmul.f32 %v8262_v54, %v15914_v53  ;;  %v8319_v36 = vmul.f32 %v8261_v12, %v15915_v47  ;;  %v8320_v58 = vmul.f32 %v8261_v12, %v15916_v7 }
 0x847   :  { %v8323_v32 = vmul.f32 %v8262_v54, %v15917_v20  ;;  %v8324_v1 = vmul.f32 %v8262_v54, %v15918_v26  ;;  %v14383_v50 = vadd.f32 %v8783_v4, %v8782_v38  ;;  %v14385_v43 = vadd.f32 %v8790_v62, %v8789_v44 }
 0x848   :  { %v14387_v16 = vadd.f32 %v8797_v27, %v8796_v34  ;;  %v8325_v11 = vmul.f32 %v8262_v54, %v15919_v15  ;;  %v8326_v12 = vmul.f32 %v8262_v54, %v15920_v2  ;;  %v8549_v33 = vadd.f32 %v8321_v63, %v8315_v35 }
 0x849   :  { %v8556_v18 = vadd.f32 %v8322_v29, %v8316_v49  ;;  %v8563_v53 = vadd.f32 %v8323_v32, %v8317_v55  ;;  %v8570_v47 = vadd.f32 %v8324_v1, %v8318_v6  ;;  %v8225_v38 = vrot.slane %v8224_v9, 2 }
 0x84a   :  { %v8577_v7 = vadd.f32 %v8325_v11, %v8319_v36  ;;  %v8584_v20 = vadd.f32 %v8326_v12, %v8320_v58  ;;  %v8231_v4 = vadd.f32 %v8230_v57, %v8229_v51  ;;  %v8550_v44 = vrot.slane %v8549_v33, 4 }
 0x84b   :  { %v8557_v62 = vrot.slane %v8556_v18, 4  ;;  %v8564_v34 = vrot.slane %v8563_v53, 4  ;;  %v8571_v27 = vrot.slane %v8570_v47, 4  ;;  %v8226_v48 = vadd.f32 %v8225_v38, %v8224_v9 }
 0x84c   :  { %v8578_v26 = vrot.slane %v8577_v7, 4  ;;  %v8585_v17 = vrot.slane %v8584_v20, 4  ;;  %v8232_v52 = vrot.slane %v8231_v4, 2  ;;  %v8551_v15 = vadd.f32 %v8550_v44, %v8549_v33  ;;  %v7947_v33 = vpop.xlane.xlu0 %7946 }
 0x84d   :  { %v8558_v45 = vadd.f32 %v8557_v62, %v8556_v18  ;;  %v8565_v54 = vadd.f32 %v8564_v34, %v8563_v53  ;;  %v8572_v35 = vadd.f32 %v8571_v27, %v8570_v47  ;;  %v8227_v6 = vrot.slane %v8226_v48, 1  ;;  %v15921_v62 = vld [vmem:[#allocation118_spill] sm:$0xff] }
 0x84e   :  { %v8579_v49 = vadd.f32 %v8578_v26, %v8577_v7  ;;  %v8586_v55 = vadd.f32 %v8585_v17, %v8584_v20  ;;  %v8233_v63 = vadd.f32 %v8232_v52, %v8231_v4  ;;  %v8552_v29 = vrot.slane %v8551_v15, 2 }
 0x84f   :  { %v8559_v36 = vrot.slane %v8558_v45, 2  ;;  %v8566_v51 = vrot.slane %v8565_v54, 2  ;;  %v8573_v57 = vrot.slane %v8572_v35, 2  ;;  %v8228_v1 = vadd.f32 %v8227_v6, %v8226_v48 }
 0x850   :  { %v8580_v58 = vrot.slane %v8579_v49, 2  ;;  %v8587_v32 = vrot.slane %v8586_v55, 2  ;;  %v8234_v11 = vrot.slane %v8233_v63, 1  ;;  %v8553_v2 = vadd.f32 %v8552_v29, %v8551_v15 }
 0x851   :  { %v8560_v12 = vadd.f32 %v8559_v36, %v8558_v45  ;;  %v8567_v9 = vadd.f32 %v8566_v51, %v8565_v54  ;;  %v8574_v38 = vadd.f32 %v8573_v57, %v8572_v35  ;;  %10800 = vrcp.f32 %v8228_v1  ;;  %v7940_v51 = vpop.xlane.xlu0 %7939 }
 0x852   :  { %v8581_v18 = vadd.f32 %v8580_v58, %v8579_v49  ;;  %v8588_v53 = vadd.f32 %v8587_v32, %v8586_v55  ;;  %v8235_v47 = vadd.f32 %v8234_v11, %v8233_v63  ;;  %v8554_v17 = vrot.slane %v8553_v2, 1  ;;  %v15922_v49 = vld [vmem:[#allocation199_spill] sm:$0xff] }
 0x853   :  { %v8561_v7 = vrot.slane %v8560_v12, 1  ;;  %v8568_v52 = vrot.slane %v8567_v9, 1  ;;  %v8575_v20 = vrot.slane %v8574_v38, 1  ;;  %v8095_v48 = vsub.f32 %v15921_v62, %v14361_v30 }
 0x854   :  { %v8582_v4 = vrot.slane %v8581_v18, 1  ;;  %v8589_v44 = vrot.slane %v8588_v53, 1  ;;  %10802 = vrcp.f32 %v8235_v47  ;;  %v8555_v34 = vadd.f32 %v8554_v17, %v8553_v2 }
 0x855   :  { %v8562_v27 = vadd.f32 %v8561_v7, %v8560_v12  ;;  %v8569_v45 = vadd.f32 %v8568_v52, %v8567_v9  ;;  %v8576_v26 = vadd.f32 %v8575_v20, %v8574_v38  ;;  %v8785_v15 = vrot.slane %v14383_v50, 1 }
 0x856   :  { %v8583_v54 = vadd.f32 %v8582_v4, %v8581_v18  ;;  %v8590_v35 = vadd.f32 %v8589_v44, %v8588_v53  ;;  %v8096_v55 = vsub.f32 %v15922_v49, %v14361_v30  ;;  %v14400_v6 = vsel %vm9003_vm4, %v8555_v34, %v14325_v39  ;;  %v15933_v34 = vld [vmem:[#allocation159_spill] sm:$0xff] }
 0x857   :  { %v14404_v63 = vsel %vm9003_vm4, %v8562_v27, %v14329_v3  ;;  %v14408_v29 = vsel %vm9003_vm4, %v8569_v45, %v14335_v19  ;;  %v14412_v36 = vsel %vm9003_vm4, %v8576_v26, %v14339_v37  ;;  %v8792_v57 = vrot.slane %v14385_v43, 1  ;;  %v15934_v45 = vld [vmem:[#allocation160_spill] sm:$0xff]  ;;  %v15949_v19 = vld [vmem:[#allocation165_spill] sm:$0xff] }
 0x858   :  { %15923 = vst [vmem:[#allocation201_spill] sm:$0xff] %v14412_v36  ;;  %v8799_v30 = vrot.slane %v14387_v16, 1  ;;  %v14418_v39 = vsel %vm9003_vm4, %v8583_v54, %v14343_v5  ;;  %v14422_v3 = vsel %vm9003_vm4, %v8590_v35, %v14347_v13  ;;  %v8127_v58 = vmul.f32 1.442695, %v8095_v48  ;;  %v15932_v48 = vld [vmem:[#allocation152_spill] sm:$0xff] }
 0x859   :  { %15924 = vst [vmem:[#allocation202_spill] sm:$0xff] %v14418_v39  ;;  %15925 = vst [vmem:[#allocation203_spill] sm:$0xff] %v14422_v3  ;;  %v8041_v32 = vrot.slane %v14364_v22, 2  ;;  %v8052_v37 = vmax.f32 %v14356_v41, %v14277_v24  ;;  %v8129_v11 = vmul.f32 1.442695, %v8096_v55  ;;  %v7973_v2 = vadd.f32 %v14020_v59, %v7947_v33  ;;  %v15936_v35 = vld [vmem:[#allocation156_spill] sm:$0xff] }
 0x85a   :  { %v14431_v5 = vadd.f32 %v14020_v59, %v7940_v51  ;;  %v15926_v13 = vrot.slane %v14366_v25, 1  ;;  %v15927_v9 = vrot.slane %v14368_v23, 1  ;;  %v15928_v33 = vrot.slane %v14370_v56, 1  ;;  %v15937_v55 = vld [vmem:[#allocation153_spill] sm:$0xff] }
 0x85b   :  { %v14444_v18 = vmax.f32 %v14364_v22, %v8041_v32  ;;  %v8053_v53 = vrot.slane %v8052_v37, 4  ;;  %v10801_v47 = vpop.eup %10800  ;;  %v14452_v17 = vadd.f32 %v8785_v15, %v14383_v50  ;;  %v14458_v7 = vadd.f32 %v8799_v30, %v14387_v16  ;;  %v15929_v16 = vld [vmem:[#allocation147_spill] sm:$0xff]  ;;  %v15935_v15 = vld [vmem:[#allocation154_spill] sm:$0xff] }
 0x85c   :  { %v14436_v12 = vadd.f32 %v15926_v13, %v14366_v25  ;;  %v14441_v38 = vadd.f32 %v15927_v9, %v14368_v23  ;;  %v14449_v59 = vadd.f32 %v15928_v33, %v14370_v56  ;;  %v14455_v25 = vadd.f32 %v8792_v57, %v14385_v43  ;;  %v15938_v57 = vld [vmem:[#allocation158_spill] sm:$0xff] }
 0x85d   :  { %v8273_v23 = vmul.f32 %v10801_v47, %v14281_v21  ;;  %v8274_v22 = vmul.f32 %v10801_v47, %v14289_v28  ;;  %10804 = vpow2.f32 %v8127_v58  ;;  %v14464_v52 = vsel %vm7978_vm1, %v7973_v2, -1e+09  ;;  %v15930_v21 = vld [vmem:[#allocation151_spill] sm:$0xff]  ;;  %v15931_v28 = vld [vmem:[#allocation149_spill] sm:$0xff]  ;;  %v15939_v58 = vld [vmem:[#allocation162_spill] sm:$0xff] }
 0x85e   :  { %v10803_v56 = vpop.eup %10802  ;;  %10806 = vpow2.f32 %v8129_v11  ;;  %v14467_v20 = vmax.f32 %v8052_v37, %v8053_v53  ;;  %v14471_v43 = vmax.f32 %v14431_v5, %v14464_v52  ;;  %v15940_v37 = vld [vmem:[#allocation163_spill] sm:$0xff]  ;;  %v15950_v50 = vld [vmem:[#allocation178_spill] sm:$0xff] }
 0x85f   :  { %v8387_v4 = vmul.f32 %v8273_v23, %v15929_v16  ;;  %v8388_v44 = vmul.f32 %v8273_v23, %v15930_v21  ;;  %v8389_v62 = vmul.f32 %v8273_v23, %v15931_v28  ;;  %v8390_v0 = vmul.f32 %v8273_v23, %v15932_v48  ;;  %v15941_v48 = vld [vmem:[#allocation166_spill] sm:$0xff] }
 0x860   :  { %v8391_v27 = vmul.f32 %v8273_v23, %v15933_v34  ;;  %v8392_v26 = vmul.f32 %v8273_v23, %v15934_v45  ;;  %v8393_v54 = vmul.f32 %v8274_v22, %v15935_v15  ;;  %v8394_v49 = vmul.f32 %v8274_v22, %v15936_v35  ;;  %v15942_v45 = vld [vmem:[#allocation170_spill] sm:$0xff] }
 0x861   :  { %v8395_v51 = vmul.f32 %v8274_v22, %v15937_v55  ;;  %v8396_v30 = vmul.f32 %v8274_v22, %v15938_v57  ;;  %v8397_v32 = vmul.f32 %v8274_v22, %v15939_v58  ;;  %v8398_v11 = vmul.f32 %v8274_v22, %v15940_v37 }
 0x862   :  { %v8801_v2 = vadd.f32 %v8393_v54, %v8387_v4  ;;  %v8808_v13 = vadd.f32 %v8394_v49, %v8388_v44  ;;  %v8275_v9 = vmul.f32 %v10803_v56, %v14311_v61  ;;  %v8276_v53 = vmul.f32 %v10803_v56, %v14313_v14  ;;  %v15943_v54 = vld [vmem:[#allocation168_spill] sm:$0xff] }
 0x863   :  { %v8815_v47 = vadd.f32 %v8395_v51, %v8389_v62  ;;  %v8822_v33 = vadd.f32 %v8396_v30, %v8390_v0  ;;  %v8829_v23 = vadd.f32 %v8397_v32, %v8391_v27  ;;  %v8836_v16 = vadd.f32 %v8398_v11, %v8392_v26  ;;  %v15944_v49 = vld [vmem:[#allocation172_spill] sm:$0xff]  ;;  %v15945_v32 = vld [vmem:[#allocation171_spill] sm:$0xff] }
 0x864   :  { %v8802_v21 = vrot.slane %v8801_v2, 4  ;;  %v8809_v28 = vrot.slane %v8808_v13, 4  ;;  %v8399_v34 = vmul.f32 %v8275_v9, %v15941_v48  ;;  %v8400_v15 = vmul.f32 %v8275_v9, %v15942_v45  ;;  %v15946_v11 = vld [vmem:[#allocation180_spill] sm:$0xff] }
 0x865   :  { %v8816_v35 = vrot.slane %v8815_v47, 4  ;;  %v8823_v55 = vrot.slane %v8822_v33, 4  ;;  %v8830_v57 = vrot.slane %v8829_v23, 4  ;;  %v8837_v22 = vrot.slane %v8836_v16, 4 }
 0x866   :  { %v8803_v4 = vadd.f32 %v8802_v21, %v8801_v2  ;;  %v8810_v44 = vadd.f32 %v8809_v28, %v8808_v13  ;;  %v8401_v61 = vmul.f32 %v8275_v9, %v15943_v54  ;;  %v8402_v14 = vmul.f32 %v8275_v9, %v15944_v49  ;;  %v15947_v49 = vld [vmem:[#allocation174_spill] sm:$0xff] }
 0x867   :  { %v14491_v56 = vpop.eup %10804  ;;  %v8817_v62 = vadd.f32 %v8816_v35, %v8815_v47  ;;  %v8824_v0 = vadd.f32 %v8823_v55, %v8822_v33  ;;  %v8831_v27 = vadd.f32 %v8830_v57, %v8829_v23  ;;  %v8838_v26 = vadd.f32 %v8837_v22, %v8836_v16  ;;  %v15948_v47 = vld [vmem:[#allocation176_spill] sm:$0xff] }
 0x868   :  { %v14493_v51 = vpop.eup %10806  ;;  %v8804_v30 = vrot.slane %v8803_v4, 2  ;;  %v8811_v58 = vrot.slane %v8810_v44, 2  ;;  %v8403_v37 = vmul.f32 %v8275_v9, %v15945_v32  ;;  %v8404_v48 = vmul.f32 %v8275_v9, %v15946_v11 }
 0x869   :  { %v8818_v2 = vrot.slane %v8817_v62, 2  ;;  %v8825_v13 = vrot.slane %v8824_v0, 2  ;;  %v8832_v21 = vrot.slane %v8831_v27, 2  ;;  %v8839_v28 = vrot.slane %v8838_v26, 2 }
 0x86a   :  { %v8805_v45 = vadd.f32 %v8804_v30, %v8803_v4  ;;  %v8812_v54 = vadd.f32 %v8811_v58, %v8810_v44  ;;  %v8405_v1 = vmul.f32 %v8276_v53, %v15947_v49  ;;  %v8406_v33 = vmul.f32 %v8276_v53, %v15948_v47  ;;  %v15951_v30 = vld [vmem:[#allocation182_spill] sm:$0xff]  ;;  %v15952_v49 = vld [vmem:[#allocation175_spill] sm:$0xff] }
 0x86b   :  { %v8819_v23 = vadd.f32 %v8818_v2, %v8817_v62  ;;  %v8826_v16 = vadd.f32 %v8825_v13, %v8824_v0  ;;  %v8833_v35 = vadd.f32 %v8832_v21, %v8831_v27  ;;  %v8840_v55 = vadd.f32 %v8839_v28, %v8838_v26 }
 0x86c   :  { %v8806_v57 = vrot.slane %v8805_v45, 1  ;;  %v8813_v22 = vrot.slane %v8812_v54, 1  ;;  %v8407_v32 = vmul.f32 %v8276_v53, %v15949_v19  ;;  %v8408_v9 = vmul.f32 %v8276_v53, %v15950_v50 }
 0x86d   :  { %v8820_v11 = vrot.slane %v8819_v23, 1  ;;  %v8827_v3 = vrot.slane %v8826_v16, 1  ;;  %v8834_v39 = vrot.slane %v8833_v35, 1  ;;  %v8841_v36 = vrot.slane %v8840_v55, 1 }
 0x86e   :  { %v8807_v4 = vadd.f32 %v8806_v57, %v8805_v45  ;;  %v8814_v44 = vadd.f32 %v8813_v22, %v8812_v54  ;;  %v8409_v58 = vmul.f32 %v8276_v53, %v15951_v30  ;;  %v8410_v47 = vmul.f32 %v8276_v53, %v15952_v49 }
 0x86f   :  { %v8821_v62 = vadd.f32 %v8820_v11, %v8819_v23  ;;  %v8828_v0 = vadd.f32 %v8827_v3, %v8826_v16  ;;  %v8835_v27 = vadd.f32 %v8834_v39, %v8833_v35  ;;  %v8842_v26 = vadd.f32 %v8841_v36, %v8840_v55 }
 0x870   :  { %v9048_v2 = vsel %vm8999_vm2, %v8807_v4, %v14436_v12  ;;  %v9051_v19 = vsel %vm8999_vm2, %v8814_v44, %v14441_v38  ;;  %v8843_v50 = vadd.f32 %v8405_v1, %v8399_v34  ;;  %v8850_v13 = vadd.f32 %v8406_v33, %v8400_v15 }
 0x871   :  { %v9054_v21 = vsel %vm8999_vm2, %v8821_v62, %v14449_v59  ;;  %v9057_v28 = vsel %vm8999_vm2, %v8828_v0, %v14452_v17  ;;  %v14513_v53 = vsel %vm8999_vm2, %v8835_v27, %v14455_v25  ;;  %v14517_v36 = vsel %vm8999_vm2, %v8842_v26, %v14458_v7 }
 0x872   :  { %v8844_v39 = vrot.slane %v8843_v50, 4  ;;  %v8851_v3 = vrot.slane %v8850_v13, 4  ;;  %v8857_v12 = vadd.f32 %v8407_v32, %v8401_v61  ;;  %v8864_v38 = vadd.f32 %v8408_v9, %v8402_v14 }
 0x873   :  { %v8871_v1 = vadd.f32 %v8409_v58, %v8403_v37  ;;  %v8878_v34 = vadd.f32 %v8410_v47, %v8404_v48  ;;  %v8187_v59 = vadd.f32 %v14493_v51, %v14491_v56  ;;  %v15953_v15 = vrot.slane %v14444_v18, 1 }
 0x874   :  { %v8845_v45 = vadd.f32 %v8844_v39, %v8843_v50  ;;  %v8852_v25 = vadd.f32 %v8851_v3, %v8850_v13  ;;  %v8858_v54 = vrot.slane %v8857_v12, 4  ;;  %v8865_v33 = vrot.slane %v8864_v38, 4 }
 0x875   :  { %v8044_v17 = vmax.f32 %v14444_v18, %v15953_v15  ;;  %v8872_v23 = vrot.slane %v8871_v1, 4  ;;  %v8879_v7 = vrot.slane %v8878_v34, 4  ;;  %v8188_v16 = vrot.slane %v8187_v59, 4 }
 0x876   :  { %v8846_v61 = vrot.slane %v8845_v45, 2  ;;  %v8853_v14 = vrot.slane %v8852_v25, 2  ;;  %v8859_v37 = vadd.f32 %v8858_v54, %v8857_v12  ;;  %v8866_v48 = vadd.f32 %v8865_v33, %v8864_v38 }
 0x877   :  { %v8097_v35 = vsub.f32 %v14269_v46, %v8044_v17  ;;  %v8873_v55 = vadd.f32 %v8872_v23, %v8871_v1  ;;  %v8880_v57 = vadd.f32 %v8879_v7, %v8878_v34  ;;  %v8189_v22 = vadd.f32 %v8188_v16, %v8187_v59 }
 0x878   :  { %v8098_v32 = vsub.f32 %v14273_v10, %v8044_v17  ;;  %v8847_v9 = vadd.f32 %v8846_v61, %v8845_v45  ;;  %v8854_v18 = vadd.f32 %v8853_v14, %v8852_v25  ;;  %v8860_v11 = vrot.slane %v8859_v37, 2 }
 0x879   :  { %v8867_v4 = vrot.slane %v8866_v48, 2  ;;  %v8874_v44 = vrot.slane %v8873_v55, 2  ;;  %v8881_v30 = vrot.slane %v8880_v57, 2  ;;  %v8190_v58 = vrot.slane %v8189_v22, 2 }
 0x87a   :  { %v8131_v49 = vmul.f32 1.442695, %v8097_v35  ;;  %v8848_v47 = vrot.slane %v8847_v9, 1  ;;  %v8855_v62 = vrot.slane %v8854_v18, 1  ;;  %v8861_v46 = vadd.f32 %v8860_v11, %v8859_v37 }
 0x87b   :  { %v8868_v0 = vadd.f32 %v8867_v4, %v8866_v48  ;;  %v8875_v27 = vadd.f32 %v8874_v44, %v8873_v55  ;;  %v8882_v26 = vadd.f32 %v8881_v30, %v8880_v57  ;;  %v8191_v50 = vadd.f32 %v8190_v58, %v8189_v22  ;;  %v15955_v57 = vld [vmem:[#allocation127_spill] sm:$0xff] }
 0x87c   :  { %10808 = vpow2.f32 %v8131_v49  ;;  %v8849_v13 = vadd.f32 %v8848_v47, %v8847_v9  ;;  %v8856_v39 = vadd.f32 %v8855_v62, %v8854_v18  ;;  %v8862_v3 = vrot.slane %v8861_v46, 1 }
 0x87d   :  { %v8869_v10 = vrot.slane %v8868_v0, 1  ;;  %v8876_v12 = vrot.slane %v8875_v27, 1  ;;  %v8883_v38 = vrot.slane %v8882_v26, 1  ;;  %v8192_v1 = vrot.slane %v8191_v50, 1 }
 0x87e   :  { %v8133_v34 = vmul.f32 1.442695, %v8098_v32  ;;  %v8863_v59 = vadd.f32 %v8862_v3, %v8861_v46  ;;  %v14527_v17 = vsel %vm9001_vm3, %v8849_v13, %v9048_v2  ;;  %v14530_v45 = vsel %vm9001_vm3, %v8856_v39, %v9051_v19 }
 0x87f   :  { %v8870_v15 = vadd.f32 %v8869_v10, %v8868_v0  ;;  %v8877_v25 = vadd.f32 %v8876_v12, %v8875_v27  ;;  %v8884_v54 = vadd.f32 %v8883_v38, %v8882_v26  ;;  %v8193_v33 = vadd.f32 %v8192_v1, %v8191_v50  ;;  %v15957_v1 = vld [vmem:[#allocation65_spill] sm:$0xff] }
 0x880   :  { %10810 = vpow2.f32 %v8133_v34  ;;  %v14533_v23 = vsel %vm9001_vm3, %v8863_v59, %v9054_v21  ;;  %v8055_v16 = vrot.slane %v14467_v20, 2  ;;  %v8081_v35 = vrot.slane %v14471_v43, 4  ;;  %v15958_v59 = vld [vmem:[#allocation67_spill] sm:$0xff] }
 0x881   :  { %v14536_v7 = vsel %vm9001_vm3, %v8870_v15, %v9057_v28  ;;  %v8690_v2 = vrot.slane %v14240_v42, 4  ;;  %v14543_v19 = vsel %vm9001_vm3, %v8877_v25, %v14513_v53  ;;  %v14547_v61 = vsel %vm9001_vm3, %v8884_v54, %v14517_v36  ;;  %v15959_v25 = vld [vmem:[#allocation73_spill] sm:$0xff] }
 0x882   :  { %10812 = vrcp.f32 %v8193_v33  ;;  %v8056_v21 = vmax.f32 %v14467_v20, %v8055_v16  ;;  %v8082_v28 = vmax.f32 %v14471_v43, %v8081_v35  ;;  %v15954_v14 = vrot.slane %v14236_v60, 4  ;;  %v15960_v33 = vld [vmem:[#allocation75_spill] sm:$0xff]  ;;  %v15961_v35 = vld [vmem:[#allocation84_spill] sm:$0xff] }
 0x883   :  { %v8697_v48 = vrot.slane %v14242_v31, 4  ;;  %v8704_v55 = vrot.slane %v14244_v40, 4  ;;  %v8711_v53 = vrot.slane %v15955_v57, 4  ;;  %v15956_v22 = vrot.slane %v14238_v8, 4 }
 0x884   :  { %v8677_v37 = vadd.f32 %v15954_v14, %v14236_v60  ;;  %v8057_v32 = vrot.slane %v8056_v21, 1  ;;  %v8083_v9 = vrot.slane %v8082_v28, 2  ;;  %v14563_v20 = vadd.f32 %v8690_v2, %v14240_v42  ;;  %v15964_v14 = vld [vmem:[#allocation71_spill] sm:$0xff] }
 0x885   :  { %v8684_v36 = vadd.f32 %v15956_v22, %v14238_v8  ;;  %v14566_v4 = vadd.f32 %v8697_v48, %v14242_v31  ;;  %v14569_v44 = vadd.f32 %v8704_v55, %v14244_v40  ;;  %v14572_v30 = vadd.f32 %v8711_v53, %v15955_v57  ;;  %v15965_v48 = vld [vmem:[#allocation77_spill] sm:$0xff]  ;;  %v15966_v55 = vld [vmem:[#allocation90_spill] sm:$0xff]  ;;  %v15967_v57 = vld [vmem:[#allocation88_spill] sm:$0xff] }
 0x886   :  { %v14560_v18 = vpop.eup %10808  ;;  %v8058_v43 = vmax.f32 %v8056_v21, %v8057_v32  ;;  %v8084_v11 = vmax.f32 %v8082_v28, %v8083_v9  ;;  %v8678_v60 = vrot.slane %v8677_v37, 2  ;;  %v8692_v62 = vrot.slane %v14563_v20, 2  ;;  %v15968_v22 = vld [vmem:[#allocation81_spill] sm:$0xff] }
 0x887   :  { %v8685_v8 = vrot.slane %v8684_v36, 2  ;;  %v8699_v50 = vrot.slane %v14566_v4, 2 }
 0x888   :  { %v8101_v58 = vsub.f32 %v14356_v41, %v8058_v43  ;;  %v8102_v49 = vsub.f32 %v14277_v24, %v8058_v43  ;;  %v8085_v47 = vrot.slane %v8084_v11, 1  ;;  %v14581_v26 = vadd.f32 %v8678_v60, %v8677_v37 }
 0x889   :  { %v8706_v41 = vrot.slane %v14569_v44, 2  ;;  %v8713_v24 = vrot.slane %v14572_v30, 2  ;;  %v14586_v13 = vadd.f32 %v8685_v8, %v8684_v36 }
 0x88a   :  { %v14576_v42 = vpop.eup %10810  ;;  %v8139_v46 = vmul.f32 1.442695, %v8101_v58  ;;  %v8141_v0 = vmul.f32 1.442695, %v8102_v49  ;;  %v8086_v40 = vmax.f32 %v8084_v11, %v8085_v47 }
 0x88b   :  { %v8194_v31 = vadd.f32 %v14576_v42, %v14560_v18 }
 0x88c   :  { %v10813_v27 = vpop.eup %10812  ;;  %10814 = vpow2.f32 %v8139_v46  ;;  %v8109_v12 = vsub.f32 %v14431_v5, %v8086_v40  ;;  %v8110_v38 = vsub.f32 %v14464_v52, %v8086_v40 }
 0x88d   :  { %v8263_v39 = vmul.f32 %v10813_v27, %v14491_v56  ;;  %v8264_v3 = vmul.f32 %v10813_v27, %v14493_v51  ;;  %v8195_v10 = vrot.slane %v8194_v31, 4  ;;  %10816 = vpow2.f32 %v8141_v0  ;;  %v15962_v56 = vld [vmem:[#allocation86_spill] sm:$0xff]  ;;  %v15963_v51 = vld [vmem:[#allocation69_spill] sm:$0xff] }
 0x88e   :  { %v8155_v11 = vmul.f32 1.442695, %v8109_v12 }
 0x88f   :  { %v8327_v34 = vmul.f32 %v8263_v39, %v15957_v1  ;;  %v8328_v15 = vmul.f32 %v8263_v39, %v15958_v59  ;;  %v8329_v54 = vmul.f32 %v8263_v39, %v15959_v25  ;;  %v8330_v16 = vmul.f32 %v8263_v39, %v15960_v33 }
 0x890   :  { %v8331_v2 = vmul.f32 %v8263_v39, %v15961_v35  ;;  %v8332_v21 = vmul.f32 %v8263_v39, %v15962_v56  ;;  %v8333_v28 = vmul.f32 %v8264_v3, %v15963_v51  ;;  %v8334_v37 = vmul.f32 %v8264_v3, %v15964_v14 }
 0x891   :  { %v8335_v5 = vmul.f32 %v8264_v3, %v15965_v48  ;;  %v8336_v52 = vmul.f32 %v8264_v3, %v15966_v55  ;;  %v8337_v53 = vmul.f32 %v8264_v3, %v15967_v57  ;;  %v8338_v36 = vmul.f32 %v8264_v3, %v15968_v22 }
 0x892   :  { %v8591_v32 = vadd.f32 %v8333_v28, %v8327_v34  ;;  %v8598_v9 = vadd.f32 %v8334_v37, %v8328_v15  ;;  %v8196_v43 = vadd.f32 %v8195_v10, %v8194_v31  ;;  %10818 = vpow2.f32 %v8155_v11 }
 0x893   :  { %v8605_v60 = vadd.f32 %v8335_v5, %v8329_v54  ;;  %v8612_v8 = vadd.f32 %v8336_v52, %v8330_v16  ;;  %v8619_v58 = vadd.f32 %v8337_v53, %v8331_v2  ;;  %v8626_v49 = vadd.f32 %v8338_v36, %v8332_v21 }
 0x894   :  { %v8592_v47 = vrot.slane %v8591_v32, 4  ;;  %v8599_v46 = vrot.slane %v8598_v9, 4  ;;  %v8197_v0 = vrot.slane %v8196_v43, 2  ;;  %v8157_v34 = vmul.f32 1.442695, %v8110_v38 }
 0x895   :  { %v8606_v40 = vrot.slane %v8605_v60, 4  ;;  %v8613_v27 = vrot.slane %v8612_v8, 4  ;;  %v8620_v39 = vrot.slane %v8619_v58, 4  ;;  %v8627_v1 = vrot.slane %v8626_v49, 4 }
 0x896   :  { %v8593_v59 = vadd.f32 %v8592_v47, %v8591_v32  ;;  %v8600_v25 = vadd.f32 %v8599_v46, %v8598_v9  ;;  %v8198_v3 = vadd.f32 %v8197_v0, %v8196_v43  ;;  %v14604_v15 = vpop.eup %10814  ;;  %10820 = vpow2.f32 %v8157_v34  ;;  %v15970_v34 = vld [vmem:[#allocation202_spill] sm:$0xff] }
 0x897   :  { %v8607_v31 = vadd.f32 %v8606_v40, %v8605_v60  ;;  %v8614_v10 = vadd.f32 %v8613_v27, %v8612_v8  ;;  %v8621_v12 = vadd.f32 %v8620_v39, %v8619_v58  ;;  %v8628_v54 = vadd.f32 %v8627_v1, %v8626_v49  ;;  %v14606_v33 = vpop.eup %10816 }
 0x898   :  { %v8594_v16 = vrot.slane %v8593_v59, 2  ;;  %v8601_v35 = vrot.slane %v8600_v25, 2  ;;  %v8199_v2 = vrot.slane %v8198_v3, 1  ;;  %v8208_v38 = vadd.f32 %v14606_v33, %v14604_v15 }
 0x899   :  { %v8608_v56 = vrot.slane %v8607_v31, 2  ;;  %v8615_v21 = vrot.slane %v8614_v10, 2  ;;  %v8622_v51 = vrot.slane %v8621_v12, 2  ;;  %v8629_v28 = vrot.slane %v8628_v54, 2 }
 0x89a   :  { %v8595_v14 = vadd.f32 %v8594_v16, %v8593_v59  ;;  %v8602_v37 = vadd.f32 %v8601_v35, %v8600_v25  ;;  %v8200_v48 = vadd.f32 %v8199_v2, %v8198_v3  ;;  %v8209_v36 = vrot.slane %v8208_v38, 4  ;;  %v15969_v25 = vld [vmem:[#allocation201_spill] sm:$0xff] }
 0x89b   :  { %v8609_v5 = vadd.f32 %v8608_v56, %v8607_v31  ;;  %v8616_v55 = vadd.f32 %v8615_v21, %v8614_v10  ;;  %v8623_v52 = vadd.f32 %v8622_v51, %v8621_v12  ;;  %v8630_v57 = vadd.f32 %v8629_v28, %v8628_v54 }
 0x89c   :  { %v8596_v53 = vrot.slane %v8595_v14, 1  ;;  %v8603_v22 = vrot.slane %v8602_v37, 1  ;;  %10822 = vrcp.f32 %v8200_v48  ;;  %v14610_v60 = vpop.eup %10818  ;;  %v8693_v8 = vadd.f32 %v8692_v62, %v14563_v20 }
 0x89d   :  { %v8610_v32 = vrot.slane %v8609_v5, 1  ;;  %v8617_v9 = vrot.slane %v8616_v55, 1  ;;  %v8624_v43 = vrot.slane %v8623_v52, 1  ;;  %v8631_v11 = vrot.slane %v8630_v57, 1 }
 0x89e   :  { %v8597_v58 = vadd.f32 %v8596_v53, %v8595_v14  ;;  %v8604_v49 = vadd.f32 %v8603_v22, %v8602_v37  ;;  %v8210_v47 = vadd.f32 %v8209_v36, %v8208_v38  ;;  %v8700_v39 = vadd.f32 %v8699_v50, %v14566_v4  ;;  %v15971_v50 = vld [vmem:[#allocation203_spill] sm:$0xff]  ;;  %v15974_v22 = vld [vmem:[#allocation94_spill] sm:$0xff]  ;;  %v15975_v36 = vld [vmem:[#allocation96_spill] sm:$0xff] }
 0x89f   :  { %v8611_v46 = vadd.f32 %v8610_v32, %v8609_v5  ;;  %v8618_v0 = vadd.f32 %v8617_v9, %v8616_v55  ;;  %v8625_v40 = vadd.f32 %v8624_v43, %v8623_v52  ;;  %v8632_v27 = vadd.f32 %v8631_v11, %v8630_v57  ;;  %v15972_v55 = vld [vmem:[#allocation83_spill] sm:$0xff]  ;;  %v15973_v57 = vld [vmem:[#allocation85_spill] sm:$0xff] }
 0x8a0   :  { %v14620_v1 = vsel %vm9005_vm5, %v8597_v58, %v14400_v6  ;;  %v14624_v59 = vsel %vm9005_vm5, %v8604_v49, %v14404_v63  ;;  %v8211_v20 = vrot.slane %v8210_v47, 2  ;;  %v14642_v31 = vpop.eup %10820  ;;  %v8707_v63 = vadd.f32 %v8706_v41, %v14569_v44  ;;  %v15977_v43 = vld [vmem:[#allocation95_spill] sm:$0xff]  ;;  %v15980_v49 = vld [vmem:[#allocation98_spill] sm:$0xff] }
 0x8a1   :  { %v14628_v62 = vsel %vm9005_vm5, %v8611_v46, %v14408_v29  ;;  %v14632_v3 = vsel %vm9005_vm5, %v8618_v0, %v15969_v25  ;;  %v14636_v4 = vsel %vm9005_vm5, %v8625_v40, %v15970_v34  ;;  %v14640_v6 = vsel %vm9005_vm5, %v8632_v27, %v15971_v50  ;;  %v15978_v11 = vld [vmem:[#allocation87_spill] sm:$0xff]  ;;  %v15982_v40 = vld [vmem:[#allocation97_spill] sm:$0xff] }
 0x8a2   :  { %v8714_v29 = vadd.f32 %v8713_v24, %v14572_v30  ;;  %v8212_v10 = vadd.f32 %v8211_v20, %v8210_v47  ;;  %v8680_v12 = vrot.slane %v14581_v26, 1  ;;  %v8687_v54 = vrot.slane %v14586_v13, 1  ;;  %v15981_v46 = vld [vmem:[#allocation91_spill] sm:$0xff] }
 0x8a3   :  { %v8236_v16 = vadd.f32 %v14642_v31, %v14610_v60  ;;  %v8694_v35 = vrot.slane %v8693_v8, 1  ;;  %v8701_v2 = vrot.slane %v8700_v39, 1  ;;  %v8708_v28 = vrot.slane %v8707_v63, 1 }
 0x8a4   :  { %v8213_v56 = vrot.slane %v8212_v10, 1  ;;  %v8715_v14 = vrot.slane %v8714_v29, 1  ;;  %v14655_v41 = vadd.f32 %v8680_v12, %v14581_v26  ;;  %v14658_v30 = vadd.f32 %v8687_v54, %v14586_v13  ;;  %v15976_v13 = vld [vmem:[#allocation93_spill] sm:$0xff] }
 0x8a5   :  { %v8237_v21 = vrot.slane %v8236_v16, 4  ;;  %v14662_v48 = vadd.f32 %v8694_v35, %v8693_v8  ;;  %v14664_v38 = vadd.f32 %v8701_v2, %v8700_v39  ;;  %v15979_v8 = vld [vmem:[#allocation100_spill] sm:$0xff]  ;;  %v15983_v39 = vld [vmem:[#allocation99_spill] sm:$0xff]  ;;  %v14678_v25 = vadd.f32 %v8708_v28, %v8707_v63 }
 0x8a6   :  { %v10823_v51 = vpop.eup %10822  ;;  %v8214_v44 = vadd.f32 %v8213_v56, %v8212_v10  ;;  %v14680_v2 = vadd.f32 %v8715_v14, %v8714_v29 }
 0x8a7   :  { %v8265_v24 = vmul.f32 %v10823_v51, %v14560_v18  ;;  %v8266_v37 = vmul.f32 %v10823_v51, %v14576_v42  ;;  %v8238_v5 = vadd.f32 %v8237_v21, %v8236_v16 }
 0x8a8   :  { %10824 = vrcp.f32 %v8214_v44 }
 0x8a9   :  { %v8339_v52 = vmul.f32 %v8265_v24, %v15972_v55  ;;  %v8340_v53 = vmul.f32 %v8265_v24, %v15973_v57  ;;  %v8341_v26 = vmul.f32 %v8265_v24, %v15974_v22  ;;  %v8342_v32 = vmul.f32 %v8265_v24, %v15975_v36 }
 0x8aa   :  { %v8343_v9 = vmul.f32 %v8265_v24, %v15976_v13  ;;  %v8344_v18 = vmul.f32 %v8265_v24, %v15977_v43  ;;  %v8345_v42 = vmul.f32 %v8266_v37, %v15978_v11  ;;  %v8346_v58 = vmul.f32 %v8266_v37, %v15979_v8 }
 0x8ab   :  { %v8347_v47 = vmul.f32 %v8266_v37, %v15980_v49  ;;  %v8348_v0 = vmul.f32 %v8266_v37, %v15981_v46  ;;  %v8349_v27 = vmul.f32 %v8266_v37, %v15982_v40  ;;  %v8350_v20 = vmul.f32 %v8266_v37, %v15983_v39 }
 0x8ac   :  { %v8633_v34 = vadd.f32 %v8345_v42, %v8339_v52  ;;  %v8640_v50 = vadd.f32 %v8346_v58, %v8340_v53  ;;  %v8239_v10 = vrot.slane %v8238_v5, 2 }
 0x8ad   :  { %v8647_v12 = vadd.f32 %v8347_v47, %v8341_v26  ;;  %v8654_v54 = vadd.f32 %v8348_v0, %v8342_v32  ;;  %v8661_v16 = vadd.f32 %v8349_v27, %v8343_v9  ;;  %v8668_v35 = vadd.f32 %v8350_v20, %v8344_v18  ;;  %v15984_v27 = vld [vmem:[#allocation122_spill] sm:$0xff]  ;;  %v15985_v20 = vld [vmem:[#allocation124_spill] sm:$0xff] }
 0x8ae   :  { %v8634_v56 = vrot.slane %v8633_v34, 4  ;;  %v8641_v21 = vrot.slane %v8640_v50, 4  ;;  %v8240_v51 = vadd.f32 %v8239_v10, %v8238_v5 }
 0x8af   :  { %v8648_v44 = vrot.slane %v8647_v12, 4  ;;  %v8655_v24 = vrot.slane %v8654_v54, 4  ;;  %v8662_v55 = vrot.slane %v8661_v16, 4  ;;  %v8669_v57 = vrot.slane %v8668_v35, 4 }
 0x8b0   :  { %v8635_v37 = vadd.f32 %v8634_v56, %v8633_v34  ;;  %v8642_v63 = vadd.f32 %v8641_v21, %v8640_v50  ;;  %v8241_v28 = vrot.slane %v8240_v51, 1  ;;  %v15986_v56 = vld [vmem:[#allocation113_spill] sm:$0xff]  ;;  %v15987_v21 = vld [vmem:[#allocation115_spill] sm:$0xff] }
 0x8b1   :  { %v8649_v52 = vadd.f32 %v8648_v44, %v8647_v12  ;;  %v8656_v53 = vadd.f32 %v8655_v24, %v8654_v54  ;;  %v8663_v22 = vadd.f32 %v8662_v55, %v8661_v16  ;;  %v8670_v26 = vadd.f32 %v8669_v57, %v8668_v35 }
 0x8b2   :  { %v10825_v36 = vpop.eup %10824  ;;  %v8636_v32 = vrot.slane %v8635_v37, 2  ;;  %v8643_v13 = vrot.slane %v8642_v63, 2  ;;  %v8242_v29 = vadd.f32 %v8241_v28, %v8240_v51 }
 0x8b3   :  { %v8650_v14 = vrot.slane %v8649_v52, 2  ;;  %v8657_v9 = vrot.slane %v8656_v53, 2  ;;  %v8664_v5 = vrot.slane %v8663_v22, 2  ;;  %v8671_v43 = vrot.slane %v8670_v26, 2 }
 0x8b4   :  { %v8637_v18 = vadd.f32 %v8636_v32, %v8635_v37  ;;  %v8644_v11 = vadd.f32 %v8643_v13, %v8642_v63  ;;  %v8269_v42 = vmul.f32 %v10825_v36, %v14604_v15  ;;  %v8270_v8 = vmul.f32 %v10825_v36, %v14606_v33  ;;  %v15988_v63 = vld [vmem:[#allocation132_spill] sm:$0xff] }
 0x8b5   :  { %v8651_v58 = vadd.f32 %v8650_v14, %v8649_v52  ;;  %v8658_v49 = vadd.f32 %v8657_v9, %v8656_v53  ;;  %v8665_v47 = vadd.f32 %v8664_v5, %v8663_v22  ;;  %v8672_v46 = vadd.f32 %v8671_v43, %v8670_v26  ;;  %v15989_v52 = vld [vmem:[#allocation123_spill] sm:$0xff]  ;;  %v15990_v14 = vld [vmem:[#allocation126_spill] sm:$0xff] }
 0x8b6   :  { %v8638_v0 = vrot.slane %v8637_v18, 1  ;;  %v8645_v40 = vrot.slane %v8644_v11, 1  ;;  %v8363_v39 = vmul.f32 %v8269_v42, %v15984_v27  ;;  %v8364_v34 = vmul.f32 %v8269_v42, %v15985_v20  ;;  %v15991_v9 = vld [vmem:[#allocation119_spill] sm:$0xff] }
 0x8b7   :  { %v8652_v50 = vrot.slane %v8651_v58, 1  ;;  %v8659_v10 = vrot.slane %v8658_v49, 1  ;;  %v8666_v12 = vrot.slane %v8665_v47, 1  ;;  %v8673_v54 = vrot.slane %v8672_v46, 1 }
 0x8b8   :  { %v8639_v16 = vadd.f32 %v8638_v0, %v8637_v18  ;;  %v8646_v35 = vadd.f32 %v8645_v40, %v8644_v11  ;;  %v8365_v15 = vmul.f32 %v8269_v42, %v15986_v56  ;;  %v8366_v33 = vmul.f32 %v8269_v42, %v15987_v21  ;;  %v15993_v18 = vld [vmem:[#allocation130_spill] sm:$0xff] }
 0x8b9   :  { %v8653_v51 = vadd.f32 %v8652_v50, %v8651_v58  ;;  %v8660_v44 = vadd.f32 %v8659_v10, %v8658_v49  ;;  %v8667_v24 = vadd.f32 %v8666_v12, %v8665_v47  ;;  %v8674_v55 = vadd.f32 %v8673_v54, %v8672_v46  ;;  %v15994_v11 = vld [vmem:[#allocation134_spill] sm:$0xff] }
 0x8ba   :  { %v9008_v57 = vsel %vm9007_vm6, %v8639_v16, %v14620_v1  ;;  %v9017_v37 = vsel %vm9007_vm6, %v8646_v35, %v14624_v59  ;;  %v8367_v28 = vmul.f32 %v8269_v42, %v15988_v63  ;;  %v8368_v53 = vmul.f32 %v8269_v42, %v15989_v52 }
 0x8bb   :  { %v9024_v22 = vsel %vm9007_vm6, %v8653_v51, %v14628_v62  ;;  %v9031_v26 = vsel %vm9007_vm6, %v8660_v44, %v14632_v3  ;;  %v9038_v36 = vsel %vm9007_vm6, %v8667_v24, %v14636_v4  ;;  %v9045_v32 = vsel %vm9007_vm6, %v8674_v55, %v14640_v6 }
 0x8bc   :  { %v9010_v1 = vsel %vm9009_vm7, %v14655_v41, %v9008_v57  ;;  %v9018_v59 = vsel %vm9009_vm7, %v14658_v30, %v9017_v37  ;;  %v9025_v13 = vsel %vm9009_vm7, %v14662_v48, %v9024_v22  ;;  %v9032_v62 = vsel %vm9009_vm7, %v14664_v38, %v9031_v26  ;;  %v15992_v41 = vld [vmem:[#allocation117_spill] sm:$0xff]  ;;  %v15995_v48 = vld [vmem:[#allocation136_spill] sm:$0xff] }
 0x8bd   :  { %v9039_v3 = vsel %vm9009_vm7, %v14678_v25, %v9038_v36  ;;  %v9046_v4 = vsel %vm9009_vm7, %v14680_v2, %v9045_v32  ;;  %v8369_v6 = vmul.f32 %v8270_v8, %v15990_v14  ;;  %v8370_v5 = vmul.f32 %v8270_v8, %v15991_v9 }
 0x8be   :  { %v8371_v43 = vmul.f32 %v8270_v8, %v15992_v41  ;;  %v8372_v30 = vmul.f32 %v8270_v8, %v15993_v18  ;;  %v8373_v42 = vmul.f32 %v8270_v8, %v15994_v11  ;;  %v8374_v58 = vmul.f32 %v8270_v8, %v15995_v48 }
 0x8bf   :  { %v8717_v49 = vadd.f32 %v8369_v6, %v8363_v39  ;;  %v8724_v38 = vadd.f32 %v8370_v5, %v8364_v34  ;;  %10826 = vrcp.f32 %v8242_v29 }
 0x8c0   :  { %v8731_v47 = vadd.f32 %v8371_v43, %v8365_v15  ;;  %v8738_v25 = vadd.f32 %v8372_v30, %v8366_v33  ;;  %v8745_v46 = vadd.f32 %v8373_v42, %v8367_v28  ;;  %v8752_v0 = vadd.f32 %v8374_v58, %v8368_v53  ;;  %v15996_v42 = vld [vmem:[#allocation186_spill] sm:$0xff]  ;;  %v15997_v58 = vld [vmem:[#allocation179_spill] sm:$0xff] }
 0x8c1   :  { %v8718_v2 = vrot.slane %v8717_v49, 4  ;;  %v8725_v40 = vrot.slane %v8724_v38, 4 }
 0x8c2   :  { %v8732_v27 = vrot.slane %v8731_v47, 4  ;;  %v8739_v20 = vrot.slane %v8738_v25, 4  ;;  %v8746_v50 = vrot.slane %v8745_v46, 4  ;;  %v8753_v10 = vrot.slane %v8752_v0, 4 }
 0x8c3   :  { %v8719_v12 = vadd.f32 %v8718_v2, %v8717_v49  ;;  %v8726_v54 = vadd.f32 %v8725_v40, %v8724_v38  ;;  %v16001_v40 = vld [vmem:[#allocation192_spill] sm:$0xff] }
 0x8c4   :  { %v8733_v16 = vadd.f32 %v8732_v27, %v8731_v47  ;;  %v8740_v35 = vadd.f32 %v8739_v20, %v8738_v25  ;;  %v8747_v56 = vadd.f32 %v8746_v50, %v8745_v46  ;;  %v8754_v21 = vadd.f32 %v8753_v10, %v8752_v0  ;;  %v15999_v25 = vld [vmem:[#allocation181_spill] sm:$0xff]  ;;  %v16000_v0 = vld [vmem:[#allocation191_spill] sm:$0xff]  ;;  %v16003_v20 = vld [vmem:[#allocation188_spill] sm:$0xff] }
 0x8c5   :  { %v8720_v8 = vrot.slane %v8719_v12, 2  ;;  %v8727_v39 = vrot.slane %v8726_v54, 2  ;;  %v16002_v27 = vld [vmem:[#allocation183_spill] sm:$0xff]  ;;  %v16004_v50 = vld [vmem:[#allocation185_spill] sm:$0xff]  ;;  %v16005_v10 = vld [vmem:[#allocation190_spill] sm:$0xff] }
 0x8c6   :  { %v8734_v34 = vrot.slane %v8733_v16, 2  ;;  %v8741_v29 = vrot.slane %v8740_v35, 2  ;;  %v8748_v15 = vrot.slane %v8747_v56, 2  ;;  %v8755_v33 = vrot.slane %v8754_v21, 2 }
 0x8c7   :  { %v8721_v51 = vadd.f32 %v8720_v8, %v8719_v12  ;;  %v8728_v44 = vadd.f32 %v8727_v39, %v8726_v54  ;;  %v16006_v54 = vld [vmem:[#allocation194_spill] sm:$0xff] }
 0x8c8   :  { %v8735_v24 = vadd.f32 %v8734_v34, %v8733_v16  ;;  %v8742_v55 = vadd.f32 %v8741_v29, %v8740_v35  ;;  %v8749_v57 = vadd.f32 %v8748_v15, %v8747_v56  ;;  %v8756_v37 = vadd.f32 %v8755_v33, %v8754_v21  ;;  %v16007_v35 = vld [vmem:[#allocation195_spill] sm:$0xff] }
 0x8c9   :  { %v10827_v63 = vpop.eup %10826  ;;  %v8722_v28 = vrot.slane %v8721_v51, 1  ;;  %v8729_v52 = vrot.slane %v8728_v44, 1 }
 0x8ca   :  { %v8736_v53 = vrot.slane %v8735_v24, 1  ;;  %v8743_v22 = vrot.slane %v8742_v55, 1  ;;  %v8750_v26 = vrot.slane %v8749_v57, 1  ;;  %v8757_v36 = vrot.slane %v8756_v37, 1 }
 0x8cb   :  { %v8723_v32 = vadd.f32 %v8722_v28, %v8721_v51  ;;  %v8730_v14 = vadd.f32 %v8729_v52, %v8728_v44  ;;  %v8277_v6 = vmul.f32 %v10827_v63, %v14610_v60  ;;  %v8278_v9 = vmul.f32 %v10827_v63, %v14642_v31 }
 0x8cc   :  { %v8737_v5 = vadd.f32 %v8736_v53, %v8735_v24  ;;  %v8744_v41 = vadd.f32 %v8743_v22, %v8742_v55  ;;  %v8751_v43 = vadd.f32 %v8750_v26, %v8749_v57  ;;  %v8758_v18 = vadd.f32 %v8757_v36, %v8756_v37 }
 0x8cd   :  { %v9012_v30 = vsel %vm9011_vm8, %v8723_v32, %v9010_v1  ;;  %v9019_v11 = vsel %vm9011_vm8, %v8730_v14, %v9018_v59  ;;  %v8411_v48 = vmul.f32 %v8277_v6, %v15996_v42  ;;  %v8412_v49 = vmul.f32 %v8277_v6, %v15997_v58  ;;  %v15998_v1 = vld [vmem:[#allocation177_spill] sm:$0xff] }
 0x8ce   :  { %v9026_v38 = vsel %vm9011_vm8, %v8737_v5, %v9025_v13  ;;  %v9033_v47 = vsel %vm9011_vm8, %v8744_v41, %v9032_v62  ;;  %v9040_v60 = vsel %vm9011_vm8, %v8751_v43, %v9039_v3  ;;  %v9047_v31 = vsel %vm9011_vm8, %v8758_v18, %v9046_v4  ;;  %9078 = vst [vmem:[#allocation14] sm:$0xff] %v9012_v30 }
 0x8cf   :  { %9079 = vst [vmem:[#allocation14 + $0x8] sm:$0xff] %v9019_v11  ;;  %9080 = vst [vmem:[#allocation14 + $0x10] sm:$0xff] %v9026_v38  ;;  %v8413_v59 = vmul.f32 %v8277_v6, %v15998_v1  ;;  %v8414_v46 = vmul.f32 %v8277_v6, %v15999_v25  ;;  %v8415_v2 = vmul.f32 %v8277_v6, %v16000_v0 }
 0x8d0   :  { %9081 = vst [vmem:[#allocation14 + $0x18] sm:$0xff] %v9033_v47  ;;  %9082 = vst [vmem:[#allocation14 + $0x20] sm:$0xff] %v9040_v60  ;;  %v8416_v13 = vmul.f32 %v8277_v6, %v16001_v40  ;;  %v8417_v62 = vmul.f32 %v8278_v9, %v16002_v27  ;;  %v8418_v3 = vmul.f32 %v8278_v9, %v16003_v20 }
 0x8d1   :  { %9083 = vst [vmem:[#allocation14 + $0x28] sm:$0xff] %v9047_v31  ;;  %v8419_v4 = vmul.f32 %v8278_v9, %v16004_v50  ;;  %v8420_v12 = vmul.f32 %v8278_v9, %v16005_v10  ;;  %v8421_v16 = vmul.f32 %v8278_v9, %v16006_v54  ;;  %v8422_v56 = vmul.f32 %v8278_v9, %v16007_v35 }
 0x8d2   :  { %v8885_v21 = vadd.f32 %v8417_v62, %v8411_v48  ;;  %v8892_v8 = vadd.f32 %v8418_v3, %v8412_v49 }
 0x8d3   :  { %v8899_v39 = vadd.f32 %v8419_v4, %v8413_v59  ;;  %v8906_v34 = vadd.f32 %v8420_v12, %v8414_v46  ;;  %v8913_v29 = vadd.f32 %v8421_v16, %v8415_v2  ;;  %v8920_v15 = vadd.f32 %v8422_v56, %v8416_v13 }
 0x8d4   :  { %v8886_v33 = vrot.slane %v8885_v21, 4  ;;  %v8893_v51 = vrot.slane %v8892_v8, 4 }
 0x8d5   :  { %v8900_v44 = vrot.slane %v8899_v39, 4  ;;  %v8907_v24 = vrot.slane %v8906_v34, 4  ;;  %v8914_v55 = vrot.slane %v8913_v29, 4  ;;  %v8921_v57 = vrot.slane %v8920_v15, 4 }
 0x8d6   :  { %v8887_v37 = vadd.f32 %v8886_v33, %v8885_v21  ;;  %v8894_v63 = vadd.f32 %v8893_v51, %v8892_v8 }
 0x8d7   :  { %v8901_v28 = vadd.f32 %v8900_v44, %v8899_v39  ;;  %v8908_v52 = vadd.f32 %v8907_v24, %v8906_v34  ;;  %v8915_v53 = vadd.f32 %v8914_v55, %v8913_v29  ;;  %v8922_v22 = vadd.f32 %v8921_v57, %v8920_v15 }
 0x8d8   :  { %v8888_v26 = vrot.slane %v8887_v37, 2  ;;  %v8895_v36 = vrot.slane %v8894_v63, 2 }
 0x8d9   :  { %v8902_v32 = vrot.slane %v8901_v28, 2  ;;  %v8909_v14 = vrot.slane %v8908_v52, 2  ;;  %v8916_v6 = vrot.slane %v8915_v53, 2  ;;  %v8923_v9 = vrot.slane %v8922_v22, 2 }
 0x8da   :  { %v8889_v5 = vadd.f32 %v8888_v26, %v8887_v37  ;;  %v8896_v41 = vadd.f32 %v8895_v36, %v8894_v63 }
 0x8db   :  { %v8903_v43 = vadd.f32 %v8902_v32, %v8901_v28  ;;  %v8910_v18 = vadd.f32 %v8909_v14, %v8908_v52  ;;  %v8917_v30 = vadd.f32 %v8916_v6, %v8915_v53  ;;  %v8924_v11 = vadd.f32 %v8923_v9, %v8922_v22 }
 0x8dc   :  { %v8890_v42 = vrot.slane %v8889_v5, 1  ;;  %v8897_v48 = vrot.slane %v8896_v41, 1 }
 0x8dd   :  { %v8904_v58 = vrot.slane %v8903_v43, 1  ;;  %v8911_v49 = vrot.slane %v8910_v18, 1  ;;  %v8918_v38 = vrot.slane %v8917_v30, 1  ;;  %v8925_v47 = vrot.slane %v8924_v11, 1 }
 0x8de   :  { %v8891_v60 = vadd.f32 %v8890_v42, %v8889_v5  ;;  %v8898_v31 = vadd.f32 %v8897_v48, %v8896_v41 }
 0x8df   :  { %v8905_v1 = vadd.f32 %v8904_v58, %v8903_v43  ;;  %v8912_v59 = vadd.f32 %v8911_v49, %v8910_v18  ;;  %v8919_v25 = vadd.f32 %v8918_v38, %v8917_v30  ;;  %v8926_v46 = vadd.f32 %v8925_v47, %v8924_v11 }
 0x8e0   :  { %v9050_v0 = vsel %vm9003_vm4, %v8891_v60, %v14527_v17  ;;  %v9053_v2 = vsel %vm9003_vm4, %v8898_v31, %v14530_v45 }
 0x8e1   :  { %v9056_v40 = vsel %vm9003_vm4, %v8905_v1, %v14533_v23  ;;  %v9059_v13 = vsel %vm9003_vm4, %v8912_v59, %v14536_v7  ;;  %v9062_v27 = vsel %vm9003_vm4, %v8919_v25, %v14543_v19  ;;  %v9065_v62 = vsel %vm9003_vm4, %v8926_v46, %v14547_v61  ;;  %9084 = vst [vmem:[#allocation14 + $0x30] sm:$0xf] %v9050_v0 }
 0x8e2   :  { %9085 = vst [vmem:[#allocation14 + $0x38] sm:$0xf] %v9053_v2  ;;  %9086 = vst [vmem:[#allocation14 + $0x40] sm:$0xf] %v9056_v40 }
 0x8e3   :  { %9087 = vst [vmem:[#allocation14 + $0x48] sm:$0xf] %v9059_v13  ;;  %9088 = vst [vmem:[#allocation14 + $0x50] sm:$0xf] %v9062_v27 }
 0x8e4   :  { %9089 = vst [vmem:[#allocation14 + $0x58] sm:$0xf] %v9065_v62 }
 0x8e5   :  { %10985 = shalt.err (!%p10982_p10)
}
 0x8e6   :  { %s10986_s21 = scalar_lea.hbm %s14775_s8, 1536 }
 0x8e7   :  { %p10987_p11 = scmp.ne.s32.totalorder %s14775_s8, %s10986_s21  ;;  %p10990_p12 = scmp.lt.u32.totalorder %s10986_s21, %s14775_s8 }
 0x8e9   :  { %p10992_p13 = pnand %p10990_p12, %p10987_p11 }
 0x8eb   :  { %10995 = shalt.err (!%p10992_p13)
}
 0x8ec   :  { %9101 = dma.vmem_to_hbm [thread:$0]  %s9096_s16, 1536, %s14775_s8, [#allocation5], %s11013_s4, %s11013_s4, %s11014_s20  }
 0x8ed   :  { %11004 = dma.done.wait [#allocation5], 1536  }
 0x8ee   :  { %11005 = vsyncadd [#allocation5], 4294965760 }
 0x8ef   :  { %9105 = vsyncpa [#allocation4], 1 }
 0x8f0   :  { %9106 = vsyncpa [#allocation7], 1 }
 0x8f1   :  { %9107 = vsyncpa [#allocation10], 1 }
 0x8f2   :  { %9108 = vsyncpa [#allocation13], 1 }
 0x8f3   :  { %9109 = vsyncpa [#allocation5], 1 }

</bundles_post_ra>
